<compile_context>
chip_gen: v5e
topology: v5e:2x2
jax: 0.10.0
libtpu: 0.0.40
codegen_flags: <defaults>
</compile_context>

<pallas_src>
import functools

import jax
import jax.numpy as jnp
from jax.experimental import pallas as pl
from jax.experimental.pallas import tpu as pltpu


# ----------------------------------------------------------------------------
# Kernel 1: cluster (cates) + first encoder layer, accumulated over M blocks.
# ----------------------------------------------------------------------------
def _cluster_encode_kernel(x_ref, items_ref, cores_ref, w1_ref,
                           acc_ref, cates_ref, *, inv_tau, n, K):
    i = pl.program_id(1)   # reduction axis within this shard

    @pl.when(i == 0)
    def _init():
        acc_ref[...] = jnp.zeros_like(acc_ref)

    # --- cluster() restricted to this items block -------------------------
    items_f = items_ref[...].astype(jnp.float32)                   # (tm, D)
    items_n = items_f * jax.lax.rsqrt(
        jnp.sum(items_f * items_f, axis=1, keepdims=True) + 1e-12)
    cores_f = cores_ref[...]                                       # (K, D)
    cores_n = cores_f * jax.lax.rsqrt(
        jnp.sum(cores_f * cores_f, axis=1, keepdims=True) + 1e-12)

    # cates kept transposed (K, tm) so everything stays lane-dense.
    scores_t = jax.lax.dot_general(
        cores_n.astype(jnp.bfloat16), items_n.astype(jnp.bfloat16),
        (((1,), (1,)), ((), ())),
        preferred_element_type=jnp.float32) * inv_tau               # (K, tm)
    m0 = jnp.max(scores_t, axis=0, keepdims=True)
    e = jnp.exp(scores_t - m0)
    cates_t = e / jnp.sum(e, axis=0, keepdims=True)                 # (K, tm)
    cates_ref[...] = cates_t                                        # reused by kernel 2

    # --- encode(): facet-weighted inputs, first Linear accumulated --------
    # facet-major stack: row k*n + s  <->  (sample s, facet k)
    x_f = x_ref[...].astype(jnp.float32)                            # (n, tm)
    tm = x_f.shape[1]
    xw = (cates_t[:, None, :] * x_f[None, :, :]).reshape(K * n, tm)
    acc_ref[...] += jnp.dot(xw.astype(jnp.bfloat16), w1_ref[...],
                            preferred_element_type=jnp.float32)     # (K*n, H)


# ----------------------------------------------------------------------------
# Kernel 2: decoder with blocked output + per-block partial row sums.
# ----------------------------------------------------------------------------
def _decode_kernel(z_ref, items_ref, cates_ref, out_ref, rowsum_ref,
                   *, inv_tau, n, K):
    # Normalized items for this block (z is pre-normalized & bf16 from wrapper).
    items_f = items_ref[...].astype(jnp.float32)                    # (tm, D)
    items_n = items_f * jax.lax.rsqrt(
        jnp.sum(items_f * items_f, axis=1, keepdims=True) + 1e-12)
    items_nb = items_n.astype(jnp.bfloat16)
    tm = items_f.shape[0]

    logits_fm = jax.lax.dot_general(
        z_ref[...], items_nb, (((1,), (1,)), ((), ())),
        preferred_element_type=jnp.float32) * inv_tau                # (K*n, tm)

    # Mixture over facets.  |logits| <= 1/tau because both operands are
    # L2-normalized, so exp without max-subtraction is safe for tau >~ 0.01.
    cates_t = cates_ref[...]                                         # (K, tm)
    probs = jnp.sum(jnp.exp(logits_fm).reshape(K, n, tm) * cates_t[:, None, :],
                    axis=0)                                          # (n, tm)

    out_ref[...] = jnp.log(probs)                                    # un-normalized
    rowsum_ref[...] = jnp.sum(probs, axis=1, keepdims=True)          # (n, 1) partial


# ----------------------------------------------------------------------------
# Wrapper
# ----------------------------------------------------------------------------
def macridvae_forward(x, params, *, tau, block_m=512):
    """Eval-mode MacridVAE forward. Returns (logits, mu, logvar, None, None, None)."""
    w1, b1, w2, b2, items, cores = params
    n, M = x.shape
    Mi, D = items.shape
    K = cores.shape[0]
    H = w1.shape[1]
    assert Mi == M and w1.shape[0] == M and w2.shape == (H, 2 * D)
    block_m = min(block_m, M)
    assert M % block_m == 0, "item count M must be a multiple of block_m"
    assert n % 8 == 0, "batch size must be a multiple of 8 (sublane alignment)"
    nK = n * K
    inv_tau = 1.0 / float(tau)
    nblk = M // block_m
    P = 2 if nblk % 2 == 0 else 1        # leading parallel axis (v7x megacore)
    npb = nblk // P

    # bf16 HBM streams (x is 0/1 so bf16 is exact; halves the dominant streams).
    xb = x.astype(jnp.bfloat16)
    w1b = w1.astype(jnp.bfloat16)
    itemsb = items.astype(jnp.bfloat16)
    w2mub = w2[:, :D].astype(jnp.bfloat16)
    w2lvb = w2[:, D:].astype(jnp.bfloat16)

    # VMEM limit derived from the per-step footprint, clamped to a range that is
    # safe on all generations (<= 48 MiB leaves DMA headroom on v7x's 64 MiB).
    k1_step = (2 * (n * block_m * 2 + block_m * D * 2 + block_m * H * 2
                    + K * block_m * 4) + K * D * 4 + 2 * nK * H * 4)
    k2_step = (2 * (block_m * D * 2 + K * block_m * 4 + n * block_m * 4 + n * 4)
               + nK * D * 2)
    vmem_limit = int(min(max(2 * max(k1_step, k2_step), 32 * 1024 * 1024),
                         48 * 1024 * 1024))

    # ---- kernel 1: cluster + first encoder layer --------------------------
    acc_p, cates = pl.pallas_call(
        functools.partial(_cluster_encode_kernel, inv_tau=inv_tau, n=n, K=K),
        out_shape=(jax.ShapeDtypeStruct((P, nK, H), jnp.float32),   # partial acc
                   jax.ShapeDtypeStruct((K, M), jnp.float32)),      # cates (K, M)
        grid_spec=pltpu.PrefetchScalarGridSpec(
            num_scalar_prefetch=0,
            grid=(P, npb),
            in_specs=[
                pl.BlockSpec((n, block_m), lambda p, i: (0, p * npb + i)),   # x (bf16)
                pl.BlockSpec((block_m, D), lambda p, i: (p * npb + i, 0)),   # items (bf16)
                pl.BlockSpec((K, D), lambda p, i: (0, 0)),                   # cores (f32)
                pl.BlockSpec((block_m, H), lambda p, i: (p * npb + i, 0)),   # W1 (bf16)
            ],
            out_specs=[
                pl.BlockSpec((None, nK, H), lambda p, i: (p, 0, 0)),         # per-shard acc
                pl.BlockSpec((K, block_m), lambda p, i: (0, p * npb + i)),   # cates blocks
            ],
        ),
        compiler_params=pltpu.CompilerParams(
            dimension_semantics=("parallel", "arbitrary"),
            vmem_limit_bytes=vmem_limit),
        cost_estimate=pl.CostEstimate(
            flops=2 * nK * M * H + 2 * K * M * D,
            transcendentals=K * M,
            bytes_accessed=(M * H + M * D + n * M) * 2 + K * M * 4
                           + P * nK * H * 4),
    )(xb, itemsb, cores, w1b)

    # Tiny XLA epilogue: combine the P partial accumulators, tanh, two heads.
    acc = jnp.sum(acc_p, axis=0)                                     # (K*n, H)
    h1 = jnp.tanh(acc + b1[None, :]).astype(jnp.bfloat16)
    mu_fm = jnp.dot(h1, w2mub, preferred_element_type=jnp.float32) + b2[:D]
    logvar_fm = jnp.dot(h1, w2lvb, preferred_element_type=jnp.float32) + b2[D:]

    # sample() in eval mode is identity; z = normalize(mu) hoisted out of kernel 2
    # (it is the same every grid step) and cast to bf16 once.
    z = mu_fm * jax.lax.rsqrt(jnp.sum(mu_fm * mu_fm, axis=1, keepdims=True) + 1e-12)
    zb = z.astype(jnp.bfloat16)

    # ---- kernel 2: decode (blocked output, fully parallel over M blocks) --
    log_probs, rowsum_p = pl.pallas_call(
        functools.partial(_decode_kernel, inv_tau=inv_tau, n=n, K=K),
        out_shape=(jax.ShapeDtypeStruct((n, M), jnp.float32),
                   jax.ShapeDtypeStruct((nblk, n, 1), jnp.float32)),
        grid_spec=pltpu.PrefetchScalarGridSpec(
            num_scalar_prefetch=0,
            grid=(nblk,),
            in_specs=[
                pl.BlockSpec((nK, D), lambda i: (0, 0)),             # z (resident, bf16)
                pl.BlockSpec((block_m, D), lambda i: (i, 0)),        # items (bf16)
                pl.BlockSpec((K, block_m), lambda i: (0, i)),        # cates (f32)
            ],
            out_specs=[
                pl.BlockSpec((n, block_m), lambda i: (0, i)),        # log(probs) block
                pl.BlockSpec((None, n, 1), lambda i: (i, 0, 0)),     # partial rowsum
            ],
        ),
        compiler_params=pltpu.CompilerParams(
            dimension_semantics=("parallel",),
            vmem_limit_bytes=vmem_limit),
        cost_estimate=pl.CostEstimate(
            flops=2 * nK * M * D,
            transcendentals=nK * M + n * M,
            bytes_accessed=M * D * 2 + K * M * 4 + nK * D * 2 + n * M * 4),
    )(zb, itemsb, cates)

    # Exact log_softmax(log p) == log p - log(sum p): one trivial broadcast-sub.
    row_sum = jnp.sum(rowsum_p[:, :, 0], axis=0)                     # (n,)
    logits = log_probs - jnp.log(row_sum)[:, None]

    # facet-major (K*n, D) -> PyTorch's batch-major interleaved (n*K, D)
    mu = mu_fm.reshape(K, n, D).transpose(1, 0, 2).reshape(nK, D)
    logvar = logvar_fm.reshape(K, n, D).transpose(1, 0, 2).reshape(nK, D)
    return logits, mu, logvar, None, None, None


# ----------------------------------------------------------------------------
# Parameter init (shapes from MacridVAE.__init__, weights stored (in, out))
# ----------------------------------------------------------------------------
def init_params(key, M, K, D):
    H = 3 * D
    ks = jax.random.split(key, 6)

    def linear(kw, kb, fan_in, fan_out):
        bound = 1.0 / (fan_in ** 0.5)      # nn.Linear default init
        w = jax.random.uniform(kw, (fan_in, fan_out), jnp.float32, -bound, bound)
        b = jax.random.uniform(kb, (fan_out,), jnp.float32, -bound, bound)
        return w, b

    w1, b1 = linear(ks[0], ks[1], M, H)            # encoder Linear(M, H)
    w2, b2 = linear(ks[2], ks[3], H, 2 * D)        # encoder Linear(H, 2D)
    items = jax.random.normal(ks[4], (M, D), jnp.float32) * ((2.0 / (M + D)) ** 0.5)
    cores = jax.random.normal(ks[5], (K, D), jnp.float32) * ((2.0 / (K + D)) ** 0.5)
    return (w1, b1, w2, b2, items, cores)


# ----------------------------------------------------------------------------
# Pure-JAX reference (same math as the PyTorch module in eval mode, using the
# same bf16 weight/activation rounding as the kernel so the check is tight).
# ----------------------------------------------------------------------------
def macridvae_reference(x, params, tau):
    w1, b1, w2, b2, items, cores = params
    M, D = items.shape
    K = cores.shape[0]
    n = x.shape[0]
    bf, f32 = jnp.bfloat16, jnp.float32
    dot = lambda a, b: jnp.dot(a.astype(bf), b.astype(bf),
                               preferred_element_type=f32)

    items_f = items.astype(bf).astype(f32)
    items_n = items_f * jax.lax.rsqrt(
        jnp.sum(items_f * items_f, axis=1, keepdims=True) + 1e-12)
    cores_n = cores * jax.lax.rsqrt(
        jnp.sum(cores * cores, axis=1, keepdims=True) + 1e-12)
    cates = jax.nn.softmax(dot(items_n, cores_n.T) / tau, axis=1)      # (M, K)

    xw = (x[:, None, :] * cates.T[None, :, :]).reshape(n * K, M)
    h1 = jnp.tanh(dot(xw, w1) + b1)
    h2 = dot(h1, w2) + b2
    mu, logvar = h2[:, :D], h2[:, D:]

    z = mu * jax.lax.rsqrt(jnp.sum(mu * mu, axis=1, keepdims=True) + 1e-12)
    logits = dot(z, items_n.T) / tau
    probs = jnp.sum(jnp.exp(logits).reshape(n, K, M) * cates.T[None, :, :], axis=1)
    logits = jax.nn.log_softmax(jnp.log(probs), axis=1)
    return logits, mu, logvar


if __name__ == "__main__":
    # Small but layout-friendly shapes: D multiple of 128 keeps H=3D and the
    # mu/logvar heads lane-dense; K*n = 128 fills the MXU rows; M=1024 with
    # block_m=512 gives 2 M-blocks (one per megacore shard on v7x).
    n, M, K, D = 32, 1024, 4, 128          # H = 384
    tau = 0.5

    key = jax.random.PRNGKey(0)
    kx, kp = jax.random.split(key)
    x = (jax.random.uniform(kx, (n, M)) < 0.05).astype(jnp.float32)  # bag-of-items
    params = init_params(kp, M, K, D)

    fwd = jax.jit(functools.partial(macridvae_forward, tau=tau, block_m=512))
    logits, mu, logvar, _, _, _ = fwd(x, params)
    jax.block_until_ready((logits, mu, logvar))

    ref_logits, ref_mu, ref_logvar = macridvae_reference(x, params, tau)
    assert jnp.allclose(logits, ref_logits, atol=1e-2, rtol=1e-2), "logits mismatch"
    assert jnp.allclose(mu, ref_mu, atol=1e-2, rtol=1e-2), "mu mismatch"
    assert jnp.allclose(logvar, ref_logvar, atol=1e-2, rtol=1e-2), "logvar mismatch"

    print("KERNEL_OK")
</pallas_src>

<mosaic_0001>
module attributes {stable_mosaic.version = 11 : i64} {
  func.func @_cluster_encode_kernel(%arg0: i32, %arg1: i32, %arg2: memref<32x512xbf16, #tpu.memory_space<vmem>>, %arg3: memref<512x128xbf16, #tpu.memory_space<vmem>>, %arg4: memref<4x128xf32, #tpu.memory_space<vmem>>, %arg5: memref<512x384xbf16, #tpu.memory_space<vmem>>, %arg6: memref<1x128x384xf32, #tpu.memory_space<vmem>>, %arg7: memref<4x512xf32, #tpu.memory_space<vmem>>) attributes {dimension_semantics = [#tpu.dimension_semantics<parallel>, #tpu.dimension_semantics<arbitrary>], iteration_bounds = array<i64: 2, 1>, scalar_prefetch = 0 : i64, scratch_operands = 0 : i64, tpu.core_type = #tpu.core_type<tc>, window_params = [{transform_indices = @transform_0, window_bounds = array<i64: 32, 512>}, {transform_indices = @transform_1, window_bounds = array<i64: 512, 128>}, {pipeline_mode = #tpu.pipeline_mode<synchronous>, transform_indices = @transform_2, window_bounds = array<i64: 4, 128>}, {transform_indices = @transform_3, window_bounds = array<i64: 512, 384>}, {transform_indices = @transform_4, window_bounds = array<i64: 1, 128, 384>}, {transform_indices = @transform_5, window_bounds = array<i64: 4, 512>}]} {
    %c0_i32 = arith.constant 0 : i32
    %0 = arith.cmpi eq, %arg1, %c0_i32 : i32
    %1 = arith.extui %0 : i1 to i32
    %c0_i32_0 = arith.constant 0 : i32
    %2 = arith.cmpi ne, %1, %c0_i32_0 : i32
    scf.if %2 {
      %cst_24 = arith.constant 0.000000e+00 : f32
      %54 = vector.broadcast %cst_24 : f32 to vector<128x384xf32>
      %c0_25 = arith.constant 0 : index
      %c0_26 = arith.constant 0 : index
      %c0_27 = arith.constant 0 : index
      %55 = vector.load %arg6[%c0_25, %c0_26, %c0_27] : memref<1x128x384xf32, #tpu.memory_space<vmem>>, vector<1x128x384xf32>
      %56 = vector.shape_cast %55 : vector<1x128x384xf32> to vector<128x384xf32>
      %57 = vector.shape_cast %54 : vector<128x384xf32> to vector<1x128x384xf32>
      tpu.vector_store %arg6[%c0_25, %c0_26, %c0_27], %57 {strides = array<i32>} : memref<1x128x384xf32, #tpu.memory_space<vmem>>, vector<1x128x384xf32>,
    } else {
    }
    %c0 = arith.constant 0 : index
    %c0_1 = arith.constant 0 : index
    %3 = vector.load %arg3[%c0, %c0_1] : memref<512x128xbf16, #tpu.memory_space<vmem>>, vector<512x128xbf16>
    %4 = arith.extf %3 : vector<512x128xbf16> to vector<512x128xf32>
    %5 = arith.mulf %4, %4 : vector<512x128xf32>
    %cst = arith.constant dense<0.000000e+00> : vector<512xf32>
    %6 = vector.multi_reduction <add>, %5, %cst [1] : vector<512x128xf32> to vector<512xf32>
    %7 = vector.shape_cast %6 : vector<512xf32> to vector<512x1xf32>
    %cst_2 = arith.constant 9.99999996E-13 : f32
    %8 = vector.broadcast %cst_2 : f32 to vector<512x1xf32>
    %9 = arith.addf %7, %8 : vector<512x1xf32>
    %10 = math.rsqrt %9 : vector<512x1xf32>
    %11 = vector.broadcast %10 : vector<512x1xf32> to vector<512x128xf32>
    %12 = arith.mulf %4, %11 : vector<512x128xf32>
    %c0_3 = arith.constant 0 : index
    %c0_4 = arith.constant 0 : index
    %13 = vector.load %arg4[%c0_3, %c0_4] : memref<4x128xf32, #tpu.memory_space<vmem>>, vector<4x128xf32>
    %14 = arith.mulf %13, %13 : vector<4x128xf32>
    %cst_5 = arith.constant dense<0.000000e+00> : vector<4xf32>
    %15 = vector.multi_reduction <add>, %14, %cst_5 [1] : vector<4x128xf32> to vector<4xf32>
    %16 = vector.shape_cast %15 : vector<4xf32> to vector<4x1xf32>
    %cst_6 = arith.constant 9.99999996E-13 : f32
    %17 = vector.broadcast %cst_6 : f32 to vector<4x1xf32>
    %18 = arith.addf %16, %17 : vector<4x1xf32>
    %19 = math.rsqrt %18 : vector<4x1xf32>
    %20 = vector.broadcast %19 : vector<4x1xf32> to vector<4x128xf32>
    %21 = arith.mulf %13, %20 : vector<4x128xf32>
    %22 = arith.truncf %21 : vector<4x128xf32> to vector<4x128xbf16>
    %23 = arith.truncf %12 : vector<512x128xf32> to vector<512x128xbf16>
    %cst_7 = arith.constant dense<0.000000e+00> : vector<4x512xf32>
    %24 = tpu.matmul %22, %23, %cst_7 {dimension_numbers = #tpu.dot_dimension_numbers<[1], [1], [0], [0], [0, 0, 1, 0], [], []>} : vector<4x128xbf16>, vector<512x128xbf16>, vector<4x512xf32> -> vector<4x512xf32>
    %cst_8 = arith.constant 2.000000e+00 : f32
    %25 = vector.broadcast %cst_8 : f32 to vector<4x512xf32>
    %26 = arith.mulf %24, %25 : vector<4x512xf32>
    %cst_9 = arith.constant dense<0xFF800000> : vector<512xf32>
    %27 = vector.multi_reduction <maximumf>, %26, %cst_9 [0] : vector<4x512xf32> to vector<512xf32>
    %28 = vector.shape_cast %27 : vector<512xf32> to vector<1x512xf32>
    %29 = vector.broadcast %28 : vector<1x512xf32> to vector<4x512xf32>
    %30 = arith.subf %26, %29 : vector<4x512xf32>
    %31 = math.exp %30 : vector<4x512xf32>
    %cst_10 = arith.constant dense<0.000000e+00> : vector<512xf32>
    %32 = vector.multi_reduction <add>, %31, %cst_10 [0] : vector<4x512xf32> to vector<512xf32>
    %33 = vector.shape_cast %32 : vector<512xf32> to vector<1x512xf32>
    %34 = vector.broadcast %33 : vector<1x512xf32> to vector<4x512xf32>
    %35 = arith.divf %31, %34 : vector<4x512xf32>
    %c0_11 = arith.constant 0 : index
    %c0_12 = arith.constant 0 : index
    %36 = vector.load %arg7[%c0_11, %c0_12] : memref<4x512xf32, #tpu.memory_space<vmem>>, vector<4x512xf32>
    tpu.vector_store %arg7[%c0_11, %c0_12], %35 {strides = array<i32>} : memref<4x512xf32, #tpu.memory_space<vmem>>, vector<4x512xf32>,
    %c0_13 = arith.constant 0 : index
    %c0_14 = arith.constant 0 : index
    %37 = vector.load %arg2[%c0_13, %c0_14] : memref<32x512xbf16, #tpu.memory_space<vmem>>, vector<32x512xbf16>
    %38 = arith.extf %37 : vector<32x512xbf16> to vector<32x512xf32>
    %39 = vector.shape_cast %35 : vector<4x512xf32> to vector<4x1x512xf32>
    %40 = vector.shape_cast %38 : vector<32x512xf32> to vector<1x32x512xf32>
    %41 = vector.broadcast %39 : vector<4x1x512xf32> to vector<4x32x512xf32>
    %42 = vector.broadcast %40 : vector<1x32x512xf32> to vector<4x32x512xf32>
    %43 = arith.mulf %41, %42 : vector<4x32x512xf32>
    %44 = vector.shape_cast %43 : vector<4x32x512xf32> to vector<128x512xf32>
    %c0_15 = arith.constant 0 : index
    %c0_16 = arith.constant 0 : index
    %c0_17 = arith.constant 0 : index
    %45 = vector.load %arg6[%c0_15, %c0_16, %c0_17] : memref<1x128x384xf32, #tpu.memory_space<vmem>>, vector<1x128x384xf32>
    %46 = vector.shape_cast %45 : vector<1x128x384xf32> to vector<128x384xf32>
    %47 = arith.truncf %44 : vector<128x512xf32> to vector<128x512xbf16>
    %c0_18 = arith.constant 0 : index
    %c0_19 = arith.constant 0 : index
    %48 = vector.load %arg5[%c0_18, %c0_19] : memref<512x384xbf16, #tpu.memory_space<vmem>>, vector<512x384xbf16>
    %cst_20 = arith.constant dense<0.000000e+00> : vector<128x384xf32>
    %49 = tpu.matmul %47, %48, %cst_20 {dimension_numbers = #tpu.dot_dimension_numbers<[1], [0], [0], [1], [0, 0, 1, 1], [], []>} : vector<128x512xbf16>, vector<512x384xbf16>, vector<128x384xf32> -> vector<128x384xf32>
    %50 = arith.addf %46, %49 : vector<128x384xf32>
    %c0_21 = arith.constant 0 : index
    %c0_22 = arith.constant 0 : index
    %c0_23 = arith.constant 0 : index
    %51 = vector.load %arg6[%c0_21, %c0_22, %c0_23] : memref<1x128x384xf32, #tpu.memory_space<vmem>>, vector<1x128x384xf32>
    %52 = vector.shape_cast %51 : vector<1x128x384xf32> to vector<128x384xf32>
    %53 = vector.shape_cast %50 : vector<128x384xf32> to vector<1x128x384xf32>
    tpu.vector_store %arg6[%c0_21, %c0_22, %c0_23], %53 {strides = array<i32>} : memref<1x128x384xf32, #tpu.memory_space<vmem>>, vector<1x128x384xf32>,
    return
  }
  func.func @transform_0(%arg0: i32, %arg1: i32) -> (i32, i32) {
    %c1_i32 = arith.constant 1 : i32
    %0 = arith.muli %arg0, %c1_i32 : i32
    %1 = arith.addi %0, %arg1 : i32
    %c0_i32 = arith.constant 0 : i32
    %c0_i32_0 = arith.constant 0 : i32
    return %c0_i32, %1 : i32, i32
  }
  func.func @transform_1(%arg0: i32, %arg1: i32) -> (i32, i32) {
    %c1_i32 = arith.constant 1 : i32
    %0 = arith.muli %arg0, %c1_i32 : i32
    %1 = arith.addi %0, %arg1 : i32
    %c0_i32 = arith.constant 0 : i32
    %c0_i32_0 = arith.constant 0 : i32
    return %1, %c0_i32 : i32, i32
  }
  func.func @transform_2(%arg0: i32, %arg1: i32) -> (i32, i32) {
    %c0_i32 = arith.constant 0 : i32
    %c0_i32_0 = arith.constant 0 : i32
    %c0_i32_1 = arith.constant 0 : i32
    return %c0_i32, %c0_i32_0 : i32, i32
  }
  func.func @transform_3(%arg0: i32, %arg1: i32) -> (i32, i32) {
    %c1_i32 = arith.constant 1 : i32
    %0 = arith.muli %arg0, %c1_i32 : i32
    %1 = arith.addi %0, %arg1 : i32
    %c0_i32 = arith.constant 0 : i32
    %c0_i32_0 = arith.constant 0 : i32
    return %1, %c0_i32 : i32, i32
  }
  func.func @transform_4(%arg0: i32, %arg1: i32) -> (i32, i32, i32) {
    %c0_i32 = arith.constant 0 : i32
    %c0_i32_0 = arith.constant 0 : i32
    %c0_i32_1 = arith.constant 0 : i32
    return %arg0, %c0_i32, %c0_i32_0 : i32, i32, i32
  }
  func.func @transform_5(%arg0: i32, %arg1: i32) -> (i32, i32) {
    %c1_i32 = arith.constant 1 : i32
    %0 = arith.muli %arg0, %c1_i32 : i32
    %1 = arith.addi %0, %arg1 : i32
    %c0_i32 = arith.constant 0 : i32
    %c0_i32_0 = arith.constant 0 : i32
    return %c0_i32, %1 : i32, i32
  }
}

module attributes {stable_mosaic.version = 11 : i64} {
  func.func @_decode_kernel(%arg0: i32, %arg1: memref<128x128xbf16, #tpu.memory_space<vmem>>, %arg2: memref<512x128xbf16, #tpu.memory_space<vmem>>, %arg3: memref<4x512xf32, #tpu.memory_space<vmem>>, %arg4: memref<32x512xf32, #tpu.memory_space<vmem>>, %arg5: memref<1x32x1xf32, #tpu.memory_space<vmem>>) attributes {dimension_semantics = [#tpu.dimension_semantics<parallel>], iteration_bounds = array<i64: 2>, scalar_prefetch = 0 : i64, scratch_operands = 0 : i64, tpu.core_type = #tpu.core_type<tc>, window_params = [{pipeline_mode = #tpu.pipeline_mode<synchronous>, transform_indices = @transform_0, window_bounds = array<i64: 128, 128>}, {transform_indices = @transform_1, window_bounds = array<i64: 512, 128>}, {transform_indices = @transform_2, window_bounds = array<i64: 4, 512>}, {transform_indices = @transform_3, window_bounds = array<i64: 32, 512>}, {transform_indices = @transform_4, window_bounds = array<i64: 1, 32, 1>}]} {
    %c0 = arith.constant 0 : index
    %c0_0 = arith.constant 0 : index
    %0 = vector.load %arg2[%c0, %c0_0] : memref<512x128xbf16, #tpu.memory_space<vmem>>, vector<512x128xbf16>
    %1 = arith.extf %0 : vector<512x128xbf16> to vector<512x128xf32>
    %2 = arith.mulf %1, %1 : vector<512x128xf32>
    %cst = arith.constant dense<0.000000e+00> : vector<512xf32>
    %3 = vector.multi_reduction <add>, %2, %cst [1] : vector<512x128xf32> to vector<512xf32>
    %4 = vector.shape_cast %3 : vector<512xf32> to vector<512x1xf32>
    %cst_1 = arith.constant 9.99999996E-13 : f32
    %5 = vector.broadcast %cst_1 : f32 to vector<512x1xf32>
    %6 = arith.addf %4, %5 : vector<512x1xf32>
    %7 = math.rsqrt %6 : vector<512x1xf32>
    %8 = vector.broadcast %7 : vector<512x1xf32> to vector<512x128xf32>
    %9 = arith.mulf %1, %8 : vector<512x128xf32>
    %10 = arith.truncf %9 : vector<512x128xf32> to vector<512x128xbf16>
    %c0_2 = arith.constant 0 : index
    %c0_3 = arith.constant 0 : index
    %11 = vector.load %arg1[%c0_2, %c0_3] : memref<128x128xbf16, #tpu.memory_space<vmem>>, vector<128x128xbf16>
    %cst_4 = arith.constant dense<0.000000e+00> : vector<128x512xf32>
    %12 = tpu.matmul %11, %10, %cst_4 {dimension_numbers = #tpu.dot_dimension_numbers<[1], [1], [0], [0], [0, 0, 1, 0], [], []>} : vector<128x128xbf16>, vector<512x128xbf16>, vector<128x512xf32> -> vector<128x512xf32>
    %cst_5 = arith.constant 2.000000e+00 : f32
    %13 = vector.broadcast %cst_5 : f32 to vector<128x512xf32>
    %14 = arith.mulf %12, %13 : vector<128x512xf32>
    %c0_6 = arith.constant 0 : index
    %c0_7 = arith.constant 0 : index
    %15 = vector.load %arg3[%c0_6, %c0_7] : memref<4x512xf32, #tpu.memory_space<vmem>>, vector<4x512xf32>
    %16 = math.exp %14 : vector<128x512xf32>
    %17 = vector.shape_cast %16 : vector<128x512xf32> to vector<4x32x512xf32>
    %18 = vector.shape_cast %15 : vector<4x512xf32> to vector<4x1x512xf32>
    %19 = vector.broadcast %18 : vector<4x1x512xf32> to vector<4x32x512xf32>
    %20 = arith.mulf %17, %19 : vector<4x32x512xf32>
    %cst_8 = arith.constant dense<0.000000e+00> : vector<32x512xf32>
    %21 = vector.multi_reduction <add>, %20, %cst_8 [0] : vector<4x32x512xf32> to vector<32x512xf32>
    %22 = math.log %21 : vector<32x512xf32>
    %c0_9 = arith.constant 0 : index
    %c0_10 = arith.constant 0 : index
    %23 = vector.load %arg4[%c0_9, %c0_10] : memref<32x512xf32, #tpu.memory_space<vmem>>, vector<32x512xf32>
    tpu.vector_store %arg4[%c0_9, %c0_10], %22 {strides = array<i32>} : memref<32x512xf32, #tpu.memory_space<vmem>>, vector<32x512xf32>,
    %cst_11 = arith.constant dense<0.000000e+00> : vector<32xf32>
    %24 = vector.multi_reduction <add>, %21, %cst_11 [1] : vector<32x512xf32> to vector<32xf32>
    %25 = vector.shape_cast %24 : vector<32xf32> to vector<32x1xf32>
    %c0_12 = arith.constant 0 : index
    %c0_13 = arith.constant 0 : index
    %c0_14 = arith.constant 0 : index
    %26 = vector.load %arg5[%c0_12, %c0_13, %c0_14] : memref<1x32x1xf32, #tpu.memory_space<vmem>>, vector<1x32x1xf32>
    %27 = vector.shape_cast %26 : vector<1x32x1xf32> to vector<32x1xf32>
    %28 = vector.shape_cast %25 : vector<32x1xf32> to vector<1x32x1xf32>
    tpu.vector_store %arg5[%c0_12, %c0_13, %c0_14], %28 {strides = array<i32>} : memref<1x32x1xf32, #tpu.memory_space<vmem>>, vector<1x32x1xf32>,
    return
  }
  func.func @transform_0(%arg0: i32) -> (i32, i32) {
    %c0_i32 = arith.constant 0 : i32
    %c0_i32_0 = arith.constant 0 : i32
    %c0_i32_1 = arith.constant 0 : i32
    return %c0_i32, %c0_i32_0 : i32, i32
  }
  func.func @transform_1(%arg0: i32) -> (i32, i32) {
    %c0_i32 = arith.constant 0 : i32
    %c0_i32_0 = arith.constant 0 : i32
    return %arg0, %c0_i32 : i32, i32
  }
  func.func @transform_2(%arg0: i32) -> (i32, i32) {
    %c0_i32 = arith.constant 0 : i32
    %c0_i32_0 = arith.constant 0 : i32
    return %c0_i32, %arg0 : i32, i32
  }
  func.func @transform_3(%arg0: i32) -> (i32, i32) {
    %c0_i32 = arith.constant 0 : i32
    %c0_i32_0 = arith.constant 0 : i32
    return %c0_i32, %arg0 : i32, i32
  }
  func.func @transform_4(%arg0: i32) -> (i32, i32, i32) {
    %c0_i32 = arith.constant 0 : i32
    %c0_i32_0 = arith.constant 0 : i32
    %c0_i32_1 = arith.constant 0 : i32
    return %arg0, %c0_i32, %c0_i32_0 : i32, i32, i32
  }
}

</mosaic_0001>

<bundles_post_ra>
// kernel: macridvae_forward.3
= control target key start
LH: loop header
LB: loop body
LE: loop exit
PB: predicated region body
PF: predicated region fallthrough
CT: control target
= control target key end

     0   :  { %s2782_s15 = smov 0   ;;  %s2784_s16 = smov 0   ;;  %s4852_s0 = inlined_call_operand.vmem [shape: bf16[128,128], index: 0, kind: input, shape index: {}]   ;;  %s4853_s1 = inlined_call_operand.vmem [shape: bf16[1024,128], index: 1, kind: input, shape index: {}]   ;;  %s4854_s2 = inlined_call_operand.vmem [shape: f32[4,1024], index: 2, kind: input, shape index: {}]   ;;  %s4855_s3 = inlined_call_operand.vmem [shape: f32[32,1024], index: 3, kind: output, shape index: {0}]   ;;  %s4856_s4 = inlined_call_operand.vmem [shape: f32[2,32,1], index: 4, kind: output, shape index: {1}]  }
   0x1   :  { %s2786_s17 = smov 0  }
   0x2 LB: > { %s2795_s18 = sadd.s32 4294967295, %s2755_s17   ;;  %s2797_s19 = sadd.s32 1, %s2755_s17   ;;  %s2755_s17 = sphi %s2786_s17, %s5038_s17   ;;  %s2751_s16 = sphi %s2784_s16, %s5037_s16   ;;  %s2747_s15 = sphi %s2782_s15, %s5036_s15  }
   0x3   : > { %s92_s20 = ssub.s32 %s2755_s17, %s2797_s19  ;;  %s95_s21 = sadd.s32 1, %s2751_s16 }
   0x4   : > { %p93_p0 = scmp.eq.s32.totalorder %s92_s20, 0  ;;  %p105_p1 = scmp.ne.s32.totalorder %s2751_s16, %s2747_s15 }
   0x5   : > { %p106_p2 = scmp.eq.s32.totalorder %s2795_s18, 1  ;;  %p2207_p3 = scmp.ge.s32.totalorder %s2755_s17, 1 }
   0x6   : > { %s2805_s22 = scalar_select %p93_p0, %s2751_s16, %s95_s21  }
   0x7   : > { %p2807_p4 = por %p106_p2, %p105_p1  ;;  %p177_p5 = scmp.lt.s32.totalorder %s2755_s17, 3 }
   0x9   : > { %p178_p6 = pnand %p2207_p3, %p177_p5 }
   0xb   : > { %181 = sbr.rel (%p178_p6) target bundleno = 740 (0x2e4), region = 32 }
  0x10   : > { %s2209_s24 = sshll.u32 %s2795_s18, 6  ;;  %s202_s30 = sand.u32 1, %s2747_s15  }
  0x11   : > { %p213_p7 = scmp.lt.s32.totalorder %s2209_s24, 127  ;;  %s2208_s15 = sshll.u32 %s202_s30, 7 }
  0x12   : > { %s4763_s5 = scalar_lea.vmem [#allocation2], %s2208_s15  ;;  %p225_p9 = scmp.lt.s32.totalorder %s2795_s18, 1 }
  0x13   : > { %s5040_s24 = smov (!%p213_p7, %s2209_s24), 127  ;;  %s2261_s11 = sshll.u32 (%p2807_p4), %s2795_s18, 5 }
  0x14   : > { %s2210_s25 = sshll.u32 %s5040_s24, 2  ;;  %s2065_s14 = scalar_lea.vmem (%p2807_p4), %s4855_s3, %s2261_s11 }
  0x15   : > { %s2815_s28 = scalar_lea.vmem %s4853_s1, %s2210_s25  ;;  %s2211_s25 = sshll.u32 %s2795_s18, 2 }
  0x16   : > { %v2420_v0 = vld [vmem:[%s2815_s28 + $0xf8] sm:$0xff]   ;;  %v2411_v16 = vld [vmem:[%s2815_s28 + $0xb0] sm:$0xff]   ;;  %v2410_v38 = vld [vmem:[%s2815_s28 + $0xa8] sm:$0xff]   ;;  %p219_p8 = scmp.lt.s32.totalorder %s2211_s25, 7 }
  0x17   : > { %v2412_v1 = vld [vmem:[%s2815_s28 + $0xb8] sm:$0xff]   ;;  %v2820_v3 = vunpack.c.l.bf16 %v2420_v0  ;;  %v2832_v9 = vunpack.c.h.bf16 %v2420_v0  ;;  %v2850_v19 = vunpack.c.l.bf16 %v2411_v16  ;;  %v2419_v23 = vld [vmem:[%s2815_s28 + $0xf0] sm:$0xff]   ;;  %v2861_v25 = vunpack.c.h.bf16 %v2411_v16  ;;  %v2418_v45 = vld [vmem:[%s2815_s28 + $0xe8] sm:$0xff]   ;;  %s226_s6 = scalar_select %p225_p9, %s2795_s18, 1 }
  0x18   : > { %v2396_v2 = vld [vmem:[%s2815_s28 + $0x38] sm:$0xff]   ;;  %v2822_v4 = vunpack.c.l.bf16 %v2412_v1  ;;  %v2834_v10 = vunpack.c.h.bf16 %v2412_v1  ;;  %v2859_v24 = vunpack.c.l.bf16 %v2419_v23  ;;  %v2863_v26 = vunpack.c.h.bf16 %v2419_v23  ;;  %v2395_v30 = vld [vmem:[%s2815_s28 + $0x30] sm:$0xff]   ;;  %v2394_v46 = vld [vmem:[%s2815_s28 + $0x28] sm:$0xff]   ;;  %s5042_s25 = smov (!%p219_p8, %s2211_s25), 7 }
  0x19   : > { %v2824_v5 = vunpack.c.l.bf16 %v2396_v2  ;;  %v420_v6 = vmul.f32 %v2820_v3, %v2820_v3  ;;  %v2836_v11 = vunpack.c.h.bf16 %v2396_v2  ;;  %v421_v12 = vmul.f32 %v2832_v9, %v2832_v9  ;;  %v2404_v15 = vld [vmem:[%s2815_s28 + $0x78] sm:$0xff]   ;;  %v2403_v31 = vld [vmem:[%s2815_s28 + $0x70] sm:$0xff]   ;;  %v2402_v53 = vld [vmem:[%s2815_s28 + $0x68] sm:$0xff]   ;;  %s2212_s26 = sshll.u32 %s5042_s25, 2  ;;  %s2252_s7 = sshll.u32 %s226_s6, 5 }
  0x1a   : > { %v404_v7 = vmul.f32 %v2822_v4, %v2822_v4  ;;  %v405_v13 = vmul.f32 %v2834_v10, %v2834_v10  ;;  %v2846_v17 = vunpack.c.h.bf16 %v2404_v15  ;;  %v2848_v18 = vunpack.c.l.bf16 %v2404_v15  ;;  %v2409_v60 = vld [vmem:[%s2815_s28 + $0xa0] sm:$0xff]   ;;  %s222_s29 = scalar_lea.vmem %s4854_s2, %s2212_s26  ;;  %s229_s10 = scalar_lea.vmem %s4856_s4, %s2252_s7 }
  0x1b   : > { %v372_v8 = vmul.f32 %v2824_v5, %v2824_v5  ;;  %546 = vadd.xlane.f32.xlu1 %v420_v6  ;;  %v373_v14 = vmul.f32 %v2836_v11, %v2836_v11  ;;  %v402_v22 = vmul.f32 %v2850_v19, %v2850_v19  ;;  %v418_v27 = vmul.f32 %v2859_v24, %v2859_v24  ;;  %v2417_v61 = vld [vmem:[%s2815_s28 + $0xe0] sm:$0xff]  }
  0x1c   : > { %514 = vadd.xlane.f32.xlu0 %v404_v7  ;;  %v389_v20 = vmul.f32 %v2846_v17, %v2846_v17  ;;  %v388_v21 = vmul.f32 %v2848_v18, %v2848_v18  ;;  %v403_v28 = vmul.f32 %v2861_v25, %v2861_v25  ;;  %v419_v29 = vmul.f32 %v2863_v26, %v2863_v26  ;;  %v2393_v7 = vld [vmem:[%s2815_s28 + $0x20] sm:$0xff]  }
  0x1d   : > { %450 = vadd.xlane.f32.xlu2 %v372_v8  ;;  %v2873_v32 = vunpack.c.h.bf16 %v2395_v30  ;;  %v2875_v33 = vunpack.c.l.bf16 %v2395_v30  ;;  %v2877_v34 = vunpack.c.l.bf16 %v2403_v31  ;;  %v2886_v39 = vunpack.c.l.bf16 %v2410_v38 }
  0x1e   : > { %v2888_v40 = vunpack.c.h.bf16 %v2403_v31  ;;  %v2890_v41 = vunpack.c.h.bf16 %v2410_v38  ;;  %v2900_v47 = vunpack.c.h.bf16 %v2418_v45  ;;  %v2902_v48 = vunpack.c.l.bf16 %v2418_v45  ;;  %v2416_v31 = vld [vmem:[%s2815_s28 + $0xd8] sm:$0xff]  }
  0x1f   : > { %v371_v35 = vmul.f32 %v2873_v32, %v2873_v32  ;;  %v370_v36 = vmul.f32 %v2875_v33, %v2875_v33  ;;  %v386_v37 = vmul.f32 %v2877_v34, %v2877_v34  ;;  %v400_v42 = vmul.f32 %v2886_v39, %v2886_v39  ;;  %v2400_v45 = vld [vmem:[%s2815_s28 + $0x58] sm:$0xff]  }
  0x20   : > { %v387_v43 = vmul.f32 %v2888_v40, %v2888_v40  ;;  %v401_v44 = vmul.f32 %v2890_v41, %v2890_v41  ;;  %v2904_v49 = vunpack.c.l.bf16 %v2394_v46  ;;  %v417_v50 = vmul.f32 %v2900_v47, %v2900_v47 }
  0x21   : > { %v416_v51 = vmul.f32 %v2902_v48, %v2902_v48  ;;  %v2913_v54 = vunpack.c.l.bf16 %v2402_v53  ;;  %v2915_v55 = vunpack.c.h.bf16 %v2394_v46  ;;  %v2917_v56 = vunpack.c.h.bf16 %v2402_v53 }
  0x22   : > { %v368_v52 = vmul.f32 %v2904_v49, %v2904_v49  ;;  %v2927_v62 = vunpack.c.h.bf16 %v2409_v60  ;;  %v2929_v63 = vunpack.c.l.bf16 %v2409_v60  ;;  %v2931_v0 = vunpack.c.l.bf16 %v2417_v61 }
  0x23   : > { %548 = vadd.xlane.f32.xlu1 %v421_v12  ;;  %4893 = vst [vmem:[#allocation3_spill] sm:$0xff] %v2917_v56  ;;  %v384_v57 = vmul.f32 %v2913_v54, %v2913_v54  ;;  %v369_v58 = vmul.f32 %v2915_v55, %v2915_v55  ;;  %v385_v59 = vmul.f32 %v2917_v56, %v2917_v56  ;;  %v2940_v8 = vunpack.c.h.bf16 %v2417_v61 }
  0x24   : > { %516 = vadd.xlane.f32.xlu0 %v405_v13  ;;  %4894 = vst [vmem:[#allocation4_spill] sm:$0xff] %v2927_v62  ;;  %v399_v1 = vmul.f32 %v2927_v62, %v2927_v62  ;;  %v398_v2 = vmul.f32 %v2929_v63, %v2929_v63  ;;  %v414_v6 = vmul.f32 %v2931_v0, %v2931_v0  ;;  %v2942_v12 = vunpack.c.l.bf16 %v2393_v7 }
  0x25   : > { %452 = vadd.xlane.f32.xlu2 %v373_v14  ;;  %4895 = vst [vmem:[#allocation5_spill] sm:$0xff] %v2929_v63  ;;  %v2944_v13 = vunpack.c.h.bf16 %v2393_v7  ;;  %v415_v14 = vmul.f32 %v2940_v8, %v2940_v8  ;;  %v2996_v60 = vunpack.c.h.bf16 %v2400_v45  ;;  %v2415_v7 = vld [vmem:[%s2815_s28 + $0xd0] sm:$0xff]  }
  0x26   : > { %4896 = vst [vmem:[#allocation6_spill] sm:$0xff] %v2931_v0  ;;  %v366_v15 = vmul.f32 %v2942_v12, %v2942_v12 }
  0x27   : > { %4897 = vst [vmem:[#allocation7_spill] sm:$0xff] %v2940_v8  ;;  %v367_v16 = vmul.f32 %v2944_v13, %v2944_v13 }
  0x28   : > { %4898 = vst [vmem:[#allocation8_spill] sm:$0xff] %v2942_v12 }
  0x29   : > { %4899 = vst [vmem:[#allocation9_spill] sm:$0xff] %v2944_v13 }
  0x2a   : > { %4910 = vst [vmem:[#allocation20_spill] sm:$0xff] %v2996_v60 }
  0x2b   : > { %484 = vadd.xlane.f32.xlu1 %v389_v20  ;;  %v2401_v20 = vld [vmem:[%s2815_s28 + $0x60] sm:$0xff]  }
  0x2c   : > { %482 = vadd.xlane.f32.xlu0 %v388_v21  ;;  %v2408_v21 = vld [vmem:[%s2815_s28 + $0x98] sm:$0xff]   ;;  %v2956_v23 = vunpack.c.h.bf16 %v2401_v20 }
  0x2d   : > { %510 = vadd.xlane.f32.xlu2 %v402_v22  ;;  %v2954_v22 = vunpack.c.l.bf16 %v2401_v20 }
  0x2e   : > { %4901 = vst [vmem:[#allocation11_spill] sm:$0xff] %v2956_v23 }
  0x2f   : > { %4900 = vst [vmem:[#allocation10_spill] sm:$0xff] %v2954_v22 }
  0x33   : > { %542 = vadd.xlane.f32.xlu1 %v418_v27  ;;  %v2958_v27 = vunpack.c.l.bf16 %v2408_v21 }
  0x34   : > { %512 = vadd.xlane.f32.xlu0 %v403_v28  ;;  %v382_v28 = vmul.f32 %v2954_v22, %v2954_v22 }
  0x35   : > { %544 = vadd.xlane.f32.xlu2 %v419_v29  ;;  %4902 = vst [vmem:[#allocation12_spill] sm:$0xff] %v2958_v27  ;;  %v383_v29 = vmul.f32 %v2956_v23, %v2956_v23  ;;  %v396_v30 = vmul.f32 %v2958_v27, %v2958_v27 }
  0x3b   : > { %448 = vadd.xlane.f32.xlu1 %v371_v35  ;;  %v2967_v35 = vunpack.c.h.bf16 %v2408_v21 }
  0x3c   : > { %446 = vadd.xlane.f32.xlu0 %v370_v36  ;;  %v2969_v36 = vunpack.c.l.bf16 %v2416_v31 }
  0x3d   : > { %478 = vadd.xlane.f32.xlu2 %v386_v37  ;;  %4903 = vst [vmem:[#allocation13_spill] sm:$0xff] %v2967_v35  ;;  %v2971_v37 = vunpack.c.h.bf16 %v2416_v31  ;;  %v397_v38 = vmul.f32 %v2967_v35, %v2967_v35 }
  0x3e   : > { %4904 = vst [vmem:[#allocation14_spill] sm:$0xff] %v2969_v36 }
  0x3f   : > { %4905 = vst [vmem:[#allocation15_spill] sm:$0xff] %v2971_v37 }
  0x43   : > { %506 = vadd.xlane.f32.xlu1 %v400_v42  ;;  %v412_v42 = vmul.f32 %v2969_v36, %v2969_v36 }
  0x44   : > { %480 = vadd.xlane.f32.xlu0 %v387_v43  ;;  %v413_v43 = vmul.f32 %v2971_v37, %v2971_v37 }
  0x45   : > { %508 = vadd.xlane.f32.xlu2 %v401_v44  ;;  %v2392_v44 = vld [vmem:[%s2815_s28 + $0x18] sm:$0xff]  }
  0x46   : > { %v2981_v46 = vunpack.c.h.bf16 %v2392_v44 }
  0x48   : > { %4906 = vst [vmem:[#allocation16_spill] sm:$0xff] %v2981_v46 }
  0x4b   : > { %540 = vadd.xlane.f32.xlu1 %v417_v50  ;;  %v2983_v50 = vunpack.c.l.bf16 %v2392_v44 }
  0x4c   : > { %538 = vadd.xlane.f32.xlu0 %v416_v51  ;;  %v2985_v51 = vunpack.c.l.bf16 %v2400_v45 }
  0x4d   : > { %442 = vadd.xlane.f32.xlu2 %v368_v52  ;;  %4907 = vst [vmem:[#allocation17_spill] sm:$0xff] %v2983_v50  ;;  %v365_v52 = vmul.f32 %v2981_v46, %v2981_v46  ;;  %v364_v53 = vmul.f32 %v2983_v50, %v2983_v50 }
  0x4e   : > { %4908 = vst [vmem:[#allocation18_spill] sm:$0xff] %v2985_v51 }
  0x53   : > { %474 = vadd.xlane.f32.xlu1 %v384_v57  ;;  %v380_v57 = vmul.f32 %v2985_v51, %v2985_v51 }
  0x54   : > { %444 = vadd.xlane.f32.xlu0 %v369_v58  ;;  %v2407_v58 = vld [vmem:[%s2815_s28 + $0x90] sm:$0xff]  }
  0x55   : > { %476 = vadd.xlane.f32.xlu2 %v385_v59  ;;  %v2994_v59 = vunpack.c.l.bf16 %v2407_v58  ;;  %v2998_v61 = vunpack.c.h.bf16 %v2407_v58 }
  0x57   : > { %4909 = vst [vmem:[#allocation19_spill] sm:$0xff] %v2994_v59 }
  0x58   : > { %4911 = vst [vmem:[#allocation21_spill] sm:$0xff] %v2998_v61 }
  0x5b   : > { %504 = vadd.xlane.f32.xlu1 %v399_v1  ;;  %v394_v1 = vmul.f32 %v2994_v59, %v2994_v59 }
  0x5c   : > { %502 = vadd.xlane.f32.xlu0 %v398_v2  ;;  %v381_v2 = vmul.f32 %v2996_v60, %v2996_v60 }
  0x5d   : > { %534 = vadd.xlane.f32.xlu2 %v414_v6  ;;  %v395_v6 = vmul.f32 %v2998_v61, %v2998_v61 }
  0x63   : > { %438 = vadd.xlane.f32.xlu1 %v366_v15  ;;  %v3008_v15 = vunpack.c.h.bf16 %v2415_v7 }
  0x64   : > { %536 = vadd.xlane.f32.xlu0 %v415_v14  ;;  %v2391_v14 = vld [vmem:[%s2815_s28 + $0x10] sm:$0xff]  }
  0x65   : > { %440 = vadd.xlane.f32.xlu2 %v367_v16  ;;  %4912 = vst [vmem:[#allocation22_spill] sm:$0xff] %v3008_v15  ;;  %v3010_v16 = vunpack.c.l.bf16 %v2415_v7  ;;  %v3012_v20 = vunpack.c.l.bf16 %v2391_v14  ;;  %v411_v21 = vmul.f32 %v3008_v15, %v3008_v15  ;;  %v2414_v7 = vld [vmem:[%s2815_s28 + $0xc8] sm:$0xff]   ;;  %v2405_v15 = vld [vmem:[%s2815_s28 + $0x80] sm:$0xff]  }
  0x66   : > { %v3088_v61 = vunpack.c.l.bf16 %v2405_v15 }
  0x67   : > { %4913 = vst [vmem:[#allocation23_spill] sm:$0xff] %v3010_v16 }
  0x68   : > { %4914 = vst [vmem:[#allocation24_spill] sm:$0xff] %v3012_v20 }
  0x69   : > { %4925 = vst [vmem:[#allocation35_spill] sm:$0xff] %v3088_v61 }
  0x6b   : > { %472 = vadd.xlane.f32.xlu1 %v383_v29  ;;  %v362_v29 = vmul.f32 %v3012_v20, %v3012_v20 }
  0x6c   : > { %470 = vadd.xlane.f32.xlu0 %v382_v28  ;;  %v410_v28 = vmul.f32 %v3010_v16, %v3010_v16 }
  0x6d   : > { %498 = vadd.xlane.f32.xlu2 %v396_v30  ;;  %v2399_v30 = vld [vmem:[%s2815_s28 + $0x50] sm:$0xff]  }
  0x6e   : > { %v3021_v31 = vunpack.c.l.bf16 %v2399_v30 }
  0x70   : > { %4915 = vst [vmem:[#allocation25_spill] sm:$0xff] %v3021_v31 }
  0x73   : > { %530 = vadd.xlane.f32.xlu1 %v412_v42  ;;  %v3025_v42 = vunpack.c.h.bf16 %v2399_v30 }
  0x74   : > { %500 = vadd.xlane.f32.xlu0 %v397_v38  ;;  %v3023_v38 = vunpack.c.h.bf16 %v2391_v14 }
  0x75   : > { %532 = vadd.xlane.f32.xlu2 %v413_v43  ;;  %4917 = vst [vmem:[#allocation27_spill] sm:$0xff] %v3025_v42 }
  0x76   : > { %4916 = vst [vmem:[#allocation26_spill] sm:$0xff] %v3023_v38  ;;  %v363_v58 = vmul.f32 %v3023_v38, %v3023_v38 }
  0x7b   : > { %436 = vadd.xlane.f32.xlu1 %v365_v52 }
  0x7c   : > { %434 = vadd.xlane.f32.xlu0 %v364_v53 }
  0x7d   : > { %466 = vadd.xlane.f32.xlu2 %v380_v57  ;;  %v378_v57 = vmul.f32 %v3021_v31, %v3021_v31 }
  0x83   : > { %494 = vadd.xlane.f32.xlu1 %v394_v1 }
  0x84   : > { %468 = vadd.xlane.f32.xlu0 %v381_v2  ;;  %v379_v2 = vmul.f32 %v3025_v42, %v3025_v42 }
  0x85   : > { %496 = vadd.xlane.f32.xlu2 %v395_v6  ;;  %v2406_v6 = vld [vmem:[%s2815_s28 + $0x88] sm:$0xff]  }
  0x86   : > { %v3044_v14 = vunpack.c.h.bf16 %v2406_v6 }
  0x88   : > { %4918 = vst [vmem:[#allocation28_spill] sm:$0xff] %v3044_v14 }
  0x8b   : > { %528 = vadd.xlane.f32.xlu1 %v411_v21  ;;  %v3046_v21 = vunpack.c.l.bf16 %v2406_v6 }
  0x8c   : > { %526 = vadd.xlane.f32.xlu0 %v410_v28  ;;  %v3048_v28 = vunpack.c.l.bf16 %v2414_v7 }
  0x8d   : > { %430 = vadd.xlane.f32.xlu2 %v362_v29  ;;  %4919 = vst [vmem:[#allocation29_spill] sm:$0xff] %v3046_v21 }
  0x8e   : > { %v547_v43 = vpop.xlane.xlu1 %546  ;;  %4920 = vst [vmem:[#allocation30_spill] sm:$0xff] %v3048_v28  ;;  %v408_v38 = vmul.f32 %v3048_v28, %v3048_v28 }
  0x8f   : > { %v515_v44 = vpop.xlane.xlu0 %514  ;;  %v3027_v45 = vadd.f32 1e-12, %v547_v43 }
  0x90   : > { %v3029_v52 = vadd.f32 1e-12, %v515_v44  ;;  %v451_v53 = vpop.xlane.xlu2 %450 }
  0x91   : > { %v3035_v1 = vadd.f32 1e-12, %v451_v53  ;;  %2445 = vrsqrt.f32 %v3027_v45  ;;  %vm1240_vm3 = vweird.f32 %v3027_v45 }
  0x92   : > { %2447 = vrsqrt.f32 %v3029_v52  ;;  %vm1080_vm7 = vweird.f32 %v3029_v52 }
  0x93   : > { %2449 = vrsqrt.f32 %v3035_v1  ;;  %462 = vadd.xlane.f32.xlu1 %v378_v57  ;;  %v393_v57 = vmul.f32 %v3044_v14, %v3044_v14  ;;  %vm760_vm0 = vweird.f32 %v3035_v1 }
  0x94   : > { %432 = vadd.xlane.f32.xlu0 %v363_v58  ;;  %v392_v58 = vmul.f32 %v3046_v21, %v3046_v21 }
  0x95   : > { %464 = vadd.xlane.f32.xlu2 %v379_v2  ;;  %v2390_v2 = vld [vmem:[%s2815_s28 + $0x8] sm:$0xff]  }
  0x96   : > { %v549_v29 = vpop.xlane.xlu1 %548  ;;  %v3077_v21 = vunpack.c.h.bf16 %v2390_v2 }
  0x97   : > { %v517_v30 = vpop.xlane.xlu0 %516  ;;  %v3050_v43 = vpop.eup %2445  ;;  %v3052_v44 = vadd.f32 1e-12, %v549_v29  ;;  %v3070_v29 = vunpack.c.h.bf16 %v2414_v7 }
  0x98   : > { %v3054_v53 = vadd.f32 1e-12, %v517_v30  ;;  %v453_v42 = vpop.xlane.xlu2 %452  ;;  %v3061_v6 = vpop.eup %2447  ;;  %v2398_v30 = vld [vmem:[%s2815_s28 + $0x48] sm:$0xff]   ;;  %4922 = vst [vmem:[#allocation32_spill] sm:$0xff] %v3077_v21  ;;  %v1235_v28 = vmul.f32 %v3050_v43, %v3027_v45  ;;  %v361_v50 = vmul.f32 %v3077_v21, %v3077_v21  ;;  %vm1241_vm6 = vweird.f32 %v3050_v43 }
  0x99   : > { %v3063_v31 = vadd.f32 1e-12, %v453_v42  ;;  %v3067_v20 = vpop.eup %2449  ;;  %2451 = vrsqrt.f32 %v3052_v44  ;;  %4921 = vst [vmem:[#allocation31_spill] sm:$0xff] %v3070_v29  ;;  %v3079_v42 = vunpack.c.l.bf16 %v2390_v2  ;;  %v1075_v16 = vmul.f32 %v3061_v6, %v3029_v52 }
  0x9a   : > { %v755_v14 = vmul.f32 %v3067_v20, %v3035_v1  ;;  %2453 = vrsqrt.f32 %v3054_v53  ;;  %v3086_v7 = vunpack.c.l.bf16 %v2398_v30  ;;  %v3090_v59 = vunpack.c.h.bf16 %v2398_v30 }
  0x9b   : > { %4923 = vst [vmem:[#allocation33_spill] sm:$0xff] %v3079_v42  ;;  %2455 = vrsqrt.f32 %v3063_v31  ;;  %492 = vadd.xlane.f32.xlu1 %v393_v57  ;;  %v409_v46 = vmul.f32 %v3070_v29, %v3070_v29  ;;  %v360_v57 = vmul.f32 %v3079_v42, %v3079_v42  ;;  %v1076_v30 = vmul.f32 %v3061_v6, %v1075_v16 }
  0x9c   : > { %490 = vadd.xlane.f32.xlu0 %v392_v58  ;;  %4924 = vst [vmem:[#allocation34_spill] sm:$0xff] %v3086_v7  ;;  %v756_v2 = vmul.f32 %v3067_v20, %v755_v14  ;;  %v1236_v58 = vmul.f32 %v3050_v43, %v1235_v28  ;;  %v376_v21 = vmul.f32 %v3086_v7, %v3086_v7  ;;  %vm1250_vm1 = vweird.f32 %v3052_v44 }
  0x9d   : > { %522 = vadd.xlane.f32.xlu2 %v408_v38  ;;  %4926 = vst [vmem:[#allocation36_spill] sm:$0xff] %v3090_v59  ;;  %v3115_v42 = vmul.f32 %v3088_v61, %v3088_v61  ;;  %v1077_v22 = vmul.f32 0.5, %v1076_v30  ;;  %vm1090_vm2 = vweird.f32 %v3054_v53  ;;  %vm770_vm4 = vweird.f32 %v3063_v31 }
  0x9e   : > { %v485_v60 = vpop.xlane.xlu1 %484  ;;  %v757_v35 = vmul.f32 0.5, %v756_v2  ;;  %v1237_v23 = vmul.f32 0.5, %v1236_v58  ;;  %vm761_vm5 = vweird.f32 %v3067_v20  ;;  %v3142_v58 = vunpack.c.h.bf16 %v2405_v15 }
  0x9f   : > { %v483_v51 = vpop.xlane.xlu0 %482  ;;  %v3099_v38 = vpop.eup %2451  ;;  %v3103_v37 = vadd.f32 1e-12, %v485_v60  ;;  %v377_v60 = vmul.f32 %v3090_v59, %v3090_v59  ;;  %v2413_v59 = vld [vmem:[%s2815_s28 + $0xc0] sm:$0xff]   ;;  %v1078_v12 = vsub.f32 1.5, %v1077_v22  ;;  %vm3172_vm10 = vmor %vm760_vm0, %vm761_vm5  ;;  %vm1081_vm13 = vweird.f32 %v3061_v6 }
  0xa0   : > { %v3105_v14 = vadd.f32 1e-12, %v483_v51  ;;  %v511_v36 = vpop.xlane.xlu2 %510  ;;  %v3107_v27 = vpop.eup %2453  ;;  %v1245_v29 = vmul.f32 %v3099_v38, %v3052_v44  ;;  %v3146_v8 = vunpack.c.l.bf16 %v2413_v59  ;;  %v1238_v13 = vsub.f32 1.5, %v1237_v23  ;;  %vm3225_vm0 = vmor %vm1080_vm7, %vm1081_vm13 }
  0xa1   : > { %v3119_v16 = vpop.eup %2455  ;;  %v1085_v51 = vmul.f32 %v3107_v27, %v3054_v53  ;;  %2457 = vrsqrt.f32 %v3103_v37  ;;  %v3125_v28 = vadd.f32 1e-12, %v511_v36  ;;  %vm1091_vm9 = vweird.f32 %v3107_v27 }
  0xa2   : > { %v1246_v7 = vmul.f32 %v3099_v38, %v1245_v29  ;;  %v765_v61 = vmul.f32 %v3119_v16, %v3063_v31  ;;  %2459 = vrsqrt.f32 %v3105_v14  ;;  %vm771_vm8 = vweird.f32 %v3119_v16  ;;  %vm3200_vm14 = vmor %vm1090_vm2, %vm1091_vm9 }
  0xa3   : > { %v1086_v0 = vmul.f32 %v3107_v27, %v1085_v51  ;;  %426 = vadd.xlane.f32.xlu1 %v360_v57  ;;  %2461 = vrsqrt.f32 %v3125_v28  ;;  %v758_v57 = vsub.f32 1.5, %v757_v35  ;;  %v391_v22 = vmul.f32 %v3142_v58, %v3142_v58  ;;  %vm3186_vm12 = vmor %vm770_vm4, %vm771_vm8 }
  0xa4   : > { %524 = vadd.xlane.f32.xlu0 %v409_v46  ;;  %v1247_v36 = vmul.f32 0.5, %v1246_v7  ;;  %v766_v29 = vmul.f32 %v3119_v16, %v765_v61  ;;  %v3144_v46 = vunpack.c.h.bf16 %v2413_v59  ;;  %vm1251_vm11 = vweird.f32 %v3099_v38 }
  0xa5   : > { %428 = vadd.xlane.f32.xlu2 %v361_v50  ;;  %v1087_v2 = vmul.f32 0.5, %v1086_v0  ;;  %v759_v23 = vmul.f32 %v3067_v20, %v758_v57  ;;  %vm3213_vm15 = vmor %vm1250_vm1, %vm1251_vm11  ;;  %vm930_vm4 = vweird.f32 %v3103_v37  ;;  %vm1060_vm7 = vweird.f32 %v3125_v28 }
  0xa6   : > { %4927 = vst [vmem:[#allocation37_spill] sm:$0xff] %v3144_v46  ;;  %v1248_v7 = vsub.f32 1.5, %v1247_v36  ;;  %v767_v30 = vmul.f32 0.5, %v766_v29  ;;  %v543_v61 = vpop.xlane.xlu1 %542  ;;  %v407_v53 = vmul.f32 %v3144_v46, %v3144_v46  ;;  %vm3251_vm1 = vmor %vm1240_vm3, %vm1241_vm6  ;;  %vm920_vm3 = vweird.f32 %v3105_v14 }
  0xa7   : > { %v513_v51 = vpop.xlane.xlu0 %512  ;;  %v3148_v50 = vpop.eup %2457  ;;  %v1088_v63 = vsub.f32 1.5, %v1087_v2  ;;  %v3157_v36 = vadd.f32 1e-12, %v543_v61  ;;  %v763_v52 = vsel %vm3172_vm10, %v3067_v20, %v759_v23 }
  0xa8   : > { %v3150_v62 = vadd.f32 1e-12, %v513_v51  ;;  %v545_v0 = vpop.xlane.xlu2 %544  ;;  %v3153_v15 = vpop.eup %2459  ;;  %v768_v56 = vsub.f32 1.5, %v767_v30  ;;  %v925_v35 = vmul.f32 %v3148_v50, %v3103_v37  ;;  %v1249_v30 = vmul.f32 %v3099_v38, %v1248_v7 }
  0xa9   : > { %v915_v59 = vmul.f32 %v3153_v15, %v3105_v14  ;;  %v3161_v29 = vadd.f32 1e-12, %v545_v0  ;;  %v3178_v61 = vpop.eup %2461  ;;  %v1079_v7 = vmul.f32 %v3061_v6, %v1078_v12  ;;  %v1239_v12 = vmul.f32 %v3050_v43, %v1238_v13 }
  0xaa   : > { %2463 = vrsqrt.f32 %v3150_v62  ;;  %v769_v57 = vmul.f32 %v3119_v16, %v768_v56  ;;  %v926_v0 = vmul.f32 %v3148_v50, %v925_v35  ;;  %v1089_v56 = vmul.f32 %v3107_v27, %v1088_v63 }
  0xab   : > { %v916_v51 = vmul.f32 %v3153_v15, %v915_v59  ;;  %460 = vadd.xlane.f32.xlu1 %v377_v60  ;;  %2465 = vrsqrt.f32 %v3157_v36  ;;  %v1055_v13 = vmul.f32 %v3178_v61, %v3125_v28  ;;  %v1253_v59 = vsel %vm3213_vm15, %v3099_v38, %v1249_v30 }
  0xac   : > { %458 = vadd.xlane.f32.xlu0 %v376_v21  ;;  %2467 = vrsqrt.f32 %v3161_v29  ;;  %v773_v60 = vsel %vm3186_vm12, %v3119_v16, %v769_v57  ;;  %v1093_v44 = vsel %vm3200_vm14, %v3107_v27, %v1089_v56  ;;  %v1083_v27 = vsel %vm3225_vm0, %v3061_v6, %v1079_v7 }
  0xad   : > { %486 = vadd.xlane.f32.xlu2 %v3115_v42  ;;  %v917_v21 = vmul.f32 0.5, %v916_v51  ;;  %v406_v51 = vmul.f32 %v3146_v8, %v3146_v8  ;;  %v927_v56 = vmul.f32 0.5, %v926_v0  ;;  %v1269_v31 = vmul.f32 %v2836_v11, %v773_v60 }
  0xae   : > { %v449_v42 = vpop.xlane.xlu1 %448  ;;  %v1301_v2 = vmul.f32 %v2834_v10, %v1093_v44  ;;  %v1243_v20 = vsel %vm3251_vm1, %v3050_v43, %v1239_v12  ;;  %v1317_v45 = vmul.f32 %v2832_v9, %v1253_v59  ;;  %v1056_v7 = vmul.f32 %v3178_v61, %v1055_v13 }
  0xaf   : > { %v447_v35 = vpop.xlane.xlu0 %446  ;;  %v3237_v1 = vadd.f32 1e-12, %v449_v42  ;;  %v918_v6 = vsub.f32 1.5, %v917_v21  ;;  %v1268_v63 = vmul.f32 %v2824_v5, %v763_v52  ;;  %v1300_v0 = vmul.f32 %v2822_v4, %v1083_v27 }
  0xb0   : > { %v479_v57 = vpop.xlane.xlu2 %478  ;;  %v3239_v46 = vadd.f32 1e-12, %v447_v35  ;;  %v3255_v30 = vpop.eup %2463  ;;  %v1316_v43 = vmul.f32 %v2820_v3, %v1243_v20  ;;  %v928_v9 = vsub.f32 1.5, %v927_v56  ;;  %vm921_vm2 = vweird.f32 %v3153_v15  ;;  %v2263_v20 = vld [vmem:[%s2815_s28] sm:$0xff]  }
  0xb1   : > { %2469 = vrsqrt.f32 %v3237_v1  ;;  %v3264_v23 = vpop.eup %2465  ;;  %v1065_v10 = vmul.f32 %v3255_v30, %v3150_v62  ;;  %v3273_v60 = vadd.f32 1e-12, %v479_v57  ;;  %v1325_v12 = vpack.c.bf16 %v1269_v31, %v1268_v63  ;;  %vm3301_vm5 = vmor %vm920_vm3, %vm921_vm2 }
  0xb2   : > { %v3269_v11 = vpop.eup %2467  ;;  %2471 = vrsqrt.f32 %v3239_v46  ;;  %v1341_v21 = vpack.c.bf16 %v1301_v2, %v1300_v0  ;;  %v1349_v5 = vpack.c.bf16 %v1317_v45, %v1316_v43  ;;  %v919_v4 = vmul.f32 %v3153_v15, %v918_v6  ;;  %v3318_v2 = vld [vmem:[%s2815_s28 + $0x40] sm:$0xff]  }
  0xb3   : > { %518 = vadd.xlane.f32.xlu1 %v406_v51  ;;  %v3280_v13 = vmul.f32 0.5, %v1056_v7  ;;  %v1215_v42 = vmul.f32 %v3264_v23, %v3157_v36  ;;  %v1225_v3 = vmul.f32 %v3269_v11, %v3161_v29  ;;  %1414 = vmatpush.bf16.xpose.msra.mxu0 %v1325_v12  ;;  %v1066_v16 = vmul.f32 %v3255_v30, %v1065_v10 }
  0xb4   : > { %488 = vadd.xlane.f32.xlu0 %v391_v22  ;;  %1512 = vmatpush.bf16.xpose.msra.mxu2 %v1341_v21  ;;  %2473 = vrsqrt.f32 %v3273_v60  ;;  %v929_v27 = vmul.f32 %v3148_v50, %v928_v9  ;;  %vm931_vm6 = vweird.f32 %v3148_v50  ;;  %v923_v31 = vsel %vm3301_vm5, %v3153_v15, %v919_v4 }
  0xb5   : > { %520 = vadd.xlane.f32.xlu2 %v407_v53  ;;  %1561 = vmatpush.bf16.xpose.msra.mxu3 %v1349_v5  ;;  %v1216_v14 = vmul.f32 %v3264_v23, %v1215_v42  ;;  %v1058_v6 = vsub.f32 1.5, %v3280_v13  ;;  %v1067_v45 = vmul.f32 0.5, %v1066_v16  ;;  %v1226_v7 = vmul.f32 %v3269_v11, %v1225_v3  ;;  %vm932_vm8 = vmor %vm930_vm4, %vm931_vm6 }
  0xb6   : > { %v507_v22 = vpop.xlane.xlu1 %506  ;;  %v933_v0 = vsel %vm932_vm8, %v3148_v50, %v929_v27  ;;  %v1284_v10 = vmul.f32 %v2848_v18, %v923_v31  ;;  %v3336_v12 = vunpack.c.l.bf16 %v3318_v2  ;;  %v3338_v37 = vunpack.c.h.bf16 %v2263_v20 }
  0xb7   : > { %v481_v35 = vpop.xlane.xlu0 %480  ;;  %v3286_v53 = vpop.eup %2469  ;;  %v3290_v59 = vadd.f32 1e-12, %v507_v22  ;;  %v1285_v9 = vmul.f32 %v2846_v17, %v933_v0  ;;  %v1217_v21 = vmul.f32 0.5, %v1216_v14  ;;  %vm1220_vm9 = vweird.f32 %v3157_v36 }
  0xb8   : > { %v509_v44 = vpop.xlane.xlu2 %508  ;;  %v3292_v51 = vadd.f32 1e-12, %v481_v35  ;;  %v745_v57 = vmul.f32 %v3286_v53, %v3237_v1  ;;  %v3307_v38 = vpop.eup %2471  ;;  %vm1070_vm10 = vweird.f32 %v3150_v62  ;;  %v3342_v5 = vunpack.c.l.bf16 %v2263_v20 }
  0xb9   : > { %v3309_v56 = vadd.f32 1e-12, %v509_v44  ;;  %2475 = vrsqrt.f32 %v3290_v59  ;;  %v735_v63 = vmul.f32 %v3307_v38, %v3239_v46  ;;  %v1227_v4 = vmul.f32 0.5, %v1226_v7 }
  0xba   : > { %2477 = vrsqrt.f32 %v3292_v51  ;;  %v746_v15 = vmul.f32 %v3286_v53, %v745_v57  ;;  %v3331_v43 = vpop.eup %2473  ;;  %v1333_v13 = vpack.c.bf16 %v1285_v9, %v1284_v10  ;;  %v374_v42 = vmul.f32 %v3336_v12, %v3336_v12 }
  0xbb   : > { %2479 = vrsqrt.f32 %v3309_v56  ;;  %v359_v17 = vmul.f32 %v3338_v37, %v3338_v37  ;;  %v895_v35 = vmul.f32 %v3331_v43, %v3273_v60  ;;  %v736_v44 = vmul.f32 %v3307_v38, %v735_v63 }
  0xbc   : > { %v3352_v16 = vmul.f32 0.5, %v746_v15  ;;  %v358_v57 = vmul.f32 %v3342_v5, %v3342_v5  ;;  %vm1061_vm11 = vweird.f32 %v3178_v61  ;;  %v1068_v27 = vsub.f32 1.5, %v1067_v45  ;;  %1463 = vmatpush.bf16.xpose.msra.mxu1 %v1333_v13 }
  0xbd   : > { %454 = vadd.xlane.f32.xlu2 %v374_v42  ;;  %v1059_v14 = vmul.f32 %v3178_v61, %v1058_v6  ;;  %v1218_v20 = vsub.f32 1.5, %v1217_v21  ;;  %vm1221_vm12 = vweird.f32 %v3264_v23  ;;  %vm1230_vm13 = vweird.f32 %v3161_v29  ;;  %424 = vadd.xlane.f32.xlu1 %v359_v17  ;;  %vm3377_vm0 = vmor %vm1060_vm7, %vm1061_vm11 }
  0xbe   : > { %v541_v50 = vpop.xlane.xlu1 %540  ;;  %422 = vadd.xlane.f32.xlu0 %v358_v57  ;;  %vm1071_vm14 = vweird.f32 %v3255_v30  ;;  %v1228_v45 = vsub.f32 1.5, %v1227_v4  ;;  %vm750_vm15 = vweird.f32 %v3237_v1  ;;  %vm1231_vm1 = vweird.f32 %v3269_v11  ;;  %vm1222_vm3 = vmor %vm1220_vm9, %vm1221_vm12 }
  0xbf   : > { %v539_v18 = vpop.xlane.xlu0 %538  ;;  %v3348_v22 = vpop.eup %2475  ;;  %v3365_v7 = vadd.f32 1e-12, %v541_v50  ;;  %v896_v0 = vmul.f32 %v3331_v43, %v895_v35  ;;  %v748_v10 = vsub.f32 1.5, %v3352_v16  ;;  %v737_v9 = vmul.f32 0.5, %v736_v44  ;;  %vm1072_vm2 = vmor %vm1070_vm10, %vm1071_vm14 }
  0xc0   : > { %v443_v3 = vpop.xlane.xlu2 %442  ;;  %v3357_v52 = vpop.eup %2477  ;;  %v3360_v31 = vadd.f32 1e-12, %v539_v18  ;;  %v1035_v21 = vmul.f32 %v3348_v22, %v3290_v59  ;;  %v1063_v28 = vsel %vm3377_vm0, %v3178_v61, %v1059_v14  ;;  %v1069_v50 = vmul.f32 %v3255_v30, %v1068_v27  ;;  %vm1232_vm4 = vmor %vm1230_vm13, %vm1231_vm1 }
  0xc1   : > { %v3367_v15 = vpop.eup %2479  ;;  %v905_v63 = vmul.f32 %v3357_v52, %v3292_v51  ;;  %v3396_v4 = vadd.f32 1e-12, %v443_v3  ;;  %v1219_v13 = vmul.f32 %v3264_v23, %v1218_v20  ;;  %v1229_v35 = vmul.f32 %v3269_v11, %v1228_v45 }
  0xc2   : > { %2481 = vrsqrt.f32 %v3360_v31  ;;  %v1045_v18 = vmul.f32 %v3367_v15, %v3309_v56  ;;  %v1073_v62 = vsel %vm1072_vm2, %v3255_v30, %v1069_v50  ;;  %v3407_v16 = vunpack.c.h.bf16 %v3318_v2 }
  0xc3   : > { %2483 = vrsqrt.f32 %v3365_v7  ;;  %v906_v61 = vmul.f32 %v3357_v52, %v905_v63  ;;  %v1298_v44 = vmul.f32 %v2850_v19, %v1063_v28  ;;  %v1299_v36 = vmul.f32 %v2861_v25, %v1073_v62 }
  0xc4   : > { %v1223_v57 = vsel %vm1222_vm3, %v3264_v23, %v1219_v13  ;;  %v1233_v30 = vsel %vm1232_vm4, %v3269_v11, %v1229_v35  ;;  %v375_v2 = vmul.f32 %v3407_v16, %v3407_v16  ;;  %v738_v45 = vsub.f32 1.5, %v737_v9 }
  0xc5   : > { %v1314_v14 = vmul.f32 %v2859_v24, %v1223_v57  ;;  %v1036_v29 = vmul.f32 %v3348_v22, %v1035_v21  ;;  %v1340_v63 = vpack.c.bf16 %v1299_v36, %v1298_v44  ;;  %v1315_v19 = vmul.f32 %v2863_v26, %v1233_v30 }
  0xc6   : > { %v475_v42 = vpop.xlane.xlu1 %474  ;;  %v897_v23 = vmul.f32 0.5, %v896_v0  ;;  %vm900_vm5 = vweird.f32 %v3273_v60  ;;  %vm751_vm6 = vweird.f32 %v3286_v53  ;;  %2485 = vrsqrt.f32 %v3396_v4  ;;  %456 = vadd.xlane.f32.xlu0 %v375_v2 }
  0xc7   : > { %v445_v17 = vpop.xlane.xlu0 %444  ;;  %v3416_v27 = vadd.f32 1e-12, %v475_v42  ;;  %vm741_vm7 = vweird.f32 %v3307_v38  ;;  %v907_v11 = vmul.f32 0.5, %v906_v61  ;;  %1513 = vmatpush.bf16.xpose.msra.mxu2 %v1340_v63  ;;  %v1348_v6 = vpack.c.bf16 %v1315_v19, %v1314_v14  ;;  %vm3442_vm9 = vmor %vm750_vm15, %vm751_vm6 }
  0xc8   : > { %v477_v3 = vpop.xlane.xlu2 %476  ;;  %v3422_v20 = vadd.f32 1e-12, %v445_v17  ;;  %v3426_v25 = vpop.eup %2481  ;;  %vm740_vm8 = vweird.f32 %v3239_v46  ;;  %v1046_v26 = vmul.f32 %v3367_v15, %v1045_v18  ;;  %v1037_v21 = vmul.f32 0.5, %v1036_v29 }
  0xc9   : > { %v3431_v24 = vpop.eup %2483  ;;  %2487 = vrsqrt.f32 %v3416_v27  ;;  %v3438_v0 = vadd.f32 1e-12, %v477_v3  ;;  %v1195_v28 = vmul.f32 %v3426_v25, %v3360_v31  ;;  %1562 = vmatpush.bf16.xpose.msra.mxu3 %v1348_v6  ;;  %v739_v50 = vmul.f32 %v3307_v38, %v738_v45  ;;  %vm742_vm11 = vmor %vm740_vm8, %vm741_vm7 }
  0xca   : > { %2489 = vrsqrt.f32 %v3422_v20  ;;  %v749_v46 = vmul.f32 %v3286_v53, %v748_v10  ;;  %v898_v42 = vsub.f32 1.5, %v897_v23  ;;  %vm901_vm10 = vweird.f32 %v3331_v43 }
  0xcb   : > { %v1205_v1 = vmul.f32 %v3431_v24, %v3365_v7  ;;  %2491 = vrsqrt.f32 %v3438_v0  ;;  %vm1040_vm12 = vweird.f32 %v3290_v59  ;;  %v908_v61 = vsub.f32 1.5, %v907_v11  ;;  %vm3490_vm0 = vmor %vm900_vm5, %vm901_vm10 }
  0xcc   : > { %v743_v62 = vsel %vm742_vm11, %v3307_v38, %v739_v50  ;;  %v753_v10 = vsel %vm3442_vm9, %v3286_v53, %v749_v46  ;;  %v3461_v35 = vpop.eup %2485  ;;  %v1047_v3 = vmul.f32 0.5, %v1046_v26  ;;  %vm1050_vm13 = vweird.f32 %v3309_v56 }
  0xcd   : > { %v1266_v44 = vmul.f32 %v2875_v33, %v743_v62  ;;  %v1267_v36 = vmul.f32 %v2873_v32, %v753_v10  ;;  %v1038_v14 = vsub.f32 1.5, %v1037_v21  ;;  %vm911_vm14 = vweird.f32 %v3357_v52 }
  0xce   : > { %v505_v18 = vpop.xlane.xlu1 %504  ;;  %v1196_v38 = vmul.f32 %v3426_v25, %v1195_v28  ;;  %v1206_v53 = vmul.f32 %v3431_v24, %v1205_v1  ;;  %v899_v32 = vmul.f32 %v3331_v43, %v898_v42  ;;  %vm910_vm15 = vweird.f32 %v3292_v51 }
  0xcf   : > { %v503_v13 = vpop.xlane.xlu0 %502  ;;  %v3465_v57 = vadd.f32 1e-12, %v505_v18  ;;  %v3467_v30 = vpop.eup %2487  ;;  %v1324_v45 = vpack.c.bf16 %v1267_v36, %v1266_v44  ;;  %v715_v33 = vmul.f32 %v3461_v35, %v3396_v4  ;;  %v909_v19 = vmul.f32 %v3357_v52, %v908_v61  ;;  %vm3499_vm3 = vmor %vm910_vm15, %vm911_vm14 }
  0xd0   : > { %v535_v17 = vpop.xlane.xlu2 %534  ;;  %v3472_v2 = vpop.eup %2489  ;;  %v3475_v29 = vadd.f32 1e-12, %v503_v13  ;;  %v1048_v6 = vsub.f32 1.5, %v1047_v3  ;;  %vm1051_vm1 = vweird.f32 %v3367_v15  ;;  %vm1041_vm2 = vweird.f32 %v3348_v22 }
  0xd1   : > { %v725_v63 = vmul.f32 %v3472_v2, %v3422_v20  ;;  %v3484_v23 = vpop.eup %2491  ;;  %1415 = vmatpush.bf16.xpose.msra.mxu0 %v1324_v45  ;;  %2493 = vrsqrt.f32 %v3465_v57  ;;  %vm1210_vm4 = vweird.f32 %v3365_v7  ;;  %v1197_v60 = vmul.f32 0.5, %v1196_v38  ;;  %vm3519_vm6 = vmor %vm1040_vm12, %vm1041_vm2 }
  0xd2   : > { %v875_v26 = vmul.f32 %v3467_v30, %v3416_v27  ;;  %v903_v9 = vsel %vm3490_vm0, %v3331_v43, %v899_v32  ;;  %v1207_v50 = vmul.f32 0.5, %v1206_v53  ;;  %vm1200_vm5 = vweird.f32 %v3360_v31  ;;  %vm3539_vm7 = vmor %vm1050_vm13, %vm1051_vm1 }
  0xd3   : > { %2495 = vrsqrt.f32 %v3475_v29  ;;  %v913_v46 = vsel %vm3499_vm3, %v3357_v52, %v909_v19  ;;  %v1039_v18 = vmul.f32 %v3348_v22, %v1038_v14  ;;  %v716_v42 = vmul.f32 %v3461_v35, %v715_v33 }
  0xd4   : > { %v726_v1 = vmul.f32 %v3472_v2, %v725_v63  ;;  %v885_v61 = vmul.f32 %v3484_v23, %v3438_v0  ;;  %v3527_v62 = vadd.f32 1e-12, %v535_v17  ;;  %v1282_v52 = vmul.f32 %v2877_v34, %v903_v9 }
  0xd5   : > { %v1283_v10 = vmul.f32 %v2888_v40, %v913_v46  ;;  %v1043_v59 = vsel %vm3519_vm6, %v3348_v22, %v1039_v18  ;;  %v1049_v3 = vmul.f32 %v3367_v15, %v1048_v6  ;;  %vm1211_vm8 = vweird.f32 %v3431_v24 }
  0xd6   : > { %v439_v28 = vpop.xlane.xlu1 %438  ;;  %v1198_v17 = vsub.f32 1.5, %v1197_v60  ;;  %vm720_vm9 = vweird.f32 %v3396_v4  ;;  %v876_v34 = vmul.f32 %v3467_v30, %v875_v26  ;;  %v1296_v56 = vmul.f32 %v2886_v39, %v1043_v59  ;;  %vm1212_vm14 = vmor %vm1210_vm4, %vm1211_vm8 }
  0xd7   : > { %v537_v21 = vpop.xlane.xlu0 %536  ;;  %v3546_v40 = vpop.eup %2493  ;;  %v1332_v22 = vpack.c.bf16 %v1283_v10, %v1282_v52  ;;  %v1053_v36 = vsel %vm3539_vm7, %v3367_v15, %v1049_v3  ;;  %v1208_v38 = vsub.f32 1.5, %v1207_v50  ;;  %v886_v53 = vmul.f32 %v3484_v23, %v885_v61 }
  0xd8   : > { %v441_v13 = vpop.xlane.xlu2 %440  ;;  %2497 = vrsqrt.f32 %v3527_v62  ;;  %v3556_v45 = vadd.f32 1e-12, %v537_v21  ;;  %vm1201_vm10 = vweird.f32 %v3426_v25  ;;  %v717_v33 = vmul.f32 0.5, %v716_v42 }
  0xd9   : > { %v3552_v14 = vadd.f32 1e-12, %v441_v13  ;;  %v3558_v32 = vpop.eup %2495  ;;  %v727_v63 = vmul.f32 0.5, %v726_v1  ;;  %1464 = vmatpush.bf16.xpose.msra.mxu1 %v1332_v22  ;;  %v1297_v15 = vmul.f32 %v2890_v41, %v1053_v36  ;;  %vm721_vm11 = vweird.f32 %v3461_v35  ;;  %vm1202_vm13 = vmor %vm1200_vm5, %vm1201_vm10 }
  0xda   : > { %v877_v39 = vmul.f32 0.5, %v876_v34  ;;  %vm880_vm12 = vweird.f32 %v3416_v27  ;;  %v1025_v19 = vmul.f32 %v3546_v40, %v3465_v57  ;;  %v3567_v60 = vadd.f32 1e-12, %v439_v28  ;;  %vm3603_vm3 = vmor %vm720_vm9, %vm721_vm11 }
  0xdb   : > { %v1339_v51 = vpack.c.bf16 %v1297_v15, %v1296_v56  ;;  %2499 = vrsqrt.f32 %v3552_v14  ;;  %v1199_v26 = vmul.f32 %v3426_v25, %v1198_v17  ;;  %v887_v41 = vmul.f32 0.5, %v886_v53 }
  0xdc   : > { %v1015_v21 = vmul.f32 %v3558_v32, %v3475_v29  ;;  %2501 = vrsqrt.f32 %v3556_v45  ;;  %v1209_v50 = vmul.f32 %v3431_v24, %v1208_v38  ;;  %v718_v28 = vsub.f32 1.5, %v717_v33 }
  0xdd   : > { %v728_v46 = vsub.f32 1.5, %v727_v63  ;;  %1514 = vmatpush.bf16.xpose.msra.mxu2 %v1339_v51  ;;  %2503 = vrsqrt.f32 %v3567_v60  ;;  %v1203_v31 = vsel %vm1202_vm13, %v3426_v25, %v1199_v26  ;;  %v878_v13 = vsub.f32 1.5, %v877_v39 }
  0xde   : > { %v473_v6 = vpop.xlane.xlu1 %472  ;;  %v3584_v18 = vpop.eup %2497  ;;  %vm730_vm15 = vweird.f32 %v3422_v20  ;;  %v1213_v43 = vsel %vm1212_vm14, %v3431_v24, %v1209_v50  ;;  %v1312_v42 = vmul.f32 %v2902_v48, %v1203_v31  ;;  %vm731_vm0 = vweird.f32 %v3472_v2 }
  0xdf   : > { %v471_v11 = vpop.xlane.xlu0 %470  ;;  %vm890_vm1 = vweird.f32 %v3438_v0  ;;  %v1313_v7 = vmul.f32 %v2900_v47, %v1213_v43  ;;  %vm881_vm2 = vweird.f32 %v3467_v30  ;;  %v888_v25 = vsub.f32 1.5, %v887_v41  ;;  %vm3617_vm4 = vmor %vm730_vm15, %vm731_vm0 }
  0xe0   : > { %v499_v9 = vpop.xlane.xlu2 %498  ;;  %v3592_v1 = vadd.f32 1e-12, %v471_v11  ;;  %v1026_v61 = vmul.f32 %v3546_v40, %v1025_v19  ;;  %v1016_v52 = vmul.f32 %v3558_v32, %v1015_v21  ;;  %v1175_v47 = vmul.f32 %v3584_v18, %v3527_v62  ;;  %vm3645_vm6 = vmor %vm880_vm12, %vm881_vm2 }
  0xe1   : > { %v3597_v10 = vpop.eup %2499  ;;  %v1347_v24 = vpack.c.bf16 %v1313_v7, %v1312_v42  ;;  %v719_v59 = vmul.f32 %v3461_v35, %v718_v28  ;;  %v729_v3 = vmul.f32 %v3472_v2, %v728_v46  ;;  %vm891_vm5 = vweird.f32 %v3484_v23 }
  0xe2   : > { %v3611_v44 = vpop.eup %2501  ;;  %v705_v17 = vmul.f32 %v3597_v10, %v3552_v14  ;;  %v3624_v34 = vadd.f32 1e-12, %v473_v6  ;;  %v879_v22 = vmul.f32 %v3467_v30, %v878_v13  ;;  %2505 = vrsqrt.f32 %v3592_v1  ;;  %vm892_vm7 = vmor %vm890_vm1, %vm891_vm5  ;;  %v4960_v13 = vld [vmem:[#allocation3_spill] sm:$0xff] }
  0xe3   : > { %v3627_v38 = vpop.eup %2503  ;;  %1563 = vmatpush.bf16.xpose.msra.mxu3 %v1347_v24  ;;  %v3630_v20 = vadd.f32 1e-12, %v499_v9  ;;  %v723_v53 = vsel %vm3603_vm3, %v3461_v35, %v719_v59  ;;  %v733_v33 = vsel %vm3617_vm4, %v3472_v2, %v729_v3  ;;  %v1027_v15 = vmul.f32 0.5, %v1026_v61 }
  0xe4   : > { %v1017_v39 = vmul.f32 0.5, %v1016_v52  ;;  %v706_v19 = vmul.f32 %v3597_v10, %v705_v17  ;;  %v695_v11 = vmul.f32 %v3627_v38, %v3567_v60  ;;  %v1176_v35 = vmul.f32 %v3584_v18, %v1175_v47 }
  0xe5   : > { %v1264_v2 = vmul.f32 %v2904_v49, %v723_v53  ;;  %v1265_v51 = vmul.f32 %v2915_v55, %v733_v33  ;;  %v889_v26 = vmul.f32 %v3484_v23, %v888_v25  ;;  %v1185_v9 = vmul.f32 %v3611_v44, %v3556_v45 }
  0xe6   : > { %v531_v56 = vpop.xlane.xlu1 %530  ;;  %v696_v41 = vmul.f32 %v3627_v38, %v695_v11  ;;  %2507 = vrsqrt.f32 %v3624_v34  ;;  %v883_v27 = vsel %vm3645_vm6, %v3467_v30, %v879_v22  ;;  %vm1030_vm8 = vweird.f32 %v3465_v57 }
  0xe7   : > { %v501_v36 = vpop.xlane.xlu0 %500  ;;  %2509 = vrsqrt.f32 %v3630_v20  ;;  %v1323_v49 = vpack.c.bf16 %v1265_v51, %v1264_v2  ;;  %v1028_v55 = vsub.f32 1.5, %v1027_v15  ;;  %v1018_v21 = vsub.f32 1.5, %v1017_v39  ;;  %v4963_v15 = vld [vmem:[#allocation5_spill] sm:$0xff] }
  0xe8   : > { %v533_v63 = vpop.xlane.xlu2 %532  ;;  %v707_v50 = vmul.f32 0.5, %v706_v19  ;;  %v893_v28 = vsel %vm892_vm7, %v3484_v23, %v889_v26  ;;  %v3667_v46 = vpop.eup %2505  ;;  %v697_v31 = vmul.f32 0.5, %v696_v41  ;;  %v1280_v30 = vmul.f32 %v2913_v54, %v883_v27  ;;  %v4964_v19 = vld [vmem:[#allocation4_spill] sm:$0xff] }
  0xe9   : > { %1416 = vmatpush.bf16.xpose.msra.mxu0 %v1323_v49  ;;  %v1281_v43 = vmul.f32 %v4960_v13, %v893_v28  ;;  %v3671_v0 = vadd.f32 1e-12, %v501_v36  ;;  %vm1031_vm9 = vweird.f32 %v3546_v40  ;;  %vm1020_vm10 = vweird.f32 %v3475_v29 }
  0xea   : > { %v1177_v42 = vmul.f32 0.5, %v1176_v35  ;;  %v1186_v7 = vmul.f32 %v3611_v44, %v1185_v9  ;;  %vm1021_vm11 = vweird.f32 %v3558_v32  ;;  %vm1180_vm12 = vweird.f32 %v3527_v62  ;;  %vm3693_vm15 = vmor %vm1030_vm8, %vm1031_vm9 }
  0xeb   : > { %vm710_vm13 = vweird.f32 %v3552_v14  ;;  %v1331_v54 = vpack.c.bf16 %v1281_v43, %v1280_v30  ;;  %2511 = vrsqrt.f32 %v3671_v0  ;;  %vm1181_vm14 = vweird.f32 %v3584_v18  ;;  %vm1022_vm0 = vmor %vm1020_vm10, %vm1021_vm11  ;;  %v4965_v30 = vld [vmem:[#allocation8_spill] sm:$0xff] }
  0xec   : > { %v3680_v52 = vpop.eup %2507  ;;  %v708_v48 = vsub.f32 1.5, %v707_v50  ;;  %v855_v47 = vmul.f32 %v3667_v46, %v3592_v1  ;;  %v3685_v24 = vadd.f32 1e-12, %v531_v56  ;;  %v698_v4 = vsub.f32 1.5, %v697_v31  ;;  %vm3755_vm7 = vmor %vm1180_vm12, %vm1181_vm14 }
  0xed   : > { %v3687_v59 = vpop.eup %2509  ;;  %1465 = vmatpush.bf16.xpose.msra.mxu1 %v1331_v54  ;;  %v3697_v17 = vadd.f32 1e-12, %v533_v63  ;;  %v1019_v22 = vmul.f32 %v3558_v32, %v1018_v21  ;;  %v1029_v36 = vmul.f32 %v3546_v40, %v1028_v55  ;;  %v1178_v56 = vsub.f32 1.5, %v1177_v42 }
  0xee   : > { %v437_v25 = vpop.xlane.xlu1 %436  ;;  %v1187_v53 = vmul.f32 0.5, %v1186_v7  ;;  %vm700_vm1 = vweird.f32 %v3567_v60  ;;  %vm701_vm2 = vweird.f32 %v3627_v38  ;;  %v865_v57 = vmul.f32 %v3680_v52, %v3624_v34  ;;  %v4966_v7 = vld [vmem:[#allocation9_spill] sm:$0xff] }
  0xef   : > { %v435_v61 = vpop.xlane.xlu0 %434  ;;  %2513 = vrsqrt.f32 %v3685_v24  ;;  %v1023_v33 = vsel %vm1022_vm0, %v3558_v32, %v1019_v22  ;;  %v1033_v63 = vsel %vm3693_vm15, %v3546_v40, %v1029_v36  ;;  %vm711_vm3 = vweird.f32 %v3597_v10  ;;  %vm702_vm5 = vmor %vm700_vm1, %vm701_vm2  ;;  %v4969_v22 = vld [vmem:[#allocation7_spill] sm:$0xff] }
  0xf0   : > { %v467_v23 = vpop.xlane.xlu2 %466  ;;  %v995_v29 = vmul.f32 %v3687_v59, %v3630_v20  ;;  %v1294_v39 = vmul.f32 %v4963_v15, %v1023_v33  ;;  %v1295_v11 = vmul.f32 %v4964_v19, %v1033_v63  ;;  %v856_v35 = vmul.f32 %v3667_v46, %v855_v47  ;;  %vm712_vm6 = vmor %vm710_vm13, %vm711_vm3 }
  0xf1   : > { %v3719_v6 = vpop.eup %2511  ;;  %2515 = vrsqrt.f32 %v3697_v17  ;;  %v699_v32 = vmul.f32 %v3627_v38, %v698_v4  ;;  %v709_v2 = vmul.f32 %v3597_v10, %v708_v48  ;;  %v1188_v40 = vsub.f32 1.5, %v1187_v53 }
  0xf2   : > { %vm1191_vm4 = vweird.f32 %v3611_v44  ;;  %v1338_v51 = vpack.c.bf16 %v1295_v11, %v1294_v39  ;;  %v3730_v26 = vadd.f32 1e-12, %v435_v61  ;;  %v866_v27 = vmul.f32 %v3680_v52, %v865_v57  ;;  %v4970_v57 = vld [vmem:[#allocation6_spill] sm:$0xff] }
  0xf3   : > { %v3737_v49 = vadd.f32 1e-12, %v437_v25  ;;  %v703_v55 = vsel %vm702_vm5, %v3627_v38, %v699_v32  ;;  %v1179_v21 = vmul.f32 %v3584_v18, %v1178_v56  ;;  %v1005_v50 = vmul.f32 %v3719_v6, %v3671_v0 }
  0xf4   : > { %1515 = vmatpush.bf16.xpose.msra.mxu2 %v1338_v51  ;;  %v3743_v28 = vadd.f32 1e-12, %v467_v23  ;;  %v713_v31 = vsel %vm712_vm6, %v3597_v10, %v709_v2  ;;  %v1262_v14 = vmul.f32 %v4965_v30, %v703_v55  ;;  %v857_v43 = vmul.f32 0.5, %v856_v35 }
  0xf5   : > { %v3747_v13 = vpop.eup %2513  ;;  %v996_v42 = vmul.f32 %v3687_v59, %v995_v29  ;;  %v1263_v38 = vmul.f32 %v4966_v7, %v713_v31  ;;  %vm1190_vm8 = vweird.f32 %v3556_v45  ;;  %2517 = vrsqrt.f32 %v3730_v26 }
  0xf6   : > { %v495_v9 = vpop.xlane.xlu1 %494  ;;  %v1155_v10 = vmul.f32 %v3747_v13, %v3685_v24  ;;  %v1189_v61 = vmul.f32 %v3611_v44, %v1188_v40  ;;  %vm1192_vm9 = vmor %vm1190_vm8, %vm1191_vm4  ;;  %v867_v23 = vmul.f32 0.5, %v866_v27  ;;  %2519 = vrsqrt.f32 %v3737_v49 }
  0xf7   : > { %v469_v41 = vpop.xlane.xlu0 %468  ;;  %v3764_v54 = vpop.eup %2515  ;;  %v1322_v62 = vpack.c.bf16 %v1263_v38, %v1262_v14  ;;  %v1183_v45 = vsel %vm3755_vm7, %v3584_v18, %v1179_v21  ;;  %v1006_v48 = vmul.f32 %v3719_v6, %v1005_v50  ;;  %2521 = vrsqrt.f32 %v3743_v28  ;;  %v4971_v14 = vld [vmem:[#allocation10_spill] sm:$0xff]  ;;  %v4972_v38 = vld [vmem:[#allocation11_spill] sm:$0xff] }
  0xf8   : > { %v497_v60 = vpop.xlane.xlu2 %496  ;;  %v1193_v47 = vsel %vm1192_vm9, %v3611_v44, %v1189_v61  ;;  %v858_v3 = vsub.f32 1.5, %v857_v43  ;;  %vm860_vm10 = vweird.f32 %v3592_v1  ;;  %v997_v4 = vmul.f32 0.5, %v996_v42 }
  0xf9   : > { %1417 = vmatpush.bf16.xpose.msra.mxu0 %v1322_v62  ;;  %v1311_v36 = vmul.f32 %v4969_v22, %v1193_v47  ;;  %v1165_v56 = vmul.f32 %v3764_v54, %v3697_v17  ;;  %v1156_v53 = vmul.f32 %v3747_v13, %v1155_v10  ;;  %v1310_v18 = vmul.f32 %v4970_v57, %v1183_v45 }
  0xfa   : > { %v3781_v33 = vadd.f32 1e-12, %v495_v9  ;;  %vm1000_vm11 = vweird.f32 %v3630_v20  ;;  %v868_v44 = vsub.f32 1.5, %v867_v23  ;;  %vm870_vm12 = vweird.f32 %v3624_v34 }
  0xfb   : > { %v3785_v15 = vadd.f32 1e-12, %v497_v60  ;;  %v3787_v19 = vpop.eup %2517  ;;  %vm861_vm13 = vweird.f32 %v3667_v46  ;;  %vm1001_vm14 = vweird.f32 %v3687_v59  ;;  %v1007_v11 = vmul.f32 0.5, %v1006_v48  ;;  %v4982_v48 = vld [vmem:[#allocation15_spill] sm:$0xff] }
  0xfc   : > { %v1346_v35 = vpack.c.bf16 %v1311_v36, %v1310_v18  ;;  %v3791_v32 = vpop.eup %2519  ;;  %v998_v2 = vsub.f32 1.5, %v997_v4  ;;  %vm871_vm15 = vweird.f32 %v3680_v52  ;;  %vm1010_vm0 = vweird.f32 %v3671_v0  ;;  %vm862_vm1 = vmor %vm860_vm10, %vm861_vm13 }
  0xfd   : > { %2523 = vrsqrt.f32 %v3781_v33  ;;  %v3796_v40 = vpop.eup %2521  ;;  %v1166_v51 = vmul.f32 %v3764_v54, %v1165_v56  ;;  %v1157_v9 = vmul.f32 0.5, %v1156_v53  ;;  %v3799_v27 = vadd.f32 1e-12, %v469_v41  ;;  %vm872_vm3 = vmor %vm870_vm12, %vm871_vm15 }
  0xfe   : > { %v529_v63 = vpop.xlane.xlu1 %528  ;;  %1564 = vmatpush.bf16.xpose.msra.mxu3 %v1346_v35  ;;  %v859_v55 = vmul.f32 %v3667_v46, %v858_v3  ;;  %vm1160_vm2 = vweird.f32 %v3685_v24  ;;  %v675_v21 = vmul.f32 %v3787_v19, %v3730_v26  ;;  %2525 = vrsqrt.f32 %v3785_v15  ;;  %vm3839_vm7 = vmor %vm1000_vm11, %vm1001_vm14 }
  0xff   : > { %v527_v29 = vpop.xlane.xlu0 %526  ;;  %v869_v60 = vmul.f32 %v3680_v52, %v868_v44  ;;  %v1008_v41 = vsub.f32 1.5, %v1007_v11  ;;  %vm1170_vm4 = vweird.f32 %v3697_v17  ;;  %v685_v50 = vmul.f32 %v3791_v32, %v3737_v49 }
 0x100   : > { %v431_v39 = vpop.xlane.xlu2 %430  ;;  %2527 = vrsqrt.f32 %v3799_v27  ;;  %v863_v1 = vsel %vm862_vm1, %v3667_v46, %v859_v55  ;;  %v835_v31 = vmul.f32 %v3796_v40, %v3743_v28  ;;  %v3822_v42 = vadd.f32 1e-12, %v527_v29 }
 0x101   : > { %v873_v30 = vsel %vm872_vm3, %v3680_v52, %v869_v60  ;;  %v1278_v43 = vmul.f32 %v4971_v14, %v863_v1  ;;  %vm1011_vm5 = vweird.f32 %v3719_v6  ;;  %v1167_v34 = vmul.f32 0.5, %v1166_v51 }
 0x102   : > { %v1158_v7 = vsub.f32 1.5, %v1157_v9  ;;  %v1279_v25 = vmul.f32 %v4972_v38, %v873_v30  ;;  %vm1171_vm6 = vweird.f32 %v3764_v54  ;;  %v676_v46 = vmul.f32 %v3787_v19, %v675_v21  ;;  %vm1012_vm9 = vmor %vm1010_vm0, %vm1011_vm5  ;;  %v4981_v30 = vld [vmem:[#allocation14_spill] sm:$0xff] }
 0x103   : > { %v3828_v23 = vpop.eup %2523  ;;  %v3832_v52 = vadd.f32 1e-12, %v529_v63  ;;  %v999_v62 = vmul.f32 %v3687_v59, %v998_v2  ;;  %vm1161_vm8 = vweird.f32 %v3747_v13  ;;  %v686_v47 = vmul.f32 %v3791_v32, %v685_v50  ;;  %v4978_v2 = vld [vmem:[#allocation12_spill] sm:$0xff]  ;;  %vm3897_vm13 = vmor %vm1170_vm4, %vm1171_vm6 }
 0x104   : > { %v1330_v3 = vpack.c.bf16 %v1279_v25, %v1278_v43  ;;  %v1009_v4 = vmul.f32 %v3719_v6, %v1008_v41  ;;  %v3846_v22 = vpop.eup %2525  ;;  %v836_v20 = vmul.f32 %v3796_v40, %v835_v31  ;;  %v975_v36 = vmul.f32 %v3828_v23, %v3781_v33  ;;  %vm3869_vm10 = vmor %vm1160_vm2, %vm1161_vm8 }
 0x105   : > { %2529 = vrsqrt.f32 %v3822_v42  ;;  %v1003_v56 = vsel %vm3839_vm7, %v3687_v59, %v999_v62  ;;  %v1168_v57 = vsub.f32 1.5, %v1167_v34  ;;  %v3861_v18 = vadd.f32 1e-12, %v431_v39  ;;  %v4977_v39 = vld [vmem:[#allocation13_spill] sm:$0xff] }
 0x106   : > { %v463_v10 = vpop.xlane.xlu1 %462  ;;  %v3859_v53 = vpop.eup %2527  ;;  %1466 = vmatpush.bf16.xpose.msra.mxu1 %v1330_v3  ;;  %v1013_v0 = vsel %vm1012_vm9, %v3719_v6, %v1009_v4  ;;  %v1159_v63 = vmul.f32 %v3747_v13, %v1158_v7  ;;  %v677_v44 = vmul.f32 0.5, %v676_v46  ;;  %2531 = vrsqrt.f32 %v3832_v52 }
 0x107   : > { %v3826_v61 = vpop.xlane.xlu0 %432  ;;  %v845_v59 = vmul.f32 %v3859_v53, %v3799_v27  ;;  %v1293_v11 = vmul.f32 %v4977_v39, %v1013_v0  ;;  %v687_v35 = vmul.f32 0.5, %v686_v47  ;;  %v985_v6 = vmul.f32 %v3846_v22, %v3785_v15  ;;  %v4983_v39 = vld [vmem:[#allocation17_spill] sm:$0xff] }
 0x108   : > { %v465_v45 = vpop.xlane.xlu2 %464  ;;  %v1292_v51 = vmul.f32 %v4978_v2, %v1003_v56  ;;  %v1163_v24 = vsel %vm3869_vm10, %v3747_v13, %v1159_v63  ;;  %v3883_v9 = vmul.f32 0.5, %v836_v20  ;;  %vm690_vm11 = vweird.f32 %v3737_v49  ;;  %v4984_v2 = vld [vmem:[#allocation16_spill] sm:$0xff]  ;;  %v4996_v13 = vld [vmem:[#allocation21_spill] sm:$0xff] }
 0x109   : > { %vm680_vm12 = vweird.f32 %v3730_v26  ;;  %v976_v55 = vmul.f32 %v3828_v23, %v975_v36  ;;  %v846_v21 = vmul.f32 %v3859_v53, %v845_v59  ;;  %2533 = vrsqrt.f32 %v3861_v18 }
 0x10a   : > { %v1337_v60 = vpack.c.bf16 %v1293_v11, %v1292_v51  ;;  %v1169_v41 = vmul.f32 %v3764_v54, %v1168_v57  ;;  %vm840_vm14 = vweird.f32 %v3743_v28  ;;  %vm841_vm15 = vweird.f32 %v3796_v40 }
 0x10b   : > { %v3891_v1 = vpop.eup %2529  ;;  %v678_v31 = vsub.f32 1.5, %v677_v44  ;;  %v1308_v14 = vmul.f32 %v4981_v30, %v1163_v24  ;;  %v3904_v43 = vadd.f32 1e-12, %v463_v10  ;;  %v688_v38 = vsub.f32 1.5, %v687_v35  ;;  %vm3971_vm9 = vmor %vm840_vm14, %vm841_vm15 }
 0x10c   : > { %vm691_vm0 = vweird.f32 %v3791_v32  ;;  %v986_v17 = vmul.f32 %v3846_v22, %v985_v6  ;;  %1516 = vmatpush.bf16.xpose.msra.mxu2 %v1337_v60  ;;  %v1173_v25 = vsel %vm3897_vm13, %v3764_v54, %v1169_v41  ;;  %v3911_v46 = vpop.eup %2531  ;;  %v838_v62 = vsub.f32 1.5, %v3883_v9 }
 0x10d   : > { %vm681_vm1 = vweird.f32 %v3787_v19  ;;  %v977_v10 = vmul.f32 0.5, %v976_v55  ;;  %v1309_v47 = vmul.f32 %v4982_v48, %v1173_v25  ;;  %vm980_vm2 = vweird.f32 %v3781_v33  ;;  %vm692_vm4 = vmor %vm690_vm11, %vm691_vm0 }
 0x10e   : > { %v493_v50 = vpop.xlane.xlu1 %492  ;;  %v847_v3 = vmul.f32 0.5, %v846_v21  ;;  %v1135_v4 = vmul.f32 %v3891_v1, %v3822_v42  ;;  %v3920_v20 = vadd.f32 1e-12, %v3826_v61  ;;  %2535 = vrsqrt.f32 %v3904_v43  ;;  %vm682_vm3 = vmor %vm680_vm12, %vm681_vm1 }
 0x10f   : > { %v491_v34 = vpop.xlane.xlu0 %490  ;;  %v1345_v36 = vpack.c.bf16 %v1309_v47, %v1308_v14  ;;  %v3923_v54 = vadd.f32 1e-12, %v465_v45  ;;  %v679_v56 = vmul.f32 %v3787_v19, %v678_v31  ;;  %v3926_v57 = vpop.eup %2533  ;;  %v987_v0 = vmul.f32 0.5, %v986_v17 }
 0x110   : > { %v523_v7 = vpop.xlane.xlu2 %522  ;;  %v1145_v63 = vmul.f32 %v3911_v46, %v3832_v52  ;;  %2537 = vrsqrt.f32 %v3920_v20  ;;  %v689_v61 = vmul.f32 %v3791_v32, %v688_v38  ;;  %vm990_vm5 = vweird.f32 %v3785_v15 }
 0x111   : > { %v978_v45 = vsub.f32 1.5, %v977_v10  ;;  %1565 = vmatpush.bf16.xpose.msra.mxu3 %v1345_v36  ;;  %2539 = vrsqrt.f32 %v3923_v54  ;;  %v683_v26 = vsel %vm682_vm3, %v3787_v19, %v679_v56  ;;  %v3941_v29 = vadd.f32 1e-12, %v493_v50 }
 0x112   : > { %v848_v44 = vsub.f32 1.5, %v847_v3  ;;  %v693_v59 = vsel %vm692_vm4, %v3791_v32, %v689_v61  ;;  %v1260_v11 = vmul.f32 %v4983_v39, %v683_v26  ;;  %v3945_v35 = vadd.f32 1e-12, %v491_v34  ;;  %v4991_v3 = vld [vmem:[#allocation18_spill] sm:$0xff] }
 0x113   : > { %vm850_vm6 = vweird.f32 %v3799_v27  ;;  %v1136_v49 = vmul.f32 %v3891_v1, %v1135_v4  ;;  %v655_v6 = vmul.f32 %v3926_v57, %v3861_v18  ;;  %v1261_v51 = vmul.f32 %v4984_v2, %v693_v59  ;;  %v4995_v2 = vld [vmem:[#allocation19_spill] sm:$0xff] }
 0x114   : > { %v988_v9 = vsub.f32 1.5, %v987_v0  ;;  %vm851_vm7 = vweird.f32 %v3859_v53  ;;  %2541 = vrsqrt.f32 %v3941_v29  ;;  %v3958_v32 = vadd.f32 1e-12, %v523_v7  ;;  %v3960_v55 = vpop.eup %2535 }
 0x115   : > { %vm991_vm8 = vweird.f32 %v3846_v22  ;;  %v1321_v21 = vpack.c.bf16 %v1261_v51, %v1260_v11  ;;  %2543 = vrsqrt.f32 %v3945_v35  ;;  %v839_v60 = vmul.f32 %v3796_v40, %v838_v62  ;;  %vm3985_vm11 = vmor %vm850_vm6, %vm851_vm7 }
 0x116   : > { %v3954_v19 = vpop.xlane.xlu1 %426  ;;  %v3965_v50 = vpop.eup %2537  ;;  %vm981_vm10 = vweird.f32 %v3828_v23  ;;  %v1146_v31 = vmul.f32 %v3911_v46, %v1145_v63  ;;  %v849_v30 = vmul.f32 %v3859_v53, %v848_v44  ;;  %v979_v14 = vmul.f32 %v3828_v23, %v978_v45  ;;  %v5009_v44 = vld [vmem:[#allocation25_spill] sm:$0xff] }
 0x117   : > { %v525_v41 = vpop.xlane.xlu0 %524  ;;  %v3979_v34 = vpop.eup %2539  ;;  %v1137_v7 = vmul.f32 0.5, %v1136_v49  ;;  %v656_v38 = vmul.f32 %v3926_v57, %v655_v6  ;;  %v665_v17 = vmul.f32 %v3965_v50, %v3920_v20  ;;  %1418 = vmatpush.bf16.xpose.msra.mxu0 %v1321_v21  ;;  %v843_v25 = vsel %vm3971_vm9, %v3796_v40, %v839_v60  ;;  %vm4007_vm13 = vmor %vm980_vm2, %vm981_vm10 }
 0x118   : > { %v3952_v24 = vpop.xlane.xlu2 %428  ;;  %vm1150_vm12 = vweird.f32 %v3832_v52  ;;  %v815_v27 = vmul.f32 %v3960_v55, %v3904_v43  ;;  %2545 = vrsqrt.f32 %v3958_v32  ;;  %v853_v62 = vsel %vm3985_vm11, %v3859_v53, %v849_v30  ;;  %v4992_v53 = vld [vmem:[#allocation20_spill] sm:$0xff]  ;;  %vm4033_vm2 = vmor %vm990_vm5, %vm991_vm8 }
 0x119   : > { %v989_v10 = vmul.f32 %v3846_v22, %v988_v9  ;;  %vm1140_vm14 = vweird.f32 %v3822_v42  ;;  %v666_v40 = vmul.f32 %v3965_v50, %v665_v17  ;;  %v825_v47 = vmul.f32 %v3979_v34, %v3923_v54 }
 0x11a   : > { %v1276_v4 = vmul.f32 %v4991_v3, %v843_v25  ;;  %v1277_v36 = vmul.f32 %v4992_v53, %v853_v62  ;;  %v4017_v56 = vpop.eup %2541  ;;  %v1147_v0 = vmul.f32 0.5, %v1146_v31  ;;  %vm1151_vm15 = vweird.f32 %v3911_v46 }
 0x11b   : > { %vm660_vm0 = vweird.f32 %v3861_v18  ;;  %v983_v33 = vsel %vm4007_vm13, %v3828_v23, %v979_v14  ;;  %v4024_v63 = vpop.eup %2543  ;;  %vm1141_vm1 = vweird.f32 %v3891_v1  ;;  %v657_v61 = vmul.f32 0.5, %v656_v38  ;;  %vm1152_vm9 = vmor %vm1150_vm12, %vm1151_vm15 }
 0x11c   : > { %v1329_v45 = vpack.c.bf16 %v1277_v36, %v1276_v4  ;;  %v4027_v26 = vadd.f32 1e-12, %v525_v41  ;;  %v1138_v59 = vsub.f32 1.5, %v1137_v7  ;;  %vm661_vm3 = vweird.f32 %v3926_v57  ;;  %vm1142_vm8 = vmor %vm1140_vm14, %vm1141_vm1  ;;  %v4997_v4 = vld [vmem:[#allocation23_spill] sm:$0xff] }
 0x11d   : > { %v816_v23 = vmul.f32 %v3960_v55, %v815_v27  ;;  %v667_v39 = vmul.f32 0.5, %v666_v40  ;;  %v826_v49 = vmul.f32 %v3979_v34, %v825_v47  ;;  %v965_v6 = vmul.f32 %v4017_v56, %v3941_v29  ;;  %vm4095_vm10 = vmor %vm660_vm0, %vm661_vm3 }
 0x11e   : > { %1467 = vmatpush.bf16.xpose.msra.mxu1 %v1329_v45  ;;  %v993_v15 = vsel %vm4033_vm2, %v3846_v22, %v989_v10  ;;  %v1290_v51 = vmul.f32 %v4995_v2, %v983_v33  ;;  %v461_v9 = vpop.xlane.xlu1 %460  ;;  %v4046_v21 = vpop.eup %2545  ;;  %v1148_v60 = vsub.f32 1.5, %v1147_v0  ;;  %vm670_vm4 = vweird.f32 %v3920_v20  ;;  %v5000_v45 = vld [vmem:[#allocation22_spill] sm:$0xff] }
 0x11f   : > { %v955_v41 = vmul.f32 %v4024_v63, %v3945_v35  ;;  %v1291_v31 = vmul.f32 %v4996_v13, %v993_v15  ;;  %v658_v30 = vsub.f32 1.5, %v657_v61  ;;  %vm671_vm5 = vweird.f32 %v3965_v50  ;;  %v459_v14 = vpop.xlane.xlu0 %458 }
 0x120   : > { %v487_v11 = vpop.xlane.xlu2 %486  ;;  %2547 = vrsqrt.f32 %v4027_v26  ;;  %v4055_v22 = vadd.f32 1e-12, %v3952_v24  ;;  %v817_v28 = vmul.f32 0.5, %v816_v23  ;;  %vm820_vm6 = vweird.f32 %v3904_v43  ;;  %vm4105_vm11 = vmor %vm670_vm4, %vm671_vm5 }
 0x121   : > { %v668_v7 = vsub.f32 1.5, %v667_v39  ;;  %v1336_v38 = vpack.c.bf16 %v1291_v31, %v1290_v51  ;;  %v4059_v17 = vadd.f32 1e-12, %v3954_v19  ;;  %v827_v25 = vmul.f32 0.5, %v826_v49 }
 0x122   : > { %vm830_vm7 = vweird.f32 %v3923_v54  ;;  %v966_v27 = vmul.f32 %v4017_v56, %v965_v6  ;;  %2549 = vrsqrt.f32 %v4055_v22  ;;  %v1139_v62 = vmul.f32 %v3891_v1, %v1138_v59 }
 0x123   : > { %v956_v24 = vmul.f32 %v4024_v63, %v955_v41  ;;  %v1115_v19 = vmul.f32 %v4046_v21, %v3958_v32  ;;  %1517 = vmatpush.bf16.xpose.msra.mxu2 %v1336_v38  ;;  %2551 = vrsqrt.f32 %v4059_v17  ;;  %v1149_v10 = vmul.f32 %v3911_v46, %v1148_v60  ;;  %v5004_v41 = vld [vmem:[#allocation26_spill] sm:$0xff] }
 0x124   : > { %v1143_v48 = vsel %vm1142_vm8, %v3891_v1, %v1139_v62  ;;  %v4079_v40 = vadd.f32 1e-12, %v459_v14  ;;  %v4081_v42 = vadd.f32 1e-12, %v487_v11  ;;  %v4083_v47 = vadd.f32 1e-12, %v461_v9 }
 0x125   : > { %v1153_v3 = vsel %vm1152_vm9, %v3911_v46, %v1149_v10  ;;  %v1306_v53 = vmul.f32 %v4997_v4, %v1143_v48  ;;  %v659_v36 = vmul.f32 %v3926_v57, %v658_v30  ;;  %v669_v0 = vmul.f32 %v3965_v50, %v668_v7 }
 0x126   : > { %v4089_v33 = vpop.eup %2547  ;;  %v818_v1 = vsub.f32 1.5, %v817_v28  ;;  %v828_v61 = vsub.f32 1.5, %v827_v25  ;;  %v1307_v46 = vmul.f32 %v5000_v45, %v1153_v3  ;;  %2553 = vrsqrt.f32 %v4079_v40  ;;  %v519_v15 = vpop.xlane.xlu1 %518 }
 0x127   : > { %v4109_v59 = vmul.f32 0.5, %v966_v27  ;;  %v4111_v18 = vmul.f32 0.5, %v956_v24  ;;  %v1116_v23 = vmul.f32 %v4046_v21, %v1115_v19  ;;  %2555 = vrsqrt.f32 %v4081_v42  ;;  %v489_v30 = vpop.xlane.xlu0 %488 }
 0x128   : > { %v521_v39 = vpop.xlane.xlu2 %520  ;;  %v4115_v11 = vpop.eup %2549  ;;  %v1344_v49 = vpack.c.bf16 %v1307_v46, %v1306_v53  ;;  %2557 = vrsqrt.f32 %v4083_v47  ;;  %v663_v20 = vsel %vm4095_vm10, %v3926_v57, %v659_v36  ;;  %v673_v6 = vsel %vm4105_vm11, %v3965_v50, %v669_v0  ;;  %v5003_v50 = vld [vmem:[#allocation24_spill] sm:$0xff] }
 0x129   : > { %v4124_v2 = vpop.eup %2551  ;;  %vm821_vm12 = vweird.f32 %v3960_v55  ;;  %vm831_vm13 = vweird.f32 %v3979_v34  ;;  %v1125_v51 = vmul.f32 %v4089_v33, %v4027_v26  ;;  %v645_v9 = vmul.f32 %v4115_v11, %v4055_v22 }
 0x12a   : > { %vm970_vm14 = vweird.f32 %v3941_v29  ;;  %vm971_vm15 = vweird.f32 %v4017_v56  ;;  %v635_v57 = vmul.f32 %v4124_v2, %v4059_v17  ;;  %1566 = vmatpush.bf16.xpose.msra.mxu3 %v1344_v49  ;;  %v1258_v60 = vmul.f32 %v5003_v50, %v663_v20  ;;  %vm4151_vm2 = vmor %vm820_vm6, %vm821_vm12 }
 0x12b   : > { %v1259_v13 = vmul.f32 %v5004_v41, %v673_v6  ;;  %v819_v31 = vmul.f32 %v3960_v55, %v818_v1  ;;  %vm960_vm0 = vweird.f32 %v3945_v35  ;;  %vm961_vm1 = vweird.f32 %v4024_v63  ;;  %vm4164_vm3 = vmor %vm830_vm7, %vm831_vm13 }
 0x12c   : > { %v4141_v14 = vmul.f32 0.5, %v1116_v23  ;;  %v646_v28 = vmul.f32 %v4115_v11, %v645_v9  ;;  %v829_v7 = vmul.f32 %v3979_v34, %v828_v61  ;;  %v4145_v38 = vpop.eup %2553  ;;  %v968_v27 = vsub.f32 1.5, %v4109_v59  ;;  %vm962_vm11 = vmor %vm960_vm0, %vm961_vm1 }
 0x12d   : > { %v958_v62 = vsub.f32 1.5, %v4111_v18  ;;  %v636_v24 = vmul.f32 %v4124_v2, %v635_v57  ;;  %v1320_v19 = vpack.c.bf16 %v1259_v13, %v1258_v60  ;;  %v4158_v10 = vpop.eup %2555  ;;  %v1126_v43 = vmul.f32 %v4089_v33, %v1125_v51  ;;  %v5010_v18 = vld [vmem:[#allocation27_spill] sm:$0xff]  ;;  %vm972_vm12 = vmor %vm970_vm14, %vm971_vm15 }
 0x12e   : > { %v795_v3 = vmul.f32 %v4145_v38, %v4079_v40  ;;  %v823_v4 = vsel %vm4151_vm2, %v3960_v55, %v819_v31  ;;  %v4174_v53 = vadd.f32 1e-12, %v489_v30  ;;  %v4176_v36 = vpop.eup %2557  ;;  %vm650_vm4 = vweird.f32 %v4055_v22 }
 0x12f   : > { %v935_v54 = vmul.f32 %v4158_v10, %v4081_v42  ;;  %1419 = vmatpush.bf16.xpose.msra.mxu0 %v1320_v19  ;;  %v833_v0 = vsel %vm4164_vm3, %v3979_v34, %v829_v7  ;;  %v4184_v52 = vadd.f32 1e-12, %v521_v39  ;;  %v1118_v1 = vsub.f32 1.5, %v4141_v14  ;;  %v5012_v19 = vld [vmem:[#allocation28_spill] sm:$0xff] }
 0x130   : > { %v647_v61 = vmul.f32 0.5, %v646_v28  ;;  %v637_v55 = vmul.f32 0.5, %v636_v24  ;;  %v805_v45 = vmul.f32 %v4176_v36, %v4083_v47  ;;  %vm640_vm5 = vweird.f32 %v4059_v17  ;;  %v455_v39 = vpop.xlane.xlu2 %454  ;;  %v425_v51 = vpop.xlane.xlu1 %424 }
 0x131   : > { %v796_v46 = vmul.f32 %v4145_v38, %v795_v3  ;;  %v1274_v59 = vmul.f32 %v5009_v44, %v823_v4  ;;  %v1275_v23 = vmul.f32 %v5010_v18, %v833_v0  ;;  %v4193_v49 = vmul.f32 0.5, %v1126_v43  ;;  %v423_v28 = vpop.xlane.xlu0 %422 }
 0x132   : > { %vm651_vm6 = vweird.f32 %v4115_v11  ;;  %v936_v34 = vmul.f32 %v4158_v10, %v935_v54  ;;  %2559 = vrsqrt.f32 %v4174_v53  ;;  %vm1120_vm7 = vweird.f32 %v3958_v32 }
 0x133   : > { %vm1121_vm8 = vweird.f32 %v4046_v21  ;;  %vm641_vm9 = vweird.f32 %v4124_v2  ;;  %v806_v20 = vmul.f32 %v4176_v36, %v805_v45  ;;  %v1328_v6 = vpack.c.bf16 %v1275_v23, %v1274_v59  ;;  %vm4246_vm15 = vmor %vm650_vm4, %vm651_vm6  ;;  %v5015_v23 = vld [vmem:[#allocation33_spill] sm:$0xff] }
 0x134   : > { %2561 = vrsqrt.f32 %v4184_v52  ;;  %vm1131_vm10 = vweird.f32 %v4089_v33  ;;  %v648_v9 = vsub.f32 1.5, %v647_v61  ;;  %v638_v57 = vsub.f32 1.5, %v637_v55  ;;  %vm642_vm2 = vmor %vm640_vm5, %vm641_vm9 }
 0x135   : > { %v4204_v50 = vadd.f32 1e-12, %v519_v15  ;;  %v959_v60 = vmul.f32 %v4024_v63, %v958_v62  ;;  %v4211_v41 = vmul.f32 0.5, %v796_v46  ;;  %1468 = vmatpush.bf16.xpose.msra.mxu1 %v1328_v6  ;;  %v969_v13 = vmul.f32 %v4017_v56, %v968_v27  ;;  %v5011_v62 = vld [vmem:[#allocation29_spill] sm:$0xff] }
 0x136   : > { %v4214_v31 = vadd.f32 1e-12, %v455_v39  ;;  %v4216_v30 = vadd.f32 1e-12, %v425_v51  ;;  %v1128_v15 = vsub.f32 1.5, %v4193_v49  ;;  %vm1130_vm13 = vweird.f32 %v4027_v26 }
 0x137   : > { %v4224_v35 = vmul.f32 0.5, %v936_v34  ;;  %2563 = vrsqrt.f32 %v4204_v50  ;;  %v963_v7 = vsel %vm962_vm11, %v4024_v63, %v959_v60  ;;  %v4228_v25 = vmul.f32 0.5, %v806_v20  ;;  %v5016_v34 = vld [vmem:[#allocation32_spill] sm:$0xff]  ;;  %vm4308_vm9 = vmor %vm1130_vm13, %vm1131_vm10 }
 0x138   : > { %v973_v27 = vsel %vm972_vm12, %v4017_v56, %v969_v13  ;;  %v1288_v24 = vmul.f32 %v5011_v62, %v963_v7  ;;  %2565 = vrsqrt.f32 %v4214_v31  ;;  %v4233_v29 = vpop.eup %2559  ;;  %vm801_vm14 = vweird.f32 %v4145_v38  ;;  %vm4296_vm12 = vmor %vm1120_vm7, %vm1121_vm8 }
 0x139   : > { %v1289_v48 = vmul.f32 %v5012_v19, %v973_v27  ;;  %2567 = vrsqrt.f32 %v4216_v30  ;;  %v4238_v43 = vadd.f32 1e-12, %v423_v28  ;;  %v798_v63 = vsub.f32 1.5, %v4211_v41 }
 0x13a   : > { %v4240_v3 = vpop.eup %2561  ;;  %vm940_vm0 = vweird.f32 %v4081_v42  ;;  %vm941_vm1 = vweird.f32 %v4158_v10  ;;  %v945_v4 = vmul.f32 %v4233_v29, %v4174_v53  ;;  %v639_v54 = vmul.f32 %v4124_v2, %v638_v57 }
 0x13b   : > { %v649_v0 = vmul.f32 %v4115_v11, %v648_v9  ;;  %vm800_vm3 = vweird.f32 %v4079_v40  ;;  %v938_v22 = vsub.f32 1.5, %v4224_v35  ;;  %vm810_vm4 = vweird.f32 %v4083_v47  ;;  %v5031_v47 = vld [vmem:[#allocation34_spill] sm:$0xff] }
 0x13c   : > { %vm811_vm6 = vweird.f32 %v4176_v36  ;;  %v1105_v61 = vmul.f32 %v4240_v3, %v4184_v52  ;;  %v1335_v55 = vpack.c.bf16 %v1289_v48, %v1288_v24  ;;  %2569 = vrsqrt.f32 %v4238_v43 }
 0x13d   : > { %v808_v45 = vsub.f32 1.5, %v4228_v25  ;;  %v946_v46 = vmul.f32 %v4233_v29, %v945_v4  ;;  %v643_v17 = vsel %vm642_vm2, %v4124_v2, %v639_v54  ;;  %v653_v44 = vsel %vm4246_vm15, %v4115_v11, %v649_v0  ;;  %v4274_v59 = vpop.eup %2563  ;;  %v5021_v4 = vld [vmem:[#allocation30_spill] sm:$0xff]  ;;  %v5022_v0 = vld [vmem:[#allocation31_spill] sm:$0xff] }
 0x13e   : > { %v1106_v18 = vmul.f32 %v4240_v3, %v1105_v61  ;;  %1518 = vmatpush.bf16.xpose.msra.mxu2 %v1335_v55  ;;  %v1256_v49 = vmul.f32 %v5015_v23, %v643_v17  ;;  %v1257_v39 = vmul.f32 %v5016_v34, %v653_v44  ;;  %v1119_v20 = vmul.f32 %v4046_v21, %v1118_v1  ;;  %v4282_v6 = vpop.eup %2565 }
 0x13f   : > { %v947_v2 = vmul.f32 0.5, %v946_v46  ;;  %vm950_vm5 = vweird.f32 %v4174_v53  ;;  %v1095_v11 = vmul.f32 %v4274_v59, %v4204_v50  ;;  %vm1100_vm11 = vweird.f32 %v4204_v50  ;;  %v4290_v9 = vpop.eup %2567 }
 0x140   : > { %v1129_v51 = vmul.f32 %v4089_v33, %v1128_v15  ;;  %vm951_vm15 = vweird.f32 %v4233_v29  ;;  %v1107_v1 = vmul.f32 0.5, %v1106_v18  ;;  %v775_v57 = vmul.f32 %v4282_v6, %v4214_v31  ;;  %v457_v15 = vpop.xlane.xlu0 %456 }
 0x141   : > { %vm630_vm2 = vweird.f32 %v4216_v30  ;;  %v1319_v60 = vpack.c.bf16 %v1257_v39, %v1256_v49  ;;  %vm1111_vm7 = vweird.f32 %v4240_v3  ;;  %v1096_v32 = vmul.f32 %v4274_v59, %v1095_v11 }
 0x142   : > { %vm1101_vm8 = vweird.f32 %v4274_v59  ;;  %v625_v28 = vmul.f32 %v4290_v9, %v4216_v30  ;;  %v4317_v7 = vpop.eup %2569  ;;  %v948_v25 = vsub.f32 1.5, %v947_v2  ;;  %v776_v27 = vmul.f32 %v4282_v6, %v775_v57  ;;  %v5034_v57 = vld [vmem:[#allocation35_spill] sm:$0xff] }
 0x143   : > { %1420 = vmatpush.bf16.xpose.msra.mxu0 %v1319_v60  ;;  %v1123_v26 = vsel %vm4296_vm12, %v4046_v21, %v1119_v20  ;;  %v1133_v62 = vsel %vm4308_vm9, %v4089_v33, %v1129_v51  ;;  %v1097_v24 = vmul.f32 0.5, %v1096_v32  ;;  %vm631_vm10 = vweird.f32 %v4290_v9  ;;  %vm4339_vm9 = vmor %vm800_vm3, %vm801_vm14  ;;  %v2260_v33 = vld [vmem:[%s4852_s0 + $0x38] sm:$0xff] }
 0x144   : > { %v626_v19 = vmul.f32 %v4290_v9, %v625_v28  ;;  %v615_v48 = vmul.f32 %v4317_v7, %v4238_v43  ;;  %v1108_v56 = vsub.f32 1.5, %v1107_v1  ;;  %vm620_vm13 = vweird.f32 %v4238_v43  ;;  %vm4351_vm12 = vmor %vm940_vm0, %vm941_vm1 }
 0x145   : > { %v1304_v54 = vmul.f32 %v5021_v4, %v1123_v26  ;;  %v1305_v61 = vmul.f32 %v5022_v0, %v1133_v62  ;;  %v4333_v21 = vadd.f32 1e-12, %v457_v15  ;;  %v1098_v55 = vsub.f32 1.5, %v1097_v24  ;;  %vm4361_vm3 = vmor %vm810_vm4, %vm811_vm6  ;;  %v5035_v15 = vld [vmem:[#allocation37_spill] sm:$0xff]  ;;  %v2254_v0 = vld [vmem:[%s4852_s0 + $0x8] sm:$0xff] }
 0x146   : > { %v627_v46 = vmul.f32 0.5, %v626_v19  ;;  %v616_v17 = vmul.f32 %v4317_v7, %v615_v48  ;;  %v799_v44 = vmul.f32 %v4145_v38, %v798_v63  ;;  %v777_v40 = vmul.f32 0.5, %v776_v27  ;;  %vm4373_vm0 = vmor %vm950_vm5, %vm951_vm15 }
 0x147   : > { %vm621_vm14 = vweird.f32 %v4317_v7  ;;  %v1343_v23 = vpack.c.bf16 %v1305_v61, %v1304_v54  ;;  %2571 = vrsqrt.f32 %v4333_v21  ;;  %v809_v34 = vmul.f32 %v4176_v36, %v808_v45  ;;  %vm1102_vm1 = vmor %vm1100_vm11, %vm1101_vm8  ;;  %v2258_v61 = vld [vmem:[%s4852_s0 + $0x28] sm:$0xff] }
 0x148   : > { %v628_v63 = vsub.f32 1.5, %v627_v46  ;;  %v617_v42 = vmul.f32 0.5, %v616_v17  ;;  %v803_v49 = vsel %vm4339_vm9, %v4145_v38, %v799_v44  ;;  %v939_v2 = vmul.f32 %v4158_v10, %v938_v22  ;;  %v5033_v22 = vld [vmem:[#allocation36_spill] sm:$0xff]  ;;  %vm632_vm5 = vmor %vm630_vm2, %vm631_vm10 }
 0x149   : > { %1567 = vmatpush.bf16.xpose.msra.mxu3 %v1343_v23  ;;  %v1272_v20 = vmul.f32 %v5031_v47, %v803_v49  ;;  %v949_v11 = vmul.f32 %v4233_v29, %v948_v25  ;;  %v1099_v38 = vmul.f32 %v4274_v59, %v1098_v55  ;;  %v813_v45 = vsel %vm4361_vm3, %v4176_v36, %v809_v34  ;;  %vm622_vm11 = vmor %vm620_vm13, %vm621_vm14 }
 0x14a   : > { %v618_v53 = vsub.f32 1.5, %v617_v42  ;;  %v1109_v51 = vmul.f32 %v4240_v3, %v1108_v56  ;;  %v629_v35 = vmul.f32 %v4290_v9, %v628_v63  ;;  %vm5032_vm4 = vweird.f32 %v4184_v52 }
 0x14b   : > { %vm1112_vm6 = vmor %vm5032_vm4, %vm1111_vm7  ;;  %v1273_v14 = vmul.f32 %v5033_v22, %v813_v45  ;;  %v943_v50 = vsel %vm4351_vm12, %v4158_v10, %v939_v2  ;;  %v953_v1 = vsel %vm4373_vm0, %v4233_v29, %v949_v11  ;;  %v1103_v36 = vsel %vm1102_vm1, %v4274_v59, %v1099_v38 }
 0x14c   : > { %v1286_v52 = vmul.f32 %v5034_v57, %v943_v50  ;;  %v1287_v60 = vmul.f32 %v3142_v58, %v953_v1  ;;  %v1113_v13 = vsel %vm1112_vm6, %v4240_v3, %v1109_v51  ;;  %v1302_v32 = vmul.f32 %v3146_v8, %v1103_v36  ;;  %v1675_v1 = vld [vmem:[%s222_s29 + $0x8] sm:$0xff] }
 0x14d   : > { %v2572_v10 = vpop.eup %2571  ;;  %v1327_v28 = vpack.c.bf16 %v1273_v14, %v1272_v20  ;;  %v1303_v25 = vmul.f32 %v5035_v15, %v1113_v13  ;;  %v619_v29 = vmul.f32 %v4317_v7, %v618_v53  ;;  %v633_v59 = vsel %vm632_vm5, %v4290_v9, %v629_v35  ;;  %v4472_v35 = vld [vmem:[%s222_s29] sm:$0xff] }
 0x14e   : > { %v778_v27 = vsub.f32 1.5, %v777_v40  ;;  %v785_v58 = vmul.f32 %v2572_v10, %v4333_v21  ;;  %v1334_v30 = vpack.c.bf16 %v1287_v60, %v1286_v52  ;;  %v1255_v3 = vmul.f32 %v3338_v37, %v633_v59  ;;  %v2253_v37 = vld [vmem:[%s4852_s0] sm:$0xff] }
 0x14f   : > { %1469 = vmatpush.bf16.xpose.msra.mxu1 %v1327_v28  ;;  %v1342_v8 = vpack.c.bf16 %v1303_v25, %v1302_v32  ;;  %v623_v26 = vsel %vm622_vm11, %v4317_v7, %v619_v29  ;;  %vm780_vm15 = vweird.f32 %v4214_v31  ;;  %vm781_vm2 = vweird.f32 %v4282_v6 }
 0x150   : > { %v786_v62 = vmul.f32 %v2572_v10, %v785_v58  ;;  %1519 = vmatpush.bf16.xpose.msra.mxu2 %v1334_v30  ;;  %v1254_v24 = vmul.f32 %v3342_v5, %v623_v26  ;;  %v779_v19 = vmul.f32 %v4282_v6, %v778_v27  ;;  %vm791_vm7 = vweird.f32 %v2572_v10  ;;  %vm782_vm8 = vmor %vm780_vm15, %vm781_vm2 }
 0x151   : > { %1568 = vmatpush.bf16.xpose.msra.mxu3 %v1342_v8  ;;  %vm790_vm10 = vweird.f32 %v4333_v21  ;;  %v2259_v21 = vld [vmem:[%s4852_s0 + $0x30] sm:$0xff]  ;;  %v4481_v52 = vrot.slane %v4472_v35, 3  ;;  %vm1809_vm9 = vcmask 1040384   ;;  %v4485_v28 = vrot.slane %v1675_v1, 1 }
 0x152   : > { %v787_v43 = vmul.f32 0.5, %v786_v62  ;;  %v1318_v9 = vpack.c.bf16 %v1255_v3, %v1254_v24  ;;  %v783_v5 = vsel %vm782_vm8, %v4282_v6, %v779_v19  ;;  %vm792_vm13 = vmor %vm790_vm10, %vm791_vm7  ;;  %v2255_v6 = vld [vmem:[%s4852_s0 + $0x10] sm:$0xff]  ;;  %vm1811_vm12 = vcmask 1042434  }
 0x153   : > { %v1270_v56 = vmul.f32 %v3336_v12, %v783_v5  ;;  %v2256_v12 = vld [vmem:[%s4852_s0 + $0x18] sm:$0xff]  ;;  %v1810_v59 = vsel %vm1809_vm9, %v4472_v35, %v4481_v52  ;;  %vm1813_vm14 = vcmask 1041408   ;;  %vm1815_vm3 = vcmask 1041409  }
 0x154   : > { %v788_v48 = vsub.f32 1.5, %v787_v43  ;;  %1421 = vmatpush.bf16.xpose.msra.mxu0 %v1318_v9  ;;  %vm1817_vm0 = vcmask 1043459   ;;  %vm1819_vm1 = vcmask 1042433   ;;  %vm1823_vm4 = vcmask 1044484  }
 0x155   : > { %vm1825_vm6 = vcmask 1043458   ;;  %vm1829_vm5 = vcmask 1045509   ;;  %vm1831_vm11 = vcmask 1044483   ;;  %vm2046_vm15 = vcmask 7168  }
 0x156   : > { %v789_v31 = vmul.f32 %v2572_v10, %v788_v48 }
 0x157   : > { %1520 = vmatmul.bf16.vlgmr.msra.gmra.mxu2 %v2253_v37 }
 0x158   : > { %1569 = vmatmul.bf16.vlgmr.msra.gmra.mxu3 %v2253_v37  ;;  %v793_v7 = vsel %vm792_vm13, %v2572_v10, %v789_v31  ;;  %v4483_v10 = vrot.slane %v1675_v1, 6  ;;  %v1816_v31 = vsel %vm1815_vm3, %v4472_v35, %v4481_v52 }
 0x159   : > { %v1271_v4 = vmul.f32 %v3407_v16, %v793_v7  ;;  %v2257_v16 = vld [vmem:[%s4852_s0 + $0x20] sm:$0xff] }
 0x15a   : > { %v1812_v26 = vsel %vm1811_vm12, %v4483_v10, %v4485_v28  ;;  %v1818_v7 = vsel %vm1817_vm0, %v4483_v10, %v4485_v28 }
 0x15b   : > { %1422 = vmatmul.bf16.vlgmr.msra.gmra.mxu0 %v2253_v37  ;;  %v1326_v54 = vpack.c.bf16 %v1271_v4, %v1270_v56 }
 0x15d   : > { %1470 = vmatpush.bf16.xpose.msra.mxu1 %v1326_v54 }
 0x164   : > { %1471 = vmatmul.bf16.vlgmr.msra.gmra.mxu1 %v2253_v37 }
 0x167   : > { %1525 = vmatmul.bf16.gmra.mxu2 %v2254_v0 }
 0x168   : > { %1574 = vmatmul.bf16.gmra.mxu3 %v2254_v0 }
 0x16b   : > { %1427 = vmatmul.bf16.gmra.mxu0 %v2254_v0 }
 0x174   : > { %1476 = vmatmul.bf16.gmra.mxu1 %v2254_v0  ;;  %v1814_v0 = vsel %vm1813_vm14, %v1810_v59, %v1812_v26 }
 0x177   : > { %1530 = vmatmul.bf16.gmra.mxu2 %v2255_v6 }
 0x178   : > { %1579 = vmatmul.bf16.gmra.mxu3 %v2255_v6 }
 0x17b   : > { %1432 = vmatmul.bf16.gmra.mxu0 %v2255_v6 }
 0x184   : > { %1481 = vmatmul.bf16.gmra.mxu1 %v2255_v6 }
 0x187   : > { %1535 = vmatmul.bf16.gmra.mxu2 %v2256_v12 }
 0x188   : > { %1584 = vmatmul.bf16.gmra.mxu3 %v2256_v12 }
 0x18b   : > { %1437 = vmatmul.bf16.gmra.mxu0 %v2256_v12 }
 0x194   : > { %1486 = vmatmul.bf16.gmra.mxu1 %v2256_v12 }
 0x197   : > { %1540 = vmatmul.bf16.gmra.mxu2 %v2257_v16 }
 0x198   : > { %1589 = vmatmul.bf16.gmra.mxu3 %v2257_v16 }
 0x19b   : > { %1442 = vmatmul.bf16.gmra.mxu0 %v2257_v16 }
 0x1a4   : > { %1491 = vmatmul.bf16.gmra.mxu1 %v2257_v16 }
 0x1a7   : > { %1545 = vmatmul.bf16.gmra.mxu2 %v2258_v61 }
 0x1a8   : > { %1594 = vmatmul.bf16.gmra.mxu3 %v2258_v61 }
 0x1ab   : > { %1447 = vmatmul.bf16.gmra.mxu0 %v2258_v61 }
 0x1b4   : > { %1496 = vmatmul.bf16.gmra.mxu1 %v2258_v61 }
 0x1b7   : > { %1550 = vmatmul.bf16.gmra.mxu2 %v2259_v21 }
 0x1b8   : > { %1599 = vmatmul.bf16.gmra.mxu3 %v2259_v21 }
 0x1bb   : > { %1452 = vmatmul.bf16.gmra.mxu0 %v2259_v21 }
 0x1c4   : > { %1501 = vmatmul.bf16.gmra.mxu1 %v2259_v21  ;;  %v1820_v21 = vsel %vm1819_vm1, %v1816_v31, %v1818_v7 }
 0x1c7   : > { %1555 = vmatmul.bf16.gmra.mxu2 %v2260_v33 }
 0x1c8   : > { %1604 = vmatmul.bf16.gmra.mxu3 %v2260_v33 }
 0x1cb   : > { %1457 = vmatmul.bf16.gmra.mxu0 %v2260_v33 }
 0x1d4   : > { %1506 = vmatmul.bf16.gmra.mxu1 %v2260_v33 }
 0x1d8   : > { %v1423_v55 = vpop.f32.mrf.mxu0 }
 0x1d9   : > { %v1610_v45 = vmul.f32 2.0, %v1423_v55  ;;  %v4508_v55 = vperm.slane %v1814_v0, 2 }
 0x1da   : > { %v1521_v46 = vpop.f32.mrf.mxu2 }
 0x1db   : > { %v1570_v17 = vpop.f32.mrf.mxu3  ;;  %v1612_v14 = vmul.f32 2.0, %v1521_v46  ;;  %v1676_v60 = vmul.f32 1.442695, %v1610_v45 }
 0x1dc   : > { %v1613_v36 = vmul.f32 2.0, %v1570_v17 }
 0x1dd   : > { %v1680_v32 = vmul.f32 1.442695, %v1612_v14  ;;  %2573 = vpow2.f32 %v1676_v60 }
 0x1de   : > { %v1682_v25 = vmul.f32 1.442695, %v1613_v36  ;;  %v4528_v36 = vperm.slane %v1814_v0, 1 }
 0x1df   : > { %2575 = vpow2.f32 %v1680_v32 }
 0x1e0   : > { %v1425_v44 = vpop.f32.mrf.mxu0  ;;  %2577 = vpow2.f32 %v1682_v25 }
 0x1e1   : > { %v1472_v18 = vpop.f32.mrf.mxu1  ;;  %v1614_v13 = vmul.f32 2.0, %v1425_v44 }
 0x1e2   : > { %v1523_v40 = vpop.f32.mrf.mxu2  ;;  %v1611_v15 = vmul.f32 2.0, %v1472_v18 }
 0x1e3   : > { %v1572_v23 = vpop.f32.mrf.mxu3  ;;  %v1616_v29 = vmul.f32 2.0, %v1523_v40  ;;  %v1684_v30 = vmul.f32 1.442695, %v1614_v13  ;;  %v2574_v54 = vpop.eup %2573  ;;  %v4513_v40 = vperm.slane %v1814_v0, 0 }
 0x1e4   : > { %v1617_v27 = vmul.f32 2.0, %v1572_v23  ;;  %v1678_v62 = vmul.f32 1.442695, %v1611_v15 }
 0x1e5   : > { %v1688_v9 = vmul.f32 1.442695, %v1616_v29  ;;  %2579 = vpow2.f32 %v1684_v30  ;;  %v2576_v33 = vpop.eup %2575  ;;  %v4532_v32 = vmul.f32 %v2574_v54, %v4513_v40 }
 0x1e6   : > { %v1690_v48 = vmul.f32 1.442695, %v1617_v27  ;;  %2581 = vpow2.f32 %v1678_v62  ;;  %v2578_v18 = vpop.eup %2577 }
 0x1e7   : > { %2583 = vpow2.f32 %v1688_v9 }
 0x1e8   : > { %v1428_v41 = vpop.f32.mrf.mxu0  ;;  %2585 = vpow2.f32 %v1690_v48 }
 0x1e9   : > { %v1474_v63 = vpop.f32.mrf.mxu1  ;;  %v1618_v3 = vmul.f32 2.0, %v1428_v41 }
 0x1ea   : > { %v1526_v42 = vpop.f32.mrf.mxu2  ;;  %v1615_v24 = vmul.f32 2.0, %v1474_v63 }
 0x1eb   : > { %v1575_v49 = vpop.f32.mrf.mxu3  ;;  %v1620_v19 = vmul.f32 2.0, %v1526_v42  ;;  %v1692_v56 = vmul.f32 1.442695, %v1618_v3  ;;  %v4540_v3 = vmul.f32 %v2576_v33, %v4508_v55 }
 0x1ec   : > { %v1621_v5 = vmul.f32 2.0, %v1575_v49  ;;  %v1686_v6 = vmul.f32 1.442695, %v1615_v24 }
 0x1ed   : > { %v1696_v16 = vmul.f32 1.442695, %v1620_v19  ;;  %2587 = vpow2.f32 %v1692_v56 }
 0x1ee   : > { %v1698_v46 = vmul.f32 1.442695, %v1621_v5  ;;  %2589 = vpow2.f32 %v1686_v6 }
 0x1ef   : > { %2591 = vpow2.f32 %v1696_v16 }
 0x1f0   : > { %v1430_v34 = vpop.f32.mrf.mxu0  ;;  %2593 = vpow2.f32 %v1698_v46 }
 0x1f1   : > { %v1477_v39 = vpop.f32.mrf.mxu1  ;;  %v1622_v4 = vmul.f32 2.0, %v1430_v34  ;;  %v4519_v34 = vrot.slane %v1820_v21, 1 }
 0x1f2   : > { %v4455_v47 = vpop.f32.mrf.mxu2  ;;  %v1619_v12 = vmul.f32 2.0, %v1477_v39 }
 0x1f3   : > { %v4457_v20 = vpop.f32.mrf.mxu3  ;;  %v1624_v61 = vmul.f32 2.0, %v4455_v47  ;;  %v1700_v23 = vmul.f32 1.442695, %v1622_v4  ;;  %v2580_v47 = vpop.eup %2579  ;;  %v4536_v59 = vperm.slane %v4519_v34, 2 }
 0x1f4   : > { %v1625_v17 = vmul.f32 2.0, %v4457_v20  ;;  %v1694_v42 = vmul.f32 1.442695, %v1619_v12  ;;  %v4523_v20 = vperm.slane %v1814_v0, 3  ;;  %v4559_v0 = vperm.slane %v4519_v34, 0 }
 0x1f5   : > { %v1704_v45 = vmul.f32 1.442695, %v1624_v61  ;;  %2595 = vpow2.f32 %v1700_v23 }
 0x1f6   : > { %v1706_v60 = vmul.f32 1.442695, %v1625_v17  ;;  %2597 = vpow2.f32 %v1694_v42  ;;  %v1824_v17 = vsel %vm1823_vm4, %v4483_v10, %v4485_v28 }
 0x1f7   : > { %2599 = vpow2.f32 %v1704_v45 }
 0x1f8   : > { %v4459_v2 = vpop.f32.mrf.mxu0  ;;  %2601 = vpow2.f32 %v1706_v60  ;;  %v4581_v60 = vperm.slane %v4519_v34, 1 }
 0x1f9   : > { %v4461_v11 = vpop.f32.mrf.mxu1  ;;  %v1626_v41 = vmul.f32 2.0, %v4459_v2  ;;  %v2582_v2 = vpop.eup %2581 }
 0x1fa   : > { %v4463_v38 = vpop.f32.mrf.mxu2  ;;  %v2584_v13 = vpop.eup %2583  ;;  %v1623_v27 = vmul.f32 2.0, %v4461_v11  ;;  %v4550_v11 = vmul.f32 %v2578_v18, %v4523_v20  ;;  %v4572_v23 = vmul.f32 %v2582_v2, %v4528_v36 }
 0x1fb   : > { %v4465_v53 = vpop.f32.mrf.mxu3  ;;  %v1628_v49 = vmul.f32 2.0, %v4463_v38  ;;  %v1708_v15 = vmul.f32 1.442695, %v1626_v41  ;;  %v2586_v29 = vpop.eup %2585  ;;  %v4575_v42 = vmul.f32 %v2584_v13, %v4508_v55 }
 0x1fc   : > { %v1629_v14 = vmul.f32 2.0, %v4465_v53  ;;  %v2588_v30 = vpop.eup %2587  ;;  %v1702_v56 = vmul.f32 1.442695, %v1623_v27 }
 0x1fd   : > { %v1712_v53 = vmul.f32 1.442695, %v1628_v49  ;;  %v2590_v62 = vpop.eup %2589  ;;  %2603 = vpow2.f32 %v1708_v15  ;;  %v4578_v49 = vmul.f32 %v2586_v29, %v4523_v20 }
 0x1fe   : > { %v2592_v48 = vpop.eup %2591  ;;  %v4589_v13 = vmul.f32 %v2590_v62, %v4528_v36 }
 0x1ff   : > { %2605 = vpow2.f32 %v1712_v53 }
 0x200   : > { %v4470_v51 = vpop.f32.mrf.mxu0 }
 0x201   : > { %v4474_v22 = vpop.f32.mrf.mxu1  ;;  %v1630_v38 = vmul.f32 2.0, %v4470_v51  ;;  %v1714_v51 = vmul.f32 1.442695, %v1629_v14 }
 0x202   : > { %v4476_v50 = vpop.f32.mrf.mxu2  ;;  %v1627_v25 = vmul.f32 2.0, %v4474_v22  ;;  %v4544_v22 = vperm.slane %v4519_v34, 3  ;;  %v4595_v34 = vmul.f32 %v2592_v48, %v4508_v55 }
 0x203   : > { %v4478_v57 = vpop.f32.mrf.mxu3  ;;  %v1632_v26 = vmul.f32 2.0, %v4476_v50  ;;  %v1716_v9 = vmul.f32 1.442695, %v1630_v38  ;;  %v2594_v50 = vpop.eup %2593  ;;  %2607 = vpow2.f32 %v1714_v51 }
 0x204   : > { %v1633_v24 = vmul.f32 2.0, %v4478_v57  ;;  %v1710_v5 = vmul.f32 1.442695, %v1627_v25  ;;  %v2596_v57 = vpop.eup %2595  ;;  %v4586_v25 = vmul.f32 %v2588_v30, %v4513_v40  ;;  %v4598_v51 = vmul.f32 %v2594_v50, %v4523_v20 }
 0x205   : > { %v1720_v6 = vmul.f32 1.442695, %v1632_v26  ;;  %2609 = vpow2.f32 %v1716_v9  ;;  %v4604_v62 = vmul.f32 %v2596_v57, %v4513_v40 }
 0x206   : > { %v1722_v61 = vmul.f32 1.442695, %v1633_v24  ;;  %2611 = vpow2.f32 %v1710_v5 }
 0x207   : > { %2613 = vpow2.f32 %v1702_v56 }
 0x208   : > { %v4489_v58 = vpop.f32.mrf.mxu0  ;;  %2615 = vpow2.f32 %v1720_v6 }
 0x209   : > { %v4491_v8 = vpop.f32.mrf.mxu1  ;;  %v1634_v31 = vmul.f32 2.0, %v4489_v58  ;;  %v2598_v58 = vpop.eup %2597  ;;  %2617 = vpow2.f32 %v1722_v61 }
 0x20a   : > { %v4496_v43 = vpop.f32.mrf.mxu2  ;;  %v1631_v4 = vmul.f32 2.0, %v4491_v8  ;;  %v1822_v8 = vsel %vm1811_vm12, %v4472_v35, %v4481_v52  ;;  %v2600_v33 = vpop.eup %2599 }
 0x20b   : > { %v4498_v37 = vpop.f32.mrf.mxu3  ;;  %v1636_v12 = vmul.f32 2.0, %v4496_v43  ;;  %v1724_v46 = vmul.f32 1.442695, %v1634_v31  ;;  %v2602_v18 = vpop.eup %2601  ;;  %v1870_v43 = vmul.f32 %v2580_v47, %v4513_v40  ;;  %v1826_v38 = vsel %vm1825_vm6, %v1822_v8, %v1824_v17 }
 0x20c   : > { %v1637_v21 = vmul.f32 2.0, %v4498_v37  ;;  %v1718_v41 = vmul.f32 1.442695, %v1631_v4  ;;  %v2604_v37 = vpop.eup %2603  ;;  %v1827_v9 = vrot.slane %v1826_v38, 2  ;;  %v4610_v31 = vmul.f32 %v2598_v58, %v4528_v36 }
 0x20d   : > { %v1728_v45 = vmul.f32 1.442695, %v1636_v12  ;;  %v2606_v14 = vpop.eup %2605  ;;  %2619 = vpow2.f32 %v1724_v46  ;;  %v4615_v4 = vmul.f32 %v2600_v33, %v4508_v55  ;;  %v4620_v61 = vmul.f32 %v2602_v18, %v4523_v20 }
 0x20e   : > { %v1730_v47 = vmul.f32 1.442695, %v1637_v21  ;;  %v2608_v15 = vpop.eup %2607  ;;  %2621 = vpow2.f32 %v1718_v41  ;;  %v1884_v50 = vmul.f32 %v2606_v14, %v4536_v59  ;;  %v4630_v33 = vperm.slane %v1827_v9, 2 }
 0x20f   : > { %v2610_v27 = vpop.eup %2609  ;;  %2623 = vpow2.f32 %v1728_v45 }
 0x210   : > { %v4511_v44 = vpop.f32.mrf.mxu0  ;;  %v2612_v24 = vpop.eup %2611  ;;  %2625 = vpow2.f32 %v1730_v47  ;;  %v1886_v40 = vmul.f32 %v2610_v27, %v4559_v0 }
 0x211   : > { %v4516_v63 = vpop.f32.mrf.mxu1  ;;  %v1638_v29 = vmul.f32 2.0, %v4511_v44  ;;  %v1882_v44 = vmul.f32 %v2604_v37, %v4559_v0  ;;  %v2614_v48 = vpop.eup %2613  ;;  %v1883_v58 = vmul.f32 %v2612_v24, %v4581_v60  ;;  %v4652_v24 = vperm.slane %v1827_v9, 1 }
 0x212   : > { %v4521_v39 = vpop.f32.mrf.mxu2  ;;  %v1635_v26 = vmul.f32 2.0, %v4516_v63  ;;  %v1885_v63 = vmul.f32 %v2608_v15, %v4544_v22  ;;  %v2616_v56 = vpop.eup %2615  ;;  %v4628_v55 = vmul.f32 %v2614_v48, %v4528_v36  ;;  %v4642_v14 = vadd.f32 %v1886_v40, %v1870_v43 }
 0x213   : > { %v4526_v1 = vpop.f32.mrf.mxu3  ;;  %v1640_v57 = vmul.f32 2.0, %v4521_v39  ;;  %v1732_v6 = vmul.f32 1.442695, %v1638_v29  ;;  %v2618_v12 = vpop.eup %2617  ;;  %v4625_v17 = vadd.f32 %v1882_v44, %v4532_v32  ;;  %v4632_v39 = vperm.slane %v1827_v9, 0 }
 0x214   : > { %v1641_v21 = vmul.f32 2.0, %v4526_v1  ;;  %v1726_v8 = vmul.f32 1.442695, %v1635_v26  ;;  %v2620_v46 = vpop.eup %2619  ;;  %v1888_v20 = vmul.f32 %v2616_v56, %v4536_v59  ;;  %v4637_v1 = vadd.f32 %v1884_v50, %v4540_v3 }
 0x215   : > { %v2622_v41 = vpop.eup %2621  ;;  %v4640_v45 = vadd.f32 %v1885_v63, %v4550_v11  ;;  %v1736_v36 = vmul.f32 1.442695, %v1640_v57  ;;  %2627 = vpow2.f32 %v1732_v6  ;;  %v1889_v29 = vmul.f32 %v2618_v12, %v4544_v22 }
 0x216   : > { %v2624_v32 = vpop.eup %2623  ;;  %v1738_v27 = vmul.f32 1.442695, %v1641_v21  ;;  %2629 = vpow2.f32 %v1726_v8  ;;  %v1890_v11 = vmul.f32 %v2620_v46, %v4559_v0  ;;  %v1887_v26 = vmul.f32 %v2622_v41, %v4581_v60 }
 0x217   : > { %v2626_v15 = vpop.eup %2625  ;;  %2631 = vpow2.f32 %v1736_v36  ;;  %v4662_v57 = vperm.slane %v1827_v9, 3  ;;  %v4665_v6 = vadd.f32 %v1889_v29, %v4578_v49 }
 0x218   : > { %v4547_v19 = vpop.f32.mrf.mxu0  ;;  %v1893_v63 = vmul.f32 %v2626_v15, %v4544_v22  ;;  %2633 = vpow2.f32 %v1738_v27 }
 0x219   : > { %v4553_v7 = vpop.f32.mrf.mxu1  ;;  %v1642_v18 = vmul.f32 2.0, %v4547_v19  ;;  %v4647_v19 = vadd.f32 %v1883_v58, %v4572_v23  ;;  %v4657_v23 = vadd.f32 %v1888_v20, %v4575_v42  ;;  %v4671_v42 = vadd.f32 %v1887_v26, %v4589_v13 }
 0x21a   : > { %v4556_v54 = vpop.f32.mrf.mxu2  ;;  %v1639_v50 = vmul.f32 2.0, %v4553_v7  ;;  %v4668_v7 = vadd.f32 %v1890_v11, %v4586_v25  ;;  %v4679_v20 = vadd.f32 %v1893_v63, %v4598_v51  ;;  %v1828_v51 = vsel %vm1817_vm0, %v4472_v35, %v4481_v52 }
 0x21b   : > { %v4562_v16 = vpop.f32.mrf.mxu3  ;;  %v1644_v47 = vmul.f32 2.0, %v4556_v54  ;;  %v1892_v54 = vmul.f32 %v2624_v32, %v4536_v59  ;;  %v1740_v48 = vmul.f32 1.442695, %v1642_v18  ;;  %v2628_v12 = vpop.eup %2627 }
 0x21c   : > { %v1645_v43 = vmul.f32 2.0, %v4562_v16  ;;  %v2630_v8 = vpop.eup %2629  ;;  %v1894_v13 = vmul.f32 %v2628_v12, %v4559_v0 }
 0x21d   : > { %v1744_v56 = vmul.f32 1.442695, %v1644_v47  ;;  %2635 = vpow2.f32 %v1740_v48  ;;  %v4676_v46 = vadd.f32 %v1892_v54, %v4595_v34  ;;  %v2632_v36 = vpop.eup %2631 }
 0x21e   : > { %v1746_v58 = vmul.f32 1.442695, %v1645_v43  ;;  %v2634_v29 = vpop.eup %2633  ;;  %v1896_v26 = vmul.f32 %v2632_v36, %v4536_v59 }
 0x21f   : > { %2637 = vpow2.f32 %v1744_v56  ;;  %v4690_v48 = vmul.f32 %v2634_v29, %v4544_v22 }
 0x220   : > { %v4583_v2 = vpop.f32.mrf.mxu0  ;;  %2639 = vpow2.f32 %v1746_v58 }
 0x221   : > { %v4592_v53 = vpop.f32.mrf.mxu1  ;;  %v1646_v40 = vmul.f32 2.0, %v4583_v2  ;;  %v1734_v2 = vmul.f32 1.442695, %v1639_v50 }
 0x222   : > { %v4601_v30 = vpop.f32.mrf.mxu2  ;;  %v1643_v16 = vmul.f32 2.0, %v4592_v53 }
 0x223   : > { %v4607_v5 = vpop.f32.mrf.mxu3  ;;  %v1648_v21 = vmul.f32 2.0, %v4601_v30  ;;  %v1748_v49 = vmul.f32 1.442695, %v1646_v40  ;;  %2641 = vpow2.f32 %v1734_v2  ;;  %v2636_v11 = vpop.eup %2635 }
 0x224   : > { %v1649_v53 = vmul.f32 2.0, %v4607_v5  ;;  %v1742_v18 = vmul.f32 1.442695, %v1643_v16  ;;  %v1891_v5 = vmul.f32 %v2630_v8, %v4581_v60  ;;  %v1898_v63 = vmul.f32 %v2636_v11, %v4632_v39 }
 0x225   : > { %v1752_v47 = vmul.f32 1.442695, %v1648_v21  ;;  %2643 = vpow2.f32 %v1748_v49  ;;  %v2638_v54 = vpop.eup %2637 }
 0x226   : > { %2645 = vpow2.f32 %v1742_v18  ;;  %v4696_v52 = vadd.f32 %v1891_v5, %v4610_v31  ;;  %v2640_v59 = vpop.eup %2639 }
 0x227   : > { %2647 = vpow2.f32 %v1752_v47 }
 0x228   : > { %v1448_v37 = vpop.f32.mrf.mxu0 }
 0x229   : > { %v1494_v38 = vpop.f32.mrf.mxu1  ;;  %v1650_v41 = vmul.f32 2.0, %v1448_v37  ;;  %v1754_v37 = vmul.f32 1.442695, %v1649_v53  ;;  %v4699_v16 = vpop.eup %2641 }
 0x22a   : > { %v1546_v3 = vpop.f32.mrf.mxu2  ;;  %v1647_v30 = vmul.f32 2.0, %v1494_v38  ;;  %v1830_v38 = vsel %vm1829_vm5, %v4483_v10, %v4485_v28 }
 0x22b   : > { %v1595_v44 = vpop.f32.mrf.mxu3  ;;  %v1652_v34 = vmul.f32 2.0, %v1546_v3  ;;  %v1756_v0 = vmul.f32 1.442695, %v1650_v41  ;;  %2649 = vpow2.f32 %v1754_v37  ;;  %v1832_v50 = vsel %vm1831_vm11, %v1828_v51, %v1830_v38  ;;  %v2644_v21 = vpop.eup %2643 }
 0x22c   : > { %v1653_v27 = vmul.f32 2.0, %v1595_v44  ;;  %v1750_v3 = vmul.f32 1.442695, %v1647_v30  ;;  %v4693_v44 = vadd.f32 %v1894_v13, %v4604_v62  ;;  %v1900_v62 = vmul.f32 %v2638_v54, %v4630_v33  ;;  %v2646_v49 = vpop.eup %2645 }
 0x22d   : > { %v1760_v35 = vmul.f32 1.442695, %v1652_v34  ;;  %2651 = vpow2.f32 %v1756_v0  ;;  %v1901_v13 = vmul.f32 %v2640_v59, %v4662_v57  ;;  %v2648_v18 = vpop.eup %2647  ;;  %v1902_v38 = vmul.f32 %v2644_v21, %v4632_v39 }
 0x22e   : > { %v1762_v10 = vmul.f32 1.442695, %v1653_v27  ;;  %2653 = vpow2.f32 %v1750_v3  ;;  %v1931_v27 = vadd.f32 %v4625_v17, %v1898_v63  ;;  %v1937_v51 = vadd.f32 %v4637_v1, %v1900_v62 }
 0x22f   : > { %2655 = vpow2.f32 %v1760_v35  ;;  %v1899_v54 = vmul.f32 %v2646_v49, %v4652_v24  ;;  %v1943_v49 = vadd.f32 %v4642_v14, %v1902_v38 }
 0x230   : > { %v1450_v9 = vpop.f32.mrf.mxu0  ;;  %2657 = vpow2.f32 %v1762_v10 }
 0x231   : > { %v1497_v25 = vpop.f32.mrf.mxu1  ;;  %v1654_v43 = vmul.f32 2.0, %v1450_v9  ;;  %v2650_v5 = vpop.eup %2649 }
 0x232   : > { %v1548_v32 = vpop.f32.mrf.mxu2  ;;  %v1651_v56 = vmul.f32 2.0, %v1497_v25  ;;  %v1833_v25 = vrot.slane %v1832_v50, 3  ;;  %v1905_v59 = vmul.f32 %v2650_v5, %v4662_v57 }
 0x233   : > { %v1597_v15 = vpop.f32.mrf.mxu3  ;;  %v1656_v12 = vmul.f32 2.0, %v1548_v32  ;;  %v1764_v58 = vmul.f32 1.442695, %v1654_v43  ;;  %v4704_v32 = vadd.f32 %v1896_v26, %v4615_v4  ;;  %v2652_v29 = vpop.eup %2651  ;;  %v1940_v26 = vadd.f32 %v4640_v45, %v1901_v13 }
 0x234   : > { %v1657_v8 = vmul.f32 2.0, %v1597_v15  ;;  %v1758_v30 = vmul.f32 1.442695, %v1651_v56  ;;  %v4706_v15 = vperm.slane %v1833_v25, 0  ;;  %v2654_v0 = vpop.eup %2653  ;;  %v4711_v4 = vperm.slane %v1833_v25, 1 }
 0x235   : > { %v1768_v47 = vmul.f32 1.442695, %v1656_v12  ;;  %v2656_v3 = vpop.eup %2655  ;;  %v1904_v43 = vmul.f32 %v2648_v18, %v4630_v33  ;;  %v4716_v50 = vperm.slane %v1833_v25, 2  ;;  %v4719_v62 = vperm.slane %v1833_v25, 3 }
 0x236   : > { %v1770_v37 = vmul.f32 1.442695, %v1657_v8  ;;  %v2658_v17 = vpop.eup %2657  ;;  %v1906_v38 = vmul.f32 %v2652_v29, %v4632_v39 }
 0x237   : > { %v1949_v5 = vadd.f32 %v4657_v23, %v1904_v43  ;;  %v1909_v29 = vmul.f32 %v2658_v17, %v4662_v57 }
 0x238   : > { %v1453_v28 = vpop.f32.mrf.mxu0 }
 0x239   : > { %v1658_v40 = vmul.f32 2.0, %v1453_v28  ;;  %v1499_v22 = vpop.f32.mrf.mxu1 }
 0x23a   : > { %v1551_v31 = vpop.f32.mrf.mxu2 }
 0x23b   : > { %v1660_v2 = vmul.f32 2.0, %v1551_v31  ;;  %v1600_v53 = vpop.f32.mrf.mxu3  ;;  %v1772_v9 = vmul.f32 1.442695, %v1658_v40  ;;  %v1655_v31 = vmul.f32 2.0, %v1499_v22 }
 0x23c   : > { %v1661_v41 = vmul.f32 2.0, %v1600_v53  ;;  %v1903_v53 = vmul.f32 %v2654_v0, %v4652_v24  ;;  %v1952_v0 = vadd.f32 %v4665_v6, %v1905_v59 }
 0x23d   : > { %v1776_v36 = vmul.f32 1.442695, %v1660_v2  ;;  %2659 = vpow2.f32 %v1772_v9 }
 0x23e   : > { %2661 = vpow2.f32 %v1764_v58  ;;  %v1778_v34 = vmul.f32 1.442695, %v1661_v41 }
 0x23f   : > { %2663 = vpow2.f32 %v1776_v36  ;;  %v1934_v36 = vadd.f32 %v4647_v19, %v1899_v54  ;;  %v1908_v19 = vmul.f32 %v2656_v3, %v4630_v33 }
 0x240   : > { %2665 = vpow2.f32 %v1778_v34  ;;  %v1455_v11 = vpop.f32.mrf.mxu0  ;;  %v1766_v34 = vmul.f32 1.442695, %v1655_v31 }
 0x241   : > { %2667 = vpow2.f32 %v1758_v30  ;;  %v1662_v35 = vmul.f32 2.0, %v1455_v11  ;;  %v1502_v10 = vpop.f32.mrf.mxu1 }
 0x242   : > { %2669 = vpow2.f32 %v1768_v47  ;;  %v1553_v1 = vpop.f32.mrf.mxu2  ;;  %v1659_v28 = vmul.f32 2.0, %v1502_v10 }
 0x243   : > { %v2660_v63 = vpop.eup %2659  ;;  %2671 = vpow2.f32 %v1770_v37  ;;  %v1664_v56 = vmul.f32 2.0, %v1553_v1  ;;  %v1602_v45 = vpop.f32.mrf.mxu3  ;;  %v1780_v40 = vmul.f32 1.442695, %v1662_v35 }
 0x244   : > { %v4721_v12 = vpop.eup %2661  ;;  %v1914_v58 = vmul.f32 %v2660_v63, %v4706_v15  ;;  %v1665_v21 = vmul.f32 2.0, %v1602_v45  ;;  %v1774_v8 = vmul.f32 1.442695, %v1659_v28 }
 0x245   : > { %v2664_v2 = vpop.eup %2663  ;;  %v1784_v9 = vmul.f32 1.442695, %v1664_v56  ;;  %2673 = vpow2.f32 %v1780_v40 }
 0x246   : > { %v2666_v41 = vpop.eup %2665  ;;  %v1786_v13 = vmul.f32 1.442695, %v1665_v21  ;;  %2675 = vpow2.f32 %v1774_v8  ;;  %v1916_v25 = vmul.f32 %v2664_v2, %v4716_v50  ;;  %v1932_v18 = vadd.f32 %v1931_v27, %v1914_v58 }
 0x247   : > { %v4727_v30 = vpop.eup %2667  ;;  %2677 = vpow2.f32 %v1784_v9  ;;  %v1917_v22 = vmul.f32 %v2666_v41, %v4719_v62  ;;  %v1961_v9 = vadd.f32 %v4676_v46, %v1908_v19 }
 0x248   : > { %v4732_v47 = vpop.eup %2669  ;;  %2679 = vpow2.f32 %v1786_v13  ;;  %v1458_v14 = vpop.f32.mrf.mxu0  ;;  %v4734_v37 = vadd.f32 %v1937_v51, %v1916_v25  ;;  %v4746_v51 = vadd.f32 %v4671_v42, %v1903_v53  ;;  %v1955_v42 = vadd.f32 %v4668_v7, %v1906_v38 }
 0x249   : > { %v4737_v27 = vpop.eup %2671  ;;  %v1666_v11 = vmul.f32 2.0, %v1458_v14  ;;  %v1504_v35 = vpop.f32.mrf.mxu1  ;;  %v4740_v10 = vadd.f32 %v1940_v26, %v1917_v22  ;;  %2681 = vlog2.f32 %v1932_v18  ;;  %v1964_v7 = vadd.f32 %v4679_v20, %v1909_v29 }
 0x24a   : > { %v1556_v23 = vpop.f32.mrf.mxu2  ;;  %v1663_v43 = vmul.f32 2.0, %v1504_v35  ;;  %2683 = vlog2.f32 %v4734_v37 }
 0x24b   : > { %v2674_v6 = vpop.eup %2673  ;;  %v1668_v54 = vmul.f32 2.0, %v1556_v23  ;;  %v1605_v1 = vpop.f32.mrf.mxu3  ;;  %v1788_v28 = vmul.f32 1.442695, %v1666_v11  ;;  %2685 = vlog2.f32 %v4740_v10 }
 0x24c   : > { %v2676_v26 = vpop.eup %2675  ;;  %2687 = vpow2.f32 %v1766_v34  ;;  %v1918_v3 = vmul.f32 %v2674_v6, %v4706_v15  ;;  %v1669_v59 = vmul.f32 2.0, %v1605_v1  ;;  %v1782_v63 = vmul.f32 1.442695, %v1663_v43 }
 0x24d   : > { %v2678_v56 = vpop.eup %2677  ;;  %v1915_v45 = vmul.f32 %v2676_v26, %v4711_v4  ;;  %v1792_v40 = vmul.f32 1.442695, %v1668_v54  ;;  %2689 = vpow2.f32 %v1788_v28 }
 0x24e   : > { %v2680_v58 = vpop.eup %2679  ;;  %v1794_v31 = vmul.f32 1.442695, %v1669_v59  ;;  %2691 = vpow2.f32 %v1782_v63  ;;  %v1920_v21 = vmul.f32 %v2678_v56, %v4716_v50  ;;  %v4754_v17 = vadd.f32 %v1943_v49, %v1918_v3 }
 0x24f   : > { %v2682_v8 = vpop.eup %2681  ;;  %2693 = vpow2.f32 %v1792_v40  ;;  %v1935_v2 = vadd.f32 %v1934_v36, %v1915_v45  ;;  %v1921_v53 = vmul.f32 %v2680_v58, %v4719_v62  ;;  %v1910_v58 = vmul.f32 %v4721_v12, %v4632_v39 }
 0x250   : > { %v2684_v41 = vpop.eup %2683  ;;  %2695 = vpow2.f32 %v1794_v31  ;;  %v1460_v13 = vpop.f32.mrf.mxu0  ;;  %v1979_v25 = vmul.f32 0.6931472, %v2682_v8  ;;  %v4758_v22 = vadd.f32 %v1949_v5, %v1920_v21 }
 0x251   : > { %v2686_v34 = vpop.eup %2685  ;;  %v1670_v14 = vmul.f32 2.0, %v1460_v13  ;;  %v1507_v38 = vpop.f32.mrf.mxu1  ;;  %v1983_v49 = vmul.f32 0.6931472, %v2684_v41  ;;  %v2026_v11 = vadd.f32 %v1935_v2, %v1932_v18  ;;  %2697 = vlog2.f32 %v1935_v2 }
 0x252   : > { %v4761_v35 = vpop.eup %2687  ;;  %v1558_v36 = vpop.f32.mrf.mxu2  ;;  %v1667_v23 = vmul.f32 2.0, %v1507_v38  ;;  %v1985_v43 = vmul.f32 0.6931472, %v2686_v34  ;;  %2010 = vst [vmem:[%s4763_s5] sm:$0xff] %v1979_v25  ;;  %v1953_v46 = vadd.f32 %v1952_v0, %v1921_v53  ;;  %2699 = vlog2.f32 %v4754_v17 }
 0x253   : > { %v2690_v20 = vpop.eup %2689  ;;  %v1672_v5 = vmul.f32 2.0, %v1558_v36  ;;  %v1607_v19 = vpop.f32.mrf.mxu3  ;;  %v1796_v6 = vmul.f32 1.442695, %v1670_v14  ;;  %v2027_v18 = vadd.f32 %v2026_v11, %v4734_v37  ;;  %2012 = vst [vmem:[%s4763_s5 + $0x10] sm:$0xff] %v1983_v49  ;;  %2701 = vlog2.f32 %v4758_v22 }
 0x254   : > { %v2692_v54 = vpop.eup %2691  ;;  %v1922_v1 = vmul.f32 %v2690_v20, %v4706_v15  ;;  %v1673_v28 = vmul.f32 2.0, %v1607_v19  ;;  %v1790_v29 = vmul.f32 1.442695, %v1667_v23  ;;  %2013 = vst [vmem:[%s4763_s5 + $0x18] sm:$0xff] %v1985_v43  ;;  %2703 = vlog2.f32 %v1953_v46 }
 0x255   : > { %v2694_v26 = vpop.eup %2693  ;;  %v1919_v0 = vmul.f32 %v2692_v54, %v4711_v4  ;;  %v1800_v3 = vmul.f32 1.442695, %v1672_v5  ;;  %2705 = vpow2.f32 %v1796_v6  ;;  %v2028_v59 = vadd.f32 %v2027_v18, %v4740_v10 }
 0x256   : > { %v2696_v63 = vpop.eup %2695  ;;  %v1802_v56 = vmul.f32 1.442695, %v1673_v28  ;;  %2707 = vpow2.f32 %v1790_v29  ;;  %v1924_v37 = vmul.f32 %v2694_v26, %v4716_v50  ;;  %v1956_v45 = vadd.f32 %v1955_v42, %v1922_v1 }
 0x257   : > { %v2698_v40 = vpop.eup %2697  ;;  %2709 = vpow2.f32 %v1800_v3  ;;  %2029 = vadd.xlane.f32.xlu1 %v2028_v59  ;;  %v1947_v31 = vadd.f32 %v4746_v51, %v1919_v0  ;;  %v1925_v21 = vmul.f32 %v2696_v63, %v4719_v62  ;;  %v1907_v10 = vmul.f32 %v4727_v30, %v4652_v24 }
 0x258   : > { %v2700_v8 = vpop.eup %2699  ;;  %2711 = vpow2.f32 %v1802_v56  ;;  %v1981_v2 = vmul.f32 0.6931472, %v2698_v40  ;;  %v1962_v53 = vadd.f32 %v1961_v9, %v1924_v37  ;;  %v1912_v51 = vmul.f32 %v4732_v47, %v4630_v33 }
 0x259   : > { %v2702_v42 = vpop.eup %2701  ;;  %v1509_v41 = vpop.f32.mrf.mxu1  ;;  %v1987_v13 = vmul.f32 0.6931472, %v2700_v8  ;;  %v2031_v39 = vadd.f32 %v1947_v31, %v4754_v17  ;;  %2713 = vlog2.f32 %v1947_v31  ;;  %v1965_v12 = vadd.f32 %v1964_v7, %v1925_v21 }
 0x25a   : > { %v2704_v25 = vpop.eup %2703  ;;  %2011 = vst [vmem:[%s4763_s5 + $0x8] sm:$0xff] %v1981_v2  ;;  %v1671_v34 = vmul.f32 2.0, %v1509_v41  ;;  %v1991_v14 = vmul.f32 0.6931472, %v2702_v42  ;;  %2715 = vlog2.f32 %v1956_v45  ;;  %v1913_v17 = vmul.f32 %v4737_v27, %v4662_v57 }
 0x25b   : > { %v2706_v30 = vpop.eup %2705  ;;  %v1993_v9 = vmul.f32 0.6931472, %v2704_v25  ;;  %v2032_v38 = vadd.f32 %v2031_v39, %v4758_v22  ;;  %2014 = vst [vmem:[%s4763_s5 + $0x20] sm:$0xff] %v1987_v13  ;;  %2717 = vlog2.f32 %v1962_v53  ;;  %v1967_v33 = vadd.f32 %v4693_v44, %v1910_v58  ;;  %v2078_v13 = vld [vmem:[%s4763_s5] sm:$0xff] (%p2807_p4)  ;;  %v2084_v25 = vld [vmem:[%s4763_s5 + $0x18] sm:$0xff] (%p2807_p4) }
 0x25c   : > { %v2708_v7 = vpop.eup %2707  ;;  %v1926_v49 = vmul.f32 %v2706_v30, %v4706_v15  ;;  %v1798_v11 = vmul.f32 1.442695, %v1671_v34  ;;  %2016 = vst [vmem:[%s4763_s5 + $0x30] sm:$0xff] %v1991_v14  ;;  %2719 = vlog2.f32 %v1965_v12  ;;  %v1958_v22 = vadd.f32 %v4696_v52, %v1907_v10 }
 0x25d   : > { %v2710_v47 = vpop.eup %2709  ;;  %v1923_v36 = vmul.f32 %v2708_v7, %v4711_v4  ;;  %v2033_v23 = vadd.f32 %v2032_v38, %v1953_v46  ;;  %2017 = vst [vmem:[%s4763_s5 + $0x38] sm:$0xff] %v1993_v9  ;;  %v1975_v43 = vadd.f32 %v4690_v48, %v4620_v61  ;;  %v1973_v27 = vadd.f32 %v4704_v32, %v1912_v51 }
 0x25e   : > { %v2712_v20 = vpop.eup %2711  ;;  %2721 = vpow2.f32 %v1798_v11  ;;  %v1928_v57 = vmul.f32 %v2710_v47, %v4716_v50  ;;  %v1968_v15 = vadd.f32 %v1967_v33, %v1926_v49  ;;  %v1895_v44 = vmul.f32 %v4699_v16, %v4581_v60  ;;  %2079 = vst [vmem:[%s2065_s14] sm:$0xff] (%p2807_p4), %v2078_v13 }
 0x25f   : > { %v2714_v5 = vpop.eup %2713  ;;  %2034 = vadd.xlane.f32.xlu2 %v2033_v23  ;;  %v1959_v46 = vadd.f32 %v1958_v22, %v1923_v36  ;;  %v1929_v19 = vmul.f32 %v2712_v20, %v4719_v62  ;;  %v1976_v52 = vadd.f32 %v1975_v43, %v1913_v17  ;;  %v1911_v61 = vmul.f32 %v4761_v35, %v4652_v24 }
 0x260   : > { %v2716_v6 = vpop.eup %2715  ;;  %v1989_v48 = vmul.f32 0.6931472, %v2714_v5  ;;  %v1974_v50 = vadd.f32 %v1973_v27, %v1928_v57  ;;  %2723 = vlog2.f32 %v1968_v15  ;;  %v1969_v62 = vadd.f32 %v1895_v44, %v4628_v55  ;;  %2085 = vst [vmem:[%s2065_s14 + $0x18] sm:$0xff] (%p2807_p4), %v2084_v25 }
 0x261   : > { %v2718_v32 = vpop.eup %2717  ;;  %v1995_v18 = vmul.f32 0.6931472, %v2716_v6  ;;  %v2036_v54 = vadd.f32 %v1959_v46, %v1956_v45  ;;  %2725 = vlog2.f32 %v1959_v46  ;;  %v1977_v60 = vadd.f32 %v1976_v52, %v1929_v19  ;;  %v2080_v39 = vld [vmem:[%s4763_s5 + $0x8] sm:$0xff] (%p2807_p4) }
 0x262   : > { %v2720_v16 = vpop.eup %2719  ;;  %2015 = vst [vmem:[%s4763_s5 + $0x28] sm:$0xff] %v1989_v48  ;;  %v1999_v1 = vmul.f32 0.6931472, %v2718_v32  ;;  %2727 = vlog2.f32 %v1974_v50  ;;  %v1970_v0 = vadd.f32 %v1969_v62, %v1911_v61  ;;  %v2086_v51 = vld [vmem:[%s4763_s5 + $0x20] sm:$0xff] (%p2807_p4) }
 0x263   : > { %v2001_v28 = vmul.f32 0.6931472, %v2720_v16  ;;  %v2037_v29 = vadd.f32 %v2036_v54, %v1962_v53  ;;  %2018 = vst [vmem:[%s4763_s5 + $0x40] sm:$0xff] %v1995_v18  ;;  %2729 = vlog2.f32 %v1977_v60  ;;  %v2090_v14 = vld [vmem:[%s4763_s5 + $0x30] sm:$0xff] (%p2807_p4) }
 0x264   : > { %v2722_v24 = vpop.eup %2721  ;;  %2020 = vst [vmem:[%s4763_s5 + $0x50] sm:$0xff] %v1999_v1  ;;  %v2092_v30 = vld [vmem:[%s4763_s5 + $0x38] sm:$0xff] (%p2807_p4) }
 0x265   : > { %v1927_v35 = vmul.f32 %v2722_v24, %v4711_v4  ;;  %v2038_v26 = vadd.f32 %v2037_v29, %v1965_v12  ;;  %2021 = vst [vmem:[%s4763_s5 + $0x58] sm:$0xff] %v2001_v28  ;;  %v2082_v12 = vld [vmem:[%s4763_s5 + $0x10] sm:$0xff] (%p2807_p4) }
 0x266   : > { %v2724_v3 = vpop.eup %2723  ;;  %2081 = vst [vmem:[%s2065_s14 + $0x8] sm:$0xff] (%p2807_p4), %v2080_v39 }
 0x267   : > { %v2726_v59 = vpop.eup %2725  ;;  %2039 = vadd.xlane.f32.xlu0 %v2038_v26  ;;  %v1971_v63 = vadd.f32 %v1970_v0, %v1927_v35  ;;  %v2003_v55 = vmul.f32 0.6931472, %v2724_v3  ;;  %2083 = vst [vmem:[%s2065_s14 + $0x10] sm:$0xff] (%p2807_p4), %v2082_v12 }
 0x268   : > { %v2728_v56 = vpop.eup %2727  ;;  %v1997_v37 = vmul.f32 0.6931472, %v2726_v59  ;;  %2087 = vst [vmem:[%s2065_s14 + $0x40] sm:$0xff] (%p2807_p4), %v2086_v51 }
 0x269   : > { %v2730_v45 = vpop.eup %2729  ;;  %v2007_v40 = vmul.f32 0.6931472, %v2728_v56  ;;  %v2041_v58 = vadd.f32 %v1971_v63, %v1968_v15  ;;  %2731 = vlog2.f32 %v1971_v63  ;;  %2022 = vst [vmem:[%s4763_s5 + $0x60] sm:$0xff] %v2003_v55  ;;  %v2088_v34 = vld [vmem:[%s4763_s5 + $0x28] sm:$0xff] (%p2807_p4) }
 0x26a   : > { %2019 = vst [vmem:[%s4763_s5 + $0x48] sm:$0xff] %v1997_v37  ;;  %v2009_v4 = vmul.f32 0.6931472, %v2730_v45  ;;  %v2094_v9 = vld [vmem:[%s4763_s5 + $0x40] sm:$0xff] (%p2807_p4) }
 0x26b   : > { %v2042_v31 = vadd.f32 %v2041_v58, %v1974_v50  ;;  %2024 = vst [vmem:[%s4763_s5 + $0x70] sm:$0xff] %v2007_v40  ;;  %v2098_v17 = vld [vmem:[%s4763_s5 + $0x50] sm:$0xff] (%p2807_p4) }
 0x26c   : > { %2025 = vst [vmem:[%s4763_s5 + $0x78] sm:$0xff] %v2009_v4  ;;  %v2100_v7 = vld [vmem:[%s4763_s5 + $0x58] sm:$0xff] (%p2807_p4) }
 0x26d   : > { %v2043_v21 = vadd.f32 %v2042_v31, %v1977_v60  ;;  %2089 = vst [vmem:[%s2065_s14 + $0x48] sm:$0xff] (%p2807_p4), %v2088_v34 }
 0x26e   : > { %2091 = vst [vmem:[%s2065_s14 + $0x50] sm:$0xff] (%p2807_p4), %v2090_v14 }
 0x26f   : > { %v2732_v8 = vpop.eup %2731  ;;  %2044 = vadd.xlane.f32.xlu1 %v2043_v21  ;;  %2093 = vst [vmem:[%s2065_s14 + $0x58] sm:$0xff] (%p2807_p4), %v2092_v30 }
 0x270   : > { %v2005_v10 = vmul.f32 0.6931472, %v2732_v8  ;;  %2095 = vst [vmem:[%s2065_s14 + $0x80] sm:$0xff] (%p2807_p4), %v2094_v9  ;;  %v2102_v49 = vld [vmem:[%s4763_s5 + $0x60] sm:$0xff] (%p2807_p4) }
 0x271   : > { %v2096_v38 = vld [vmem:[%s4763_s5 + $0x48] sm:$0xff] (%p2807_p4)  ;;  %2099 = vst [vmem:[%s2065_s14 + $0x90] sm:$0xff] (%p2807_p4), %v2098_v17 }
 0x272   : > { %2023 = vst [vmem:[%s4763_s5 + $0x68] sm:$0xff] %v2005_v10  ;;  %v2106_v33 = vld [vmem:[%s4763_s5 + $0x70] sm:$0xff] (%p2807_p4) }
 0x273   : > { %2097 = vst [vmem:[%s2065_s14 + $0x88] sm:$0xff] (%p2807_p4), %v2096_v38  ;;  %v2108_v47 = vld [vmem:[%s4763_s5 + $0x78] sm:$0xff] (%p2807_p4) }
 0x274   : > { %2101 = vst [vmem:[%s2065_s14 + $0x98] sm:$0xff] (%p2807_p4), %v2100_v7 }
 0x275   : > { %2103 = vst [vmem:[%s2065_s14 + $0xc0] sm:$0xff] (%p2807_p4), %v2102_v49 }
 0x276   : > { %2107 = vst [vmem:[%s2065_s14 + $0xd0] sm:$0xff] (%p2807_p4), %v2106_v33 }
 0x277   : > { %2109 = vst [vmem:[%s2065_s14 + $0xd8] sm:$0xff] (%p2807_p4), %v2108_v47 }
 0x279   : > { %v2104_v11 = vld [vmem:[%s4763_s5 + $0x68] sm:$0xff] (%p2807_p4) }
 0x27a   : > { %2105 = vst [vmem:[%s2065_s14 + $0xc8] sm:$0xff] (%p2807_p4), %v2104_v11 }
 0x2ca   : > { %v2030_v2 = vpop.xlane.xlu1 %2029 }
 0x2cb   : > { %2047 = vst.msk [vmem:[%s229_s10] sm:$0xff] %vm2046_vm15, %v2030_v2 }
 0x2d2   : > { %v2035_v53 = vpop.xlane.xlu2 %2034 }
 0x2d3   : > { %2048 = vst.msk [vmem:[%s229_s10 + $0x8] sm:$0xff] %vm2046_vm15, %v2035_v53 }
 0x2da   : > { %v2040_v42 = vpop.xlane.xlu0 %2039 }
 0x2db   : > { %2049 = vst.msk [vmem:[%s229_s10 + $0x10] sm:$0xff] %vm2046_vm15, %v2040_v42 }
 0x2df   : > { %2062 = sbr.rel (!%p2807_p4) target bundleno = 740 (0x2e4), region = 36 }
 0x2e2   : > { %v2045_v41 = vpop.xlane.xlu1 %2044 }
 0x2e3   : > { %2050 = vst.msk [vmem:[%s229_s10 + $0x18] sm:$0xff] %vm2046_vm15, %v2045_v41 }
 0x2e4 PF: > { %p12_p10 = scmp.ge.s32.totalorder %s2797_s19, 4   ;;  %s5036_s15 = smov %s2751_s16 }
 0x2e5   : > { %s5037_s16 = smov %s2805_s22  ;;  %s5038_s17 = smov %s2797_s19 }
 0x2e6   :  { %14 = sbr.rel (!%p12_p10) target bundleno = 2 (0x2), region = 100 }

// kernel: macridvae_forward.2
= control target key start
LH: loop header
LB: loop body
LE: loop exit
PB: predicated region body
PF: predicated region fallthrough
CT: control target
= control target key end

     0   :  { %s4345_s18 = smov 0   ;;  %s4347_s19 = smov 0   ;;  %s6825_s0 = inlined_call_operand.vmem [shape: bf16[32,1024], index: 0, kind: input, shape index: {}]   ;;  %s6826_s1 = inlined_call_operand.vmem [shape: bf16[1024,128], index: 1, kind: input, shape index: {}]   ;;  %s6827_s2 = inlined_call_operand.vmem [shape: f32[4,128], index: 2, kind: input, shape index: {}]   ;;  %s6828_s3 = inlined_call_operand.vmem [shape: bf16[1024,384], index: 3, kind: input, shape index: {}]   ;;  %s6829_s4 = inlined_call_operand.vmem [shape: f32[2,128,384], index: 4, kind: output, shape index: {0}]   ;;  %s6830_s5 = inlined_call_operand.vmem [shape: f32[4,1024], index: 5, kind: output, shape index: {1}]  }
   0x1   :  { %s4349_s20 = smov 0   ;;  %s4351_s21 = smov 0  }
   0x2   :  { %s4353_s22 = smov 0  }
   0x3 LB: > { %s28_s23 = sadd.s32 1, %s4309_s21  ;;  %p44_p1 = scmp.ne.s32.totalorder %s4301_s19, %s4297_s18  ;;  %s4313_s22 = sphi %s4353_s22, %s16_s22   ;;  %s4309_s21 = sphi %s4351_s21, %s7049_s21   ;;  %s4305_s20 = sphi %s4349_s20, %s7048_s20   ;;  %s4301_s19 = sphi %s4347_s19, %s7047_s19   ;;  %s4297_s18 = sphi %s4345_s18, %s7046_s18  }
   0x4   : > { %p30_p0 = scmp.ge.s32.totalorder %s28_s23, 2  ;;  %p45_p2 = scmp.eq.s32.totalorder %s4313_s22, 0 }
   0x5   : > { %s37_s25 = sadd.s32 1, %s4301_s19  ;;  %p3430_p5 = scmp.ge.s32.totalorder %s4313_s22, 2 }
   0x6   : > { %s7051_s23 = smov (%p30_p0, %s28_s23), 0  ;;  %p46_p3 = por %p45_p2, %p44_p1 }
   0x7   : > { %s34_s24 = ssub.s32 %s4309_s21, %s7051_s23  ;;  %204 = sbr.rel (%p3430_p5) target bundleno = 24 (0x18), region = 20 }
   0x8   : > { %p35_p4 = scmp.eq.s32.totalorder %s34_s24, 0 }
   0xa   : > { %s4380_s26 = scalar_select %p35_p4, %s4301_s19, %s37_s25  }
   0xc   : > { %207 = sbr.rel (!%p46_p3) target bundleno = 24 (0x18), region = 24  ;;  %s209_s27 = sand.u32 (%p46_p3), 1, %s4301_s19  }
   0xd   : > { %s3829_s28 = sshll.u32 (%p46_p3), %s4309_s21, 4  ;;  %s3431_s29 = sshll.u32 (%p46_p3), %s209_s27, 6 }
   0xe   : > { %s215_s7 = scalar_lea.vmem (%p46_p3), %s6825_s0, %s3829_s28  ;;  %s211_s8 = scalar_lea.vmem (%p46_p3), [#allocation2], %s3431_s29 }
   0xf   : > { %v228_v0 = vld [vmem:[%s215_s7] sm:$0xff] (%p46_p3)  ;;  %v230_v1 = vld [vmem:[%s215_s7 + $0x8] sm:$0xff] (%p46_p3) }
  0x10   : > { %v232_v2 = vld [vmem:[%s215_s7 + $0x20] sm:$0xff] (%p46_p3)  ;;  %229 = vst [vmem:[%s211_s8] sm:$0xff] (%p46_p3), %v228_v0  ;;  %v234_v3 = vld [vmem:[%s215_s7 + $0x28] sm:$0xff] (%p46_p3) }
  0x11   : > { %231 = vst [vmem:[%s211_s8 + $0x8] sm:$0xff] %v230_v1  ;;  %v236_v4 = vld [vmem:[%s215_s7 + $0x40] sm:$0xff]  ;;  %v238_v5 = vld [vmem:[%s215_s7 + $0x48] sm:$0xff] }
  0x12   : > { %233 = vst [vmem:[%s211_s8 + $0x10] sm:$0xff] %v232_v2  ;;  %v240_v6 = vld [vmem:[%s215_s7 + $0x60] sm:$0xff]  ;;  %v242_v7 = vld [vmem:[%s215_s7 + $0x68] sm:$0xff] }
  0x13   : > { %235 = vst [vmem:[%s211_s8 + $0x18] sm:$0xff] %v234_v3 }
  0x14   : > { %237 = vst [vmem:[%s211_s8 + $0x20] sm:$0xff] %v236_v4 }
  0x15   : > { %239 = vst [vmem:[%s211_s8 + $0x28] sm:$0xff] %v238_v5 }
  0x16   : > { %241 = vst [vmem:[%s211_s8 + $0x30] sm:$0xff] %v240_v6 }
  0x17   : > { %243 = vst [vmem:[%s211_s8 + $0x38] sm:$0xff] %v242_v7 }
  0x18 PF: > { %p3434_p6 = scmp.ge.s32.totalorder %s4313_s22, 1  ;;  %p271_p7 = scmp.lt.s32.totalorder %s4313_s22, 3 }
  0x1a   : > { %p272_p8 = pnand %p3434_p6, %p271_p7 }
  0x1c   : > { %275 = sbr.rel (%p272_p8) target bundleno = 1082 (0x43a), region = 55 }
  0x21   : > { %s3436_s9 = sshll.u32 %s4305_s20, 6  ;;  %s3441_s29 = sshll.u32 %s4305_s20, 2 }
  0x22   : > { %p328_p9 = scmp.lt.s32.totalorder %s3436_s9, 127  ;;  %s278_s30 = sand.u32 1, %s4297_s18  }
  0x23   : > { %s6139_s18 = sshll.u32 %s278_s30, 6  ;;  %p6175_p10 = scmp.lt.s32.totalorder %s3441_s29, 7 }
  0x24   : > { %s7053_s9 = smov (!%p328_p9, %s3436_s9), 127  ;;  %s6256_s7 = scalar_lea.vmem [#allocation2], %s6139_s18 }
  0x25   : > { %s3437_s10 = sshll.u32 %s7053_s9, 2  ;;  %s4085_s24 = smul.u32 12, %s7053_s9 }
  0x26   : > { %s4397_s13 = scalar_lea.vmem %s6826_s1, %s3437_s10  ;;  %s7055_s29 = smov (!%p6175_p10, %s3441_s29), 7 }
  0x27   : > { %v4084_v8 = vld [vmem:[%s4397_s13 + $0xf8] sm:$0xff]   ;;  %v4075_v24 = vld [vmem:[%s4397_s13 + $0xb0] sm:$0xff]   ;;  %v4074_v46 = vld [vmem:[%s4397_s13 + $0xa8] sm:$0xff]   ;;  %s6046_s28 = scalar_lea.vmem %s6828_s3, %s4085_s24  ;;  %s3442_s8 = sshll.u32 %s7055_s29, 2 }
  0x28   : > { %v4076_v9 = vld [vmem:[%s4397_s13 + $0xb8] sm:$0xff]   ;;  %v4402_v11 = vunpack.c.l.bf16 %v4084_v8  ;;  %v4414_v17 = vunpack.c.h.bf16 %v4084_v8  ;;  %v4432_v27 = vunpack.c.l.bf16 %v4075_v24  ;;  %v4083_v31 = vld [vmem:[%s4397_s13 + $0xf0] sm:$0xff]   ;;  %v4443_v33 = vunpack.c.h.bf16 %v4075_v24  ;;  %v4082_v53 = vld [vmem:[%s4397_s13 + $0xe8] sm:$0xff]   ;;  %s353_s11 = scalar_lea.vmem %s6830_s5, %s3442_s8  ;;  %p343_p11 = scmp.lt.s32.totalorder %s4305_s20, 1 }
  0x29   : > { %v4068_v10 = vld [vmem:[%s4397_s13 + $0x78] sm:$0xff]   ;;  %v4404_v12 = vunpack.c.l.bf16 %v4076_v9  ;;  %v4416_v18 = vunpack.c.h.bf16 %v4076_v9  ;;  %v4441_v32 = vunpack.c.l.bf16 %v4083_v31  ;;  %v4445_v34 = vunpack.c.h.bf16 %v4083_v31  ;;  %v4067_v38 = vld [vmem:[%s4397_s13 + $0x70] sm:$0xff]   ;;  %v4066_v54 = vld [vmem:[%s4397_s13 + $0x68] sm:$0xff]  }
  0x2a   : > { %v4406_v13 = vunpack.c.l.bf16 %v4068_v10  ;;  %v598_v14 = vmul.f32 %v4402_v11, %v4402_v11  ;;  %v4418_v19 = vunpack.c.h.bf16 %v4068_v10  ;;  %v599_v20 = vmul.f32 %v4414_v17, %v4414_v17  ;;  %v4060_v23 = vld [vmem:[%s4397_s13 + $0x38] sm:$0xff]   ;;  %v4059_v39 = vld [vmem:[%s4397_s13 + $0x30] sm:$0xff]   ;;  %v4058_v61 = vld [vmem:[%s4397_s13 + $0x28] sm:$0xff]   ;;  %s7057_s20 = smov (!%p343_p11, %s4305_s20), 1 }
  0x2b   : > { %v582_v15 = vmul.f32 %v4404_v12, %v4404_v12  ;;  %v583_v21 = vmul.f32 %v4416_v18, %v4416_v18  ;;  %v4428_v25 = vunpack.c.h.bf16 %v4060_v23  ;;  %v4430_v26 = vunpack.c.l.bf16 %v4060_v23  ;;  %v4073_v4 = vld [vmem:[%s4397_s13 + $0xa0] sm:$0xff]   ;;  %s4086_s12 = smul.u32 384, %s7057_s20 }
  0x2c   : > { %v566_v16 = vmul.f32 %v4406_v13, %v4406_v13  ;;  %724 = vadd.xlane.f32.xlu1 %v598_v14  ;;  %v567_v22 = vmul.f32 %v4418_v19, %v4418_v19  ;;  %v580_v30 = vmul.f32 %v4432_v27, %v4432_v27  ;;  %v596_v35 = vmul.f32 %v4441_v32, %v4441_v32  ;;  %v4081_v5 = vld [vmem:[%s4397_s13 + $0xe0] sm:$0xff]  }
  0x2d   : > { %692 = vadd.xlane.f32.xlu0 %v582_v15  ;;  %v551_v28 = vmul.f32 %v4428_v25, %v4428_v25  ;;  %v550_v29 = vmul.f32 %v4430_v26, %v4430_v26  ;;  %v581_v36 = vmul.f32 %v4443_v33, %v4443_v33  ;;  %v597_v37 = vmul.f32 %v4445_v34, %v4445_v34  ;;  %v4065_v15 = vld [vmem:[%s4397_s13 + $0x60] sm:$0xff]   ;;  %s6656_s15 = scalar_lea.vmem %s6829_s4, %s4086_s12 }
  0x2e   : > { %660 = vadd.xlane.f32.xlu2 %v566_v16  ;;  %v4455_v40 = vunpack.c.h.bf16 %v4067_v38  ;;  %v4457_v41 = vunpack.c.l.bf16 %v4067_v38  ;;  %v4459_v42 = vunpack.c.l.bf16 %v4059_v39  ;;  %v4468_v47 = vunpack.c.l.bf16 %v4074_v46 }
  0x2f   : > { %v4470_v48 = vunpack.c.h.bf16 %v4059_v39  ;;  %v4472_v49 = vunpack.c.h.bf16 %v4074_v46  ;;  %v4482_v55 = vunpack.c.h.bf16 %v4082_v53  ;;  %v4484_v56 = vunpack.c.l.bf16 %v4082_v53  ;;  %v4080_v39 = vld [vmem:[%s4397_s13 + $0xd8] sm:$0xff]  }
  0x30   : > { %v565_v43 = vmul.f32 %v4455_v40, %v4455_v40  ;;  %v564_v44 = vmul.f32 %v4457_v41, %v4457_v41  ;;  %v548_v45 = vmul.f32 %v4459_v42, %v4459_v42  ;;  %v578_v50 = vmul.f32 %v4468_v47, %v4468_v47  ;;  %v4056_v53 = vld [vmem:[%s4397_s13 + $0x18] sm:$0xff]  }
  0x31   : > { %v549_v51 = vmul.f32 %v4470_v48, %v4470_v48  ;;  %v579_v52 = vmul.f32 %v4472_v49, %v4472_v49  ;;  %v4486_v57 = vunpack.c.l.bf16 %v4066_v54  ;;  %v595_v58 = vmul.f32 %v4482_v55, %v4482_v55 }
  0x32   : > { %v594_v59 = vmul.f32 %v4484_v56, %v4484_v56  ;;  %v4495_v62 = vunpack.c.h.bf16 %v4066_v54  ;;  %v4497_v63 = vunpack.c.l.bf16 %v4058_v61  ;;  %v4499_v0 = vunpack.c.h.bf16 %v4058_v61 }
  0x33   : > { %v562_v60 = vmul.f32 %v4486_v57, %v4486_v57  ;;  %v4509_v6 = vunpack.c.l.bf16 %v4073_v4  ;;  %v4511_v7 = vunpack.c.h.bf16 %v4073_v4  ;;  %v4513_v8 = vunpack.c.l.bf16 %v4081_v5 }
  0x34   : > { %726 = vadd.xlane.f32.xlu1 %v599_v20  ;;  %v563_v1 = vmul.f32 %v4495_v62, %v4495_v62  ;;  %v546_v2 = vmul.f32 %v4497_v63, %v4497_v63  ;;  %v547_v3 = vmul.f32 %v4499_v0, %v4499_v0  ;;  %v4522_v16 = vunpack.c.h.bf16 %v4081_v5 }
  0x35   : > { %694 = vadd.xlane.f32.xlu0 %v583_v21  ;;  %6867 = vst [vmem:[#allocation3_spill] sm:$0xff] %v4509_v6  ;;  %v576_v9 = vmul.f32 %v4509_v6, %v4509_v6  ;;  %v577_v10 = vmul.f32 %v4511_v7, %v4511_v7  ;;  %v592_v14 = vmul.f32 %v4513_v8, %v4513_v8  ;;  %v4524_v20 = vunpack.c.l.bf16 %v4065_v15 }
  0x36   : > { %662 = vadd.xlane.f32.xlu2 %v567_v22  ;;  %6868 = vst [vmem:[#allocation4_spill] sm:$0xff] %v4511_v7  ;;  %v4526_v21 = vunpack.c.h.bf16 %v4065_v15  ;;  %v593_v22 = vmul.f32 %v4522_v16, %v4522_v16  ;;  %v4578_v4 = vunpack.c.h.bf16 %v4056_v53  ;;  %v4079_v15 = vld [vmem:[%s4397_s13 + $0xd0] sm:$0xff]  }
  0x37   : > { %6869 = vst [vmem:[#allocation5_spill] sm:$0xff] %v4513_v8  ;;  %v560_v23 = vmul.f32 %v4524_v20, %v4524_v20 }
  0x38   : > { %6870 = vst [vmem:[#allocation6_spill] sm:$0xff] %v4522_v16  ;;  %v561_v24 = vmul.f32 %v4526_v21, %v4526_v21 }
  0x39   : > { %6871 = vst [vmem:[#allocation7_spill] sm:$0xff] %v4524_v20 }
  0x3a   : > { %6872 = vst [vmem:[#allocation8_spill] sm:$0xff] %v4526_v21 }
  0x3b   : > { %6883 = vst [vmem:[#allocation19_spill] sm:$0xff] %v4578_v4 }
  0x3c   : > { %630 = vadd.xlane.f32.xlu1 %v551_v28  ;;  %v4057_v28 = vld [vmem:[%s4397_s13 + $0x20] sm:$0xff]  }
  0x3d   : > { %628 = vadd.xlane.f32.xlu0 %v550_v29  ;;  %v4072_v29 = vld [vmem:[%s4397_s13 + $0x98] sm:$0xff]   ;;  %v4538_v31 = vunpack.c.l.bf16 %v4057_v28 }
  0x3e   : > { %688 = vadd.xlane.f32.xlu2 %v580_v30  ;;  %v4536_v30 = vunpack.c.h.bf16 %v4057_v28 }
  0x3f   : > { %6874 = vst [vmem:[#allocation10_spill] sm:$0xff] %v4538_v31 }
  0x40   : > { %6873 = vst [vmem:[#allocation9_spill] sm:$0xff] %v4536_v30 }
  0x44   : > { %720 = vadd.xlane.f32.xlu1 %v596_v35  ;;  %v4540_v35 = vunpack.c.l.bf16 %v4072_v29 }
  0x45   : > { %690 = vadd.xlane.f32.xlu0 %v581_v36  ;;  %v545_v36 = vmul.f32 %v4536_v30, %v4536_v30 }
  0x46   : > { %722 = vadd.xlane.f32.xlu2 %v597_v37  ;;  %6875 = vst [vmem:[#allocation11_spill] sm:$0xff] %v4540_v35  ;;  %v544_v37 = vmul.f32 %v4538_v31, %v4538_v31  ;;  %v574_v38 = vmul.f32 %v4540_v35, %v4540_v35 }
  0x4c   : > { %658 = vadd.xlane.f32.xlu1 %v565_v43  ;;  %v4549_v43 = vunpack.c.l.bf16 %v4080_v39 }
  0x4d   : > { %656 = vadd.xlane.f32.xlu0 %v564_v44  ;;  %v4551_v44 = vunpack.c.h.bf16 %v4072_v29 }
  0x4e   : > { %624 = vadd.xlane.f32.xlu2 %v548_v45  ;;  %6876 = vst [vmem:[#allocation12_spill] sm:$0xff] %v4549_v43  ;;  %v4553_v45 = vunpack.c.h.bf16 %v4080_v39  ;;  %v590_v46 = vmul.f32 %v4549_v43, %v4549_v43 }
  0x4f   : > { %6877 = vst [vmem:[#allocation13_spill] sm:$0xff] %v4551_v44 }
  0x50   : > { %6878 = vst [vmem:[#allocation14_spill] sm:$0xff] %v4553_v45 }
  0x54   : > { %684 = vadd.xlane.f32.xlu1 %v578_v50  ;;  %v575_v50 = vmul.f32 %v4551_v44, %v4551_v44 }
  0x55   : > { %626 = vadd.xlane.f32.xlu0 %v549_v51  ;;  %v591_v51 = vmul.f32 %v4553_v45, %v4553_v45 }
  0x56   : > { %686 = vadd.xlane.f32.xlu2 %v579_v52  ;;  %v4064_v52 = vld [vmem:[%s4397_s13 + $0x58] sm:$0xff]  }
  0x57   : > { %v4563_v54 = vunpack.c.h.bf16 %v4064_v52 }
  0x59   : > { %6879 = vst [vmem:[#allocation15_spill] sm:$0xff] %v4563_v54 }
  0x5c   : > { %718 = vadd.xlane.f32.xlu1 %v595_v58  ;;  %v4565_v58 = vunpack.c.l.bf16 %v4064_v52 }
  0x5d   : > { %716 = vadd.xlane.f32.xlu0 %v594_v59  ;;  %v4567_v59 = vunpack.c.l.bf16 %v4056_v53 }
  0x5e   : > { %652 = vadd.xlane.f32.xlu2 %v562_v60  ;;  %6880 = vst [vmem:[#allocation16_spill] sm:$0xff] %v4565_v58  ;;  %v559_v60 = vmul.f32 %v4563_v54, %v4563_v54  ;;  %v558_v61 = vmul.f32 %v4565_v58, %v4565_v58 }
  0x5f   : > { %6881 = vst [vmem:[#allocation17_spill] sm:$0xff] %v4567_v59 }
  0x64   : > { %620 = vadd.xlane.f32.xlu1 %v546_v2  ;;  %v4071_v2 = vld [vmem:[%s4397_s13 + $0x90] sm:$0xff]  }
  0x65   : > { %654 = vadd.xlane.f32.xlu0 %v563_v1  ;;  %v542_v1 = vmul.f32 %v4567_v59, %v4567_v59  ;;  %v4580_v5 = vunpack.c.h.bf16 %v4071_v2 }
  0x66   : > { %622 = vadd.xlane.f32.xlu2 %v547_v3  ;;  %v4576_v3 = vunpack.c.l.bf16 %v4071_v2 }
  0x67   : > { %6884 = vst [vmem:[#allocation20_spill] sm:$0xff] %v4580_v5 }
  0x68   : > { %6882 = vst [vmem:[#allocation18_spill] sm:$0xff] %v4576_v3 }
  0x6c   : > { %682 = vadd.xlane.f32.xlu1 %v577_v10  ;;  %v543_v10 = vmul.f32 %v4578_v4, %v4578_v4 }
  0x6d   : > { %680 = vadd.xlane.f32.xlu0 %v576_v9  ;;  %v572_v9 = vmul.f32 %v4576_v3, %v4576_v3 }
  0x6e   : > { %712 = vadd.xlane.f32.xlu2 %v592_v14  ;;  %v573_v14 = vmul.f32 %v4580_v5, %v4580_v5 }
  0x74   : > { %648 = vadd.xlane.f32.xlu1 %v560_v23  ;;  %v4590_v23 = vunpack.c.h.bf16 %v4079_v15 }
  0x75   : > { %714 = vadd.xlane.f32.xlu0 %v593_v22  ;;  %v4063_v22 = vld [vmem:[%s4397_s13 + $0x50] sm:$0xff]  }
  0x76   : > { %650 = vadd.xlane.f32.xlu2 %v561_v24  ;;  %6885 = vst [vmem:[#allocation21_spill] sm:$0xff] %v4590_v23  ;;  %v4592_v24 = vunpack.c.l.bf16 %v4079_v15  ;;  %v4594_v28 = vunpack.c.l.bf16 %v4063_v22  ;;  %v589_v29 = vmul.f32 %v4590_v23, %v4590_v23  ;;  %v4603_v39 = vunpack.c.h.bf16 %v4063_v22  ;;  %v4078_v15 = vld [vmem:[%s4397_s13 + $0xc8] sm:$0xff]  }
  0x78   : > { %6886 = vst [vmem:[#allocation22_spill] sm:$0xff] %v4592_v24 }
  0x79   : > { %6887 = vst [vmem:[#allocation23_spill] sm:$0xff] %v4594_v28 }
  0x7a   : > { %6888 = vst [vmem:[#allocation24_spill] sm:$0xff] %v4603_v39 }
  0x7c   : > { %618 = vadd.xlane.f32.xlu1 %v545_v36  ;;  %v588_v36 = vmul.f32 %v4592_v24, %v4592_v24 }
  0x7d   : > { %616 = vadd.xlane.f32.xlu0 %v544_v37  ;;  %v556_v37 = vmul.f32 %v4594_v28, %v4594_v28 }
  0x7e   : > { %676 = vadd.xlane.f32.xlu2 %v574_v38  ;;  %v4055_v38 = vld [vmem:[%s4397_s13 + $0x10] sm:$0xff]  }
  0x84   : > { %708 = vadd.xlane.f32.xlu1 %v590_v46  ;;  %v4605_v46 = vunpack.c.l.bf16 %v4055_v38 }
  0x85   : > { %678 = vadd.xlane.f32.xlu0 %v575_v50  ;;  %v4607_v50 = vunpack.c.h.bf16 %v4055_v38 }
  0x86   : > { %710 = vadd.xlane.f32.xlu2 %v591_v51  ;;  %6889 = vst [vmem:[#allocation25_spill] sm:$0xff] %v4605_v46  ;;  %v540_v2 = vmul.f32 %v4605_v46, %v4605_v46 }
  0x87   : > { %6890 = vst [vmem:[#allocation26_spill] sm:$0xff] %v4607_v50 }
  0x8c   : > { %646 = vadd.xlane.f32.xlu1 %v559_v60 }
  0x8d   : > { %644 = vadd.xlane.f32.xlu0 %v558_v61 }
  0x8e   : > { %612 = vadd.xlane.f32.xlu2 %v542_v1  ;;  %v557_v1 = vmul.f32 %v4603_v39, %v4603_v39 }
  0x94   : > { %672 = vadd.xlane.f32.xlu1 %v572_v9 }
  0x95   : > { %614 = vadd.xlane.f32.xlu0 %v543_v10  ;;  %v541_v10 = vmul.f32 %v4607_v50, %v4607_v50 }
  0x96   : > { %674 = vadd.xlane.f32.xlu2 %v573_v14  ;;  %v4070_v14 = vld [vmem:[%s4397_s13 + $0x88] sm:$0xff]  }
  0x97   : > { %v4626_v22 = vunpack.c.l.bf16 %v4070_v14 }
  0x99   : > { %6891 = vst [vmem:[#allocation27_spill] sm:$0xff] %v4626_v22 }
  0x9c   : > { %706 = vadd.xlane.f32.xlu1 %v589_v29  ;;  %v4628_v29 = vunpack.c.h.bf16 %v4070_v14 }
  0x9d   : > { %704 = vadd.xlane.f32.xlu0 %v588_v36  ;;  %v4630_v36 = vunpack.c.l.bf16 %v4078_v15 }
  0x9e   : > { %640 = vadd.xlane.f32.xlu2 %v556_v37  ;;  %6892 = vst [vmem:[#allocation28_spill] sm:$0xff] %v4628_v29 }
  0x9f   : > { %v725_v51 = vpop.xlane.xlu1 %724  ;;  %6893 = vst [vmem:[#allocation29_spill] sm:$0xff] %v4630_v36  ;;  %v586_v50 = vmul.f32 %v4630_v36, %v4630_v36 }
  0xa0   : > { %v693_v52 = vpop.xlane.xlu0 %692  ;;  %v4609_v53 = vadd.f32 1e-12, %v725_v51 }
  0xa1   : > { %v4611_v60 = vadd.f32 1e-12, %v693_v52  ;;  %v661_v61 = vpop.xlane.xlu2 %660 }
  0xa2   : > { %v4617_v9 = vadd.f32 1e-12, %v661_v61  ;;  %4128 = vrsqrt.f32 %v4609_v53  ;;  %vm1418_vm7 = vweird.f32 %v4609_v53 }
  0xa3   : > { %4130 = vrsqrt.f32 %v4611_v60  ;;  %vm1258_vm5 = vweird.f32 %v4611_v60 }
  0xa4   : > { %4132 = vrsqrt.f32 %v4617_v9  ;;  %608 = vadd.xlane.f32.xlu1 %v540_v2  ;;  %v571_v2 = vmul.f32 %v4628_v29, %v4628_v29  ;;  %v4659_v29 = vunpack.c.h.bf16 %v4078_v15  ;;  %vm1098_vm0 = vweird.f32 %v4617_v9 }
  0xa5   : > { %642 = vadd.xlane.f32.xlu0 %v557_v1  ;;  %v570_v1 = vmul.f32 %v4626_v22, %v4626_v22 }
  0xa6   : > { %610 = vadd.xlane.f32.xlu2 %v541_v10  ;;  %v4062_v10 = vld [vmem:[%s4397_s13 + $0x48] sm:$0xff]   ;;  %6894 = vst [vmem:[#allocation30_spill] sm:$0xff] %v4659_v29  ;;  %v587_v58 = vmul.f32 %v4659_v29, %v4659_v29 }
  0xa7   : > { %v727_v37 = vpop.xlane.xlu1 %726  ;;  %v4661_v23 = vunpack.c.l.bf16 %v4062_v10  ;;  %v4668_v24 = vunpack.c.h.bf16 %v4062_v10 }
  0xa8   : > { %v695_v38 = vpop.xlane.xlu0 %694  ;;  %v4632_v51 = vpop.eup %4128  ;;  %v4634_v52 = vadd.f32 1e-12, %v727_v37  ;;  %v4653_v37 = vld [vmem:[%s4397_s13 + $0x80] sm:$0xff]  }
  0xa9   : > { %v4636_v61 = vadd.f32 1e-12, %v695_v38  ;;  %v663_v39 = vpop.xlane.xlu2 %662  ;;  %v4643_v14 = vpop.eup %4130  ;;  %v4054_v38 = vld [vmem:[%s4397_s13 + $0x8] sm:$0xff]   ;;  %6895 = vst [vmem:[#allocation31_spill] sm:$0xff] %v4661_v23  ;;  %v4671_v5 = vunpack.c.l.bf16 %v4653_v37  ;;  %vm1419_vm4 = vweird.f32 %v4632_v51 }
  0xaa   : > { %v4645_v28 = vadd.f32 1e-12, %v663_v39  ;;  %v4649_v46 = vpop.eup %4132  ;;  %4134 = vrsqrt.f32 %v4634_v52  ;;  %v1413_v39 = vmul.f32 %v4632_v51, %v4609_v53  ;;  %v1253_v36 = vmul.f32 %v4643_v14, %v4611_v60  ;;  %6896 = vst [vmem:[#allocation32_spill] sm:$0xff] %v4668_v24 }
  0xab   : > { %v1093_v22 = vmul.f32 %v4649_v46, %v4617_v9  ;;  %4136 = vrsqrt.f32 %v4636_v61  ;;  %6897 = vst [vmem:[#allocation33_spill] sm:$0xff] %v4671_v5  ;;  %v4673_v15 = vunpack.c.h.bf16 %v4054_v38  ;;  %v4676_v59 = vunpack.c.l.bf16 %v4054_v38 }
  0xac   : > { %4138 = vrsqrt.f32 %v4645_v28  ;;  %670 = vadd.xlane.f32.xlu1 %v571_v2  ;;  %v1414_v2 = vmul.f32 %v4632_v51, %v1413_v39  ;;  %v1254_v10 = vmul.f32 %v4643_v14, %v1253_v36  ;;  %v4698_v44 = vmul.f32 %v4671_v5, %v4671_v5 }
  0xad   : > { %668 = vadd.xlane.f32.xlu0 %v570_v1  ;;  %6898 = vst [vmem:[#allocation34_spill] sm:$0xff] %v4673_v15  ;;  %v1094_v3 = vmul.f32 %v4649_v46, %v1093_v22  ;;  %v554_v1 = vmul.f32 %v4661_v23, %v4661_v23  ;;  %v555_v23 = vmul.f32 %v4668_v24, %v4668_v24  ;;  %vm1268_vm1 = vweird.f32 %v4636_v61 }
  0xae   : > { %700 = vadd.xlane.f32.xlu2 %v586_v50  ;;  %6899 = vst [vmem:[#allocation35_spill] sm:$0xff] %v4676_v59  ;;  %v539_v36 = vmul.f32 %v4673_v15, %v4673_v15  ;;  %v538_v35 = vmul.f32 %v4676_v59, %v4676_v59  ;;  %v4077_v15 = vld [vmem:[%s4397_s13 + $0xc0] sm:$0xff]   ;;  %v1415_v31 = vmul.f32 0.5, %v1414_v2  ;;  %vm1108_vm2 = vweird.f32 %v4645_v28 }
  0xaf   : > { %v631_v4 = vpop.xlane.xlu1 %630  ;;  %v1095_v39 = vmul.f32 0.5, %v1094_v3  ;;  %v1255_v3 = vmul.f32 0.5, %v1254_v10  ;;  %vm1099_vm3 = vweird.f32 %v4649_v46  ;;  %vm1259_vm6 = vweird.f32 %v4643_v14 }
  0xb0   : > { %v629_v54 = vpop.xlane.xlu0 %628  ;;  %v4682_v50 = vpop.eup %4134  ;;  %v4686_v43 = vadd.f32 1e-12, %v631_v4  ;;  %v4725_v2 = vunpack.c.h.bf16 %v4077_v15  ;;  %vm4757_vm11 = vmor %vm1098_vm0, %vm1099_vm3  ;;  %vm1428_vm13 = vweird.f32 %v4634_v52 }
  0xb1   : > { %v689_v45 = vpop.xlane.xlu2 %688  ;;  %v4688_v22 = vadd.f32 1e-12, %v629_v54  ;;  %v4690_v38 = vpop.eup %4136  ;;  %v1423_v29 = vmul.f32 %v4682_v50, %v4634_v52  ;;  %v1256_v21 = vsub.f32 1.5, %v1255_v3  ;;  %vm1429_vm10 = vweird.f32 %v4682_v50  ;;  %vm4809_vm0 = vmor %vm1258_vm5, %vm1259_vm6 }
  0xb2   : > { %v4702_v4 = vpop.eup %4138  ;;  %v1263_v54 = vmul.f32 %v4690_v38, %v4636_v61  ;;  %4140 = vrsqrt.f32 %v4686_v43  ;;  %v4713_v30 = vadd.f32 1e-12, %v689_v45  ;;  %v1096_v45 = vsub.f32 1.5, %v1095_v39  ;;  %6900 = vst [vmem:[#allocation36_spill] sm:$0xff] %v4725_v2  ;;  %vm4794_vm15 = vmor %vm1428_vm13, %vm1429_vm10 }
  0xb3   : > { %v1424_v24 = vmul.f32 %v4682_v50, %v1423_v29  ;;  %v1103_v5 = vmul.f32 %v4702_v4, %v4645_v28  ;;  %4142 = vrsqrt.f32 %v4688_v22  ;;  %vm1109_vm8 = vweird.f32 %v4702_v4 }
  0xb4   : > { %v1264_v16 = vmul.f32 %v4690_v38, %v1263_v54  ;;  %636 = vadd.xlane.f32.xlu1 %v554_v1  ;;  %4144 = vrsqrt.f32 %v4713_v30  ;;  %v4729_v1 = vunpack.c.l.bf16 %v4077_v15  ;;  %v1416_v54 = vsub.f32 1.5, %v1415_v31  ;;  %vm4769_vm12 = vmor %vm1108_vm2, %vm1109_vm8 }
  0xb5   : > { %702 = vadd.xlane.f32.xlu0 %v587_v58  ;;  %v1425_v59 = vmul.f32 0.5, %v1424_v24  ;;  %v1104_v8 = vmul.f32 %v4702_v4, %v1103_v5  ;;  %v1097_v15 = vmul.f32 %v4649_v46, %v1096_v45  ;;  %vm1269_vm9 = vweird.f32 %v4690_v38 }
  0xb6   : > { %638 = vadd.xlane.f32.xlu2 %v555_v23  ;;  %v1265_v29 = vmul.f32 0.5, %v1264_v16  ;;  %6901 = vst [vmem:[#allocation37_spill] sm:$0xff] %v4729_v1  ;;  %v4746_v31 = vunpack.c.h.bf16 %v4653_v37  ;;  %vm4784_vm14 = vmor %vm1268_vm1, %vm1269_vm9  ;;  %v584_v52 = vmul.f32 %v4729_v1, %v4729_v1  ;;  %vm938_vm3 = vweird.f32 %v4688_v22 }
  0xb7   : > { %v1426_v58 = vsub.f32 1.5, %v1425_v59  ;;  %v1105_v24 = vmul.f32 0.5, %v1104_v8  ;;  %v721_v5 = vpop.xlane.xlu1 %720  ;;  %v1101_v60 = vsel %vm4757_vm11, %v4649_v46, %v1097_v15  ;;  %vm4831_vm1 = vmor %vm1418_vm7, %vm1419_vm4  ;;  %vm1238_vm6 = vweird.f32 %v4713_v30 }
  0xb8   : > { %v691_v23 = vpop.xlane.xlu0 %690  ;;  %v4731_v10 = vpop.eup %4140  ;;  %v4733_v16 = vadd.f32 1e-12, %v721_v5  ;;  %v1266_v7 = vsub.f32 1.5, %v1265_v29  ;;  %v569_v61 = vmul.f32 %v4746_v31, %v4746_v31  ;;  %vm948_vm7 = vweird.f32 %v4686_v43 }
  0xb9   : > { %v723_v39 = vpop.xlane.xlu2 %722  ;;  %v4735_v20 = vadd.f32 1e-12, %v691_v23  ;;  %v1106_v6 = vsub.f32 1.5, %v1105_v24  ;;  %v943_v8 = vmul.f32 %v4731_v10, %v4686_v43  ;;  %v4740_v59 = vpop.eup %4142  ;;  %v1427_v24 = vmul.f32 %v4682_v50, %v1426_v58 }
  0xba   : > { %v933_v3 = vmul.f32 %v4740_v59, %v4688_v22  ;;  %v4750_v29 = vadd.f32 1e-12, %v723_v39  ;;  %4146 = vrsqrt.f32 %v4733_v16  ;;  %v1257_v23 = vmul.f32 %v4643_v14, %v1256_v21  ;;  %v4774_v39 = vpop.eup %4144 }
  0xbb   : > { %v944_v37 = vmul.f32 %v4731_v10, %v943_v8  ;;  %4148 = vrsqrt.f32 %v4735_v20  ;;  %v1107_v5 = vmul.f32 %v4702_v4, %v1106_v6  ;;  %v1267_v6 = vmul.f32 %v4690_v38, %v1266_v7 }
  0xbc   : > { %606 = vadd.xlane.f32.xlu1 %v539_v36  ;;  %v934_v58 = vmul.f32 %v4740_v59, %v933_v3  ;;  %v1417_v21 = vmul.f32 %v4632_v51, %v1416_v54  ;;  %v585_v7 = vmul.f32 %v4725_v2, %v4725_v2  ;;  %4150 = vrsqrt.f32 %v4750_v29 }
  0xbd   : > { %604 = vadd.xlane.f32.xlu0 %v538_v35  ;;  %v1111_v28 = vsel %vm4769_vm12, %v4702_v4, %v1107_v5  ;;  %v1271_v3 = vsel %vm4784_vm14, %v4690_v38, %v1267_v6  ;;  %v1431_v5 = vsel %vm4794_vm15, %v4682_v50, %v1427_v24  ;;  %v1233_v9 = vmul.f32 %v4774_v39, %v4713_v30 }
  0xbe   : > { %664 = vadd.xlane.f32.xlu2 %v4698_v44  ;;  %v935_v36 = vmul.f32 0.5, %v934_v58  ;;  %v945_v58 = vmul.f32 0.5, %v944_v37  ;;  %v1261_v1 = vsel %vm4809_vm0, %v4643_v14, %v1257_v23  ;;  %v1463_v37 = vmul.f32 %v4418_v19, %v1111_v28 }
  0xbf   : > { %v659_v54 = vpop.xlane.xlu1 %658  ;;  %v1479_v46 = vmul.f32 %v4416_v18, %v1271_v3  ;;  %v1421_v14 = vsel %vm4831_vm1, %v4632_v51, %v1417_v21  ;;  %v1495_v23 = vmul.f32 %v4414_v17, %v1431_v5  ;;  %v1462_v35 = vmul.f32 %v4406_v13, %v1101_v60  ;;  %v1496_v60 = vld [vmem:[%s6827_s2] sm:$0xf] }
  0xc0   : > { %v657_v4 = vpop.xlane.xlu0 %656  ;;  %v4835_v50 = vpop.eup %4146  ;;  %v4837_v24 = vadd.f32 1e-12, %v659_v54  ;;  %v936_v45 = vsub.f32 1.5, %v935_v36  ;;  %v1478_v44 = vmul.f32 %v4404_v12, %v1261_v1  ;;  %v1234_v19 = vmul.f32 %v4774_v39, %v1233_v9 }
  0xc1   : > { %v625_v2 = vpop.xlane.xlu2 %624  ;;  %v4844_v15 = vpop.eup %4148  ;;  %v4846_v53 = vadd.f32 1e-12, %v657_v4  ;;  %v946_v18 = vsub.f32 1.5, %v945_v58  ;;  %v1393_v28 = vmul.f32 %v4835_v50, %v4733_v16  ;;  %v1494_v51 = vmul.f32 %v4402_v11, %v1421_v14 }
  0xc2   : > { %v4849_v6 = vadd.f32 1e-12, %v625_v2  ;;  %v4857_v21 = vpop.eup %4150  ;;  %v1243_v17 = vmul.f32 %v4844_v15, %v4735_v20  ;;  %4152 = vrsqrt.f32 %v4837_v24  ;;  %v1530_v13 = vpack.c.bf16 %v1463_v37, %v1462_v35 }
  0xc3   : > { %v1538_v2 = vpack.c.bf16 %v1479_v46, %v1478_v44  ;;  %4154 = vrsqrt.f32 %v4846_v53  ;;  %v1546_v12 = vpack.c.bf16 %v1495_v23, %v1494_v51  ;;  %v937_v1 = vmul.f32 %v4740_v59, %v936_v45 }
  0xc4   : > { %696 = vadd.xlane.f32.xlu1 %v584_v52  ;;  %vm939_vm2 = vweird.f32 %v4740_v59  ;;  %4156 = vrsqrt.f32 %v4849_v6  ;;  %1560 = vmatpush.bf16.xpose.msra.mxu1 %v1530_v13  ;;  %v1394_v4 = vmul.f32 %v4835_v50, %v1393_v28  ;;  %v1244_v8 = vmul.f32 %v4844_v15, %v1243_v17 }
  0xc5   : > { %666 = vadd.xlane.f32.xlu0 %v569_v61  ;;  %1573 = vmatpush.bf16.xpose.msra.mxu2 %v1538_v2  ;;  %v4866_v61 = vmul.f32 0.5, %v1234_v19  ;;  %vm4875_vm4 = vmor %vm938_vm3, %vm939_vm2  ;;  %v947_v5 = vmul.f32 %v4731_v10, %v946_v18  ;;  %vm949_vm5 = vweird.f32 %v4731_v10  ;;  %v1497_v18 = vmul.f32 %v1496_v60, %v1496_v60 }
  0xc6   : > { %698 = vadd.xlane.f32.xlu2 %v585_v7  ;;  %v1403_v7 = vmul.f32 %v4857_v21, %v4750_v29  ;;  %1586 = vmatpush.bf16.xpose.msra.mxu3 %v1546_v12  ;;  %v941_v9 = vsel %vm4875_vm4, %v4740_v59, %v937_v1  ;;  %vm950_vm8 = vmor %vm948_vm7, %vm949_vm5  ;;  %v4061_v59 = vld [vmem:[%s4397_s13 + $0x40] sm:$0xff]   ;;  %v1395_v23 = vmul.f32 0.5, %v1394_v4  ;;  %v1245_v43 = vmul.f32 0.5, %v1244_v8 }
  0xc7   : > { %v685_v11 = vpop.xlane.xlu1 %684  ;;  %v1236_v37 = vsub.f32 1.5, %v4866_v61  ;;  %v951_v35 = vsel %vm950_vm8, %v4731_v10, %v947_v5  ;;  %v1446_v44 = vmul.f32 %v4430_v26, %v941_v9  ;;  %vm6866_vm9 = vcmask 1043456  }
  0xc8   : > { %v627_v52 = vpop.xlane.xlu0 %626  ;;  %v4871_v36 = vadd.f32 1e-12, %v685_v11  ;;  %v4886_v58 = vpop.eup %4152  ;;  %v1404_v46 = vmul.f32 %v4857_v21, %v1403_v7  ;;  %v1447_v19 = vmul.f32 %v4428_v25, %v951_v35  ;;  %v4911_v17 = vunpack.c.h.bf16 %v4061_v59 }
  0xc9   : > { %v687_v54 = vpop.xlane.xlu2 %686  ;;  %v4881_v22 = vadd.f32 1e-12, %v627_v52  ;;  %v4893_v38 = vpop.eup %4154  ;;  %v1083_v28 = vmul.f32 %v4886_v58, %v4837_v24  ;;  %v4913_v13 = vunpack.c.l.bf16 %v4061_v59  ;;  %v1499_v12 = vsel %vm6866_vm9, %v1497_v18, 0.0 }
  0xca   : > { %4158 = vrsqrt.f32 %v4871_v36  ;;  %v4898_v14 = vadd.f32 1e-12, %v687_v54  ;;  %v4901_v45 = vpop.eup %4156  ;;  %v1073_v51 = vmul.f32 %v4893_v38, %v4846_v53  ;;  %v1522_v25 = vpack.c.bf16 %v1447_v19, %v1446_v44 }
  0xcb   : > { %4160 = vrsqrt.f32 %v4881_v22  ;;  %v913_v26 = vmul.f32 %v4901_v45, %v4849_v6  ;;  %vm1239_vm10 = vweird.f32 %v4774_v39  ;;  %v1396_v11 = vsub.f32 1.5, %v1395_v23 }
  0xcc   : > { %4162 = vrsqrt.f32 %v4898_v14  ;;  %v1246_v52 = vsub.f32 1.5, %v1245_v43  ;;  %v553_v61 = vmul.f32 %v4911_v17, %v4911_v17  ;;  %v1405_v54 = vmul.f32 0.5, %v1404_v46  ;;  %1547 = vmatpush.bf16.xpose.msra.mxu0 %v1522_v25  ;;  %vm4944_vm15 = vmor %vm1238_vm6, %vm1239_vm10 }
  0xcd   : > { %vm1408_vm11 = vweird.f32 %v4750_v29  ;;  %vm1398_vm12 = vweird.f32 %v4733_v16  ;;  %v552_v4 = vmul.f32 %v4913_v13, %v4913_v13  ;;  %vm1399_vm13 = vweird.f32 %v4835_v50 }
  0xce   : > { %1500 = vadd.xlane.f32.xlu2 %v1499_v12  ;;  %vm1249_vm14 = vweird.f32 %v4844_v15  ;;  %v1084_v8 = vmul.f32 %v4886_v58, %v1083_v28  ;;  %v1074_v3 = vmul.f32 %v4893_v38, %v1073_v51  ;;  %634 = vadd.xlane.f32.xlu1 %v553_v61  ;;  %v914_v9 = vmul.f32 %v4901_v45, %v913_v26  ;;  %vm4960_vm2 = vmor %vm1398_vm12, %vm1399_vm13 }
  0xcf   : > { %v719_v2 = vpop.xlane.xlu1 %718  ;;  %632 = vadd.xlane.f32.xlu0 %v552_v4  ;;  %v1237_v59 = vmul.f32 %v4774_v39, %v1236_v37  ;;  %vm1248_vm0 = vweird.f32 %v4735_v20  ;;  %v1247_v35 = vmul.f32 %v4844_v15, %v1246_v52  ;;  %v1397_v44 = vmul.f32 %v4835_v50, %v1396_v11 }
  0xd0   : > { %v717_v10 = vpop.xlane.xlu0 %716  ;;  %v4922_v7 = vpop.eup %4158  ;;  %v4935_v60 = vadd.f32 1e-12, %v719_v2  ;;  %v1406_v37 = vsub.f32 1.5, %v1405_v54  ;;  %vm1409_vm1 = vweird.f32 %v4857_v21  ;;  %vm1089_vm3 = vweird.f32 %v4886_v58  ;;  %vm4968_vm4 = vmor %vm1248_vm0, %vm1249_vm14  ;;  %v3927_v2 = vld [vmem:[%s4397_s13] sm:$0xff]  }
  0xd1   : > { %v653_v1 = vpop.xlane.xlu2 %652  ;;  %v4932_v5 = vpop.eup %4160  ;;  %v4937_v46 = vadd.f32 1e-12, %v717_v10  ;;  %v1213_v43 = vmul.f32 %v4922_v7, %v4871_v36  ;;  %v1085_v18 = vmul.f32 0.5, %v1084_v8  ;;  %v1075_v28 = vmul.f32 0.5, %v1074_v3  ;;  %vm1410_vm6 = vmor %vm1408_vm11, %vm1409_vm1 }
  0xd2   : > { %v4953_v19 = vpop.eup %4162  ;;  %v923_v51 = vmul.f32 %v4932_v5, %v4881_v22  ;;  %v1241_v16 = vsel %vm4944_vm15, %v4774_v39, %v1237_v59  ;;  %vm1088_vm5 = vweird.f32 %v4837_v24  ;;  %v4979_v25 = vmul.f32 0.5, %v914_v9 }
  0xd3   : > { %4164 = vrsqrt.f32 %v4937_v46  ;;  %v1251_v12 = vsel %vm4968_vm4, %v4844_v15, %v1247_v35  ;;  %v1401_v11 = vsel %vm4960_vm2, %v4835_v50, %v1397_v44  ;;  %v1214_v39 = vmul.f32 %v4922_v7, %v1213_v43  ;;  %vm5036_vm11 = vmor %vm1088_vm5, %vm1089_vm3 }
  0xd4   : > { %4166 = vrsqrt.f32 %v4935_v60  ;;  %v1223_v61 = vmul.f32 %v4953_v19, %v4898_v14  ;;  %v1476_v54 = vmul.f32 %v4432_v27, %v1241_v16  ;;  %v1477_v4 = vmul.f32 %v4443_v33, %v1251_v12 }
  0xd5   : > { %v4993_v8 = vadd.f32 1e-12, %v653_v1  ;;  %v1407_v3 = vmul.f32 %v4857_v21, %v1406_v37  ;;  %v4996_v9 = vunpack.c.h.bf16 %v3927_v2  ;;  %v4998_v15 = vunpack.c.l.bf16 %v3927_v2 }
  0xd6   : > { %v924_v50 = vmul.f32 %v4932_v5, %v923_v51  ;;  %v1537_v59 = vpack.c.bf16 %v1477_v4, %v1476_v54  ;;  %v1492_v27 = vmul.f32 %v4441_v32, %v1401_v11  ;;  %v1086_v29 = vsub.f32 1.5, %v1085_v18 }
  0xd7   : > { %v621_v26 = vpop.xlane.xlu1 %620  ;;  %v1411_v1 = vsel %vm1410_vm6, %v4857_v21, %v1407_v3  ;;  %v537_v43 = vmul.f32 %v4996_v9, %v4996_v9  ;;  %v536_v35 = vmul.f32 %v4998_v15, %v4998_v15  ;;  %v1076_v37 = vsub.f32 1.5, %v1075_v28 }
  0xd8   : > { %v655_v10 = vpop.xlane.xlu0 %654  ;;  %v5015_v44 = vadd.f32 1e-12, %v621_v26  ;;  %vm1079_vm7 = vweird.f32 %v4893_v38  ;;  %1574 = vmatpush.bf16.xpose.msra.mxu2 %v1537_v59  ;;  %v1493_v32 = vmul.f32 %v4445_v34, %v1411_v1  ;;  %v1215_v20 = vmul.f32 0.5, %v1214_v39 }
  0xd9   : > { %v623_v52 = vpop.xlane.xlu2 %622  ;;  %v5008_v33 = vpop.eup %4164  ;;  %v1224_v21 = vmul.f32 %v4953_v19, %v1223_v61  ;;  %4168 = vrsqrt.f32 %v4993_v8  ;;  %602 = vadd.xlane.f32.xlu1 %v537_v43  ;;  %600 = vadd.xlane.f32.xlu0 %v536_v35  ;;  %v5023_v51 = vadd.f32 1e-12, %v655_v10  ;;  %v925_v16 = vmul.f32 0.5, %v924_v50 }
  0xda   : > { %v5006_v23 = vadd.f32 1e-12, %v623_v52  ;;  %v5019_v30 = vpop.eup %4166  ;;  %v1373_v18 = vmul.f32 %v5008_v33, %v4937_v46  ;;  %v1545_v28 = vpack.c.bf16 %v1493_v32, %v1492_v27  ;;  %vm1078_vm8 = vweird.f32 %v4846_v53 }
  0xdb   : > { %v916_v26 = vsub.f32 1.5, %v4979_v25  ;;  %vm918_vm10 = vweird.f32 %v4849_v6  ;;  %vm919_vm12 = vweird.f32 %v4901_v45  ;;  %vm1218_vm13 = vweird.f32 %v4871_v36  ;;  %vm1080_vm15 = vmor %vm1078_vm8, %vm1079_vm7 }
  0xdc   : > { %4170 = vrsqrt.f32 %v5006_v23  ;;  %vm928_vm14 = vweird.f32 %v4881_v22  ;;  %1587 = vmatpush.bf16.xpose.msra.mxu3 %v1545_v28  ;;  %v1077_v53 = vmul.f32 %v4893_v38, %v1076_v37  ;;  %v1087_v25 = vmul.f32 %v4886_v58, %v1086_v29  ;;  %vm5078_vm3 = vmor %vm918_vm10, %vm919_vm12 }
  0xdd   : > { %4172 = vrsqrt.f32 %v5015_v44  ;;  %v1216_v11 = vsub.f32 1.5, %v1215_v20  ;;  %v1225_v24 = vmul.f32 0.5, %v1224_v21  ;;  %v1383_v52 = vmul.f32 %v5019_v30, %v4935_v60 }
  0xde   : > { %4174 = vrsqrt.f32 %v5023_v51  ;;  %v926_v39 = vsub.f32 1.5, %v925_v16  ;;  %v1374_v61 = vmul.f32 %v5008_v33, %v1373_v18  ;;  %v1081_v54 = vsel %vm1080_vm15, %v4893_v38, %v1077_v53 }
  0xdf   : > { %v683_v34 = vpop.xlane.xlu1 %682  ;;  %v1091_v4 = vsel %vm5036_vm11, %v4886_v58, %v1087_v25  ;;  %v5055_v3 = vpop.eup %4168  ;;  %v1460_v50 = vmul.f32 %v4457_v41, %v1081_v54  ;;  %v917_v1 = vmul.f32 %v4901_v45, %v916_v26  ;;  %vm1219_vm0 = vweird.f32 %v4922_v7 }
  0xe0   : > { %v681_v2 = vpop.xlane.xlu0 %680  ;;  %v1461_v59 = vmul.f32 %v4455_v40, %v1091_v4  ;;  %vm929_vm1 = vweird.f32 %v4932_v5  ;;  %vm1228_vm2 = vweird.f32 %v4898_v14  ;;  %v5067_v38 = vadd.f32 1e-12, %v683_v34  ;;  %vm5108_vm6 = vmor %vm1218_vm13, %vm1219_vm0 }
  0xe1   : > { %v713_v12 = vpop.xlane.xlu2 %712  ;;  %v5059_v27 = vadd.f32 1e-12, %v681_v2  ;;  %v1226_v35 = vsub.f32 1.5, %v1225_v24  ;;  %v1384_v41 = vmul.f32 %v5019_v30, %v1383_v52  ;;  %vm1229_vm4 = vweird.f32 %v4953_v19  ;;  %vm930_vm5 = vmor %vm928_vm14, %vm929_vm1 }
  0xe2   : > { %v5062_v43 = vpop.eup %4170  ;;  %v1529_v29 = vpack.c.bf16 %v1461_v59, %v1460_v50  ;;  %v1375_v32 = vmul.f32 0.5, %v1374_v61  ;;  %v1053_v20 = vmul.f32 %v5055_v3, %v4993_v8  ;;  %v921_v6 = vsel %vm5078_vm3, %v4901_v45, %v917_v1  ;;  %vm1230_vm12 = vmor %vm1228_vm2, %vm1229_vm4 }
  0xe3   : > { %v5069_v58 = vpop.eup %4172  ;;  %v903_v40 = vmul.f32 %v5062_v43, %v5006_v23  ;;  %4176 = vrsqrt.f32 %v5059_v27  ;;  %v927_v2 = vmul.f32 %v4932_v5, %v926_v39  ;;  %v1217_v34 = vmul.f32 %v4922_v7, %v1216_v11 }
  0xe4   : > { %v893_v21 = vmul.f32 %v5069_v58, %v5015_v44  ;;  %v5087_v28 = vpop.eup %4174  ;;  %1561 = vmatpush.bf16.xpose.msra.mxu1 %v1529_v29  ;;  %v5101_v25 = vadd.f32 1e-12, %v713_v12  ;;  %4178 = vrsqrt.f32 %v5067_v38  ;;  %v1385_v11 = vmul.f32 0.5, %v1384_v41 }
  0xe5   : > { %v904_v10 = vmul.f32 %v5062_v43, %v903_v40  ;;  %vm1378_vm7 = vweird.f32 %v4937_v46  ;;  %v931_v22 = vsel %vm930_vm5, %v4932_v5, %v927_v2  ;;  %v1227_v24 = vmul.f32 %v4953_v19, %v1226_v35 }
  0xe6   : > { %v894_v53 = vmul.f32 %v5069_v58, %v893_v21  ;;  %vm1388_vm8 = vweird.f32 %v4935_v60  ;;  %v1063_v12 = vmul.f32 %v5087_v28, %v5023_v51  ;;  %v1444_v52 = vmul.f32 %v4459_v42, %v921_v6 }
  0xe7   : > { %v649_v18 = vpop.xlane.xlu1 %648  ;;  %v1445_v36 = vmul.f32 %v4470_v48, %v931_v22  ;;  %v1221_v39 = vsel %vm5108_vm6, %v4922_v7, %v1217_v34  ;;  %vm1389_vm10 = vweird.f32 %v5019_v30  ;;  %v1376_v61 = vsub.f32 1.5, %v1375_v32 }
  0xe8   : > { %v715_v16 = vpop.xlane.xlu0 %714  ;;  %vm1379_vm11 = vweird.f32 %v5008_v33  ;;  %v1054_v5 = vmul.f32 %v5055_v3, %v1053_v20  ;;  %v905_v54 = vmul.f32 0.5, %v904_v10  ;;  %v895_v42 = vmul.f32 0.5, %v894_v53  ;;  %vm1390_vm4 = vmor %vm1388_vm8, %vm1389_vm10 }
  0xe9   : > { %v651_v26 = vpop.xlane.xlu2 %650  ;;  %4180 = vrsqrt.f32 %v5101_v25  ;;  %v1521_v48 = vpack.c.bf16 %v1445_v36, %v1444_v52  ;;  %v5131_v4 = vpop.eup %4176  ;;  %v1386_v7 = vsub.f32 1.5, %v1385_v11  ;;  %vm908_vm13 = vweird.f32 %v5006_v23  ;;  %vm1380_vm1 = vmor %vm1378_vm7, %vm1379_vm11 }
  0xea   : > { %v1231_v50 = vsel %vm1230_vm12, %v4953_v19, %v1227_v24  ;;  %v1474_v59 = vmul.f32 %v4468_v47, %v1221_v39  ;;  %v5136_v1 = vpop.eup %4178  ;;  %v1064_v35 = vmul.f32 %v5087_v28, %v1063_v12  ;;  %v5140_v41 = vadd.f32 1e-12, %v715_v16 }
  0xeb   : > { %1548 = vmatpush.bf16.xpose.msra.mxu0 %v1521_v48  ;;  %v1475_v14 = vmul.f32 %v4472_v49, %v1231_v50  ;;  %v5142_v40 = vadd.f32 1e-12, %v651_v26  ;;  %v1055_v32 = vmul.f32 0.5, %v1054_v5  ;;  %vm1058_vm14 = vweird.f32 %v4993_v8 }
  0xec   : > { %vm1059_vm15 = vweird.f32 %v5055_v3  ;;  %vm909_vm0 = vweird.f32 %v5062_v43  ;;  %v5147_v47 = vadd.f32 1e-12, %v649_v18  ;;  %v1377_v19 = vmul.f32 %v5008_v33, %v1376_v61 }
  0xed   : > { %v906_v21 = vsub.f32 1.5, %v905_v54  ;;  %v896_v49 = vsub.f32 1.5, %v895_v42  ;;  %v1536_v16 = vpack.c.bf16 %v1475_v14, %v1474_v59  ;;  %4182 = vrsqrt.f32 %v5140_v41  ;;  %vm5179_vm6 = vmor %vm908_vm13, %vm909_vm0 }
  0xee   : > { %vm899_vm2 = vweird.f32 %v5069_v58  ;;  %v1193_v6 = vmul.f32 %v5131_v4, %v5059_v27  ;;  %v1203_v18 = vmul.f32 %v5136_v1, %v5067_v38  ;;  %4184 = vrsqrt.f32 %v5142_v40  ;;  %vm5228_vm10 = vmor %vm1058_vm14, %vm1059_vm15 }
  0xef   : > { %v619_v29 = vpop.xlane.xlu1 %618  ;;  %v5161_v2 = vpop.eup %4180  ;;  %v1065_v34 = vmul.f32 0.5, %v1064_v35  ;;  %vm1068_vm3 = vweird.f32 %v5023_v51  ;;  %1575 = vmatpush.bf16.xpose.msra.mxu2 %v1536_v16  ;;  %4186 = vrsqrt.f32 %v5147_v47  ;;  %v1381_v46 = vsel %vm1380_vm1, %v5008_v33, %v1377_v19 }
  0xf0   : > { %v617_v37 = vpop.xlane.xlu0 %616  ;;  %v1387_v26 = vmul.f32 %v5019_v30, %v1386_v7  ;;  %v1056_v10 = vsub.f32 1.5, %v1055_v32  ;;  %vm898_vm5 = vweird.f32 %v5015_v44  ;;  %v1490_v53 = vmul.f32 %v4484_v56, %v1381_v46 }
  0xf1   : > { %v677_v20 = vpop.xlane.xlu2 %676  ;;  %v5173_v45 = vadd.f32 1e-12, %v619_v29  ;;  %v5184_v22 = vadd.f32 1e-12, %v617_v37  ;;  %v897_v60 = vmul.f32 %v5069_v58, %v896_v49  ;;  %v907_v44 = vmul.f32 %v5062_v43, %v906_v21  ;;  %vm5190_vm7 = vmor %vm898_vm5, %vm899_vm2 }
  0xf2   : > { %v1391_v11 = vsel %vm1390_vm4, %v5019_v30, %v1387_v26  ;;  %v1194_v23 = vmul.f32 %v5131_v4, %v1193_v6  ;;  %v1353_v24 = vmul.f32 %v5161_v2, %v5101_v25  ;;  %v1204_v12 = vmul.f32 %v5136_v1, %v1203_v18 }
  0xf3   : > { %v1491_v30 = vmul.f32 %v4482_v55, %v1391_v11  ;;  %v5199_v52 = vpop.eup %4182  ;;  %v1066_v36 = vsub.f32 1.5, %v1065_v34  ;;  %v5201_v39 = vadd.f32 1e-12, %v677_v20  ;;  %v901_v61 = vsel %vm5190_vm7, %v5069_v58, %v897_v60 }
  0xf4   : > { %v911_v5 = vsel %vm5179_vm6, %v5062_v43, %v907_v44  ;;  %v5209_v48 = vpop.eup %4184  ;;  %vm1069_vm8 = vweird.f32 %v5087_v28  ;;  %4188 = vrsqrt.f32 %v5173_v45  ;;  %v1057_v7 = vmul.f32 %v5055_v3, %v1056_v10 }
  0xf5   : > { %v1544_v55 = vpack.c.bf16 %v1491_v30, %v1490_v53  ;;  %v5214_v59 = vpop.eup %4186  ;;  %v1043_v58 = vmul.f32 %v5209_v48, %v5142_v40  ;;  %4190 = vrsqrt.f32 %v5184_v22  ;;  %v1442_v43 = vmul.f32 %v4497_v63, %v901_v61  ;;  %vm5240_vm11 = vmor %vm1068_vm3, %vm1069_vm8 }
  0xf6   : > { %v1443_v35 = vmul.f32 %v4499_v0, %v911_v5  ;;  %v1195_v14 = vmul.f32 0.5, %v1194_v23  ;;  %v1354_v29 = vmul.f32 %v5161_v2, %v1353_v24  ;;  %v1205_v37 = vmul.f32 0.5, %v1204_v12 }
  0xf7   : > { %v709_v54 = vpop.xlane.xlu1 %708  ;;  %v1033_v32 = vmul.f32 %v5214_v59, %v5147_v47  ;;  %1588 = vmatpush.bf16.xpose.msra.mxu3 %v1544_v55  ;;  %v1363_v63 = vmul.f32 %v5199_v52, %v5140_v41  ;;  %4192 = vrsqrt.f32 %v5201_v39  ;;  %v1067_v20 = vmul.f32 %v5087_v28, %v1066_v36 }
  0xf8   : > { %v679_v42 = vpop.xlane.xlu0 %678  ;;  %v1520_v0 = vpack.c.bf16 %v1443_v35, %v1442_v43  ;;  %v1044_v8 = vmul.f32 %v5209_v48, %v1043_v58  ;;  %v1061_v6 = vsel %vm5228_vm10, %v5055_v3, %v1057_v7  ;;  %v5254_v51 = vadd.f32 1e-12, %v709_v54 }
  0xf9   : > { %v711_v50 = vpop.xlane.xlu2 %710  ;;  %v1034_v16 = vmul.f32 %v5214_v59, %v1033_v32  ;;  %v1071_v18 = vsel %vm5240_vm11, %v5087_v28, %v1067_v20  ;;  %vm1198_vm12 = vweird.f32 %v5059_v27  ;;  %vm1199_vm13 = vweird.f32 %v5131_v4 }
  0xfa   : > { %v5245_v49 = vadd.f32 1e-12, %v711_v50  ;;  %1549 = vmatpush.bf16.xpose.msra.mxu0 %v1520_v0  ;;  %v5256_v34 = vpop.eup %4188  ;;  %vm1208_vm14 = vweird.f32 %v5067_v38  ;;  %v1196_v26 = vsub.f32 1.5, %v1195_v14  ;;  %v1355_v10 = vmul.f32 0.5, %v1354_v29  ;;  %vm5283_vm2 = vmor %vm1198_vm12, %vm1199_vm13  ;;  %v6938_v14 = vld [vmem:[#allocation3_spill] sm:$0xff] }
  0xfb   : > { %v5261_v46 = vpop.eup %4190  ;;  %v1206_v53 = vsub.f32 1.5, %v1205_v37  ;;  %v1364_v3 = vmul.f32 %v5199_v52, %v1363_v63  ;;  %v1045_v28 = vmul.f32 0.5, %v1044_v8  ;;  %v1458_v60 = vmul.f32 %v4486_v57, %v1061_v6  ;;  %v6939_v37 = vld [vmem:[#allocation4_spill] sm:$0xff] }
  0xfc   : > { %v1459_v44 = vmul.f32 %v4495_v62, %v1071_v18  ;;  %4194 = vrsqrt.f32 %v5245_v49  ;;  %vm1358_vm15 = vweird.f32 %v5101_v25  ;;  %vm1209_vm0 = vweird.f32 %v5136_v1 }
  0xfd   : > { %v5267_v23 = vpop.eup %4192  ;;  %v1035_v24 = vmul.f32 0.5, %v1034_v16  ;;  %v883_v12 = vmul.f32 %v5256_v34, %v5173_v45  ;;  %4196 = vrsqrt.f32 %v5254_v51  ;;  %vm1359_vm1 = vweird.f32 %v5161_v2  ;;  %vm1210_vm3 = vmor %vm1208_vm14, %vm1209_vm0 }
  0xfe   : > { %v873_v57 = vmul.f32 %v5261_v46, %v5184_v22  ;;  %v1528_v62 = vpack.c.bf16 %v1459_v44, %v1458_v60  ;;  %v5277_v30 = vadd.f32 1e-12, %v679_v42  ;;  %v1356_v61 = vsub.f32 1.5, %v1355_v10  ;;  %vm5344_vm12 = vmor %vm1358_vm15, %vm1359_vm1 }
  0xff   : > { %v647_v33 = vpop.xlane.xlu1 %646  ;;  %v1365_v5 = vmul.f32 0.5, %v1364_v3  ;;  %v1197_v54 = vmul.f32 %v5131_v4, %v1196_v26  ;;  %v1207_v55 = vmul.f32 %v5136_v1, %v1206_v53  ;;  %v1046_v7 = vsub.f32 1.5, %v1045_v28 }
 0x100   : > { %v645_v11 = vpop.xlane.xlu0 %644  ;;  %vm1048_vm4 = vweird.f32 %v5142_v40  ;;  %v1173_v42 = vmul.f32 %v5267_v23, %v5201_v39  ;;  %1562 = vmatpush.bf16.xpose.msra.mxu1 %v1528_v62  ;;  %4198 = vrsqrt.f32 %v5277_v30  ;;  %v1036_v27 = vsub.f32 1.5, %v1035_v24 }
 0x101   : > { %v613_v56 = vpop.xlane.xlu2 %612  ;;  %v884_v50 = vmul.f32 %v5256_v34, %v883_v12  ;;  %v1201_v58 = vsel %vm5283_vm2, %v5131_v4, %v1197_v54  ;;  %v1211_v43 = vsel %vm1210_vm3, %v5136_v1, %v1207_v55  ;;  %v874_v35 = vmul.f32 %v5261_v46, %v873_v57 }
 0x102   : > { %v5300_v38 = vpop.eup %4194  ;;  %v1472_v29 = vmul.f32 %v6938_v14, %v1201_v58  ;;  %v1473_v32 = vmul.f32 %v6939_v37, %v1211_v43  ;;  %v5305_v19 = vadd.f32 1e-12, %v645_v11  ;;  %v1366_v0 = vsub.f32 1.5, %v1365_v5  ;;  %v6946_v58 = vld [vmem:[#allocation5_spill] sm:$0xff] }
 0x103   : > { %v5307_v63 = vpop.eup %4196  ;;  %vm1369_vm5 = vweird.f32 %v5199_v52  ;;  %vm1038_vm6 = vweird.f32 %v5147_v47  ;;  %vm1039_vm7 = vweird.f32 %v5214_v59  ;;  %vm1049_vm8 = vweird.f32 %v5209_v48 }
 0x104   : > { %v1174_v20 = vmul.f32 %v5267_v23, %v1173_v42  ;;  %v1535_v21 = vpack.c.bf16 %v1473_v32, %v1472_v29  ;;  %v5314_v8 = vadd.f32 1e-12, %v647_v33  ;;  %v1333_v6 = vmul.f32 %v5307_v63, %v5254_v51  ;;  %vm1040_vm10 = vmor %vm1038_vm6, %vm1039_vm7 }
 0x105   : > { %v1037_v18 = vmul.f32 %v5214_v59, %v1036_v27  ;;  %v1047_v26 = vmul.f32 %v5209_v48, %v1046_v7  ;;  %v1357_v47 = vmul.f32 %v5161_v2, %v1356_v61  ;;  %v885_v53 = vmul.f32 0.5, %v884_v50  ;;  %vm5330_vm11 = vmor %vm1048_vm4, %vm1049_vm8  ;;  %v6945_v61 = vld [vmem:[#allocation8_spill] sm:$0xff] }
 0x106   : > { %v5321_v10 = vpop.eup %4198  ;;  %v875_v3 = vmul.f32 0.5, %v874_v35  ;;  %v1343_v11 = vmul.f32 %v5300_v38, %v5245_v49  ;;  %1576 = vmatpush.bf16.xpose.msra.mxu2 %v1535_v21  ;;  %4200 = vrsqrt.f32 %v5305_v19  ;;  %v5336_v60 = vadd.f32 1e-12, %v613_v56  ;;  %v6944_v56 = vld [vmem:[#allocation7_spill] sm:$0xff]  ;;  %v6947_v35 = vld [vmem:[#allocation6_spill] sm:$0xff] }
 0x107   : > { %v673_v4 = vpop.xlane.xlu1 %672  ;;  %v1183_v28 = vmul.f32 %v5321_v10, %v5277_v30  ;;  %v1041_v44 = vsel %vm1040_vm10, %v5214_v59, %v1037_v18  ;;  %v1367_v24 = vmul.f32 %v5199_v52, %v1366_v0  ;;  %vm1368_vm13 = vweird.f32 %v5140_v41 }
 0x108   : > { %v615_v1 = vpop.xlane.xlu0 %614  ;;  %v1051_v40 = vsel %vm5330_vm11, %v5209_v48, %v1047_v26  ;;  %v1456_v57 = vmul.f32 %v6944_v56, %v1041_v44  ;;  %v1334_v59 = vmul.f32 %v5307_v63, %v1333_v6  ;;  %4202 = vrsqrt.f32 %v5314_v8  ;;  %vm1370_vm14 = vmor %vm1368_vm13, %vm1369_vm5  ;;  %v6958_v26 = vld [vmem:[#allocation12_spill] sm:$0xff] }
 0x109   : > { %v675_v16 = vpop.xlane.xlu2 %674  ;;  %v1184_v62 = vmul.f32 %v5321_v10, %v1183_v28  ;;  %v1361_v25 = vsel %vm5344_vm12, %v5161_v2, %v1357_v47  ;;  %v1175_v41 = vmul.f32 0.5, %v1174_v20  ;;  %vm1178_vm15 = vweird.f32 %v5201_v39  ;;  %v6950_v28 = vld [vmem:[#allocation10_spill] sm:$0xff] }
 0x10a   : > { %v886_v36 = vsub.f32 1.5, %v885_v53  ;;  %v876_v48 = vsub.f32 1.5, %v875_v3  ;;  %v1457_v5 = vmul.f32 %v6945_v61, %v1051_v40  ;;  %v1344_v54 = vmul.f32 %v5300_v38, %v1343_v11 }
 0x10b   : > { %v1185_v55 = vmul.f32 0.5, %v1184_v62  ;;  %4204 = vrsqrt.f32 %v5336_v60  ;;  %v1371_v7 = vsel %vm1370_vm14, %v5199_v52, %v1367_v24  ;;  %v1488_v43 = vmul.f32 %v6946_v58, %v1361_v25  ;;  %v6951_v24 = vld [vmem:[#allocation9_spill] sm:$0xff] }
 0x10c   : > { %v5366_v2 = vpop.eup %4200  ;;  %v1527_v50 = vpack.c.bf16 %v1457_v5, %v1456_v57  ;;  %v1489_v14 = vmul.f32 %v6947_v35, %v1371_v7  ;;  %v5370_v29 = vadd.f32 1e-12, %v673_v4  ;;  %vm888_vm0 = vweird.f32 %v5173_v45 }
 0x10d   : > { %vm889_vm1 = vweird.f32 %v5256_v34  ;;  %vm878_vm2 = vweird.f32 %v5184_v22  ;;  %v1335_v32 = vmul.f32 0.5, %v1334_v59  ;;  %v1176_v52 = vsub.f32 1.5, %v1175_v41 }
 0x10e   : > { %vm1179_vm3 = vweird.f32 %v5267_v23  ;;  %vm879_vm4 = vweird.f32 %v5261_v46  ;;  %1563 = vmatpush.bf16.xpose.msra.mxu1 %v1527_v50  ;;  %v1543_v0 = vpack.c.bf16 %v1489_v14, %v1488_v43  ;;  %v5377_v20 = vpop.eup %4202  ;;  %v1345_v21 = vmul.f32 0.5, %v1344_v54  ;;  %vm5388_vm6 = vmor %vm888_vm0, %vm889_vm1  ;;  %v6956_v50 = vld [vmem:[#allocation11_spill] sm:$0xff]  ;;  %v6957_v43 = vld [vmem:[#allocation13_spill] sm:$0xff] }
 0x10f   : > { %v707_v42 = vpop.xlane.xlu1 %706  ;;  %vm1348_vm5 = vweird.f32 %v5245_v49  ;;  %v1013_v4 = vmul.f32 %v5366_v2, %v5305_v19  ;;  %v5382_v6 = vadd.f32 1e-12, %v615_v1  ;;  %v5384_v18 = vadd.f32 1e-12, %v675_v16  ;;  %vm880_vm7 = vmor %vm878_vm2, %vm879_vm4  ;;  %v6959_v49 = vld [vmem:[#allocation14_spill] sm:$0xff] }
 0x110   : > { %v705_v27 = vpop.xlane.xlu0 %704  ;;  %v1186_v47 = vsub.f32 1.5, %v1185_v55  ;;  %1589 = vmatpush.bf16.xpose.msra.mxu3 %v1543_v0  ;;  %4206 = vrsqrt.f32 %v5370_v29  ;;  %v877_v53 = vmul.f32 %v5261_v46, %v876_v48  ;;  %v887_v3 = vmul.f32 %v5256_v34, %v886_v36  ;;  %vm5425_vm12 = vmor %vm1178_vm15, %vm1179_vm3 }
 0x111   : > { %v641_v37 = vpop.xlane.xlu2 %640  ;;  %v5395_v11 = vpop.eup %4204  ;;  %v1336_v45 = vsub.f32 1.5, %v1335_v32  ;;  %vm1188_vm8 = vweird.f32 %v5277_v30  ;;  %vm1189_vm10 = vweird.f32 %v5321_v10  ;;  %4208 = vrsqrt.f32 %v5382_v6 }
 0x112   : > { %v1023_v1 = vmul.f32 %v5377_v20, %v5314_v8  ;;  %4210 = vrsqrt.f32 %v5384_v18  ;;  %v881_v16 = vsel %vm880_vm7, %v5261_v46, %v877_v53  ;;  %v891_v33 = vsel %vm5388_vm6, %v5256_v34, %v887_v3  ;;  %vm1190_vm14 = vmor %vm1188_vm8, %vm1189_vm10 }
 0x113   : > { %v1014_v22 = vmul.f32 %v5366_v2, %v1013_v4  ;;  %v1440_v44 = vmul.f32 %v6950_v28, %v881_v16  ;;  %v1441_v12 = vmul.f32 %v6951_v24, %v891_v33  ;;  %v5414_v40 = vadd.f32 1e-12, %v707_v42 }
 0x114   : > { %v1346_v59 = vsub.f32 1.5, %v1345_v21  ;;  %vm1339_vm11 = vweird.f32 %v5307_v63  ;;  %v1177_v46 = vmul.f32 %v5267_v23, %v1176_v52  ;;  %v1187_v62 = vmul.f32 %v5321_v10, %v1186_v47 }
 0x115   : > { %v853_v41 = vmul.f32 %v5395_v11, %v5336_v60  ;;  %v1519_v36 = vpack.c.bf16 %v1441_v12, %v1440_v44  ;;  %v5431_v48 = vadd.f32 1e-12, %v705_v27  ;;  %v1337_v61 = vmul.f32 %v5307_v63, %v1336_v45 }
 0x116   : > { %v5434_v5 = vpop.eup %4206  ;;  %vm1338_vm13 = vweird.f32 %v5254_v51  ;;  %v1024_v39 = vmul.f32 %v5377_v20, %v1023_v1  ;;  %v5442_v54 = vadd.f32 1e-12, %v641_v37  ;;  %v1181_v55 = vsel %vm5425_vm12, %v5267_v23, %v1177_v46 }
 0x117   : > { %v5416_v57 = vpop.xlane.xlu1 %608  ;;  %v5447_v7 = vpop.eup %4208  ;;  %vm1349_vm15 = vweird.f32 %v5300_v38  ;;  %vm5452_vm0 = vmor %vm1338_vm13, %vm1339_vm11  ;;  %v1015_v30 = vmul.f32 0.5, %v1014_v22  ;;  %1550 = vmatpush.bf16.xpose.msra.mxu0 %v1519_v36  ;;  %4212 = vrsqrt.f32 %v5414_v40  ;;  %v1191_v42 = vsel %vm1190_vm14, %v5321_v10, %v1187_v62 }
 0x118   : > { %v643_v56 = vpop.xlane.xlu0 %642  ;;  %v5458_v27 = vpop.eup %4210  ;;  %v863_v23 = vmul.f32 %v5447_v7, %v5382_v6  ;;  %v1470_v58 = vmul.f32 %v6956_v50, %v1181_v55  ;;  %v1471_v35 = vmul.f32 %v6957_v43, %v1191_v42  ;;  %v1341_v14 = vsel %vm5452_vm0, %v5307_v63, %v1337_v61  ;;  %vm1350_vm1 = vmor %vm1348_vm5, %vm1349_vm15 }
 0x119   : > { %v611_v25 = vpop.xlane.xlu2 %610  ;;  %v854_v37 = vmul.f32 %v5395_v11, %v853_v41  ;;  %v1153_v32 = vmul.f32 %v5434_v5, %v5370_v29  ;;  %4214 = vrsqrt.f32 %v5431_v48  ;;  %v1347_v10 = vmul.f32 %v5300_v38, %v1346_v59 }
 0x11a   : > { %v1025_v52 = vmul.f32 0.5, %v1024_v39  ;;  %4216 = vrsqrt.f32 %v5442_v54  ;;  %v1534_v0 = vpack.c.bf16 %v1471_v35, %v1470_v58  ;;  %v864_v63 = vmul.f32 %v5447_v7, %v863_v23  ;;  %v6960_v23 = vld [vmem:[#allocation16_spill] sm:$0xff] }
 0x11b   : > { %v1163_v21 = vmul.f32 %v5458_v27, %v5384_v18  ;;  %v1351_v4 = vsel %vm1350_vm1, %v5300_v38, %v1347_v10  ;;  %v1486_v47 = vmul.f32 %v6958_v26, %v1341_v14  ;;  %vm1028_vm2 = vweird.f32 %v5314_v8  ;;  %v6961_v14 = vld [vmem:[#allocation15_spill] sm:$0xff] }
 0x11c   : > { %1577 = vmatpush.bf16.xpose.msra.mxu2 %v1534_v0  ;;  %v1487_v45 = vmul.f32 %v6959_v49, %v1351_v4  ;;  %v5484_v1 = vadd.f32 1e-12, %v643_v56  ;;  %v1016_v22 = vsub.f32 1.5, %v1015_v30  ;;  %v855_v28 = vmul.f32 0.5, %v854_v37 }
 0x11d   : > { %v5486_v33 = vpop.eup %4212  ;;  %v1154_v44 = vmul.f32 %v5434_v5, %v1153_v32  ;;  %v5489_v24 = vadd.f32 1e-12, %v611_v25  ;;  %v1026_v38 = vsub.f32 1.5, %v1025_v52  ;;  %vm1018_vm3 = vweird.f32 %v5305_v19 }
 0x11e   : > { %vm1019_vm4 = vweird.f32 %v5366_v2  ;;  %vm858_vm5 = vweird.f32 %v5336_v60  ;;  %v865_v56 = vmul.f32 0.5, %v864_v63  ;;  %v1164_v59 = vmul.f32 %v5458_v27, %v1163_v21 }
 0x11f   : > { %v671_v3 = vpop.xlane.xlu1 %670  ;;  %v5494_v12 = vpop.eup %4214  ;;  %v1542_v46 = vpack.c.bf16 %v1487_v45, %v1486_v47  ;;  %4218 = vrsqrt.f32 %v5484_v1  ;;  %vm1029_vm6 = vweird.f32 %v5377_v20  ;;  %vm859_vm7 = vweird.f32 %v5395_v11  ;;  %vm1020_vm11 = vmor %vm1018_vm3, %vm1019_vm4 }
 0x120   : > { %v669_v53 = vpop.xlane.xlu0 %668  ;;  %v5498_v62 = vpop.eup %4216  ;;  %vm868_vm8 = vweird.f32 %v5382_v6  ;;  %4220 = vrsqrt.f32 %v5489_v24  ;;  %v856_v25 = vsub.f32 1.5, %v855_v28  ;;  %v1155_v34 = vmul.f32 0.5, %v1154_v44  ;;  %vm1030_vm13 = vmor %vm1028_vm2, %vm1029_vm6 }
 0x121   : > { %v701_v16 = vpop.xlane.xlu2 %700  ;;  %vm1158_vm10 = vweird.f32 %v5370_v29  ;;  %1590 = vmatpush.bf16.xpose.msra.mxu3 %v1542_v46  ;;  %v5506_v41 = vadd.f32 1e-12, %v5416_v57  ;;  %v1017_v36 = vmul.f32 %v5366_v2, %v1016_v22  ;;  %vm1159_vm12 = vweird.f32 %v5434_v5  ;;  %vm5553_vm1 = vmor %vm858_vm5, %vm859_vm7  ;;  %v6967_v46 = vld [vmem:[#allocation17_spill] sm:$0xff] }
 0x122   : > { %v1323_v61 = vmul.f32 %v5486_v33, %v5414_v40  ;;  %v1313_v39 = vmul.f32 %v5494_v12, %v5431_v48  ;;  %v1027_v55 = vmul.f32 %v5377_v20, %v1026_v38  ;;  %v866_v57 = vsub.f32 1.5, %v865_v56  ;;  %vm5581_vm3 = vmor %vm1158_vm10, %vm1159_vm12  ;;  %v6966_v38 = vld [vmem:[#allocation19_spill] sm:$0xff] }
 0x123   : > { %v1165_v51 = vmul.f32 0.5, %v1164_v59  ;;  %vm1168_vm14 = vweird.f32 %v5384_v18  ;;  %4222 = vrsqrt.f32 %v5506_v41  ;;  %v1021_v19 = vsel %vm1020_vm11, %v5366_v2, %v1017_v36 }
 0x124   : > { %v993_v30 = vmul.f32 %v5498_v62, %v5442_v54  ;;  %v1031_v42 = vsel %vm1030_vm13, %v5377_v20, %v1027_v55  ;;  %v1454_v50 = vmul.f32 %v6960_v23, %v1021_v19  ;;  %v5530_v58 = vadd.f32 1e-12, %v669_v53  ;;  %v6970_v19 = vld [vmem:[#allocation18_spill] sm:$0xff] }
 0x125   : > { %v5534_v8 = vpop.eup %4218  ;;  %v1156_v35 = vsub.f32 1.5, %v1155_v34  ;;  %vm869_vm15 = vweird.f32 %v5447_v7  ;;  %v1455_v37 = vmul.f32 %v6961_v14, %v1031_v42  ;;  %v5538_v32 = vadd.f32 1e-12, %v701_v16 }
 0x126   : > { %v5542_v52 = vpop.eup %4220  ;;  %vm1169_vm0 = vweird.f32 %v5458_v27  ;;  %v1314_v20 = vmul.f32 %v5494_v12, %v1313_v39  ;;  %v5546_v0 = vadd.f32 1e-12, %v671_v3  ;;  %v857_v63 = vmul.f32 %v5395_v11, %v856_v25  ;;  %vm870_vm2 = vmor %vm868_vm8, %vm869_vm15 }
 0x127   : > { %v5540_v10 = vpop.xlane.xlu1 %636  ;;  %v1324_v4 = vmul.f32 %v5486_v33, %v1323_v61  ;;  %v843_v26 = vmul.f32 %v5542_v52, %v5489_v24  ;;  %v1526_v47 = vpack.c.bf16 %v1455_v37, %v1454_v50  ;;  %v867_v53 = vmul.f32 %v5447_v7, %v866_v57  ;;  %vm5608_vm7 = vmor %vm1168_vm14, %vm1169_vm0 }
 0x128   : > { %v703_v2 = vpop.xlane.xlu0 %702  ;;  %v1166_v3 = vsub.f32 1.5, %v1165_v51  ;;  %v994_v60 = vmul.f32 %v5498_v62, %v993_v30  ;;  %4224 = vrsqrt.f32 %v5530_v58  ;;  %v861_v49 = vsel %vm5553_vm1, %v5395_v11, %v857_v63 }
 0x129   : > { %v5532_v43 = vpop.xlane.xlu2 %638  ;;  %v5570_v45 = vpop.eup %4222  ;;  %v1003_v16 = vmul.f32 %v5534_v8, %v5484_v1  ;;  %1564 = vmatpush.bf16.xpose.msra.mxu1 %v1526_v47  ;;  %4226 = vrsqrt.f32 %v5538_v32  ;;  %v871_v6 = vsel %vm870_vm2, %v5447_v7, %v867_v53  ;;  %v1157_v22 = vmul.f32 %v5434_v5, %v1156_v35 }
 0x12a   : > { %v1315_v11 = vmul.f32 0.5, %v1314_v20  ;;  %v833_v44 = vmul.f32 %v5570_v45, %v5506_v41  ;;  %4228 = vrsqrt.f32 %v5546_v0  ;;  %v1439_v56 = vmul.f32 %v6966_v38, %v871_v6  ;;  %v6972_v38 = vld [vmem:[#allocation22_spill] sm:$0xff] }
 0x12b   : > { %v1325_v59 = vmul.f32 0.5, %v1324_v4  ;;  %v844_v7 = vmul.f32 %v5542_v52, %v843_v26  ;;  %v1438_v25 = vmul.f32 %v6967_v46, %v861_v49  ;;  %v1161_v29 = vsel %vm5581_vm3, %v5434_v5, %v1157_v22 }
 0x12c   : > { %vm1328_vm4 = vweird.f32 %v5414_v40  ;;  %vm1329_vm5 = vweird.f32 %v5486_v33  ;;  %vm1318_vm6 = vweird.f32 %v5431_v48  ;;  %v834_v34 = vmul.f32 %v5570_v45, %v833_v44  ;;  %v6973_v40 = vld [vmem:[#allocation21_spill] sm:$0xff] }
 0x12d   : > { %v5598_v36 = vmul.f32 0.5, %v994_v60  ;;  %v1004_v61 = vmul.f32 %v5534_v8, %v1003_v16  ;;  %v1518_v39 = vpack.c.bf16 %v1439_v56, %v1438_v25  ;;  %v1167_v55 = vmul.f32 %v5458_v27, %v1166_v3  ;;  %vm1330_vm15 = vmor %vm1328_vm4, %vm1329_vm5 }
 0x12e   : > { %v5602_v57 = vpop.eup %4224  ;;  %v1316_v51 = vsub.f32 1.5, %v1315_v11  ;;  %vm1319_vm8 = vweird.f32 %v5494_v12  ;;  %v1468_v30 = vmul.f32 %v6970_v19, %v1161_v29  ;;  %v5614_v42 = vadd.f32 1e-12, %v703_v2  ;;  %v6971_v2 = vld [vmem:[#allocation20_spill] sm:$0xff] }
 0x12f   : > { %v5616_v50 = vpop.eup %4226  ;;  %v1326_v35 = vsub.f32 1.5, %v1325_v59  ;;  %v845_v14 = vmul.f32 0.5, %v844_v7  ;;  %vm848_vm10 = vweird.f32 %v5489_v24  ;;  %1551 = vmatpush.bf16.xpose.msra.mxu0 %v1518_v39  ;;  %v1171_v18 = vsel %vm5608_vm7, %v5458_v27, %v1167_v55  ;;  %v607_v37 = vpop.xlane.xlu1 %606  ;;  %vm1320_vm14 = vmor %vm1318_vm6, %vm1319_vm8 }
 0x130   : > { %v605_v20 = vpop.xlane.xlu0 %604  ;;  %v5622_v63 = vpop.eup %4228  ;;  %v835_v21 = vmul.f32 0.5, %v834_v34  ;;  %vm838_vm11 = vweird.f32 %v5506_v41  ;;  %v1469_v4 = vmul.f32 %v6971_v2, %v1171_v18  ;;  %4230 = vrsqrt.f32 %v5614_v42 }
 0x131   : > { %v665_v23 = vpop.xlane.xlu2 %664  ;;  %v996_v26 = vsub.f32 1.5, %v5598_v36  ;;  %v5628_v47 = vmul.f32 0.5, %v1004_v61  ;;  %v1133_v53 = vmul.f32 %v5602_v57, %v5530_v58  ;;  %v5633_v27 = vadd.f32 1e-12, %v5532_v43 }
 0x132   : > { %vm998_vm12 = vweird.f32 %v5442_v54  ;;  %vm999_vm13 = vweird.f32 %v5498_v62  ;;  %v1293_v3 = vmul.f32 %v5616_v50, %v5538_v32  ;;  %v1533_v60 = vpack.c.bf16 %v1469_v4, %v1468_v30 }
 0x133   : > { %v5640_v49 = vadd.f32 1e-12, %v5540_v10  ;;  %v1317_v16 = vmul.f32 %v5494_v12, %v1316_v51  ;;  %v846_v43 = vsub.f32 1.5, %v845_v14  ;;  %v1143_v6 = vmul.f32 %v5622_v63, %v5546_v0 }
 0x134   : > { %4232 = vrsqrt.f32 %v5633_v27  ;;  %v1327_v22 = vmul.f32 %v5486_v33, %v1326_v35  ;;  %v836_v10 = vsub.f32 1.5, %v835_v21  ;;  %1578 = vmatpush.bf16.xpose.msra.mxu2 %v1533_v60  ;;  %v5657_v28 = vadd.f32 1e-12, %v665_v23 }
 0x135   : > { %4234 = vrsqrt.f32 %v5640_v49  ;;  %v1321_v48 = vsel %vm1320_vm14, %v5494_v12, %v1317_v16  ;;  %v1134_v11 = vmul.f32 %v5602_v57, %v1133_v53  ;;  %v5662_v59 = vadd.f32 1e-12, %v607_v37  ;;  %v6977_v53 = vld [vmem:[#allocation26_spill] sm:$0xff] }
 0x136   : > { %v1331_v44 = vsel %vm1330_vm15, %v5486_v33, %v1327_v22  ;;  %v1484_v56 = vmul.f32 %v6972_v38, %v1321_v48  ;;  %v5664_v7 = vpop.eup %4230  ;;  %vm1008_vm0 = vweird.f32 %v5484_v1  ;;  %vm839_vm1 = vweird.f32 %v5570_v45 }
 0x137   : > { %v1485_v46 = vmul.f32 %v6973_v40, %v1331_v44  ;;  %4236 = vrsqrt.f32 %v5657_v28  ;;  %v5670_v12 = vadd.f32 1e-12, %v605_v20  ;;  %vm849_vm2 = vweird.f32 %v5542_v52  ;;  %vm5686_vm4 = vmor %vm838_vm11, %vm839_vm1  ;;  %v697_v30 = vpop.xlane.xlu1 %696 }
 0x138   : > { %v1294_v33 = vmul.f32 %v5616_v50, %v1293_v3  ;;  %v1144_v25 = vmul.f32 %v5622_v63, %v1143_v6  ;;  %4238 = vrsqrt.f32 %v5662_v59  ;;  %v1006_v29 = vsub.f32 1.5, %v5628_v47  ;;  %v667_v23 = vpop.xlane.xlu0 %666  ;;  %vm850_vm5 = vmor %vm848_vm10, %vm849_vm2  ;;  %v6976_v47 = vld [vmem:[#allocation25_spill] sm:$0xff] }
 0x139   : > { %v1541_v34 = vpack.c.bf16 %v1485_v46, %v1484_v56  ;;  %4240 = vrsqrt.f32 %v5670_v12  ;;  %v837_v36 = vmul.f32 %v5570_v45, %v836_v10  ;;  %v699_v61 = vpop.xlane.xlu2 %698  ;;  %vm1009_vm3 = vweird.f32 %v5534_v8  ;;  %vm5727_vm10 = vmor %vm998_vm12, %vm999_vm13 }
 0x13a   : > { %v5679_v39 = vpop.eup %4232  ;;  %v5690_v5 = vmul.f32 0.5, %v1134_v11  ;;  %v1303_v51 = vmul.f32 %v5664_v7, %v5614_v42  ;;  %v847_v19 = vmul.f32 %v5542_v52, %v846_v43  ;;  %vm1139_vm6 = vweird.f32 %v5602_v57  ;;  %vm1010_vm12 = vmor %vm1008_vm0, %vm1009_vm3 }
 0x13b   : > { %v5695_v35 = vpop.eup %4234  ;;  %v983_v41 = vmul.f32 %v5679_v39, %v5633_v27  ;;  %1591 = vmatpush.bf16.xpose.msra.mxu3 %v1541_v34  ;;  %v841_v14 = vsel %vm5686_vm4, %v5570_v45, %v837_v36  ;;  %v997_v18 = vmul.f32 %v5498_v62, %v996_v26  ;;  %v5708_v37 = vmul.f32 0.5, %v1294_v33  ;;  %v6981_v36 = vld [vmem:[#allocation24_spill] sm:$0xff] }
 0x13c   : > { %v1145_v20 = vmul.f32 0.5, %v1144_v25  ;;  %vm1149_vm7 = vweird.f32 %v5622_v63  ;;  %v973_v24 = vmul.f32 %v5695_v35, %v5640_v49  ;;  %v851_v21 = vsel %vm850_vm5, %v5542_v52, %v847_v19 }
 0x13d   : > { %v5714_v2 = vpop.eup %4236  ;;  %vm1138_vm8 = vweird.f32 %v5530_v58  ;;  %v984_v4 = vmul.f32 %v5679_v39, %v983_v41  ;;  %v1436_v45 = vmul.f32 %v6976_v47, %v841_v14  ;;  %v1437_v26 = vmul.f32 %v6977_v53, %v851_v21 }
 0x13e   : > { %v1007_v3 = vmul.f32 %v5534_v8, %v1006_v29  ;;  %v5721_v60 = vpop.eup %4238  ;;  %v1136_v16 = vsub.f32 1.5, %v5690_v5  ;;  %vm1148_vm11 = vweird.f32 %v5546_v0  ;;  %v1304_v43 = vmul.f32 %v5664_v7, %v1303_v51  ;;  %v6980_v29 = vld [vmem:[#allocation23_spill] sm:$0xff]  ;;  %vm1140_vm4 = vmor %vm1138_vm8, %vm1139_vm6 }
 0x13f   : > { %v974_v6 = vmul.f32 %v5695_v35, %v973_v24  ;;  %v1113_v22 = vmul.f32 %v5714_v2, %v5657_v28  ;;  %v5737_v10 = vpop.eup %4240  ;;  %v823_v54 = vmul.f32 %v5721_v60, %v5662_v59  ;;  %v1517_v48 = vpack.c.bf16 %v1437_v26, %v1436_v45  ;;  %vm1150_vm5 = vmor %vm1148_vm11, %vm1149_vm7 }
 0x140   : > { %v1001_v11 = vsel %vm5727_vm10, %v5498_v62, %v997_v18  ;;  %v5744_v44 = vadd.f32 1e-12, %v699_v61  ;;  %v1296_v38 = vsub.f32 1.5, %v5708_v37  ;;  %v985_v56 = vmul.f32 0.5, %v984_v4 }
 0x141   : > { %vm988_vm13 = vweird.f32 %v5633_v27  ;;  %v975_v40 = vmul.f32 0.5, %v974_v6  ;;  %v1146_v46 = vsub.f32 1.5, %v1145_v20  ;;  %vm978_vm14 = vweird.f32 %v5640_v49  ;;  %1552 = vmatpush.bf16.xpose.msra.mxu0 %v1517_v48  ;;  %v1501_v51 = vpop.xlane.xlu2 %1500  ;;  %v635_v18 = vpop.xlane.xlu1 %634 }
 0x142   : > { %v813_v33 = vmul.f32 %v5737_v10, %v5670_v12  ;;  %v1011_v62 = vsel %vm1010_vm12, %v5534_v8, %v1007_v3  ;;  %v1114_v25 = vmul.f32 %v5714_v2, %v1113_v22  ;;  %v824_v1 = vmul.f32 %v5721_v60, %v823_v54  ;;  %v633_v20 = vpop.xlane.xlu0 %632  ;;  %v6982_v3 = vld [vmem:[#allocation27_spill] sm:$0xff] }
 0x143   : > { %v1452_v34 = vmul.f32 %v6980_v29, %v1001_v11  ;;  %v1453_v61 = vmul.f32 %v6981_v36, %v1011_v62  ;;  %v5760_v55 = vmul.f32 0.5, %v1304_v43  ;;  %vm989_vm15 = vweird.f32 %v5679_v39  ;;  %v6988_v29 = vld [vmem:[#allocation31_spill] sm:$0xff] }
 0x144   : > { %4242 = vrsqrt.f32 %v5744_v44  ;;  %v5764_v5 = vadd.f32 1e-12, %v697_v30  ;;  %vm1298_vm0 = vweird.f32 %v5538_v32  ;;  %vm1299_vm1 = vweird.f32 %v5616_v50  ;;  %vm5808_vm6 = vmor %vm988_vm13, %vm989_vm15 }
 0x145   : > { %v986_v8 = vsub.f32 1.5, %v985_v56  ;;  %v976_v19 = vsub.f32 1.5, %v975_v40  ;;  %v1525_v41 = vpack.c.bf16 %v1453_v61, %v1452_v34  ;;  %v5768_v14 = vadd.f32 1e-12, %v667_v23 }
 0x146   : > { %vm1309_vm2 = vweird.f32 %v5664_v7  ;;  %vm979_vm3 = vweird.f32 %v5695_v35  ;;  %v814_v24 = vmul.f32 %v5737_v10, %v813_v33  ;;  %4244 = vrsqrt.f32 %v5764_v5 }
 0x147   : > { %v1137_v30 = vmul.f32 %v5602_v57, %v1136_v16  ;;  %v5779_v21 = vmul.f32 0.5, %v1114_v25  ;;  %v5781_v23 = vmul.f32 0.5, %v824_v1  ;;  %1565 = vmatpush.bf16.xpose.msra.mxu1 %v1525_v41  ;;  %4246 = vrsqrt.f32 %v5768_v14  ;;  %vm5818_vm7 = vmor %vm978_vm14, %vm979_vm3 }
 0x148   : > { %v1147_v4 = vmul.f32 %v5622_v63, %v1146_v46  ;;  %vm1308_vm10 = vweird.f32 %v5614_v42  ;;  %v5791_v58 = vadd.f32 1e-12, %v1501_v51  ;;  %v5793_v45 = vadd.f32 1e-12, %v635_v18 }
 0x149   : > { %v1141_v47 = vsel %vm1140_vm4, %v5602_v57, %v1137_v30  ;;  %v5795_v53 = vadd.f32 1e-12, %v633_v20  ;;  %v977_v16 = vmul.f32 %v5695_v35, %v976_v19  ;;  %v987_v43 = vmul.f32 %v5679_v39, %v986_v8  ;;  %vm5881_vm15 = vmor %vm1308_vm10, %vm1309_vm2 }
 0x14a   : > { %v1151_v26 = vsel %vm1150_vm5, %v5622_v63, %v1147_v4  ;;  %v1466_v52 = vmul.f32 %v6982_v3, %v1141_v47  ;;  %v5801_v0 = vpop.eup %4242  ;;  %v1306_v6 = vsub.f32 1.5, %v5760_v55  ;;  %v815_v22 = vmul.f32 0.5, %v814_v24  ;;  %v6985_v63 = vld [vmem:[#allocation28_spill] sm:$0xff] }
 0x14b   : > { %v1467_v54 = vmul.f32 %v6985_v63, %v1151_v26  ;;  %4248 = vrsqrt.f32 %v5791_v58  ;;  %v1116_v11 = vsub.f32 1.5, %v5779_v21  ;;  %vm1118_vm8 = vweird.f32 %v5657_v28 }
 0x14c   : > { %vm1119_vm11 = vweird.f32 %v5714_v2  ;;  %vm819_vm12 = vweird.f32 %v5737_v10  ;;  %v1283_v27 = vmul.f32 %v5801_v0, %v5744_v44  ;;  %4250 = vrsqrt.f32 %v5793_v45  ;;  %v5829_v56 = vpop.eup %4244  ;;  %v603_v41 = vpop.xlane.xlu1 %602 }
 0x14d   : > { %vm829_vm13 = vweird.f32 %v5721_v60  ;;  %vm818_vm14 = vweird.f32 %v5670_v12  ;;  %v1532_v49 = vpack.c.bf16 %v1467_v54, %v1466_v52  ;;  %4252 = vrsqrt.f32 %v5795_v53  ;;  %v5840_v33 = vpop.eup %4246  ;;  %v601_v57 = vpop.xlane.xlu0 %600  ;;  %v6994_v54 = vld [vmem:[#allocation29_spill] sm:$0xff] }
 0x14e   : > { %v981_v40 = vsel %vm5818_vm7, %v5695_v35, %v977_v16  ;;  %v991_v46 = vsel %vm5808_vm6, %v5679_v39, %v987_v43  ;;  %v826_v62 = vsub.f32 1.5, %v5781_v23  ;;  %v1284_v25 = vmul.f32 %v5801_v0, %v1283_v27  ;;  %v6989_v39 = vld [vmem:[#allocation32_spill] sm:$0xff]  ;;  %vm5867_vm6 = vmor %vm1298_vm0, %vm1299_vm1 }
 0x14f   : > { %v1273_v1 = vmul.f32 %v5829_v56, %v5764_v5  ;;  %v1450_v34 = vmul.f32 %v6988_v29, %v981_v40  ;;  %vm828_vm3 = vweird.f32 %v5662_v59  ;;  %v816_v35 = vsub.f32 1.5, %v815_v22  ;;  %1579 = vmatpush.bf16.xpose.msra.mxu2 %v1532_v49  ;;  %vm5914_vm10 = vmor %vm818_vm14, %vm819_vm12  ;;  %v7005_v59 = vld [vmem:[#allocation35_spill] sm:$0xff] }
 0x150   : > { %v1123_v36 = vmul.f32 %v5840_v33, %v5768_v14  ;;  %v1451_v61 = vmul.f32 %v6989_v39, %v991_v46  ;;  %v1297_v55 = vmul.f32 %v5616_v50, %v1296_v38  ;;  %v5855_v51 = vmul.f32 0.5, %v1284_v25  ;;  %vm5938_vm12 = vmor %vm828_vm3, %vm829_vm13 }
 0x151   : > { %vm1289_vm4 = vweird.f32 %v5801_v0  ;;  %v1274_v8 = vmul.f32 %v5829_v56, %v1273_v1  ;;  %v1307_v19 = vmul.f32 %v5664_v7, %v1306_v6  ;;  %v5861_v18 = vpop.eup %4248  ;;  %vm1279_vm7 = vweird.f32 %v5829_v56 }
 0x152   : > { %v1124_v38 = vmul.f32 %v5840_v33, %v1123_v36  ;;  %vm1128_vm9 = vweird.f32 %v5768_v14  ;;  %vm1129_vm5 = vweird.f32 %v5840_v33  ;;  %v1524_v20 = vpack.c.bf16 %v1451_v61, %v1450_v34  ;;  %v5875_v24 = vpop.eup %4250  ;;  %v7011_v14 = vld [vmem:[#allocation34_spill] sm:$0xff] }
 0x153   : > { %v1275_v30 = vmul.f32 0.5, %v1274_v8  ;;  %v1504_v23 = vmul.f32 %v5861_v18, %v5791_v58  ;;  %v1301_v4 = vsel %vm5867_vm6, %v5616_v50, %v1297_v55  ;;  %v5890_v47 = vadd.f32 1e-12, %v603_v41  ;;  %v5892_v26 = vpop.eup %4252  ;;  %vm5925_vm6 = vmor %vm1118_vm8, %vm1119_vm11 }
 0x154   : > { %vm1278_vm0 = vweird.f32 %v5764_v5  ;;  %v1125_v3 = vmul.f32 0.5, %v1124_v38  ;;  %v963_v42 = vmul.f32 %v5875_v24, %v5793_v45  ;;  %1566 = vmatpush.bf16.xpose.msra.mxu1 %v1524_v20  ;;  %v1311_v52 = vsel %vm5881_vm15, %v5664_v7, %v1307_v19  ;;  %v6995_v7 = vld [vmem:[#allocation30_spill] sm:$0xff]  ;;  %vm5961_vm13 = vmor %vm1128_vm9, %vm1129_vm5 }
 0x155   : > { %v817_v16 = vmul.f32 %v5737_v10, %v816_v35  ;;  %v1286_v43 = vsub.f32 1.5, %v5855_v51  ;;  %v1505_v50 = vmul.f32 %v5861_v18, %v1504_v23  ;;  %vm1510_vm1 = vweird.f32 %v5861_v18  ;;  %vm5988_vm9 = vmor %vm1278_vm0, %vm1279_vm7 }
 0x156   : > { %v953_v6 = vmul.f32 %v5892_v26, %v5795_v53  ;;  %vm958_vm2 = vweird.f32 %v5795_v53  ;;  %v1276_v22 = vsub.f32 1.5, %v1275_v30  ;;  %v964_v63 = vmul.f32 %v5875_v24, %v963_v42 }
 0x157   : > { %v1482_v48 = vmul.f32 %v6994_v54, %v1301_v4  ;;  %v1483_v27 = vmul.f32 %v6995_v7, %v1311_v52  ;;  %v1126_v40 = vsub.f32 1.5, %v1125_v3  ;;  %v1506_v46 = vmul.f32 0.5, %v1505_v50 }
 0x158   : > { %vm968_vm15 = vweird.f32 %v5793_v45  ;;  %v954_v25 = vmul.f32 %v5892_v26, %v953_v6  ;;  %4254 = vrsqrt.f32 %v5890_v47  ;;  %v965_v12 = vmul.f32 0.5, %v964_v63  ;;  %v4274_v45 = vld [vmem:[%s6827_s2] sm:$0xf] }
 0x159   : > { %v1540_v29 = vpack.c.bf16 %v1483_v27, %v1482_v48  ;;  %v5929_v34 = vadd.f32 1e-12, %v601_v57  ;;  %v821_v35 = vsel %vm5914_vm10, %v5737_v10, %v817_v16  ;;  %v1507_v28 = vsub.f32 1.5, %v1506_v46  ;;  %v7017_v57 = vld [vmem:[#allocation37_spill] sm:$0xff] }
 0x15a   : > { %v955_v39 = vmul.f32 0.5, %v954_v25  ;;  %vm959_vm8 = vweird.f32 %v5892_v26  ;;  %v827_v61 = vmul.f32 %v5721_v60, %v826_v62  ;;  %vm7002_vm11 = vweird.f32 %v5744_v44 }
 0x15b   : > { %vm5948_vm14 = vmor %vm7002_vm11, %vm1289_vm4  ;;  %v966_v55 = vsub.f32 1.5, %v965_v12  ;;  %1592 = vmatpush.bf16.xpose.msra.mxu3 %v1540_v29  ;;  %4256 = vrsqrt.f32 %v5929_v34  ;;  %v1434_v51 = vmul.f32 %v7005_v59, %v821_v35  ;;  %v1117_v8 = vmul.f32 %v5714_v2, %v1116_v11 }
 0x15c   : > { %v1508_v62 = vmul.f32 %v5861_v18, %v1507_v28  ;;  %v956_v19 = vsub.f32 1.5, %v955_v39  ;;  %v831_v41 = vsel %vm5938_vm12, %v5721_v60, %v827_v61  ;;  %v1127_v37 = vmul.f32 %v5840_v33, %v1126_v40  ;;  %vm6004_vm7 = vmor %vm958_vm2, %vm959_vm8 }
 0x15d   : > { %vm7008_vm3 = vweird.f32 %v5791_v58  ;;  %v1435_v11 = vmul.f32 %v7011_v14, %v831_v41  ;;  %v1121_v38 = vsel %vm5925_vm6, %v5714_v2, %v1117_v8  ;;  %v1277_v20 = vmul.f32 %v5829_v56, %v1276_v22 }
 0x15e   : > { %vm5974_vm4 = vmor %vm7008_vm3, %vm1510_vm1  ;;  %v1287_v60 = vmul.f32 %v5801_v0, %v1286_v43  ;;  %v4255_v32 = vpop.eup %4254  ;;  %vm969_vm5 = vweird.f32 %v5875_v24  ;;  %v1131_v2 = vsel %vm5961_vm13, %v5840_v33, %v1127_v37  ;;  %v957_v23 = vmul.f32 %v5892_v26, %v956_v19 }
 0x15f   : > { %v1512_v30 = vsel %vm5974_vm4, %v5861_v18, %v1508_v62  ;;  %v803_v4 = vmul.f32 %v4255_v32, %v5890_v47  ;;  %v1516_v3 = vpack.c.bf16 %v1435_v11, %v1434_v51  ;;  %v7016_v18 = vld [vmem:[#allocation33_spill] sm:$0xff]  ;;  %v1465_v52 = vmul.f32 %v4746_v31, %v1131_v2  ;;  %vm970_vm0 = vmor %vm968_vm15, %vm969_vm5 }
 0x160   : > { %v1464_v42 = vmul.f32 %v7016_v18, %v1121_v38  ;;  %v1281_v33 = vsel %vm5988_vm9, %v5829_v56, %v1277_v20  ;;  %v1291_v16 = vsel %vm5948_vm14, %v5801_v0, %v1287_v60  ;;  %v961_v53 = vsel %vm6004_vm7, %v5892_v26, %v957_v23  ;;  %v7018_v56 = vld [vmem:[#allocation36_spill] sm:$0xff] }
 0x161   : > { %v967_v43 = vmul.f32 %v5875_v24, %v966_v55  ;;  %v4257_v50 = vpop.eup %4256  ;;  %v804_v6 = vmul.f32 %v4255_v32, %v803_v4  ;;  %1553 = vmatpush.bf16.xpose.msra.mxu0 %v1516_v3  ;;  %v1480_v22 = vmul.f32 %v7017_v57, %v1281_v33  ;;  %v1481_v63 = vmul.f32 %v7018_v56, %v1291_v16 }
 0x162   : > { %v1531_v31 = vpack.c.bf16 %v1465_v52, %v1464_v42  ;;  %v793_v54 = vmul.f32 %v4257_v50, %v5929_v34  ;;  %v1448_v48 = vmul.f32 %v4913_v13, %v961_v53  ;;  %v1513_v49 = vmul.f32 %v4274_v45, %v1512_v30 }
 0x163   : > { %v971_v0 = vsel %vm970_vm0, %v5875_v24, %v967_v43  ;;  %v805_v26 = vmul.f32 0.5, %v804_v6  ;;  %v1539_v7 = vpack.c.bf16 %v1481_v63, %v1480_v22  ;;  %vm809_vm1 = vweird.f32 %v4255_v32 }
 0x164   : > { %1580 = vmatpush.bf16.xpose.msra.mxu2 %v1531_v31  ;;  %v1449_v27 = vmul.f32 %v4911_v17, %v971_v0  ;;  %v794_v40 = vmul.f32 %v4257_v50, %v793_v54  ;;  %v1514_v12 = vpack.c.bf16 %v1513_v49, %v1513_v49  ;;  %vm808_vm2 = vweird.f32 %v5890_v47 }
 0x165   : > { %v806_v46 = vsub.f32 1.5, %v805_v26  ;;  %1593 = vmatpush.bf16.xpose.msra.mxu3 %v1539_v7  ;;  %vm810_vm10 = vmor %vm808_vm2, %vm809_vm1  ;;  %vm799_vm15 = vweird.f32 %v4257_v50  ;;  %vm798_vm6 = vweird.f32 %v5929_v34  ;;  %vm7019_vm8 = vcmask 1043456  }
 0x166   : > { %v1523_v25 = vpack.c.bf16 %v1449_v27, %v1448_v48  ;;  %v795_v1 = vmul.f32 0.5, %v794_v40  ;;  %vm800_vm12 = vmor %vm798_vm6, %vm799_vm15 }
 0x167   : > { %v807_v13 = vmul.f32 %v4255_v32, %v806_v46  ;;  %vm7020_vm11 = vmmov %vm7019_vm8 }
 0x168   : > { %1567 = vmatpush.bf16.xpose.msra.mxu1 %v1523_v25  ;;  %v796_v24 = vsub.f32 1.5, %v795_v1  ;;  %vm7021_vm14 = vmmov %vm7019_vm8  ;;  %v3529_v25 = vld [vmem:[%s6046_s28 + $0xa8] sm:$0xf]  ;;  %v3852_v1 = vld [vmem:[%s6046_s28 + $0xb0] sm:$0xf0] }
 0x169   : > { %v811_v17 = vsel %vm810_vm10, %v4255_v32, %v807_v13  ;;  %vm7022_vm13 = vmmov %vm7019_vm8 }
 0x16a   : > { %v797_v29 = vmul.f32 %v4257_v50, %v796_v24  ;;  %v1433_v35 = vmul.f32 %v4996_v9, %v811_v17  ;;  %vm7023_vm3 = vmmov %vm7019_vm8  ;;  %v3530_v17 = vor.u32 %v3852_v1, %v3529_v25  ;;  %v3589_v25 = vld [vmem:[%s6046_s28 + $0x120] sm:$0xf] }
 0x16b   : > { %1581 = vmatmul.bf16.vlgmr.msra.gmra.mxu2 %v1514_v12  ;;  %vm7024_vm4 = vmmov %vm7023_vm3 }
 0x16c   : > { %1594 = vmatmul.bf16.vlgmr.msra.gmra.mxu3 %v1514_v12  ;;  %v801_v36 = vsel %vm800_vm12, %v4257_v50, %v797_v29  ;;  %v3625_v29 = vld [vmem:[%s6046_s28 + $0x168] sm:$0xf]  ;;  %vm7025_vm9 = vmmov %vm7023_vm3 }
 0x16d   : > { %v1432_v28 = vmul.f32 %v4998_v15, %v801_v36  ;;  %vm7026_vm5 = vmmov %vm7023_vm3 }
 0x16f   : > { %1568 = vmatmul.bf16.vlgmr.msra.gmra.mxu1 %v1514_v12  ;;  %v1515_v39 = vpack.c.bf16 %v1433_v35, %v1432_v28  ;;  %v3876_v35 = vld [vmem:[%s6046_s28 + $0x170] sm:$0xf0] }
 0x170   : > { %v3626_v28 = vor.u32 %v3876_v35, %v3625_v29  ;;  %v3685_v35 = vld [vmem:[%s6046_s28 + $0x1e0] sm:$0xf] }
 0x171   : > { %1554 = vmatpush.bf16.xpose.msra.mxu0 %v1515_v39  ;;  %v3721_v39 = vld [vmem:[%s6046_s28 + $0x228] sm:$0xf] }
 0x172   : > { %2660 = vmatpush.bf16.msrb.mxu1 %v3626_v28 }
 0x178   : > { %1555 = vmatmul.bf16.vlgmr.msra.gmra.mxu0 %v1514_v12 }
 0x179   : > { %2611 = vmatpush.bf16.msrb.mxu0 %v3530_v17 }
 0x1ec   : > { %v1569_v47 = vpop.f32.mrf.mxu1 }
 0x1ed   : > { %v1600_v61 = vmul.f32 2.0, %v1569_v47  ;;  %v3900_v47 = vld [vmem:[%s6046_s28 + $0x230] sm:$0xf0] }
 0x1ee   : > { %v1582_v10 = vpop.f32.mrf.mxu2 }
 0x1ef   : > { %v1601_v55 = vmul.f32 2.0, %v1582_v10  ;;  %v1610_v59 = vsel %vm7019_vm8, %v1600_v61, -inf  ;;  %v1595_v34 = vpop.f32.mrf.mxu3 }
 0x1f0   : > { %v1611_v51 = vrot.slane %v1610_v59, 4  ;;  %v1602_v44 = vmul.f32 2.0, %v1595_v34  ;;  %v3817_v34 = vld [vmem:[%s6046_s28 + $0x2e8] sm:$0xf] }
 0x1f1   : > { %v1617_v8 = vsel %vm7020_vm11, %v1601_v55, -inf }
 0x1f2   : > { %v1618_v9 = vrot.slane %v1617_v8, 4  ;;  %v1612_v62 = vmax.f32 %v1610_v59, %v1611_v51  ;;  %v1624_v19 = vsel %vm7021_vm14, %v1602_v44, -inf  ;;  %v3722_v59 = vor.u32 %v3900_v47, %v3721_v39  ;;  %v3924_v51 = vld [vmem:[%s6046_s28 + $0x2f0] sm:$0xf0]  ;;  %v3891_v47 = vld [vmem:[%s6046_s28 + $0x1e8] sm:$0xf0] }
 0x1f3   : > { %v1625_v41 = vrot.slane %v1624_v19, 4 }
 0x1f4   : > { %v1619_v15 = vmax.f32 %v1617_v8, %v1618_v9  ;;  %v1613_v37 = vrot.slane %v1612_v62, 2  ;;  %v1571_v21 = vpop.f32.mrf.mxu1  ;;  %v3818_v8 = vor.u32 %v3924_v51, %v3817_v34  ;;  %v3849_v9 = vld [vmem:[%s6046_s28 + $0x98] sm:$0xf0]  ;;  %2709 = vmatpush.bf16.msrb.mxu2 %v3722_v59  ;;  %v3686_v34 = vor.u32 %v3891_v47, %v3685_v35 }
 0x1f5   : > { %v1626_v11 = vmax.f32 %v1624_v19, %v1625_v41  ;;  %v1556_v60 = vpop.f32.mrf.mxu0  ;;  %v3873_v41 = vld [vmem:[%s6046_s28 + $0x158] sm:$0xf0] }
 0x1f6   : > { %v1620_v14 = vrot.slane %v1619_v15, 2  ;;  %v1614_v38 = vmax.f32 %v1612_v62, %v1613_v37  ;;  %v1584_v20 = vpop.f32.mrf.mxu2  ;;  %v1599_v32 = vmul.f32 2.0, %v1556_v60  ;;  %v3613_v62 = vld [vmem:[%s6046_s28 + $0x150] sm:$0xf]  ;;  %2758 = vmatpush.bf16.msrb.mxu3 %v3818_v8  ;;  %v3481_v8 = vld [vmem:[%s6046_s28 + $0x48] sm:$0xf] }
 0x1f7   : > { %v1627_v30 = vrot.slane %v1626_v11, 2  ;;  %v1597_v23 = vpop.f32.mrf.mxu3 }
 0x1f8   : > { %v1621_v58 = vmax.f32 %v1619_v15, %v1620_v14  ;;  %v1615_v2 = vrot.slane %v1614_v38, 1  ;;  %v1603_v5 = vsel %vm7022_vm13, %v1599_v32, -inf  ;;  %v3614_v14 = vor.u32 %v3873_v41, %v3613_v62 }
 0x1f9   : > { %v1628_v3 = vmax.f32 %v1626_v11, %v1627_v30  ;;  %v1604_v42 = vrot.slane %v1603_v5, 4  ;;  %v3709_v11 = vld [vmem:[%s6046_s28 + $0x210] sm:$0xf] }
 0x1fa   : > { %v1622_v4 = vrot.slane %v1621_v58, 1  ;;  %v1616_v18 = vmax.f32 %v1614_v38, %v1615_v2  ;;  %v3897_v38 = vld [vmem:[%s6046_s28 + $0x218] sm:$0xf0]  ;;  %v3805_v30 = vld [vmem:[%s6046_s28 + $0x2d0] sm:$0xf]  ;;  %2661 = vmatpush.bf16.msrb.mxu1 %v3614_v14 }
 0x1fb   : > { %v1629_v33 = vrot.slane %v1628_v3, 1  ;;  %v1605_v53 = vmax.f32 %v1603_v5, %v1604_v42  ;;  %v3921_v2 = vld [vmem:[%s6046_s28 + $0x2d8] sm:$0xf0] }
 0x1fc   : > { %v1623_v52 = vmax.f32 %v1621_v58, %v1622_v4  ;;  %v1632_v16 = vsub.f32 %v1600_v61, %v1616_v18  ;;  %v3710_v58 = vor.u32 %v3897_v38, %v3709_v11  ;;  %v3806_v4 = vor.u32 %v3921_v2, %v3805_v30  ;;  %v3846_v18 = vld [vmem:[%s6046_s28 + $0x80] sm:$0xf0]  ;;  %v3855_v11 = vld [vmem:[%s6046_s28 + $0xc8] sm:$0xf0] }
 0x1fd   : > { %v1630_v50 = vmax.f32 %v1628_v3, %v1629_v33  ;;  %v1606_v31 = vrot.slane %v1605_v53, 2  ;;  %v1558_v57 = vpop.f32.mrf.mxu0  ;;  %v3505_v3 = vld [vmem:[%s6046_s28 + $0x78] sm:$0xf] }
 0x1fe   : > { %v1633_v43 = vsub.f32 %v1601_v55, %v1623_v52  ;;  %v1637_v6 = vmul.f32 1.442695, %v1632_v16  ;;  %2710 = vmatpush.bf16.msrb.mxu2 %v3710_v58  ;;  %v3506_v16 = vor.u32 %v3846_v18, %v3505_v3  ;;  %2759 = vmatpush.bf16.msrb.mxu3 %v3806_v4  ;;  %v3894_v57 = vld [vmem:[%s6046_s28 + $0x200] sm:$0xf0]  ;;  %v3888_v58 = vld [vmem:[%s6046_s28 + $0x1d0] sm:$0xf0] }
 0x1ff   : > { %v1634_v56 = vsub.f32 %v1602_v44, %v1630_v50  ;;  %v1607_v63 = vmax.f32 %v1605_v53, %v1606_v31  ;;  %v3517_v44 = vld [vmem:[%s6046_s28 + $0x90] sm:$0xf]  ;;  %v3601_v53 = vld [vmem:[%s6046_s28 + $0x138] sm:$0xf]  ;;  %v3912_v4 = vld [vmem:[%s6046_s28 + $0x290] sm:$0xf0] }
 0x200   : > { %v1639_v22 = vmul.f32 1.442695, %v1633_v43  ;;  %4258 = vpow2.f32 %v1637_v6  ;;  %v3518_v21 = vor.u32 %v3849_v9, %v3517_v44  ;;  %v3870_v43 = vld [vmem:[%s6046_s28 + $0x140] sm:$0xf0]  ;;  %v3697_v31 = vld [vmem:[%s6046_s28 + $0x1f8] sm:$0xf] }
 0x201   : > { %v1641_v54 = vmul.f32 1.442695, %v1634_v56  ;;  %v1608_v0 = vrot.slane %v1607_v63, 1  ;;  %v3602_v6 = vor.u32 %v3870_v43, %v3601_v53  ;;  %v3840_v44 = vld [vmem:[%s6046_s28 + $0x50] sm:$0xf0] }
 0x202   : > { %4260 = vpow2.f32 %v1639_v22  ;;  %2612 = vmatpush.bf16.msrb.mxu0 %v3518_v21  ;;  %v3482_v41 = vor.u32 %v3840_v44, %v3481_v8  ;;  %v3864_v21 = vld [vmem:[%s6046_s28 + $0x110] sm:$0xf0]  ;;  %v3837_v53 = vld [vmem:[%s6046_s28 + $0x38] sm:$0xf0] }
 0x203   : > { %4262 = vpow2.f32 %v1641_v54  ;;  %v1609_v48 = vmax.f32 %v1607_v63, %v1608_v0  ;;  %v3698_v54 = vor.u32 %v3894_v57, %v3697_v31  ;;  %2662 = vmatpush.bf16.msrb.mxu1 %v3602_v6  ;;  %v3793_v0 = vld [vmem:[%s6046_s28 + $0x2b8] sm:$0xf]  ;;  %v3565_v31 = vld [vmem:[%s6046_s28 + $0xf0] sm:$0xf]  ;;  %v3861_v57 = vld [vmem:[%s6046_s28 + $0xf8] sm:$0xf0] }
 0x205   : > { %v1631_v7 = vsub.f32 %v1599_v32, %v1609_v48  ;;  %v3918_v48 = vld [vmem:[%s6046_s28 + $0x2c0] sm:$0xf0]  ;;  %2711 = vmatpush.bf16.msrb.mxu2 %v3698_v54  ;;  %v3923_v54 = vld [vmem:[%s6046_s28 + $0x2ec] sm:$0xf] }
 0x206   : > { %v6041_v26 = vpop.eup %4258  ;;  %2613 = vmatpush.bf16.msrb.mxu0 %v3506_v16  ;;  %v3469_v16 = vld [vmem:[%s6046_s28 + $0x30] sm:$0xf] }
 0x207   : > { %v1650_v27 = vsel %vm7023_vm3, %v6041_v26, 0.0  ;;  %v1635_v40 = vmul.f32 1.442695, %v1631_v7  ;;  %v3493_v7 = vld [vmem:[%s6046_s28 + $0x60] sm:$0xf]  ;;  %vm1790_vm3 = vcmask 1045509  }
 0x208   : > { %v6050_v45 = vpop.eup %4260  ;;  %v1651_v49 = vrot.slane %v1650_v27, 4 }
 0x209   : > { %v1657_v46 = vsel %vm7024_vm4, %v6050_v45, 0.0  ;;  %v6056_v12 = vpop.eup %4262  ;;  %4264 = vpow2.f32 %v1635_v40  ;;  %2712 = vmatpush.bf16.msrb.mxu2 %v3686_v34 }
 0x20a   : > { %v1658_v13 = vrot.slane %v1657_v46, 4  ;;  %v1652_v24 = vadd.f32 %v1651_v49, %v1650_v27  ;;  %v1664_v36 = vsel %vm7025_vm9, %v6056_v12, 0.0  ;;  %vm1770_vm9 = vcmask 1040384  }
 0x20b   : > { %v1665_v10 = vrot.slane %v1664_v36, 4 }
 0x20c   : > { %v1659_v61 = vadd.f32 %v1658_v13, %v1657_v46  ;;  %v1653_v55 = vrot.slane %v1652_v24, 2  ;;  %v3843_v46 = vld [vmem:[%s6046_s28 + $0x68] sm:$0xf0]  ;;  %v3794_v13 = vor.u32 %v3918_v48, %v3793_v0  ;;  %v3819_v0 = vld [vmem:[%s6046_s28 + $0x2f4] sm:$0xf0] }
 0x20d   : > { %v1666_v15 = vadd.f32 %v1665_v10, %v1664_v36  ;;  %v3494_v28 = vor.u32 %v3843_v46, %v3493_v7  ;;  %v3915_v10 = vld [vmem:[%s6046_s28 + $0x2a8] sm:$0xf0]  ;;  %v3885_v7 = vld [vmem:[%s6046_s28 + $0x1b8] sm:$0xf0]  ;;  %v3470_v46 = vor.u32 %v3837_v53, %v3469_v16  ;;  %v1743_v16 = vld [vmem:[%s6256_s7] sm:$0xff] }
 0x20e   : > { %v1660_v19 = vrot.slane %v1659_v61, 2  ;;  %v1654_v37 = vadd.f32 %v1653_v55, %v1652_v24  ;;  %v3867_v24 = vld [vmem:[%s6046_s28 + $0x128] sm:$0xf0]  ;;  %2760 = vmatpush.bf16.msrb.mxu3 %v3794_v13  ;;  %v3909_v13 = vld [vmem:[%s6046_s28 + $0x278] sm:$0xf0] }
 0x20f   : > { %v6072_v20 = vpop.eup %4264  ;;  %v1667_v32 = vrot.slane %v1666_v15, 2  ;;  %v3590_v39 = vor.u32 %v3867_v24, %v3589_v25  ;;  %2614 = vmatpush.bf16.msrb.mxu0 %v3494_v28  ;;  %v3566_v25 = vor.u32 %v3861_v57, %v3565_v31  ;;  %v3834_v28 = vld [vmem:[%s6046_s28 + $0x20] sm:$0xf0]  ;;  %v3899_v53 = vld [vmem:[%s6046_s28 + $0x22c] sm:$0xf] }
 0x210   : > { %v1661_v60 = vadd.f32 %v1660_v19, %v1659_v61  ;;  %v1655_v23 = vrot.slane %v1654_v37, 1  ;;  %v1643_v5 = vsel %vm7026_vm5, %v6072_v20, 0.0  ;;  %v3781_v61 = vld [vmem:[%s6046_s28 + $0x2a0] sm:$0xf]  ;;  %vm1772_vm5 = vcmask 1042434  }
 0x211   : > { %v1668_v52 = vadd.f32 %v1667_v32, %v1666_v15  ;;  %v1644_v33 = vrot.slane %v1643_v5, 4  ;;  %v3782_v51 = vor.u32 %v3915_v10, %v3781_v61  ;;  %2663 = vmatpush.bf16.msrb.mxu1 %v3590_v39  ;;  %v3673_v32 = vld [vmem:[%s6046_s28 + $0x1c8] sm:$0xf]  ;;  %v3858_v61 = vld [vmem:[%s6046_s28 + $0xe0] sm:$0xf0] }
 0x212   : > { %v1662_v42 = vrot.slane %v1661_v60, 1  ;;  %v6082_v50 = vadd.f32 %v1655_v23, %v1654_v37  ;;  %v3577_v37 = vld [vmem:[%s6046_s28 + $0x108] sm:$0xf]  ;;  %v3674_v23 = vor.u32 %v3888_v58, %v3673_v32  ;;  %v3649_v10 = vld [vmem:[%s6046_s28 + $0x198] sm:$0xf] }
 0x213   : > { %v1669_v56 = vrot.slane %v1668_v52, 1  ;;  %v1645_v63 = vadd.f32 %v1644_v33, %v1643_v5  ;;  %2761 = vmatpush.bf16.msrb.mxu3 %v3782_v51  ;;  %v3769_v5 = vld [vmem:[%s6046_s28 + $0x288] sm:$0xf]  ;;  %2615 = vmatpush.bf16.msrb.mxu0 %v3482_v41  ;;  %v3906_v41 = vld [vmem:[%s6046_s28 + $0x260] sm:$0xf0] }
 0x214   : > { %v6086_v22 = vadd.f32 %v1662_v42, %v1661_v60  ;;  %4266 = vrcp.f32 %v6082_v50  ;;  %v1697_v49 = vand.u32 2147483648, %v6082_v50  ;;  %v1695_v29 = vand.u32 2147483647, %v6082_v50  ;;  %2713 = vmatpush.bf16.msrb.mxu2 %v3674_v23  ;;  %v3637_v23 = vld [vmem:[%s6046_s28 + $0x180] sm:$0xf] }
 0x215   : > { %v6093_v27 = vadd.f32 %v1669_v56, %v1668_v52  ;;  %v1646_v40 = vrot.slane %v1645_v63, 2  ;;  %vm1691_vm7 = vweird.f32 %v6082_v50  ;;  %v3578_v60 = vor.u32 %v3864_v21, %v3577_v37  ;;  %v3661_v56 = vld [vmem:[%s6046_s28 + $0x1b0] sm:$0xf] }
 0x216   : > { %4268 = vrcp.f32 %v6086_v22  ;;  %v1712_v1 = vand.u32 2147483648, %v6086_v22  ;;  %v1710_v17 = vand.u32 2147483647, %v6086_v22  ;;  %v6111_v59 = vor.u32 1.1754944e-38, %v1697_v49 }
 0x217   : > { %4270 = vrcp.f32 %v6093_v27  ;;  %v1647_v36 = vadd.f32 %v1646_v40, %v1645_v63  ;;  %vm1706_vm0 = vweird.f32 %v6086_v22  ;;  %v1725_v38 = vand.u32 2147483647, %v6093_v27  ;;  %2664 = vmatpush.bf16.msrb.mxu1 %v3578_v60  ;;  %2616 = vmatpush.bf16.msrb.mxu0 %v3470_v46  ;;  %v3541_v60 = vld [vmem:[%s6046_s28 + $0xc0] sm:$0xf] }
 0x218   : > { %v6118_v62 = vor.u32 1.1754944e-38, %v1712_v1  ;;  %vm6127_vm1 = vcmp.eq.f32.partialorder %v1710_v17, 8.507059e+37  ;;  %v1727_v42 = vand.u32 2147483648, %v6093_v27  ;;  %vm6145_vm15 = vcmp.eq.f32.partialorder %v1695_v29, 8.507059e+37  ;;  %v3757_v1 = vld [vmem:[%s6046_s28 + $0x270] sm:$0xf] }
 0x219   : > { %v1648_v15 = vrot.slane %v1647_v36, 1  ;;  %v3770_v33 = vor.u32 %v3912_v4, %v3769_v5  ;;  %vm1721_vm12 = vweird.f32 %v6093_v27  ;;  %vm6161_vm8 = vcmp.eq.f32.partialorder %v1725_v38, 8.507059e+37  ;;  %v3831_v38 = vld [vmem:[%s6046_s28 + $0x8] sm:$0xf0] }
 0x21a   : > { %v6108_v55 = vpop.eup %4266  ;;  %v1728_v17 = vor.u32 1.1754944e-38, %v1727_v42  ;;  %v3662_v35 = vor.u32 %v3885_v7, %v3661_v56  ;;  %v3758_v47 = vor.u32 %v3909_v13, %v3757_v1  ;;  %v3879_v5 = vld [vmem:[%s6046_s28 + $0x188] sm:$0xf0]  ;;  %v3733_v42 = vld [vmem:[%s6046_s28 + $0x240] sm:$0xf]  ;;  %v1746_v1 = vld [vmem:[%s6256_s7 + $0x18] sm:$0xff] }
 0x21b   : > { %v1687_v19 = vmul.f32 %v6108_v55, %v6082_v50  ;;  %vm1692_vm2 = vweird.f32 %v6108_v55  ;;  %v6135_v2 = vadd.f32 %v1648_v15, %v1647_v36  ;;  %2762 = vmatpush.bf16.msrb.mxu3 %v3770_v33  ;;  %v3457_v36 = vld [vmem:[%s6046_s28 + $0x18] sm:$0xf]  ;;  %2665 = vmatpush.bf16.msrb.mxu1 %v3566_v25  ;;  %v3542_v33 = vor.u32 %v3855_v11, %v3541_v60  ;;  %v3851_v7 = vld [vmem:[%s6046_s28 + $0xac] sm:$0xf] }
 0x21c   : > { %v6116_v9 = vpop.eup %4268  ;;  %vm6169_vm11 = vmor %vm1691_vm7, %vm1692_vm2  ;;  %2714 = vmatpush.bf16.msrb.mxu2 %v3662_v35  ;;  %v3458_v8 = vor.u32 %v3834_v28, %v3457_v36  ;;  %v3745_v15 = vld [vmem:[%s6046_s28 + $0x258] sm:$0xf]  ;;  %v3638_v57 = vor.u32 %v3879_v5, %v3637_v23  ;;  %vm1776_vm2 = vcmask 1041409   ;;  %v1744_v25 = vld [vmem:[%s6256_s7 + $0x8] sm:$0xff] }
 0x21d   : > { %v1702_v14 = vmul.f32 %v6116_v9, %v6086_v22  ;;  %v1688_v30 = vsub.f32 1.0, %v1687_v19  ;;  %v6141_v3 = vpop.eup %4270  ;;  %vm1707_vm10 = vweird.f32 %v6116_v9  ;;  %4272 = vrcp.f32 %v6135_v2  ;;  %v3882_v19 = vld [vmem:[%s6046_s28 + $0x1a0] sm:$0xf0]  ;;  %v3531_v50 = vld [vmem:[%s6046_s28 + $0xb4] sm:$0xf0] }
 0x21e   : > { %v1717_v43 = vmul.f32 %v6141_v3, %v6093_v27  ;;  %vm1722_vm6 = vweird.f32 %v6141_v3  ;;  %v1680_v48 = vand.u32 2147483647, %v6135_v2  ;;  %vm6185_vm14 = vmor %vm1706_vm0, %vm1707_vm10  ;;  %v1682_v29 = vand.u32 2147483648, %v6135_v2  ;;  %v3553_v27 = vld [vmem:[%s6046_s28 + $0xd8] sm:$0xf]  ;;  %2617 = vmatpush.bf16.msrb.mxu0 %v3458_v8 }
 0x21f   : > { %v1703_v18 = vsub.f32 1.0, %v1702_v14  ;;  %v1689_v6 = vmul.f32 %v6108_v55, %v1688_v30  ;;  %vm6197_vm13 = vmor %vm1721_vm12, %vm1722_vm6  ;;  %v3554_v44 = vor.u32 %v3858_v61, %v3553_v27  ;;  %2763 = vmatpush.bf16.msrb.mxu3 %v3758_v47  ;;  %v3445_v14 = vld [vmem:[%s6046_s28] sm:$0xf]  ;;  %v3746_v30 = vor.u32 %v3906_v41, %v3745_v15  ;;  %v3896_v36 = vld [vmem:[%s6046_s28 + $0x214] sm:$0xf] }
 0x220   : > { %v1718_v49 = vsub.f32 1.0, %v1717_v43  ;;  %vm6246_vm4 = vcmp.eq.f32.partialorder %v1680_v48, 8.507059e+37  ;;  %v3723_v43 = vld [vmem:[%s6046_s28 + $0x234] sm:$0xf0]  ;;  %vm1778_vm0 = vcmask 1043459   ;;  %v1683_v46 = vor.u32 1.1754944e-38, %v1682_v29 }
 0x221   : > { %v1704_v63 = vmul.f32 %v6116_v9, %v1703_v18  ;;  %v1690_v40 = vadd.f32 %v6108_v55, %v1689_v6  ;;  %2666 = vmatpush.bf16.msrb.mxu1 %v3554_v44  ;;  %v3446_v18 = vor.u32 %v3831_v38, %v3445_v14  ;;  %v3726_v13 = vor.u32 %v3899_v53, %v3723_v43  ;;  %v3711_v28 = vld [vmem:[%s6046_s28 + $0x21c] sm:$0xf0]  ;;  %v3920_v47 = vld [vmem:[%s6046_s28 + $0x2d4] sm:$0xf] }
 0x222   : > { %v1719_v39 = vmul.f32 %v6141_v3, %v1718_v49  ;;  %v3534_v29 = vor.u32 %v3851_v7, %v3531_v50  ;;  %v3807_v27 = vld [vmem:[%s6046_s28 + $0x2dc] sm:$0xf0]  ;;  %v3848_v61 = vld [vmem:[%s6046_s28 + $0x94] sm:$0xf]  ;;  %v6329_v14 = vunpack.c.l.bf16 %v1744_v25  ;;  %v6331_v38 = vunpack.c.l.bf16 %v1746_v1 }
 0x223   : > { %v1705_v24 = vadd.f32 %v6116_v9, %v1704_v63  ;;  %v1694_v51 = vsel %vm6169_vm11, %v6108_v55, %v1690_v40  ;;  %v6217_v37 = vpop.eup %4272  ;;  %v3650_v55 = vor.u32 %v3882_v19, %v3649_v10  ;;  %2764 = vmatpush.bf16.msrb.mxu3 %v3746_v30  ;;  %v1745_v63 = vld [vmem:[%s6256_s7 + $0x10] sm:$0xff]  ;;  %2618 = vmatpush.bf16.msrb.mxu0 %v3446_v18  ;;  %v3519_v44 = vld [vmem:[%s6046_s28 + $0x9c] sm:$0xf0]  ;;  %vm7044_vm6 = vcmask 1043456  }
 0x224   : > { %v1720_v21 = vadd.f32 %v6141_v3, %v1719_v39  ;;  %v1672_v58 = vmul.f32 %v6217_v37, %v6135_v2  ;;  %v1699_v4 = vsel %vm6145_vm15, %v6111_v59, %v1694_v51  ;;  %vm1677_vm7 = vweird.f32 %v6217_v37  ;;  %v3872_v19 = vld [vmem:[%s6046_s28 + $0x154] sm:$0xf]  ;;  %v3615_v15 = vld [vmem:[%s6046_s28 + $0x15c] sm:$0xf0]  ;;  %vm7045_vm12 = vmmov %vm7044_vm6 }
 0x225   : > { %v1709_v34 = vsel %vm6185_vm14, %v6116_v9, %v1705_v24  ;;  %2715 = vmatpush.bf16.msrb.mxu2 %v3650_v55  ;;  %v1700_v40 = vmul.f32 %v6041_v26, %v1699_v4  ;;  %2667 = vmatpush.bf16.msrb.mxu1 %v3542_v33  ;;  %v3627_v24 = vld [vmem:[%s6046_s28 + $0x174] sm:$0xf0]  ;;  %v6311_v51 = vunpack.c.h.bf16 %v1743_v16  ;;  %v6313_v8 = vunpack.c.h.bf16 %v1745_v63 }
 0x226   : > { %v1714_v9 = vsel %vm6127_vm1, %v6118_v62, %v1709_v34  ;;  %v1724_v62 = vsel %vm6197_vm13, %v6141_v3, %v1720_v21  ;;  %v3903_v3 = vld [vmem:[%s6046_s28 + $0x248] sm:$0xf0]  ;;  %v1673_v52 = vsub.f32 1.0, %v1672_v58  ;;  %vm1676_vm1 = vweird.f32 %v6135_v2 }
 0x227   : > { %v6227_v32 = vmul.f32 %v6050_v45, %v1714_v9  ;;  %v1729_v59 = vsel %vm6161_vm8, %v1728_v17, %v1724_v62  ;;  %v3734_v56 = vor.u32 %v3903_v3, %v3733_v42  ;;  %vm6290_vm10 = vmor %vm1676_vm1, %vm1677_vm7  ;;  %v3822_v17 = vor.u32 %v3923_v54, %v3819_v0  ;;  %2807 = vmatpush.bf16.msra.mxu0 %v3534_v29 }
 0x228   : > { %v6265_v31 = vmul.f32 %v6056_v12, %v1729_v59  ;;  %v1674_v48 = vmul.f32 %v6217_v37, %v1673_v52  ;;  %v3875_v12 = vld [vmem:[%s6046_s28 + $0x16c] sm:$0xf]  ;;  %v6301_v2 = vunpack.c.l.bf16 %v1743_v16  ;;  %v6309_v34 = vunpack.c.l.bf16 %v1745_v63 }
 0x229   : > { %v6262_v6 = vrot.slane %v6227_v32, 6  ;;  %2716 = vmatpush.bf16.msrb.mxu2 %v3638_v57  ;;  %v3630_v35 = vor.u32 %v3875_v12, %v3627_v24  ;;  %2765 = vmatpush.bf16.msrb.mxu3 %v3734_v56  ;;  %v1735_v9 = vrot.slane %v1700_v40, 4  ;;  %v6319_v21 = vrot.slane %v1700_v40, 7  ;;  %v1747_v57 = vld [vmem:[%s6256_s7 + $0x20] sm:$0xff]  ;;  %v1748_v12 = vld [vmem:[%s6256_s7 + $0x28] sm:$0xff]  ;;  %v1750_v40 = vld [vmem:[%s6256_s7 + $0x38] sm:$0xff] }
 0x22a   : > { %v6276_v49 = vrot.slane %v6265_v31, 5  ;;  %v1675_v22 = vadd.f32 %v6217_v37, %v1674_v48  ;;  %v1736_v41 = vrot.slane %v6265_v31, 4  ;;  %vm1774_vm15 = vcmask 1041408   ;;  %v1749_v48 = vld [vmem:[%s6256_s7 + $0x30] sm:$0xff] }
 0x22b   : > { %2856 = vmatpush.bf16.msra.mxu1 %v3630_v35  ;;  %v3714_v60 = vor.u32 %v3896_v36, %v3711_v28  ;;  %v3810_v58 = vor.u32 %v3920_v47, %v3807_v27  ;;  %v3522_v30 = vor.u32 %v3848_v61, %v3519_v44  ;;  %v3618_v11 = vor.u32 %v3872_v19, %v3615_v15  ;;  %v3893_v36 = vld [vmem:[%s6046_s28 + $0x1fc] sm:$0xf]  ;;  %v3699_v28 = vld [vmem:[%s6046_s28 + $0x204] sm:$0xf0] }
 0x22c   : > { %v6299_v39 = vsel %vm1790_vm3, %v6262_v6, %v6276_v49  ;;  %v1679_v10 = vsel %vm6290_vm10, %v6217_v37, %v1675_v22  ;;  %v1738_v4 = vsel %vm7045_vm12, %v6227_v32, %v1736_v41  ;;  %v6345_v18 = vunpack.c.h.bf16 %v1744_v25  ;;  %v3917_v47 = vld [vmem:[%s6046_s28 + $0x2bc] sm:$0xf]  ;;  %v3795_v44 = vld [vmem:[%s6046_s28 + $0x2c4] sm:$0xf0] }
 0x22d   : > { %2905 = vmatpush.bf16.msra.mxu2 %v3726_v13  ;;  %2954 = vmatpush.bf16.msra.mxu3 %v3822_v17  ;;  %v1684_v55 = vsel %vm6246_vm4, %v1683_v46, %v1679_v10  ;;  %v6347_v42 = vunpack.c.h.bf16 %v1746_v1  ;;  %1742 = vst [vmem:[%s353_s11 + $0x8] sm:$0xff] %v1738_v4  ;;  %vm1780_vm8 = vcmask 1042433   ;;  %vm1784_vm11 = vcmask 1044484  }
 0x22e   : > { %v1685_v37 = vmul.f32 %v6072_v20, %v1684_v55  ;;  %v1773_v20 = vsel %vm1772_vm5, %v6262_v6, %v6276_v49  ;;  %2808 = vmatpush.bf16.msra.mxu0 %v3522_v30  ;;  %v1779_v46 = vsel %vm1778_vm0, %v6262_v6, %v6276_v49  ;;  %v6374_v13 = vunpack.c.l.bf16 %v1747_v57  ;;  %v3845_v55 = vld [vmem:[%s6046_s28 + $0x7c] sm:$0xf] }
 0x22f   : > { %2857 = vmatpush.bf16.msra.mxu1 %v3618_v11  ;;  %v6378_v24 = vunpack.c.l.bf16 %v1749_v48  ;;  %v6380_v22 = vunpack.c.h.bf16 %v1747_v57  ;;  %vm1786_vm14 = vcmask 1043458   ;;  %v6385_v17 = vunpack.c.h.bf16 %v1749_v48 }
 0x230   : > { %v1737_v23 = vsel %vm7044_vm6, %v1685_v37, %v1735_v9  ;;  %v6336_v5 = vsel %vm1778_vm0, %v1685_v37, %v6319_v21  ;;  %v1771_v62 = vsel %vm1770_vm9, %v1685_v37, %v6319_v21  ;;  %v1777_v32 = vsel %vm1776_vm2, %v1685_v37, %v6319_v21 }
 0x231   : > { %1741 = vst [vmem:[%s353_s11] sm:$0xff] %v1737_v23  ;;  %v1775_v45 = vsel %vm1774_vm15, %v1771_v62, %v1773_v20  ;;  %2906 = vmatpush.bf16.msra.mxu2 %v3714_v60  ;;  %2955 = vmatpush.bf16.msra.mxu3 %v3810_v58  ;;  %v1781_v26 = vsel %vm1780_vm8, %v1777_v32, %v1779_v46  ;;  %v6387_v29 = vunpack.c.l.bf16 %v1748_v12  ;;  %v6389_v35 = vunpack.c.l.bf16 %v1750_v40  ;;  %v3507_v60 = vld [vmem:[%s6046_s28 + $0x84] sm:$0xf0] }
 0x232   : > { %v1795_v3 = vperm.slane %v1775_v45, 0  ;;  %v1796_v59 = vperm.slane %v1775_v45, 1  ;;  %v1797_v52 = vperm.slane %v1775_v45, 2  ;;  %v1798_v33 = vperm.slane %v1775_v45, 3 }
 0x233   : > { %v1783_v27 = vsel %vm1772_vm5, %v1685_v37, %v6319_v21  ;;  %v6396_v61 = vunpack.c.h.bf16 %v1748_v12  ;;  %v6398_v10 = vunpack.c.h.bf16 %v1750_v40  ;;  %v1785_v19 = vsel %vm1784_vm11, %v6262_v6, %v6276_v49  ;;  %v3869_v21 = vld [vmem:[%s6046_s28 + $0x13c] sm:$0xf]  ;;  %v3603_v37 = vld [vmem:[%s6046_s28 + $0x144] sm:$0xf0] }
 0x234   : > { %v1827_v16 = vmul.f32 %v1795_v3, %v6301_v2  ;;  %v1831_v53 = vmul.f32 %v1795_v3, %v6309_v34  ;;  %v1828_v43 = vmul.f32 %v1796_v59, %v6311_v51  ;;  %v1832_v31 = vmul.f32 %v1796_v59, %v6313_v8 }
 0x235   : > { %v1829_v56 = vmul.f32 %v1797_v52, %v6329_v14  ;;  %v1833_v63 = vmul.f32 %v1797_v52, %v6331_v38  ;;  %v1830_v54 = vmul.f32 %v1798_v33, %v6345_v18  ;;  %v1834_v0 = vmul.f32 %v1798_v33, %v6347_v42 }
 0x236   : > { %v6361_v7 = vpack.c.bf16 %v1831_v53, %v1827_v16  ;;  %v6363_v50 = vpack.c.bf16 %v1832_v31, %v1828_v43  ;;  %v6404_v15 = vrot.slane %v1781_v26, 1  ;;  %v3702_v41 = vor.u32 %v3893_v36, %v3699_v28 }
 0x237   : > { %v6370_v25 = vpack.c.bf16 %v1833_v63, %v1829_v56  ;;  %v6372_v1 = vpack.c.bf16 %v1834_v0, %v1830_v54  ;;  %v3798_v9 = vor.u32 %v3917_v47, %v3795_v44  ;;  %v1835_v58 = vmul.f32 %v1795_v3, %v6374_v13 }
 0x238   : > { %2619 = vmatmul.bf16.vlgmr.msrb.gmra.mxu0 %v6361_v7  ;;  %2668 = vmatmul.bf16.vlgmr.msrb.gmra.mxu1 %v6363_v50  ;;  %v1839_v30 = vmul.f32 %v1795_v3, %v6378_v24  ;;  %v1787_v11 = vsel %vm1786_vm14, %v1783_v27, %v1785_v19  ;;  %v1836_v23 = vmul.f32 %v1796_v59, %v6380_v22  ;;  %v6420_v32 = vperm.slane %v6404_v15, 0 }
 0x239   : > { %2717 = vmatmul.bf16.vlgmr.msrb.gmra.mxu2 %v6370_v25  ;;  %2766 = vmatmul.bf16.vlgmr.msrb.gmra.mxu3 %v6372_v1  ;;  %v1840_v62 = vmul.f32 %v1796_v59, %v6385_v17  ;;  %v1837_v6 = vmul.f32 %v1797_v52, %v6387_v29  ;;  %v1841_v49 = vmul.f32 %v1797_v52, %v6389_v35  ;;  %v1788_v59 = vrot.slane %v1787_v11, 2 }
 0x23a   : > { %2907 = vmatpush.bf16.msra.mxu2 %v3702_v41  ;;  %v1838_v20 = vmul.f32 %v1798_v33, %v6396_v61  ;;  %v1842_v4 = vmul.f32 %v1798_v33, %v6398_v10  ;;  %2956 = vmatpush.bf16.msra.mxu3 %v3798_v9  ;;  %v3510_v45 = vor.u32 %v3845_v55, %v3507_v60  ;;  %vm1792_vm13 = vcmask 1044483  }
 0x23b   : > { %v3606_v3 = vor.u32 %v3869_v21, %v3603_v37  ;;  %v6422_v16 = vpack.c.bf16 %v1839_v30, %v1835_v58  ;;  %v6424_v53 = vpack.c.bf16 %v1840_v62, %v1836_v23  ;;  %v6426_v52 = vpack.c.bf16 %v1841_v49, %v1837_v6  ;;  %v3890_v23 = vld [vmem:[%s6046_s28 + $0x1e4] sm:$0xf]  ;;  %v3687_v62 = vld [vmem:[%s6046_s28 + $0x1ec] sm:$0xf0] }
 0x23c   : > { %2809 = vmatpush.bf16.msra.mxu0 %v3510_v45  ;;  %v6429_v43 = vperm.slane %v6404_v15, 1  ;;  %v6432_v33 = vperm.slane %v6404_v15, 2  ;;  %v6434_v31 = vpack.c.bf16 %v1842_v4, %v1838_v20  ;;  %v1803_v57 = vperm.slane %v1788_v59, 0  ;;  %v3914_v6 = vld [vmem:[%s6046_s28 + $0x2a4] sm:$0xf] }
 0x23d   : > { %2858 = vmatpush.bf16.msra.mxu1 %v3606_v3  ;;  %v1804_v56 = vperm.slane %v1788_v59, 1  ;;  %v1805_v63 = vperm.slane %v1788_v59, 2  ;;  %v6438_v54 = vmul.f32 %v6420_v32, %v6301_v2  ;;  %v6442_v0 = vmul.f32 %v6420_v32, %v6309_v34 }
 0x23e   : > { %v1806_v48 = vperm.slane %v1788_v59, 3  ;;  %v1793_v12 = vsel %vm1792_vm13, %v6336_v5, %v6299_v39  ;;  %v1859_v40 = vmul.f32 %v1803_v57, %v6301_v2  ;;  %v1863_v46 = vmul.f32 %v1803_v57, %v6309_v34 }
 0x23f   : > { %v1860_v26 = vmul.f32 %v1804_v56, %v6311_v51  ;;  %v1864_v36 = vmul.f32 %v1804_v56, %v6313_v8  ;;  %v1861_v28 = vmul.f32 %v1805_v63, %v6329_v14  ;;  %v1865_v47 = vmul.f32 %v1805_v63, %v6331_v38 }
 0x240   : > { %v1862_v27 = vmul.f32 %v1806_v48, %v6345_v18  ;;  %v1866_v44 = vmul.f32 %v1806_v48, %v6347_v42  ;;  %v6454_v19 = vpack.c.bf16 %v1863_v46, %v1859_v40  ;;  %v1867_v5 = vmul.f32 %v1803_v57, %v6374_v13 }
 0x241   : > { %v6456_v39 = vpack.c.bf16 %v1864_v36, %v1860_v26  ;;  %v1871_v41 = vmul.f32 %v1803_v57, %v6378_v24  ;;  %v6460_v9 = vpack.c.bf16 %v1865_v47, %v1861_v28  ;;  %v1868_v60 = vmul.f32 %v1804_v56, %v6380_v22  ;;  %v3783_v57 = vld [vmem:[%s6046_s28 + $0x2ac] sm:$0xf0]  ;;  %v3866_v26 = vld [vmem:[%s6046_s28 + $0x124] sm:$0xf] }
 0x242   : > { %v6462_v55 = vpack.c.bf16 %v1866_v44, %v1862_v27  ;;  %v1872_v58 = vmul.f32 %v1804_v56, %v6385_v17  ;;  %v1869_v21 = vmul.f32 %v1805_v63, %v6387_v29  ;;  %v1873_v37 = vmul.f32 %v1805_v63, %v6389_v35  ;;  %v3842_v56 = vld [vmem:[%s6046_s28 + $0x64] sm:$0xf]  ;;  %v3495_v63 = vld [vmem:[%s6046_s28 + $0x6c] sm:$0xf0] }
 0x243   : > { %v6468_v30 = vpack.c.bf16 %v1871_v41, %v1867_v5  ;;  %v1794_v11 = vrot.slane %v1793_v12, 3  ;;  %v1870_v20 = vmul.f32 %v1806_v48, %v6396_v61  ;;  %v1874_v4 = vmul.f32 %v1806_v48, %v6398_v10  ;;  %v3591_v36 = vld [vmem:[%s6046_s28 + $0x12c] sm:$0xf0] }
 0x244   : > { %v6477_v49 = vpack.c.bf16 %v1872_v58, %v1868_v60  ;;  %v1844_v45 = vmul.f32 %v6429_v43, %v6311_v51  ;;  %v1848_v3 = vmul.f32 %v6429_v43, %v6313_v8  ;;  %v3690_v59 = vor.u32 %v3890_v23, %v3687_v62 }
 0x245   : > { %v6488_v12 = vpack.c.bf16 %v1873_v37, %v1869_v21  ;;  %v3786_v40 = vor.u32 %v3914_v6, %v3783_v57  ;;  %v3498_v46 = vor.u32 %v3842_v56, %v3495_v63  ;;  %v6492_v28 = vpack.c.bf16 %v1874_v4, %v1870_v20 }
 0x246   : > { %v1807_v47 = vperm.slane %v1794_v11, 0  ;;  %2908 = vmatpush.bf16.msra.mxu2 %v3690_v59  ;;  %v3594_v48 = vor.u32 %v3866_v26, %v3591_v36  ;;  %v1808_v27 = vperm.slane %v1794_v11, 1  ;;  %v1809_v44 = vperm.slane %v1794_v11, 2 }
 0x247   : > { %v1810_v5 = vperm.slane %v1794_v11, 3  ;;  %v6495_v41 = vperm.slane %v6404_v15, 3  ;;  %2957 = vmatpush.bf16.msra.mxu3 %v3786_v40  ;;  %2810 = vmatpush.bf16.msra.mxu0 %v3498_v46  ;;  %v1845_v40 = vmul.f32 %v6432_v33, %v6329_v14 }
 0x248   : > { %2624 = vmatmul.bf16.gmra.mxu0 %v6422_v16  ;;  %2673 = vmatmul.bf16.gmra.mxu1 %v6424_v53  ;;  %v1875_v60 = vmul.f32 %v1807_v47, %v6301_v2  ;;  %v1879_v58 = vmul.f32 %v1807_v47, %v6309_v34  ;;  %v1883_v21 = vmul.f32 %v1807_v47, %v6374_v13 }
 0x249   : > { %2722 = vmatmul.bf16.gmra.mxu2 %v6426_v52  ;;  %2771 = vmatmul.bf16.gmra.mxu3 %v6434_v31  ;;  %v1876_v37 = vmul.f32 %v1808_v27, %v6311_v51  ;;  %v1880_v23 = vmul.f32 %v1808_v27, %v6313_v8  ;;  %v1877_v62 = vmul.f32 %v1809_v44, %v6329_v14 }
 0x24a   : > { %2859 = vmatpush.bf16.msra.mxu1 %v3594_v48  ;;  %v1881_v11 = vmul.f32 %v1809_v44, %v6331_v38  ;;  %v6504_v6 = vpack.c.bf16 %v1879_v58, %v1875_v60  ;;  %v1878_v15 = vmul.f32 %v1810_v5, %v6345_v18  ;;  %v1882_v20 = vmul.f32 %v1810_v5, %v6347_v42  ;;  %v3675_v58 = vld [vmem:[%s6046_s28 + $0x1d4] sm:$0xf0] }
 0x24b   : > { %v1887_v2 = vmul.f32 %v1807_v47, %v6378_v24  ;;  %v6509_v34 = vpack.c.bf16 %v1880_v23, %v1876_v37  ;;  %v1884_v51 = vmul.f32 %v1808_v27, %v6380_v22  ;;  %v1888_v8 = vmul.f32 %v1808_v27, %v6385_v17 }
 0x24c   : > { %v6511_v4 = vpack.c.bf16 %v1881_v11, %v1877_v62  ;;  %v6515_v59 = vpack.c.bf16 %v1882_v20, %v1878_v15  ;;  %v1885_v56 = vmul.f32 %v1809_v44, %v6387_v29  ;;  %v1889_v63 = vmul.f32 %v1809_v44, %v6389_v35  ;;  %v3863_v62 = vld [vmem:[%s6046_s28 + $0x10c] sm:$0xf]  ;;  %v3579_v11 = vld [vmem:[%s6046_s28 + $0x114] sm:$0xf0] }
 0x24d   : > { %v6517_v57 = vpack.c.bf16 %v1887_v2, %v1883_v21  ;;  %v6523_v46 = vpack.c.bf16 %v1888_v8, %v1884_v51  ;;  %v1886_v26 = vmul.f32 %v1810_v5, %v6396_v61  ;;  %v1890_v36 = vmul.f32 %v1810_v5, %v6398_v10  ;;  %v3483_v21 = vld [vmem:[%s6046_s28 + $0x54] sm:$0xf0] }
 0x24e   : > { %v1849_v47 = vmul.f32 %v6432_v33, %v6331_v38  ;;  %v1846_v48 = vmul.f32 %v6495_v41, %v6345_v18  ;;  %v1850_v27 = vmul.f32 %v6495_v41, %v6347_v42  ;;  %v6533_v14 = vpack.c.bf16 %v1889_v63, %v1885_v56  ;;  %v3887_v42 = vld [vmem:[%s6046_s28 + $0x1cc] sm:$0xf] }
 0x24f   : > { %v6535_v44 = vpack.c.bf16 %v1890_v36, %v1886_v26  ;;  %v6539_v5 = vpack.c.bf16 %v6442_v0, %v6438_v54  ;;  %v6541_v60 = vpack.c.bf16 %v1848_v3, %v1844_v45  ;;  %v3911_v54 = vld [vmem:[%s6046_s28 + $0x28c] sm:$0xf]  ;;  %v3678_v0 = vor.u32 %v3887_v42, %v3675_v58  ;;  %v3771_v45 = vld [vmem:[%s6046_s28 + $0x294] sm:$0xf0]  ;;  %v3881_v42 = vld [vmem:[%s6046_s28 + $0x19c] sm:$0xf] }
 0x250   : > { %v6543_v38 = vpack.c.bf16 %v1849_v47, %v1845_v40  ;;  %v6545_v18 = vpack.c.bf16 %v1850_v27, %v1846_v48  ;;  %v3839_v3 = vld [vmem:[%s6046_s28 + $0x4c] sm:$0xf]  ;;  %v3774_v37 = vor.u32 %v3911_v54, %v3771_v45  ;;  %v3582_v15 = vor.u32 %v3863_v62, %v3579_v11  ;;  %v3471_v40 = vld [vmem:[%s6046_s28 + $0x3c] sm:$0xf0]  ;;  %v3860_v47 = vld [vmem:[%s6046_s28 + $0xf4] sm:$0xf] }
 0x251   : > { %v3486_v23 = vor.u32 %v3839_v3, %v3483_v21  ;;  %2909 = vmatpush.bf16.msra.mxu2 %v3678_v0  ;;  %v1851_v20 = vmul.f32 %v6420_v32, %v6374_v13  ;;  %v1855_v2 = vmul.f32 %v6420_v32, %v6378_v24  ;;  %v1852_v51 = vmul.f32 %v6429_v43, %v6380_v22  ;;  %v3567_v48 = vld [vmem:[%s6046_s28 + $0xfc] sm:$0xf0]  ;;  %v3651_v58 = vld [vmem:[%s6046_s28 + $0x1a4] sm:$0xf0]  ;;  %v3905_v54 = vld [vmem:[%s6046_s28 + $0x25c] sm:$0xf] }
 0x252   : > { %2958 = vmatpush.bf16.msra.mxu3 %v3774_v37  ;;  %2860 = vmatpush.bf16.msra.mxu1 %v3582_v15  ;;  %v1856_v8 = vmul.f32 %v6429_v43, %v6385_v17  ;;  %v1853_v56 = vmul.f32 %v6432_v33, %v6387_v29  ;;  %v1857_v63 = vmul.f32 %v6432_v33, %v6389_v35  ;;  %v3884_v35 = vld [vmem:[%s6046_s28 + $0x1b4] sm:$0xf]  ;;  %v3759_v33 = vld [vmem:[%s6046_s28 + $0x27c] sm:$0xf0]  ;;  %v3747_v45 = vld [vmem:[%s6046_s28 + $0x264] sm:$0xf0] }
 0x253   : > { %2811 = vmatpush.bf16.msra.mxu0 %v3486_v23  ;;  %v1854_v13 = vmul.f32 %v6495_v41, %v6396_v61  ;;  %v1858_v24 = vmul.f32 %v6495_v41, %v6398_v10  ;;  %v6575_v22 = vpack.c.bf16 %v1855_v2, %v1851_v20  ;;  %v3663_v61 = vld [vmem:[%s6046_s28 + $0x1bc] sm:$0xf0]  ;;  %v3908_v10 = vld [vmem:[%s6046_s28 + $0x274] sm:$0xf]  ;;  %v3570_v27 = vor.u32 %v3860_v47, %v3567_v48  ;;  %v3833_v3 = vld [vmem:[%s6046_s28 + $0x1c] sm:$0xf] }
 0x254   : > { %v6577_v32 = vpack.c.bf16 %v1856_v8, %v1852_v51  ;;  %v6579_v17 = vpack.c.bf16 %v1857_v63, %v1853_v56  ;;  %v3666_v43 = vor.u32 %v3884_v35, %v3663_v61  ;;  %v3836_v41 = vld [vmem:[%s6046_s28 + $0x34] sm:$0xf]  ;;  %v3762_v26 = vor.u32 %v3908_v10, %v3759_v33  ;;  %v3459_v21 = vld [vmem:[%s6046_s28 + $0x24] sm:$0xf0]  ;;  %v3857_v62 = vld [vmem:[%s6046_s28 + $0xdc] sm:$0xf] }
 0x255   : > { %v6581_v29 = vpack.c.bf16 %v1858_v24, %v1854_v13  ;;  %v3474_v36 = vor.u32 %v3836_v41, %v3471_v40  ;;  %v3654_v0 = vor.u32 %v3881_v42, %v3651_v58  ;;  %v3750_v37 = vor.u32 %v3905_v54, %v3747_v45  ;;  %v3555_v11 = vld [vmem:[%s6046_s28 + $0xe4] sm:$0xf0]  ;;  %v3878_v20 = vld [vmem:[%s6046_s28 + $0x184] sm:$0xf]  ;;  %v3639_v2 = vld [vmem:[%s6046_s28 + $0x18c] sm:$0xf0] }
 0x256   : > { %2910 = vmatpush.bf16.msra.mxu2 %v3666_v43  ;;  %2959 = vmatpush.bf16.msra.mxu3 %v3762_v26  ;;  %v3462_v23 = vor.u32 %v3833_v3, %v3459_v21  ;;  %v3558_v15 = vor.u32 %v3857_v62, %v3555_v11  ;;  %v3902_v51 = vld [vmem:[%s6046_s28 + $0x244] sm:$0xf]  ;;  %v3642_v8 = vor.u32 %v3878_v20, %v3639_v2  ;;  %v3735_v56 = vld [vmem:[%s6046_s28 + $0x24c] sm:$0xf0]  ;;  %v3901_v41 = vld [vmem:[%s6046_s28 + $0x238] sm:$0xf0] }
 0x257   : > { %2812 = vmatpush.bf16.msra.mxu0 %v3474_v36  ;;  %2861 = vmatpush.bf16.msra.mxu1 %v3570_v27  ;;  %v3830_v63 = vld [vmem:[%s6046_s28 + $0x4] sm:$0xf]  ;;  %v3447_v13 = vld [vmem:[%s6046_s28 + $0xc] sm:$0xf0]  ;;  %v3738_v24 = vor.u32 %v3902_v51, %v3735_v56  ;;  %v3925_v36 = vld [vmem:[%s6046_s28 + $0x2f8] sm:$0xf0] }
 0x258   : > { %2629 = vmatmul.bf16.gmra.mxu0 %v6539_v5  ;;  %2678 = vmatmul.bf16.gmra.mxu1 %v6541_v60  ;;  %v3450_v35 = vor.u32 %v3830_v63, %v3447_v13  ;;  %v3854_v61 = vld [vmem:[%s6046_s28 + $0xc4] sm:$0xf]  ;;  %v3543_v10 = vld [vmem:[%s6046_s28 + $0xcc] sm:$0xf0]  ;;  %v3853_v27 = vld [vmem:[%s6046_s28 + $0xb8] sm:$0xf0] }
 0x259   : > { %2727 = vmatmul.bf16.gmra.mxu2 %v6543_v38  ;;  %2776 = vmatmul.bf16.gmra.mxu3 %v6545_v18  ;;  %v3546_v43 = vor.u32 %v3854_v61, %v3543_v10  ;;  %v3729_v33 = vld [vmem:[%s6046_s28 + $0x230] sm:$0xf]  ;;  %v3877_v54 = vld [vmem:[%s6046_s28 + $0x178] sm:$0xf0]  ;;  %v3717_v45 = vld [vmem:[%s6046_s28 + $0x218] sm:$0xf] }
 0x25a   : > { %2911 = vmatpush.bf16.msra.mxu2 %v3654_v0  ;;  %2960 = vmatpush.bf16.msra.mxu3 %v3750_v37  ;;  %v3825_v40 = vld [vmem:[%s6046_s28 + $0x2f0] sm:$0xf]  ;;  %v3730_v26 = vor.u32 %v3901_v41, %v3729_v33  ;;  %v3898_v3 = vld [vmem:[%s6046_s28 + $0x220] sm:$0xf0]  ;;  %v3813_v21 = vld [vmem:[%s6046_s28 + $0x2d8] sm:$0xf] }
 0x25b   : > { %2813 = vmatpush.bf16.msra.mxu0 %v3462_v23  ;;  %2862 = vmatpush.bf16.msra.mxu1 %v3558_v15  ;;  %v3826_v47 = vor.u32 %v3925_v36, %v3825_v40  ;;  %v3537_v48 = vld [vmem:[%s6046_s28 + $0xb0] sm:$0xf]  ;;  %v3718_v37 = vor.u32 %v3898_v3, %v3717_v45  ;;  %v3922_v23 = vld [vmem:[%s6046_s28 + $0x2e0] sm:$0xf0]  ;;  %v3525_v11 = vld [vmem:[%s6046_s28 + $0x98] sm:$0xf] }
 0x25c   : > { %v3633_v42 = vld [vmem:[%s6046_s28 + $0x170] sm:$0xf]  ;;  %v3538_v58 = vor.u32 %v3853_v27, %v3537_v48  ;;  %v3814_v62 = vor.u32 %v3922_v23, %v3813_v21  ;;  %v3850_v15 = vld [vmem:[%s6046_s28 + $0xa0] sm:$0xf0]  ;;  %v3621_v20 = vld [vmem:[%s6046_s28 + $0x158] sm:$0xf] }
 0x25d   : > { %v3634_v0 = vor.u32 %v3877_v54, %v3633_v42  ;;  %v3526_v2 = vor.u32 %v3850_v15, %v3525_v11  ;;  %v3874_v51 = vld [vmem:[%s6046_s28 + $0x160] sm:$0xf0]  ;;  %v3801_v61 = vld [vmem:[%s6046_s28 + $0x2c0] sm:$0xf]  ;;  %v3919_v41 = vld [vmem:[%s6046_s28 + $0x2c8] sm:$0xf0] }
 0x25e   : > { %2912 = vmatpush.bf16.msra.mxu2 %v3642_v8  ;;  %2961 = vmatpush.bf16.msra.mxu3 %v3738_v24  ;;  %v3622_v63 = vor.u32 %v3874_v51, %v3621_v20  ;;  %v3705_v24 = vld [vmem:[%s6046_s28 + $0x200] sm:$0xf]  ;;  %v3871_v21 = vld [vmem:[%s6046_s28 + $0x148] sm:$0xf0]  ;;  %v3892_v51 = vld [vmem:[%s6046_s28 + $0x1f0] sm:$0xf0] }
 0x25f   : > { %2814 = vmatpush.bf16.msra.mxu0 %v3450_v35  ;;  %2863 = vmatpush.bf16.msra.mxu1 %v3546_v43  ;;  %v3895_v35 = vld [vmem:[%s6046_s28 + $0x208] sm:$0xf0]  ;;  %v3513_v42 = vld [vmem:[%s6046_s28 + $0x80] sm:$0xf] }
 0x260   : > { %v3706_v33 = vor.u32 %v3895_v35, %v3705_v24  ;;  %v3609_v54 = vld [vmem:[%s6046_s28 + $0x140] sm:$0xf]  ;;  %v3916_v24 = vld [vmem:[%s6046_s28 + $0x2b0] sm:$0xf0] }
 0x261   : > { %v3610_v11 = vor.u32 %v3871_v21, %v3609_v54 }
 0x262   : > { %3101 = vmatpush.bf16.msrb.mxu2 %v3730_v26  ;;  %3150 = vmatpush.bf16.msrb.mxu3 %v3826_v47  ;;  %v3802_v47 = vor.u32 %v3919_v41, %v3801_v61 }
 0x263   : > { %3003 = vmatpush.bf16.msrb.mxu0 %v3538_v58  ;;  %3052 = vmatpush.bf16.msrb.mxu1 %v3634_v0  ;;  %v3847_v58 = vld [vmem:[%s6046_s28 + $0x88] sm:$0xf0] }
 0x264   : > { %v3514_v3 = vor.u32 %v3847_v58, %v3513_v42  ;;  %v3868_v42 = vld [vmem:[%s6046_s28 + $0x130] sm:$0xf0] }
 0x266   : > { %3102 = vmatpush.bf16.msrb.mxu2 %v3718_v37  ;;  %3151 = vmatpush.bf16.msrb.mxu3 %v3814_v62 }
 0x267   : > { %3004 = vmatpush.bf16.msrb.mxu0 %v3526_v2  ;;  %3053 = vmatpush.bf16.msrb.mxu1 %v3622_v63  ;;  %v3693_v2 = vld [vmem:[%s6046_s28 + $0x1e8] sm:$0xf] }
 0x268   : > { %2634 = vmatmul.bf16.gmra.mxu0 %v6575_v22  ;;  %2683 = vmatmul.bf16.gmra.mxu1 %v6577_v32  ;;  %v3694_v63 = vor.u32 %v3892_v51, %v3693_v2  ;;  %v3913_v2 = vld [vmem:[%s6046_s28 + $0x298] sm:$0xf0] }
 0x269   : > { %2732 = vmatmul.bf16.gmra.mxu2 %v6579_v17  ;;  %2781 = vmatmul.bf16.gmra.mxu3 %v6581_v29 }
 0x26a   : > { %3103 = vmatpush.bf16.msrb.mxu2 %v3706_v33  ;;  %3152 = vmatpush.bf16.msrb.mxu3 %v3802_v47 }
 0x26b   : > { %3005 = vmatpush.bf16.msrb.mxu0 %v3514_v3  ;;  %3054 = vmatpush.bf16.msrb.mxu1 %v3610_v11 }
 0x26e   : > { %3104 = vmatpush.bf16.msrb.mxu2 %v3694_v63 }
 0x278   : > { %2639 = vmatmul.bf16.gmra.mxu0 %v6454_v19  ;;  %2688 = vmatmul.bf16.gmra.mxu1 %v6456_v39 }
 0x279   : > { %2737 = vmatmul.bf16.gmra.mxu2 %v6460_v9  ;;  %2786 = vmatmul.bf16.gmra.mxu3 %v6462_v55 }
 0x288   : > { %2644 = vmatmul.bf16.gmra.mxu0 %v6468_v30  ;;  %2693 = vmatmul.bf16.gmra.mxu1 %v6477_v49 }
 0x289   : > { %2742 = vmatmul.bf16.gmra.mxu2 %v6488_v12  ;;  %2791 = vmatmul.bf16.gmra.mxu3 %v6492_v28 }
 0x298   : > { %2649 = vmatmul.bf16.gmra.mxu0 %v6504_v6  ;;  %2698 = vmatmul.bf16.gmra.mxu1 %v6509_v34 }
 0x299   : > { %2747 = vmatmul.bf16.gmra.mxu2 %v6511_v4  ;;  %2796 = vmatmul.bf16.gmra.mxu3 %v6515_v59 }
 0x2a8   : > { %2654 = vmatmul.bf16.gmra.mxu0 %v6517_v57  ;;  %2703 = vmatmul.bf16.gmra.mxu1 %v6523_v46 }
 0x2a9   : > { %2752 = vmatmul.bf16.gmra.mxu2 %v6533_v14  ;;  %2801 = vmatmul.bf16.gmra.mxu3 %v6535_v44 }
 0x2b5   : > { %v2620_v8 = vpop.f32.mrf.mxu0  ;;  %v2669_v56 = vpop.f32.mrf.mxu1 }
 0x2b6   : > { %v2670_v13 = vadd.f32 %v2669_v56, %v2620_v8 }
 0x2b8   : > { %2815 = vmatmul.bf16.vlgmr.msra.gmra.mxu0 %v6361_v7  ;;  %2864 = vmatmul.bf16.vlgmr.msra.gmra.mxu1 %v6363_v50 }
 0x2b9   : > { %2913 = vmatmul.bf16.vlgmr.msra.gmra.mxu2 %v6370_v25  ;;  %2962 = vmatmul.bf16.vlgmr.msra.gmra.mxu3 %v6372_v1 }
 0x2bc   : > { %v2718_v10 = vpop.f32.mrf.mxu2  ;;  %v2767_v43 = vpop.f32.mrf.mxu3 }
 0x2bd   : > { %v2719_v40 = vadd.f32 %v2718_v10, %v2670_v13  ;;  %v2622_v26 = vpop.f32.mrf.mxu0  ;;  %v2671_v36 = vpop.f32.mrf.mxu1  ;;  %v3789_v13 = vld [vmem:[%s6046_s28 + $0x2a8] sm:$0xf] }
 0x2be   : > { %v2672_v27 = vadd.f32 %v2671_v36, %v2622_v26  ;;  %v3844_v26 = vld [vmem:[%s6046_s28 + $0x70] sm:$0xf0] }
 0x2bf   : > { %v2768_v48 = vadd.f32 %v2767_v43, %v2719_v40  ;;  %v3790_v43 = vor.u32 %v3916_v24, %v3789_v13  ;;  %v3501_v40 = vld [vmem:[%s6046_s28 + $0x68] sm:$0xf] }
 0x2c1   : > { %3247 = vst [vmem:[%s6656_s15] sm:$0xff] %v2768_v48  ;;  %3153 = vmatpush.bf16.msrb.mxu3 %v3790_v43  ;;  %v3502_v48 = vor.u32 %v3844_v26, %v3501_v40  ;;  %v3865_v40 = vld [vmem:[%s6046_s28 + $0x118] sm:$0xf0] }
 0x2c3   : > { %3006 = vmatpush.bf16.msrb.mxu0 %v3502_v48 }
 0x2c4   : > { %v2720_v0 = vpop.f32.mrf.mxu2  ;;  %v2769_v45 = vpop.f32.mrf.mxu3 }
 0x2c5   : > { %v2721_v37 = vadd.f32 %v2720_v0, %v2672_v27  ;;  %v2625_v23 = vpop.f32.mrf.mxu0  ;;  %v2674_v62 = vpop.f32.mrf.mxu1  ;;  %v3597_v27 = vld [vmem:[%s6046_s28 + $0x128] sm:$0xf] }
 0x2c6   : > { %v2675_v20 = vadd.f32 %v2674_v62, %v2625_v23  ;;  %v3889_v23 = vld [vmem:[%s6046_s28 + $0x1d8] sm:$0xf0] }
 0x2c7   : > { %v2770_v15 = vadd.f32 %v2769_v45, %v2721_v37  ;;  %v3598_v45 = vor.u32 %v3868_v42, %v3597_v27  ;;  %v3681_v37 = vld [vmem:[%s6046_s28 + $0x1d0] sm:$0xf] }
 0x2c8   : > { %2820 = vmatmul.bf16.gmra.mxu0 %v6422_v16  ;;  %2869 = vmatmul.bf16.gmra.mxu1 %v6424_v53 }
 0x2c9   : > { %2918 = vmatmul.bf16.gmra.mxu2 %v6426_v52  ;;  %2967 = vmatmul.bf16.gmra.mxu3 %v6434_v31  ;;  %3250 = vst [vmem:[%s6656_s15 + $0x18] sm:$0xff] %v2770_v15  ;;  %v3682_v15 = vor.u32 %v3889_v23, %v3681_v37  ;;  %v3910_v37 = vld [vmem:[%s6046_s28 + $0x280] sm:$0xf0] }
 0x2ca   : > { %3055 = vmatpush.bf16.msrb.mxu1 %v3598_v45 }
 0x2cb   : > { %3105 = vmatpush.bf16.msrb.mxu2 %v3682_v15 }
 0x2cc   : > { %v2723_v8 = vpop.f32.mrf.mxu2  ;;  %v2772_v56 = vpop.f32.mrf.mxu3 }
 0x2cd   : > { %v2724_v35 = vadd.f32 %v2723_v8, %v2675_v20  ;;  %v2627_v61 = vpop.f32.mrf.mxu0  ;;  %v2676_v10 = vpop.f32.mrf.mxu1  ;;  %v3777_v20 = vld [vmem:[%s6046_s28 + $0x290] sm:$0xf] }
 0x2ce   : > { %v2677_v41 = vadd.f32 %v2676_v10, %v2627_v61  ;;  %v3778_v63 = vor.u32 %v3913_v2, %v3777_v20  ;;  %v3841_v61 = vld [vmem:[%s6046_s28 + $0x58] sm:$0xf0] }
 0x2cf   : > { %v2773_v33 = vadd.f32 %v2772_v56, %v2724_v35  ;;  %v3489_v35 = vld [vmem:[%s6046_s28 + $0x50] sm:$0xf] }
 0x2d0   : > { %3154 = vmatpush.bf16.msrb.mxu3 %v3778_v63 }
 0x2d1   : > { %3253 = vst [vmem:[%s6656_s15 + $0x30] sm:$0xff] %v2773_v33  ;;  %v3490_v33 = vor.u32 %v3841_v61, %v3489_v35  ;;  %v3862_v35 = vld [vmem:[%s6046_s28 + $0x100] sm:$0xf0] }
 0x2d3   : > { %3007 = vmatpush.bf16.msrb.mxu0 %v3490_v33 }
 0x2d4   : > { %v2725_v36 = vpop.f32.mrf.mxu2  ;;  %v2774_v47 = vpop.f32.mrf.mxu3 }
 0x2d5   : > { %v2726_v58 = vadd.f32 %v2725_v36, %v2677_v41  ;;  %v2630_v54 = vpop.f32.mrf.mxu0  ;;  %v2679_v0 = vpop.f32.mrf.mxu1  ;;  %v3585_v41 = vld [vmem:[%s6046_s28 + $0x110] sm:$0xf] }
 0x2d6   : > { %v2680_v21 = vadd.f32 %v2679_v0, %v2630_v54  ;;  %v3586_v48 = vor.u32 %v3865_v40, %v3585_v41  ;;  %v3886_v54 = vld [vmem:[%s6046_s28 + $0x1c0] sm:$0xf0] }
 0x2d7   : > { %v2775_v3 = vadd.f32 %v2774_v47, %v2726_v58  ;;  %v3669_v58 = vld [vmem:[%s6046_s28 + $0x1b8] sm:$0xf] }
 0x2d8   : > { %2825 = vmatmul.bf16.gmra.mxu0 %v6539_v5  ;;  %2874 = vmatmul.bf16.gmra.mxu1 %v6541_v60 }
 0x2d9   : > { %2923 = vmatmul.bf16.gmra.mxu2 %v6543_v38  ;;  %2972 = vmatmul.bf16.gmra.mxu3 %v6545_v18  ;;  %3256 = vst [vmem:[%s6656_s15 + $0x48] sm:$0xff] %v2775_v3  ;;  %v3670_v3 = vor.u32 %v3886_v54, %v3669_v58  ;;  %v3907_v58 = vld [vmem:[%s6046_s28 + $0x268] sm:$0xf0] }
 0x2da   : > { %3056 = vmatpush.bf16.msrb.mxu1 %v3586_v48 }
 0x2db   : > { %3106 = vmatpush.bf16.msrb.mxu2 %v3670_v3 }
 0x2dc   : > { %v2728_v62 = vpop.f32.mrf.mxu2  ;;  %v2777_v11 = vpop.f32.mrf.mxu3 }
 0x2dd   : > { %v2729_v51 = vadd.f32 %v2728_v62, %v2680_v21  ;;  %v2632_v8 = vpop.f32.mrf.mxu0  ;;  %v2681_v56 = vpop.f32.mrf.mxu1  ;;  %v3765_v21 = vld [vmem:[%s6046_s28 + $0x278] sm:$0xf] }
 0x2de   : > { %v2682_v24 = vadd.f32 %v2681_v56, %v2632_v8  ;;  %v3766_v15 = vor.u32 %v3910_v37, %v3765_v21  ;;  %v3838_v8 = vld [vmem:[%s6046_s28 + $0x40] sm:$0xf0] }
 0x2df   : > { %v2778_v13 = vadd.f32 %v2777_v11, %v2729_v51  ;;  %v3477_v51 = vld [vmem:[%s6046_s28 + $0x38] sm:$0xf] }
 0x2e0   : > { %3155 = vmatpush.bf16.msrb.mxu3 %v3766_v15 }
 0x2e1   : > { %3259 = vst [vmem:[%s6656_s15 + $0x60] sm:$0xff] %v2778_v13  ;;  %v3478_v13 = vor.u32 %v3838_v8, %v3477_v51  ;;  %v3859_v51 = vld [vmem:[%s6046_s28 + $0xe8] sm:$0xf0] }
 0x2e3   : > { %3008 = vmatpush.bf16.msrb.mxu0 %v3478_v13 }
 0x2e4   : > { %v2730_v10 = vpop.f32.mrf.mxu2  ;;  %v2779_v43 = vpop.f32.mrf.mxu3 }
 0x2e5   : > { %v2731_v26 = vadd.f32 %v2730_v10, %v2682_v24  ;;  %v2635_v36 = vpop.f32.mrf.mxu0  ;;  %v2684_v47 = vpop.f32.mrf.mxu1  ;;  %v3573_v24 = vld [vmem:[%s6046_s28 + $0xf8] sm:$0xf] }
 0x2e6   : > { %v2685_v42 = vadd.f32 %v2684_v47, %v2635_v36  ;;  %v3574_v33 = vor.u32 %v3862_v35, %v3573_v24  ;;  %v3883_v36 = vld [vmem:[%s6046_s28 + $0x1a8] sm:$0xf0] }
 0x2e7   : > { %v2780_v27 = vadd.f32 %v2779_v43, %v2731_v26  ;;  %v3657_v26 = vld [vmem:[%s6046_s28 + $0x1a0] sm:$0xf] }
 0x2e8   : > { %2830 = vmatmul.bf16.gmra.mxu0 %v6575_v22  ;;  %2879 = vmatmul.bf16.gmra.mxu1 %v6577_v32 }
 0x2e9   : > { %2928 = vmatmul.bf16.gmra.mxu2 %v6579_v17  ;;  %2977 = vmatmul.bf16.gmra.mxu3 %v6581_v29  ;;  %3262 = vst [vmem:[%s6656_s15 + $0x78] sm:$0xff] %v2780_v27  ;;  %v3658_v27 = vor.u32 %v3883_v36, %v3657_v26  ;;  %v3904_v26 = vld [vmem:[%s6046_s28 + $0x250] sm:$0xf0] }
 0x2ea   : > { %3057 = vmatpush.bf16.msrb.mxu1 %v3574_v33 }
 0x2eb   : > { %3107 = vmatpush.bf16.msrb.mxu2 %v3658_v27 }
 0x2ec   : > { %v2733_v0 = vpop.f32.mrf.mxu2  ;;  %v2782_v45 = vpop.f32.mrf.mxu3 }
 0x2ed   : > { %v2734_v23 = vadd.f32 %v2733_v0, %v2685_v42  ;;  %v2637_v62 = vpop.f32.mrf.mxu0  ;;  %v2686_v11 = vpop.f32.mrf.mxu1  ;;  %v3753_v42 = vld [vmem:[%s6046_s28 + $0x260] sm:$0xf] }
 0x2ee   : > { %v2687_v2 = vadd.f32 %v2686_v11, %v2637_v62  ;;  %v3754_v3 = vor.u32 %v3907_v58, %v3753_v42  ;;  %v3835_v62 = vld [vmem:[%s6046_s28 + $0x28] sm:$0xf0] }
 0x2ef   : > { %v2783_v20 = vadd.f32 %v2782_v45, %v2734_v23  ;;  %v3465_v23 = vld [vmem:[%s6046_s28 + $0x20] sm:$0xf] }
 0x2f0   : > { %3156 = vmatpush.bf16.msrb.mxu3 %v3754_v3 }
 0x2f1   : > { %3265 = vst [vmem:[%s6656_s15 + $0x90] sm:$0xff] %v2783_v20  ;;  %v3466_v20 = vor.u32 %v3835_v62, %v3465_v23  ;;  %v3856_v23 = vld [vmem:[%s6046_s28 + $0xd0] sm:$0xf0] }
 0x2f3   : > { %3009 = vmatpush.bf16.msrb.mxu0 %v3466_v20 }
 0x2f4   : > { %v2735_v56 = vpop.f32.mrf.mxu2  ;;  %v2784_v63 = vpop.f32.mrf.mxu3 }
 0x2f5   : > { %v2736_v61 = vadd.f32 %v2735_v56, %v2687_v2  ;;  %v2640_v10 = vpop.f32.mrf.mxu0  ;;  %v2689_v43 = vpop.f32.mrf.mxu1  ;;  %v3561_v2 = vld [vmem:[%s6046_s28 + $0xe0] sm:$0xf] }
 0x2f6   : > { %v2690_v40 = vadd.f32 %v2689_v43, %v2640_v10  ;;  %v3562_v13 = vor.u32 %v3859_v51, %v3561_v2  ;;  %v3880_v10 = vld [vmem:[%s6046_s28 + $0x190] sm:$0xf0] }
 0x2f7   : > { %v2785_v41 = vadd.f32 %v2784_v63, %v2736_v61  ;;  %v3645_v61 = vld [vmem:[%s6046_s28 + $0x188] sm:$0xf] }
 0x2f8   : > { %2835 = vmatmul.bf16.gmra.mxu0 %v6454_v19  ;;  %2884 = vmatmul.bf16.gmra.mxu1 %v6456_v39 }
 0x2f9   : > { %2933 = vmatmul.bf16.gmra.mxu2 %v6460_v9  ;;  %2982 = vmatmul.bf16.gmra.mxu3 %v6462_v55  ;;  %3268 = vst [vmem:[%s6656_s15 + $0xa8] sm:$0xff] %v2785_v41  ;;  %v3646_v41 = vor.u32 %v3880_v10, %v3645_v61 }
 0x2fa   : > { %3058 = vmatpush.bf16.msrb.mxu1 %v3562_v13 }
 0x2fb   : > { %3108 = vmatpush.bf16.msrb.mxu2 %v3646_v41 }
 0x2fc   : > { %v2738_v47 = vpop.f32.mrf.mxu2  ;;  %v2787_v48 = vpop.f32.mrf.mxu3 }
 0x2fd   : > { %v2739_v54 = vadd.f32 %v2738_v47, %v2690_v40  ;;  %v2642_v0 = vpop.f32.mrf.mxu0  ;;  %v2691_v45 = vpop.f32.mrf.mxu1  ;;  %v3741_v40 = vld [vmem:[%s6046_s28 + $0x248] sm:$0xf] }
 0x2fe   : > { %v2692_v37 = vadd.f32 %v2691_v45, %v2642_v0  ;;  %v3742_v27 = vor.u32 %v3904_v26, %v3741_v40  ;;  %v3832_v0 = vld [vmem:[%s6046_s28 + $0x10] sm:$0xf0] }
 0x2ff   : > { %v2788_v21 = vadd.f32 %v2787_v48, %v2739_v54  ;;  %v3453_v54 = vld [vmem:[%s6046_s28 + $0x8] sm:$0xf] }
 0x300   : > { %3157 = vmatpush.bf16.msrb.mxu3 %v3742_v27 }
 0x301   : > { %3271 = vst [vmem:[%s6656_s15 + $0xc0] sm:$0xff] %v2788_v21  ;;  %v3454_v21 = vor.u32 %v3832_v0, %v3453_v54 }
 0x303   : > { %3010 = vmatpush.bf16.msrb.mxu0 %v3454_v21 }
 0x304   : > { %v2740_v11 = vpop.f32.mrf.mxu2  ;;  %v2789_v15 = vpop.f32.mrf.mxu3 }
 0x305   : > { %v2741_v8 = vadd.f32 %v2740_v11, %v2692_v37  ;;  %v2645_v56 = vpop.f32.mrf.mxu0  ;;  %v2694_v63 = vpop.f32.mrf.mxu1  ;;  %v3549_v37 = vld [vmem:[%s6046_s28 + $0xc8] sm:$0xf] }
 0x306   : > { %v2695_v35 = vadd.f32 %v2694_v63, %v2645_v56  ;;  %v3550_v20 = vor.u32 %v3856_v23, %v3549_v37 }
 0x307   : > { %v2790_v24 = vadd.f32 %v2789_v15, %v2741_v8 }
 0x308   : > { %2840 = vmatmul.bf16.gmra.mxu0 %v6468_v30  ;;  %2889 = vmatmul.bf16.gmra.mxu1 %v6477_v49 }
 0x309   : > { %2938 = vmatmul.bf16.gmra.mxu2 %v6488_v12  ;;  %2987 = vmatmul.bf16.gmra.mxu3 %v6492_v28  ;;  %3274 = vst [vmem:[%s6656_s15 + $0xd8] sm:$0xff] %v2790_v24 }
 0x30a   : > { %3059 = vmatpush.bf16.msrb.mxu1 %v3550_v20 }
 0x30c   : > { %v2743_v43 = vpop.f32.mrf.mxu2  ;;  %v2792_v33 = vpop.f32.mrf.mxu3 }
 0x30d   : > { %v2744_v36 = vadd.f32 %v2743_v43, %v2695_v35  ;;  %v2647_v47 = vpop.f32.mrf.mxu0  ;;  %v2696_v48 = vpop.f32.mrf.mxu1 }
 0x30e   : > { %v2697_v58 = vadd.f32 %v2696_v48, %v2647_v47 }
 0x30f   : > { %v2793_v42 = vadd.f32 %v2792_v33, %v2744_v36 }
 0x311   : > { %3277 = vst [vmem:[%s6656_s15 + $0xf0] sm:$0xff] %v2793_v42 }
 0x314   : > { %v2745_v45 = vpop.f32.mrf.mxu2  ;;  %v2794_v3 = vpop.f32.mrf.mxu3 }
 0x315   : > { %v2746_v62 = vadd.f32 %v2745_v45, %v2697_v58  ;;  %v2650_v11 = vpop.f32.mrf.mxu0  ;;  %v2699_v15 = vpop.f32.mrf.mxu1 }
 0x316   : > { %v2700_v51 = vadd.f32 %v2699_v15, %v2650_v11 }
 0x317   : > { %v2795_v2 = vadd.f32 %v2794_v3, %v2746_v62 }
 0x318   : > { %2845 = vmatmul.bf16.gmra.mxu0 %v6504_v6  ;;  %2894 = vmatmul.bf16.gmra.mxu1 %v6509_v34 }
 0x319   : > { %2943 = vmatmul.bf16.gmra.mxu2 %v6511_v4  ;;  %2992 = vmatmul.bf16.gmra.mxu3 %v6515_v59  ;;  %3280 = vst [vmem:[%s6656_s15 + $0x108] sm:$0xff] %v2795_v2 }
 0x31c   : > { %v2748_v8 = vpop.f32.mrf.mxu2  ;;  %v2797_v56 = vpop.f32.mrf.mxu3 }
 0x31d   : > { %v2749_v63 = vadd.f32 %v2748_v8, %v2700_v51  ;;  %v2652_v13 = vpop.f32.mrf.mxu0  ;;  %v2701_v24 = vpop.f32.mrf.mxu1 }
 0x31e   : > { %v2702_v61 = vadd.f32 %v2701_v24, %v2652_v13 }
 0x31f   : > { %v2798_v35 = vadd.f32 %v2797_v56, %v2749_v63 }
 0x321   : > { %3283 = vst [vmem:[%s6656_s15 + $0x120] sm:$0xff] %v2798_v35 }
 0x324   : > { %v2750_v10 = vpop.f32.mrf.mxu2  ;;  %v2799_v43 = vpop.f32.mrf.mxu3 }
 0x325   : > { %v2751_v33 = vadd.f32 %v2750_v10, %v2702_v61  ;;  %v2655_v41 = vpop.f32.mrf.mxu0  ;;  %v2704_v40 = vpop.f32.mrf.mxu1 }
 0x326   : > { %v2705_v36 = vadd.f32 %v2704_v40, %v2655_v41 }
 0x327   : > { %v2800_v26 = vadd.f32 %v2799_v43, %v2751_v33 }
 0x328   : > { %2850 = vmatmul.bf16.gmra.mxu0 %v6517_v57  ;;  %2899 = vmatmul.bf16.gmra.mxu1 %v6523_v46 }
 0x329   : > { %2948 = vmatmul.bf16.gmra.mxu2 %v6533_v14  ;;  %2997 = vmatmul.bf16.gmra.mxu3 %v6535_v44  ;;  %3286 = vst [vmem:[%s6656_s15 + $0x138] sm:$0xff] %v2800_v26 }
 0x32c   : > { %v2753_v47 = vpop.f32.mrf.mxu2  ;;  %v2802_v48 = vpop.f32.mrf.mxu3 }
 0x32d   : > { %v2754_v27 = vadd.f32 %v2753_v47, %v2705_v36  ;;  %v2657_v42 = vpop.f32.mrf.mxu0  ;;  %v2706_v58 = vpop.f32.mrf.mxu1 }
 0x32e   : > { %v2707_v0 = vadd.f32 %v2706_v58, %v2657_v42 }
 0x32f   : > { %v2803_v54 = vadd.f32 %v2802_v48, %v2754_v27 }
 0x331   : > { %3289 = vst [vmem:[%s6656_s15 + $0x150] sm:$0xff] %v2803_v54 }
 0x334   : > { %v2755_v45 = vpop.f32.mrf.mxu2  ;;  %v2804_v3 = vpop.f32.mrf.mxu3 }
 0x335   : > { %v2756_v21 = vadd.f32 %v2755_v45, %v2707_v0  ;;  %v2816_v37 = vpop.f32.mrf.mxu0  ;;  %v2865_v23 = vpop.f32.mrf.mxu1 }
 0x336   : > { %v2866_v11 = vadd.f32 %v2865_v23, %v2816_v37 }
 0x337   : > { %v2805_v62 = vadd.f32 %v2804_v3, %v2756_v21 }
 0x338   : > { %3011 = vmatmul.bf16.vlgmr.msrb.gmra.mxu0 %v6361_v7  ;;  %3060 = vmatmul.bf16.vlgmr.msrb.gmra.mxu1 %v6363_v50 }
 0x339   : > { %3109 = vmatmul.bf16.vlgmr.msrb.gmra.mxu2 %v6370_v25  ;;  %3158 = vmatmul.bf16.vlgmr.msrb.gmra.mxu3 %v6372_v1  ;;  %3292 = vst [vmem:[%s6656_s15 + $0x168] sm:$0xff] %v2805_v62 }
 0x33c   : > { %v2914_v15 = vpop.f32.mrf.mxu2  ;;  %v2963_v20 = vpop.f32.mrf.mxu3 }
 0x33d   : > { %v2915_v2 = vadd.f32 %v2914_v15, %v2866_v11  ;;  %v2818_v51 = vpop.f32.mrf.mxu0  ;;  %v2867_v8 = vpop.f32.mrf.mxu1 }
 0x33e   : > { %v2868_v63 = vadd.f32 %v2867_v8, %v2818_v51 }
 0x33f   : > { %v2964_v56 = vadd.f32 %v2963_v20, %v2915_v2 }
 0x341   : > { %3248 = vst [vmem:[%s6656_s15 + $0x8] sm:$0xff] %v2964_v56 }
 0x344   : > { %v2916_v13 = vpop.f32.mrf.mxu2  ;;  %v2965_v24 = vpop.f32.mrf.mxu3 }
 0x345   : > { %v2917_v7 = vadd.f32 %v2916_v13, %v2868_v63  ;;  %v2821_v50 = vpop.f32.mrf.mxu0  ;;  %v2870_v35 = vpop.f32.mrf.mxu1 }
 0x346   : > { %v2871_v1 = vadd.f32 %v2870_v35, %v2821_v50 }
 0x347   : > { %v2966_v25 = vadd.f32 %v2965_v24, %v2917_v7 }
 0x348   : > { %3016 = vmatmul.bf16.gmra.mxu0 %v6422_v16  ;;  %3065 = vmatmul.bf16.gmra.mxu1 %v6424_v53 }
 0x349   : > { %3114 = vmatmul.bf16.gmra.mxu2 %v6426_v52  ;;  %3163 = vmatmul.bf16.gmra.mxu3 %v6434_v31  ;;  %3251 = vst [vmem:[%s6656_s15 + $0x20] sm:$0xff] %v2966_v25 }
 0x34c   : > { %v2919_v61 = vpop.f32.mrf.mxu2  ;;  %v2968_v10 = vpop.f32.mrf.mxu3 }
 0x34d   : > { %v2920_v43 = vadd.f32 %v2919_v61, %v2871_v1  ;;  %v2823_v33 = vpop.f32.mrf.mxu0  ;;  %v2872_v41 = vpop.f32.mrf.mxu1 }
 0x34e   : > { %v2873_v26 = vadd.f32 %v2872_v41, %v2823_v33 }
 0x34f   : > { %v2969_v40 = vadd.f32 %v2968_v10, %v2920_v43 }
 0x351   : > { %3254 = vst [vmem:[%s6656_s15 + $0x38] sm:$0xff] %v2969_v40 }
 0x354   : > { %v2921_v36 = vpop.f32.mrf.mxu2  ;;  %v2970_v47 = vpop.f32.mrf.mxu3 }
 0x355   : > { %v2922_v16 = vadd.f32 %v2921_v36, %v2873_v26  ;;  %v2826_v53 = vpop.f32.mrf.mxu0  ;;  %v2875_v48 = vpop.f32.mrf.mxu1 }
 0x356   : > { %v2876_v31 = vadd.f32 %v2875_v48, %v2826_v53 }
 0x357   : > { %v2971_v52 = vadd.f32 %v2970_v47, %v2922_v16 }
 0x358   : > { %3021 = vmatmul.bf16.gmra.mxu0 %v6539_v5  ;;  %3070 = vmatmul.bf16.gmra.mxu1 %v6541_v60 }
 0x359   : > { %3119 = vmatmul.bf16.gmra.mxu2 %v6543_v38  ;;  %3168 = vmatmul.bf16.gmra.mxu3 %v6545_v18  ;;  %3257 = vst [vmem:[%s6656_s15 + $0x50] sm:$0xff] %v2971_v52 }
 0x35c   : > { %v2924_v27 = vpop.f32.mrf.mxu2  ;;  %v2973_v42 = vpop.f32.mrf.mxu3 }
 0x35d   : > { %v2925_v58 = vadd.f32 %v2924_v27, %v2876_v31  ;;  %v2828_v54 = vpop.f32.mrf.mxu0  ;;  %v2877_v0 = vpop.f32.mrf.mxu1 }
 0x35e   : > { %v2878_v3 = vadd.f32 %v2877_v0, %v2828_v54 }
 0x35f   : > { %v2974_v45 = vadd.f32 %v2973_v42, %v2925_v58 }
 0x361   : > { %3260 = vst [vmem:[%s6656_s15 + $0x68] sm:$0xff] %v2974_v45 }
 0x364   : > { %v2926_v21 = vpop.f32.mrf.mxu2  ;;  %v2975_v37 = vpop.f32.mrf.mxu3 }
 0x365   : > { %v2927_v5 = vadd.f32 %v2926_v21, %v2878_v3  ;;  %v2831_v60 = vpop.f32.mrf.mxu0  ;;  %v2880_v23 = vpop.f32.mrf.mxu1 }
 0x366   : > { %v2881_v18 = vadd.f32 %v2880_v23, %v2831_v60 }
 0x367   : > { %v2976_v38 = vadd.f32 %v2975_v37, %v2927_v5 }
 0x368   : > { %3026 = vmatmul.bf16.gmra.mxu0 %v6575_v22  ;;  %3075 = vmatmul.bf16.gmra.mxu1 %v6577_v32 }
 0x369   : > { %3124 = vmatmul.bf16.gmra.mxu2 %v6579_v17  ;;  %3173 = vmatmul.bf16.gmra.mxu3 %v6581_v29  ;;  %3263 = vst [vmem:[%s6656_s15 + $0x80] sm:$0xff] %v2976_v38 }
 0x36c   : > { %v2929_v62 = vpop.f32.mrf.mxu2  ;;  %v2978_v11 = vpop.f32.mrf.mxu3 }
 0x36d   : > { %v2930_v15 = vadd.f32 %v2929_v62, %v2881_v18  ;;  %v2833_v20 = vpop.f32.mrf.mxu0  ;;  %v2882_v2 = vpop.f32.mrf.mxu1 }
 0x36e   : > { %v2883_v8 = vadd.f32 %v2882_v2, %v2833_v20 }
 0x36f   : > { %v2979_v51 = vadd.f32 %v2978_v11, %v2930_v15 }
 0x371   : > { %3266 = vst [vmem:[%s6656_s15 + $0x98] sm:$0xff] %v2979_v51 }
 0x374   : > { %v2931_v56 = vpop.f32.mrf.mxu2  ;;  %v2980_v63 = vpop.f32.mrf.mxu3 }
 0x375   : > { %v2932_v22 = vadd.f32 %v2931_v56, %v2883_v8  ;;  %v2836_v32 = vpop.f32.mrf.mxu0  ;;  %v2885_v13 = vpop.f32.mrf.mxu1 }
 0x376   : > { %v2886_v29 = vadd.f32 %v2885_v13, %v2836_v32 }
 0x377   : > { %v2981_v17 = vadd.f32 %v2980_v63, %v2932_v22 }
 0x378   : > { %3031 = vmatmul.bf16.gmra.mxu0 %v6454_v19  ;;  %3080 = vmatmul.bf16.gmra.mxu1 %v6456_v39 }
 0x379   : > { %3129 = vmatmul.bf16.gmra.mxu2 %v6460_v9  ;;  %3178 = vmatmul.bf16.gmra.mxu3 %v6462_v55  ;;  %3269 = vst [vmem:[%s6656_s15 + $0xb0] sm:$0xff] %v2981_v17 }
 0x37c   : > { %v2934_v24 = vpop.f32.mrf.mxu2  ;;  %v2983_v7 = vpop.f32.mrf.mxu3 }
 0x37d   : > { %v2935_v50 = vadd.f32 %v2934_v24, %v2886_v29  ;;  %v2838_v35 = vpop.f32.mrf.mxu0  ;;  %v2887_v25 = vpop.f32.mrf.mxu1 }
 0x37e   : > { %v2888_v61 = vadd.f32 %v2887_v25, %v2838_v35 }
 0x37f   : > { %v2984_v1 = vadd.f32 %v2983_v7, %v2935_v50 }
 0x381   : > { %3272 = vst [vmem:[%s6656_s15 + $0xc8] sm:$0xff] %v2984_v1 }
 0x384   : > { %v2936_v10 = vpop.f32.mrf.mxu2  ;;  %v2985_v43 = vpop.f32.mrf.mxu3 }
 0x385   : > { %v2937_v19 = vadd.f32 %v2936_v10, %v2888_v61  ;;  %v2841_v39 = vpop.f32.mrf.mxu0  ;;  %v2890_v33 = vpop.f32.mrf.mxu1 }
 0x386   : > { %v2891_v55 = vadd.f32 %v2890_v33, %v2841_v39 }
 0x387   : > { %v2986_v9 = vadd.f32 %v2985_v43, %v2937_v19 }
 0x388   : > { %3036 = vmatmul.bf16.gmra.mxu0 %v6468_v30  ;;  %3085 = vmatmul.bf16.gmra.mxu1 %v6477_v49 }
 0x389   : > { %3134 = vmatmul.bf16.gmra.mxu2 %v6488_v12  ;;  %3183 = vmatmul.bf16.gmra.mxu3 %v6492_v28  ;;  %3275 = vst [vmem:[%s6656_s15 + $0xe0] sm:$0xff] %v2986_v9 }
 0x38c   : > { %v2939_v41 = vpop.f32.mrf.mxu2  ;;  %v2988_v40 = vpop.f32.mrf.mxu3 }
 0x38d   : > { %v2940_v26 = vadd.f32 %v2939_v41, %v2891_v55  ;;  %v2843_v36 = vpop.f32.mrf.mxu0  ;;  %v2892_v47 = vpop.f32.mrf.mxu1 }
 0x38e   : > { %v2893_v53 = vadd.f32 %v2892_v47, %v2843_v36 }
 0x38f   : > { %v2989_v16 = vadd.f32 %v2988_v40, %v2940_v26 }
 0x391   : > { %3278 = vst [vmem:[%s6656_s15 + $0xf8] sm:$0xff] %v2989_v16 }
 0x394   : > { %v2941_v48 = vpop.f32.mrf.mxu2  ;;  %v2990_v52 = vpop.f32.mrf.mxu3 }
 0x395   : > { %v2942_v30 = vadd.f32 %v2941_v48, %v2893_v53  ;;  %v2846_v49 = vpop.f32.mrf.mxu0  ;;  %v2895_v31 = vpop.f32.mrf.mxu1 }
 0x396   : > { %v2896_v28 = vadd.f32 %v2895_v31, %v2846_v49 }
 0x397   : > { %v2991_v12 = vadd.f32 %v2990_v52, %v2942_v30 }
 0x398   : > { %3041 = vmatmul.bf16.gmra.mxu0 %v6504_v6  ;;  %3090 = vmatmul.bf16.gmra.mxu1 %v6509_v34 }
 0x399   : > { %3139 = vmatmul.bf16.gmra.mxu2 %v6511_v4  ;;  %3188 = vmatmul.bf16.gmra.mxu3 %v6515_v59  ;;  %3281 = vst [vmem:[%s6656_s15 + $0x110] sm:$0xff] %v2991_v12 }
 0x39c   : > { %v2944_v27 = vpop.f32.mrf.mxu2  ;;  %v2993_v42 = vpop.f32.mrf.mxu3 }
 0x39d   : > { %v2945_v58 = vadd.f32 %v2944_v27, %v2896_v28  ;;  %v2848_v54 = vpop.f32.mrf.mxu0  ;;  %v2897_v0 = vpop.f32.mrf.mxu1 }
 0x39e   : > { %v2898_v3 = vadd.f32 %v2897_v0, %v2848_v54 }
 0x39f   : > { %v2994_v45 = vadd.f32 %v2993_v42, %v2945_v58 }
 0x3a1   : > { %3284 = vst [vmem:[%s6656_s15 + $0x128] sm:$0xff] %v2994_v45 }
 0x3a4   : > { %v2946_v21 = vpop.f32.mrf.mxu2  ;;  %v2995_v37 = vpop.f32.mrf.mxu3 }
 0x3a5   : > { %v2947_v6 = vadd.f32 %v2946_v21, %v2898_v3  ;;  %v2851_v34 = vpop.f32.mrf.mxu0  ;;  %v2900_v5 = vpop.f32.mrf.mxu1 }
 0x3a6   : > { %v2901_v59 = vadd.f32 %v2900_v5, %v2851_v34 }
 0x3a7   : > { %v2996_v4 = vadd.f32 %v2995_v37, %v2947_v6 }
 0x3a8   : > { %3046 = vmatmul.bf16.gmra.mxu0 %v6517_v57  ;;  %3095 = vmatmul.bf16.gmra.mxu1 %v6523_v46 }
 0x3a9   : > { %3144 = vmatmul.bf16.gmra.mxu2 %v6533_v14  ;;  %3193 = vmatmul.bf16.gmra.mxu3 %v6535_v44  ;;  %3287 = vst [vmem:[%s6656_s15 + $0x140] sm:$0xff] %v2996_v4 }
 0x3ac   : > { %v2949_v60 = vpop.f32.mrf.mxu2  ;;  %v2998_v23 = vpop.f32.mrf.mxu3 }
 0x3ad   : > { %v2950_v38 = vadd.f32 %v2949_v60, %v2901_v59  ;;  %v2853_v18 = vpop.f32.mrf.mxu0  ;;  %v2902_v62 = vpop.f32.mrf.mxu1 }
 0x3ae   : > { %v2903_v15 = vadd.f32 %v2902_v62, %v2853_v18 }
 0x3af   : > { %v2999_v11 = vadd.f32 %v2998_v23, %v2950_v38 }
 0x3b1   : > { %3290 = vst [vmem:[%s6656_s15 + $0x158] sm:$0xff] %v2999_v11 }
 0x3b4   : > { %v2951_v20 = vpop.f32.mrf.mxu2  ;;  %v3000_v57 = vpop.f32.mrf.mxu3 }
 0x3b5   : > { %v2952_v2 = vadd.f32 %v2951_v20, %v2903_v15  ;;  %v3012_v46 = vpop.f32.mrf.mxu0  ;;  %v3061_v51 = vpop.f32.mrf.mxu1 }
 0x3b6   : > { %v3062_v44 = vadd.f32 %v3061_v51, %v3012_v46 }
 0x3b7   : > { %v3001_v14 = vadd.f32 %v3000_v57, %v2952_v2 }
 0x3b9   : > { %3293 = vst [vmem:[%s6656_s15 + $0x170] sm:$0xff] %v3001_v14 }
 0x3bc   : > { %v3110_v8 = vpop.f32.mrf.mxu2  ;;  %v3159_v56 = vpop.f32.mrf.mxu3 }
 0x3bd   : > { %v3111_v63 = vadd.f32 %v3110_v8, %v3062_v44  ;;  %v3014_v22 = vpop.f32.mrf.mxu0  ;;  %v3063_v32 = vpop.f32.mrf.mxu1 }
 0x3be   : > { %v3064_v17 = vadd.f32 %v3063_v32, %v3014_v22 }
 0x3bf   : > { %v3160_v13 = vadd.f32 %v3159_v56, %v3111_v63 }
 0x3c1   : > { %3249 = vst [vmem:[%s6656_s15 + $0x10] sm:$0xff] %v3160_v13 }
 0x3c4   : > { %v3112_v29 = vpop.f32.mrf.mxu2  ;;  %v3161_v24 = vpop.f32.mrf.mxu3 }
 0x3c5   : > { %v3113_v7 = vadd.f32 %v3112_v29, %v3064_v17  ;;  %v3017_v50 = vpop.f32.mrf.mxu0  ;;  %v3066_v35 = vpop.f32.mrf.mxu1 }
 0x3c6   : > { %v3067_v1 = vadd.f32 %v3066_v35, %v3017_v50 }
 0x3c7   : > { %v3162_v25 = vadd.f32 %v3161_v24, %v3113_v7 }
 0x3c9   : > { %3252 = vst [vmem:[%s6656_s15 + $0x28] sm:$0xff] %v3162_v25 }
 0x3cc   : > { %v3115_v61 = vpop.f32.mrf.mxu2  ;;  %v3164_v10 = vpop.f32.mrf.mxu3 }
 0x3cd   : > { %v3116_v43 = vadd.f32 %v3115_v61, %v3067_v1  ;;  %v3019_v19 = vpop.f32.mrf.mxu0  ;;  %v3068_v39 = vpop.f32.mrf.mxu1 }
 0x3ce   : > { %v3069_v9 = vadd.f32 %v3068_v39, %v3019_v19 }
 0x3cf   : > { %v3165_v33 = vadd.f32 %v3164_v10, %v3116_v43 }
 0x3d1   : > { %3255 = vst [vmem:[%s6656_s15 + $0x40] sm:$0xff] %v3165_v33 }
 0x3d4   : > { %v3117_v55 = vpop.f32.mrf.mxu2  ;;  %v3166_v41 = vpop.f32.mrf.mxu3 }
 0x3d5   : > { %v3118_v40 = vadd.f32 %v3117_v55, %v3069_v9  ;;  %v3022_v26 = vpop.f32.mrf.mxu0  ;;  %v3071_v36 = vpop.f32.mrf.mxu1 }
 0x3d6   : > { %v3072_v16 = vadd.f32 %v3071_v36, %v3022_v26 }
 0x3d7   : > { %v3167_v47 = vadd.f32 %v3166_v41, %v3118_v40 }
 0x3d9   : > { %3258 = vst [vmem:[%s6656_s15 + $0x58] sm:$0xff] %v3167_v47 }
 0x3dc   : > { %v3120_v53 = vpop.f32.mrf.mxu2  ;;  %v3169_v48 = vpop.f32.mrf.mxu3 }
 0x3dd   : > { %v3121_v52 = vadd.f32 %v3120_v53, %v3072_v16  ;;  %v3024_v30 = vpop.f32.mrf.mxu0  ;;  %v3073_v49 = vpop.f32.mrf.mxu1 }
 0x3de   : > { %v3074_v12 = vadd.f32 %v3073_v49, %v3024_v30 }
 0x3df   : > { %v3170_v31 = vadd.f32 %v3169_v48, %v3121_v52 }
 0x3e1   : > { %3261 = vst [vmem:[%s6656_s15 + $0x70] sm:$0xff] %v3170_v31 }
 0x3e4   : > { %v3122_v28 = vpop.f32.mrf.mxu2  ;;  %v3171_v27 = vpop.f32.mrf.mxu3 }
 0x3e5   : > { %v3123_v42 = vadd.f32 %v3122_v28, %v3074_v12  ;;  %v3027_v58 = vpop.f32.mrf.mxu0  ;;  %v3076_v54 = vpop.f32.mrf.mxu1 }
 0x3e6   : > { %v3077_v45 = vadd.f32 %v3076_v54, %v3027_v58 }
 0x3e7   : > { %v3172_v0 = vadd.f32 %v3171_v27, %v3123_v42 }
 0x3e9   : > { %3264 = vst [vmem:[%s6656_s15 + $0x88] sm:$0xff] %v3172_v0 }
 0x3ec   : > { %v3125_v3 = vpop.f32.mrf.mxu2  ;;  %v3174_v21 = vpop.f32.mrf.mxu3 }
 0x3ed   : > { %v3126_v37 = vadd.f32 %v3125_v3, %v3077_v45  ;;  %v3029_v6 = vpop.f32.mrf.mxu0  ;;  %v3078_v34 = vpop.f32.mrf.mxu1 }
 0x3ee   : > { %v3079_v4 = vadd.f32 %v3078_v34, %v3029_v6 }
 0x3ef   : > { %v3175_v5 = vadd.f32 %v3174_v21, %v3126_v37 }
 0x3f1   : > { %3267 = vst [vmem:[%s6656_s15 + $0xa0] sm:$0xff] %v3175_v5 }
 0x3f4   : > { %v3127_v59 = vpop.f32.mrf.mxu2  ;;  %v3176_v60 = vpop.f32.mrf.mxu3 }
 0x3f5   : > { %v3128_v23 = vadd.f32 %v3127_v59, %v3079_v4  ;;  %v3032_v38 = vpop.f32.mrf.mxu0  ;;  %v3081_v18 = vpop.f32.mrf.mxu1 }
 0x3f6   : > { %v3082_v11 = vadd.f32 %v3081_v18, %v3032_v38 }
 0x3f7   : > { %v3177_v62 = vadd.f32 %v3176_v60, %v3128_v23 }
 0x3f9   : > { %3270 = vst [vmem:[%s6656_s15 + $0xb8] sm:$0xff] %v3177_v62 }
 0x3fc   : > { %v3130_v15 = vpop.f32.mrf.mxu2  ;;  %v3179_v20 = vpop.f32.mrf.mxu3 }
 0x3fd   : > { %v3131_v57 = vadd.f32 %v3130_v15, %v3082_v11  ;;  %v3034_v2 = vpop.f32.mrf.mxu0  ;;  %v3083_v46 = vpop.f32.mrf.mxu1 }
 0x3fe   : > { %v3084_v14 = vadd.f32 %v3083_v46, %v3034_v2 }
 0x3ff   : > { %v3180_v51 = vadd.f32 %v3179_v20, %v3131_v57 }
 0x401   : > { %3273 = vst [vmem:[%s6656_s15 + $0xd0] sm:$0xff] %v3180_v51 }
 0x404   : > { %v3132_v44 = vpop.f32.mrf.mxu2  ;;  %v3181_v8 = vpop.f32.mrf.mxu3 }
 0x405   : > { %v3133_v56 = vadd.f32 %v3132_v44, %v3084_v14  ;;  %v3037_v63 = vpop.f32.mrf.mxu0  ;;  %v3086_v22 = vpop.f32.mrf.mxu1 }
 0x406   : > { %v3087_v13 = vadd.f32 %v3086_v22, %v3037_v63 }
 0x407   : > { %v3182_v32 = vadd.f32 %v3181_v8, %v3133_v56 }
 0x409   : > { %3276 = vst [vmem:[%s6656_s15 + $0xe8] sm:$0xff] %v3182_v32 }
 0x40c   : > { %v3135_v17 = vpop.f32.mrf.mxu2  ;;  %v3184_v29 = vpop.f32.mrf.mxu3 }
 0x40d   : > { %v3136_v24 = vadd.f32 %v3135_v17, %v3087_v13  ;;  %v3039_v7 = vpop.f32.mrf.mxu0  ;;  %v3088_v50 = vpop.f32.mrf.mxu1 }
 0x40e   : > { %v3089_v25 = vadd.f32 %v3088_v50, %v3039_v7 }
 0x40f   : > { %v3185_v35 = vadd.f32 %v3184_v29, %v3136_v24 }
 0x411   : > { %3279 = vst [vmem:[%s6656_s15 + $0x100] sm:$0xff] %v3185_v35 }
 0x414   : > { %v3137_v1 = vpop.f32.mrf.mxu2  ;;  %v3186_v61 = vpop.f32.mrf.mxu3 }
 0x415   : > { %v3138_v10 = vadd.f32 %v3137_v1, %v3089_v25  ;;  %v3042_v43 = vpop.f32.mrf.mxu0  ;;  %v3091_v19 = vpop.f32.mrf.mxu1 }
 0x416   : > { %v3092_v33 = vadd.f32 %v3091_v19, %v3042_v43 }
 0x417   : > { %v3187_v39 = vadd.f32 %v3186_v61, %v3138_v10 }
 0x419   : > { %3282 = vst [vmem:[%s6656_s15 + $0x118] sm:$0xff] %v3187_v39 }
 0x41c   : > { %v3140_v9 = vpop.f32.mrf.mxu2  ;;  %v3189_v55 = vpop.f32.mrf.mxu3 }
 0x41d   : > { %v3141_v41 = vadd.f32 %v3140_v9, %v3092_v33  ;;  %v3044_v40 = vpop.f32.mrf.mxu0  ;;  %v3093_v26 = vpop.f32.mrf.mxu1 }
 0x41e   : > { %v3094_v47 = vadd.f32 %v3093_v26, %v3044_v40 }
 0x41f   : > { %v3190_v36 = vadd.f32 %v3189_v55, %v3141_v41 }
 0x421   : > { %3285 = vst [vmem:[%s6656_s15 + $0x130] sm:$0xff] %v3190_v36 }
 0x424   : > { %v3142_v16 = vpop.f32.mrf.mxu2  ;;  %v3191_v53 = vpop.f32.mrf.mxu3 }
 0x425   : > { %v3143_v48 = vadd.f32 %v3142_v16, %v3094_v47  ;;  %v3047_v52 = vpop.f32.mrf.mxu0  ;;  %v3096_v30 = vpop.f32.mrf.mxu1 }
 0x426   : > { %v3097_v31 = vadd.f32 %v3096_v30, %v3047_v52 }
 0x427   : > { %v3192_v49 = vadd.f32 %v3191_v53, %v3143_v48 }
 0x429   : > { %3288 = vst [vmem:[%s6656_s15 + $0x148] sm:$0xff] %v3192_v49 }
 0x42c   : > { %v3145_v12 = vpop.f32.mrf.mxu2  ;;  %v3194_v28 = vpop.f32.mrf.mxu3 }
 0x42d   : > { %v3146_v27 = vadd.f32 %v3145_v12, %v3097_v31  ;;  %v3049_v58 = vpop.f32.mrf.mxu0  ;;  %v3098_v54 = vpop.f32.mrf.mxu1 }
 0x42e   : > { %v3099_v0 = vadd.f32 %v3098_v54, %v3049_v58 }
 0x42f   : > { %v3195_v42 = vadd.f32 %v3194_v28, %v3146_v27 }
 0x431   : > { %3291 = vst [vmem:[%s6656_s15 + $0x160] sm:$0xff] %v3195_v42 }
 0x434   : > { %v3147_v45 = vpop.f32.mrf.mxu2  ;;  %v3196_v21 = vpop.f32.mrf.mxu3 }
 0x435   : > { %v3148_v3 = vadd.f32 %v3147_v45, %v3099_v0 }
 0x437   : > { %v3197_v37 = vadd.f32 %v3196_v21, %v3148_v3 }
 0x439   : > { %3294 = vst [vmem:[%s6656_s15 + $0x178] sm:$0xff] %v3197_v37 }
 0x43a PF: > { %s16_s22 = sadd.s32 1, %s4313_s22   ;;  %s7046_s18 = smov %s4301_s19 }
 0x43b   : > { %p13_p12 = scmp.ge.s32.totalorder %s16_s22, 4   ;;  %s7047_s19 = smov %s4380_s26 }
 0x43c   : > { %s7048_s20 = smov %s4309_s21  ;;  %s7049_s21 = smov %s7051_s23 }
 0x43d   :  { %15 = sbr.rel (!%p13_p12) target bundleno = 3 (0x3), region = 116 }

</bundles_post_ra>
